<compile_context>
chip_gen: v6e
topology: v6e:2x2x1
jax: 0.10.0
libtpu: 0.0.40
codegen_flags: <defaults>
</compile_context>

<pallas_src>
import functools

import jax
import jax.numpy as jnp
from jax.experimental import pallas as pl
from jax.experimental.pallas import tpu as pltpu

NEG_SLOPE = 0.01  # LeakyReLU slope used inside Relation


def _elu(v):
    return jnp.where(v > 0.0, v, jnp.exp(v) - 1.0)


def _lrelu(v):
    return jnp.where(v > 0.0, v, NEG_SLOPE * v)


# ---------------------------------------------------------------------------
# Pallas kernel: one LRGCN layer (non-tail branch)
# ---------------------------------------------------------------------------
def lrgcn_layer_kernel(xg_ref, mean1_ref, mean2_ref, g1b1_ref, mw_ref, r_ref,
                       embed_ref, m_ref, *, apply_elu_out):
    K, tn, F = xg_ref.shape                # xg: (K, tn, F), k-major gathered rows
    H = embed_ref.shape[-1]
    F2 = 2 * F
    mm_dtype = g1b1_ref.dtype              # bf16 (default) or f32 matmul inputs

    mean1 = mean1_ref[...]                 # (tn, F) f32   Relation's mean_x
    mean2 = mean2_ref[...]                 # (tn, F) f32   GCN's a2-weighted mean

    # ---- fused mean-side matmul: [mean1; mean2] @ [g2|b2 | W] -------------
    # One MXU push instead of two; 2F+H columns still fit one pass width.
    stacked = jnp.concatenate([mean1, mean2], axis=0).astype(mm_dtype)  # (2tn, F)
    mm = jnp.dot(stacked, mw_ref[...],
                 preferred_element_type=jnp.float32)                    # (2tn, 2F+H)
    nb = mm[:tn, :F2]                       # mean1 @ [g2 | b2]   (tn, 2F)
    emb = mm[tn:, F2:]                      # mean2 @ W           (tn, H)
    if apply_elu_out:
        emb = _elu(emb)     # F.elu fused here; F.dropout(training=False) == identity
    embed_ref[...] = emb

    # ---- per-neighbor relation features: one big MXU call -----------------
    # (K*tn, 2F) f32 result lives in VMEM (accounted for in the tile budget).
    xg2d = xg_ref[...].reshape(K * tn, F).astype(mm_dtype)
    ft = jnp.dot(xg2d, g1b1_ref[...], preferred_element_type=jnp.float32)

    # ---- m = x + gamma*r + beta - mean_x, stored in 128-lane groups -------
    r_b = jnp.broadcast_to(r_ref[...].astype(jnp.float32), (tn, F))  # hoisted

    if F % 128 == 0:
        gsz = 1                      # each part already lane-dense
    elif 128 % F == 0:
        gsz = 128 // F               # group parts into unmasked 128-lane slabs
    else:
        gsz = K                      # irregular F: single concatenated store

    for g0 in range(0, K, gsz):
        gk = min(gsz, K - g0)
        parts = []
        for k in range(g0, g0 + gk):
            xk = xg_ref[k].astype(jnp.float32)                  # re-load (bounded live range)
            mod = _lrelu(ft[k * tn:(k + 1) * tn] + nb)          # (tn, 2F)
            gamma = mod[:, :F] + 1.0
            beta = mod[:, F:]
            parts.append(xk + gamma * r_b + beta - mean1)       # (tn, F)
        grp = parts[0] if gk == 1 else jnp.concatenate(parts, axis=-1)
        m_ref[:, g0 * F:(g0 + gk) * F] = grp.astype(m_ref.dtype)


# ---------------------------------------------------------------------------
# Tile-size selection with corrected VMEM accounting
# ---------------------------------------------------------------------------
def _vmem_bytes(tn, K, F, H, mm_sz, io_sz):
    f2h = 2 * F + H
    blocks = 2 * (K * tn * F * io_sz        # xg in (double-buffered)
                  + 2 * tn * F * 4          # mean1 + mean2 in (f32)
                  + tn * K * F * io_sz      # m out
                  + tn * H * 4)             # embed out
    weights = 2 * ((F * 2 * F + F * f2h) * mm_sz + F * 4)   # resident weight blocks
    ft_spill = K * tn * 2 * F * 4           # (K*tn, 2F) f32 relation features
    mm_spill = 2 * tn * f2h * 4             # fused mean-matmul result
    return blocks + weights + ft_spill + mm_spill


def _pick_tn(N, K, F, H, mm_sz, io_sz, *, tn_cap=512, vmem_budget=24 << 20):
    """Largest tile (multiple of 8, dividing N, <= cap, under budget) that keeps
    the grid at >= 2 steps (v7x dual-TensorCore sharding)."""
    best = None
    for d in range(8, min(N, tn_cap) + 1, 8):
        if N % d:
            continue
        if _vmem_bytes(d, K, F, H, mm_sz, io_sz) > vmem_budget:
            continue
        if N // d >= 2:
            best = d
    if best is None:
        for d in range(8, N, 8):
            if N % d == 0 and _vmem_bytes(d, K, F, H, mm_sz, io_sz) <= vmem_budget:
                best = d
                break
    if best is None:
        best = N    # tiny / indivisible N: single-tile fallback
    return best


# ---------------------------------------------------------------------------
# One layer: pallas_call wrapper
# ---------------------------------------------------------------------------
def lrgcn_layer(xg_km, mean1, mean2, g1b1, mw, r, *, apply_elu_out,
                use_bf16=True, tn=None):
    K, N, F = xg_km.shape
    H = mw.shape[1] - 2 * F

    mm_dtype = jnp.bfloat16 if use_bf16 else jnp.float32
    m_dtype = jnp.bfloat16 if use_bf16 else jnp.float32
    io_sz = jnp.dtype(xg_km.dtype).itemsize
    mm_sz = jnp.dtype(mm_dtype).itemsize

    g1b1 = g1b1.astype(mm_dtype)            # cast weights once (halves weight DMA)
    mw = mw.astype(mm_dtype)
    r = r.astype(jnp.float32)
    mean1 = mean1.astype(jnp.float32)
    mean2 = mean2.astype(jnp.float32)

    if tn is None:
        tn = _pick_tn(N, K, F, H, mm_sz, io_sz)
    assert N % tn == 0 and (tn % 8 == 0 or tn == N)

    est = _vmem_bytes(tn, K, F, H, mm_sz, io_sz)
    vmem_limit = int(min(48 << 20, max(32 << 20, 2 * est)))

    wbytes = (g1b1.size + mw.size) * mm_sz + r.size * 4
    m_sz = jnp.dtype(m_dtype).itemsize
    cost = pl.CostEstimate(
        flops=int(2 * N * K * F * (2 * F)            # relation features
                  + 2 * (2 * N) * F * (2 * F + H)),  # fused mean-side matmul
        transcendentals=int(N * H if apply_elu_out else 0),
        bytes_accessed=int(N * K * F * io_sz          # xg in
                           + 2 * N * F * 4            # mean1, mean2 in
                           + N * K * F * m_sz         # m out
                           + N * H * 4                # embed out
                           + wbytes))

    kernel = functools.partial(lrgcn_layer_kernel, apply_elu_out=apply_elu_out)
    embed, m_flat = pl.pallas_call(
        kernel,
        out_shape=(
            jax.ShapeDtypeStruct((N, H), jnp.float32),
            jax.ShapeDtypeStruct((N, K * F), m_dtype),      # lane-dense m_info
        ),
        grid_spec=pltpu.PrefetchScalarGridSpec(
            num_scalar_prefetch=0,
            grid=(N // tn,),
            in_specs=[
                pl.BlockSpec((K, tn, F), lambda i: (0, i, 0)),       # xg (k-major)
                pl.BlockSpec((tn, F), lambda i: (i, 0)),             # mean1 (a1-weighted)
                pl.BlockSpec((tn, F), lambda i: (i, 0)),             # mean2 (a2-weighted)
                pl.BlockSpec((F, 2 * F), lambda i: (0, 0)),          # [gamma_1 | beta_1]
                pl.BlockSpec((F, 2 * F + H), lambda i: (0, 0)),      # [gamma_2 | beta_2 | W]
                pl.BlockSpec((1, F), lambda i: (0, 0)),              # r
            ],
            out_specs=(
                pl.BlockSpec((tn, H), lambda i: (i, 0)),             # embed
                pl.BlockSpec((tn, K * F), lambda i: (i, 0)),         # m_info (flat)
            ),
        ),
        compiler_params=pltpu.CompilerParams(
            dimension_semantics=("parallel",),     # independent tiles -> v7x dual-TC
            vmem_limit_bytes=vmem_limit),
        cost_estimate=cost,
    )(xg_km, mean1, mean2, g1b1, mw, r)
    return embed, m_flat.reshape(N, K, F)


# ---------------------------------------------------------------------------
# Full forward (tail=False); gather + weighted means + weight packing = glue
# ---------------------------------------------------------------------------
def _lrgcn_block(x, adj, W, rel, *, apply_elu_out, use_bf16, tn):
    io_dtype = jnp.bfloat16 if use_bf16 else jnp.float32
    idx = adj[0][:, 1:].astype(jnp.int32)        # (N, K)
    a1 = adj[1][:, 1:]
    a2 = adj[2][:, 1:]
    # Gather directly in k-major layout; casting x first makes the gathered
    # HBM copy (dominant stream) half-width in the bf16 fast path.
    xg_km = jnp.take(x.astype(io_dtype), idx.T, axis=0)          # (K, N, F)
    xg_f32 = xg_km.astype(jnp.float32)
    # Weighted neighborhood means computed here next to the gather (XLA fuses
    # them); the kernel never sees the lane-width-1 adjacency weights.
    mean1 = jnp.mean(xg_f32 * a1.T[:, :, None], axis=0)          # (N, F)
    mean2 = jnp.mean(xg_f32 * a2.T[:, :, None], axis=0)          # (N, F)
    g1, g2, b1, b2, r = rel
    g1b1 = jnp.concatenate([g1, b1], axis=1)                     # (F, 2F)
    mw = jnp.concatenate([g2, b2, W], axis=1)                    # (F, 2F + H)
    return lrgcn_layer(xg_km, mean1, mean2, g1b1, mw, r,
                       apply_elu_out=apply_elu_out, use_bf16=use_bf16, tn=tn)


@functools.partial(jax.jit, static_argnames=("use_bf16", "tn"))
def lrgcn_batch_forward(x, adj1, adj2, params, *, use_bf16=True, tn=None):
    # layer 1 -- F.dropout(eval)=identity; F.elu fused into the embed store
    h1, m1 = _lrgcn_block(x, adj1, params["W1"], params["r1"],
                          apply_elu_out=True, use_bf16=use_bf16, tn=tn)
    # layer 2 (consumes the already-ELU'd h1, exactly as elu-then-gather)
    h2, m2 = _lrgcn_block(h1, adj2, params["W2"], params["r2"],
                          apply_elu_out=False, use_bf16=use_bf16, tn=tn)
    return h2, (m1, m2)


# ---------------------------------------------------------------------------
# Pure-JAX reference (module semantics, f32) for the correctness check
# ---------------------------------------------------------------------------
def _layer_ref(xg, a1, a2, wg, g1, g2, b1, b2, r):
    mean_x = jnp.mean(xg * a1[:, :, None], axis=1)
    gamma = _lrelu(xg @ g1 + (mean_x @ g2)[:, None, :]) + 1.0
    beta = _lrelu(xg @ b1 + (mean_x @ b2)[:, None, :])
    m = xg + gamma * r + beta - mean_x[:, None, :]
    emb = jnp.mean((xg @ wg) * a2[:, :, None], axis=1)
    return emb, m


def _forward_ref(x, adj1, adj2, params):
    idx1 = adj1[0][:, 1:].astype(jnp.int32)
    h1, m1 = _layer_ref(jnp.take(x, idx1, axis=0), adj1[1][:, 1:], adj1[2][:, 1:],
                        params["W1"], *params["r1"])
    h1 = _elu(h1)                                 # dropout(eval) + ELU
    idx2 = adj2[0][:, 1:].astype(jnp.int32)
    h2, m2 = _layer_ref(jnp.take(h1, idx2, axis=0), adj2[1][:, 1:], adj2[2][:, 1:],
                        params["W2"], *params["r2"])
    return h1, h2, (m1, m2)


# ---------------------------------------------------------------------------
# Deterministic parameter init (synthetic, no checkpoint)
# ---------------------------------------------------------------------------
def init_params(key, nfeat, nhid, nclass):
    ks = jax.random.split(key, 12)

    def lin(k, fi, fo):  # weight in right-multiply form [in, out]
        return jax.random.normal(k, (fi, fo), jnp.float32) * (1.0 / jnp.sqrt(fi))

    def relation(ks4, kr, d):
        return (lin(ks4[0], d, d), lin(ks4[1], d, d),
                lin(ks4[2], d, d), lin(ks4[3], d, d),
                jax.random.normal(kr, (1, d), jnp.float32) * 0.1)

    return {
        "W1": lin(ks[0], nfeat, nhid),
        "W2": lin(ks[1], nhid, nclass),
        "r1": relation(ks[2:6], ks[10], nfeat),
        "r2": relation(ks[6:10], ks[11], nhid),
    }


if __name__ == "__main__":
    N, K = 256, 8            # target nodes, neighbors per node
    nfeat, nhid, nclass = 32, 32, 16

    key = jax.random.PRNGKey(0)
    kx, ka, kp = jax.random.split(key, 3)

    x = jax.random.normal(kx, (N, nfeat), jnp.float32)

    def make_adj(k):
        k0, k1, k2 = jax.random.split(k, 3)
        idx = jax.random.randint(k0, (N, K + 1), 0, N).astype(jnp.int32)
        w1 = jax.random.uniform(k1, (N, K + 1), jnp.float32)
        w2 = jax.random.uniform(k2, (N, K + 1), jnp.float32)
        return (idx, w1, w2)

    ka1, ka2 = jax.random.split(ka)
    adj1 = make_adj(ka1)
    adj2 = make_adj(ka2)

    params = init_params(kp, nfeat, nhid, nclass)

    # bf16-IO / bf16-MXU mode (default fast path)
    h2_bf, (m1_bf, m2_bf) = lrgcn_batch_forward(x, adj1, adj2, params, use_bf16=True)
    jax.block_until_ready((h2_bf, m1_bf, m2_bf))

    # f32 mode (tight correctness check)
    h2_f, (m1_f, m2_f) = lrgcn_batch_forward(x, adj1, adj2, params, use_bf16=False)
    jax.block_until_ready((h2_f, m1_f, m2_f))

    _, h2_r, (m1_r, m2_r) = _forward_ref(x, adj1, adj2, params)

    assert h2_f.shape == (N, nclass)
    assert m1_f.shape == (N, K, nfeat) and m2_f.shape == (N, K, nhid)

    # f32 kernel vs f32 reference (same algebra; MXU / reduction-order rounding)
    assert jnp.allclose(h2_f, h2_r, rtol=2e-2, atol=2e-2)
    assert jnp.allclose(m1_f, m1_r, rtol=2e-2, atol=2e-2)
    assert jnp.allclose(m2_f, m2_r, rtol=2e-2, atol=2e-2)

    # bf16 fast path vs f32 reference (bf16 gather IO, bf16 matmuls, bf16 m store)
    assert jnp.allclose(h2_bf, h2_r, rtol=5e-2, atol=1e-1)
    assert jnp.allclose(m1_bf.astype(jnp.float32), m1_r, rtol=5e-2, atol=1e-1)
    assert jnp.allclose(m2_bf.astype(jnp.float32), m2_r, rtol=5e-2, atol=1e-1)

    print("KERNEL_OK")
</pallas_src>

<mosaic_0001>
module attributes {stable_mosaic.version = 11 : i64} {
  func.func @lrgcn_layer_kernel(%arg0: i32, %arg1: memref<8x128x32xbf16, #tpu.memory_space<vmem>>, %arg2: memref<128x32xf32, #tpu.memory_space<vmem>>, %arg3: memref<128x32xf32, #tpu.memory_space<vmem>>, %arg4: memref<32x64xbf16, #tpu.memory_space<vmem>>, %arg5: memref<32x96xbf16, #tpu.memory_space<vmem>>, %arg6: memref<1x32xf32, #tpu.memory_space<vmem>>, %arg7: memref<128x32xf32, #tpu.memory_space<vmem>>, %arg8: memref<128x256xbf16, #tpu.memory_space<vmem>>) attributes {dimension_semantics = [#tpu.dimension_semantics<parallel>], iteration_bounds = array<i64: 2>, scalar_prefetch = 0 : i64, scratch_operands = 0 : i64, tpu.core_type = #tpu.core_type<tc>, window_params = [{transform_indices = @transform_0, window_bounds = array<i64: 8, 128, 32>}, {transform_indices = @transform_1, window_bounds = array<i64: 128, 32>}, {transform_indices = @transform_2, window_bounds = array<i64: 128, 32>}, {pipeline_mode = #tpu.pipeline_mode<synchronous>, transform_indices = @transform_3, window_bounds = array<i64: 32, 64>}, {pipeline_mode = #tpu.pipeline_mode<synchronous>, transform_indices = @transform_4, window_bounds = array<i64: 32, 96>}, {pipeline_mode = #tpu.pipeline_mode<synchronous>, transform_indices = @transform_5, window_bounds = array<i64: 1, 32>}, {transform_indices = @transform_6, window_bounds = array<i64: 128, 32>}, {transform_indices = @transform_7, window_bounds = array<i64: 128, 256>}]} {
    %c0 = arith.constant 0 : index
    %c0_0 = arith.constant 0 : index
    %0 = vector.load %arg2[%c0, %c0_0] : memref<128x32xf32, #tpu.memory_space<vmem>>, vector<128x32xf32>
    %c0_1 = arith.constant 0 : index
    %c0_2 = arith.constant 0 : index
    %1 = vector.load %arg3[%c0_1, %c0_2] : memref<128x32xf32, #tpu.memory_space<vmem>>, vector<128x32xf32>
    %2 = tpu.concatenate %0, %1 in 0 : vector<128x32xf32>, vector<128x32xf32> -> vector<256x32xf32>
    %3 = arith.truncf %2 : vector<256x32xf32> to vector<256x32xbf16>
    %c0_3 = arith.constant 0 : index
    %c0_4 = arith.constant 0 : index
    %4 = vector.load %arg5[%c0_3, %c0_4] : memref<32x96xbf16, #tpu.memory_space<vmem>>, vector<32x96xbf16>
    %cst = arith.constant dense<0.000000e+00> : vector<256x96xf32>
    %5 = tpu.matmul %3, %4, %cst {dimension_numbers = #tpu.dot_dimension_numbers<[1], [0], [0], [1], [0, 0, 1, 1], [], []>} : vector<256x32xbf16>, vector<32x96xbf16>, vector<256x96xf32> -> vector<256x96xf32>
    %6 = vector.extract_strided_slice %5 {offsets = [0, 0], sizes = [128, 64], strides = [1, 1]} : vector<256x96xf32> to vector<128x64xf32>
    %7 = vector.extract_strided_slice %5 {offsets = [128, 64], sizes = [128, 32], strides = [1, 1]} : vector<256x96xf32> to vector<128x32xf32>
    %cst_5 = arith.constant 0.000000e+00 : f32
    %8 = vector.broadcast %cst_5 : f32 to vector<128x32xf32>
    %9 = arith.cmpf ogt, %7, %8 : vector<128x32xf32>
    %10 = math.exp %7 : vector<128x32xf32>
    %cst_6 = arith.constant 1.000000e+00 : f32
    %11 = vector.broadcast %cst_6 : f32 to vector<128x32xf32>
    %12 = arith.subf %10, %11 : vector<128x32xf32>
    %13 = arith.select %9, %7, %12 : vector<128x32xi1>, vector<128x32xf32>
    %c0_7 = arith.constant 0 : index
    %c0_8 = arith.constant 0 : index
    %14 = vector.load %arg7[%c0_7, %c0_8] : memref<128x32xf32, #tpu.memory_space<vmem>>, vector<128x32xf32>
    tpu.vector_store %arg7[%c0_7, %c0_8], %13 {strides = array<i32>} : memref<128x32xf32, #tpu.memory_space<vmem>>, vector<128x32xf32>,
    %c0_9 = arith.constant 0 : index
    %c0_10 = arith.constant 0 : index
    %c0_11 = arith.constant 0 : index
    %15 = vector.load %arg1[%c0_9, %c0_10, %c0_11] : memref<8x128x32xbf16, #tpu.memory_space<vmem>>, vector<8x128x32xbf16>
    %16 = vector.shape_cast %15 : vector<8x128x32xbf16> to vector<1024x32xbf16>
    %c0_12 = arith.constant 0 : index
    %c0_13 = arith.constant 0 : index
    %17 = vector.load %arg4[%c0_12, %c0_13] : memref<32x64xbf16, #tpu.memory_space<vmem>>, vector<32x64xbf16>
    %cst_14 = arith.constant dense<0.000000e+00> : vector<1024x64xf32>
    %18 = tpu.matmul %16, %17, %cst_14 {dimension_numbers = #tpu.dot_dimension_numbers<[1], [0], [0], [1], [0, 0, 1, 1], [], []>} : vector<1024x32xbf16>, vector<32x64xbf16>, vector<1024x64xf32> -> vector<1024x64xf32>
    %c0_15 = arith.constant 0 : index
    %c0_16 = arith.constant 0 : index
    %19 = vector.load %arg6[%c0_15, %c0_16] : memref<1x32xf32, #tpu.memory_space<vmem>>, vector<1x32xf32>
    %20 = vector.shape_cast %19 : vector<1x32xf32> to vector<1x32xf32>
    %21 = vector.broadcast %20 : vector<1x32xf32> to vector<128x32xf32>
    %c0_17 = arith.constant 0 : index
    %c0_18 = arith.constant 0 : index
    %c0_19 = arith.constant 0 : index
    %22 = vector.load %arg1[%c0_17, %c0_18, %c0_19] : memref<8x128x32xbf16, #tpu.memory_space<vmem>>, vector<1x128x32xbf16>
    %23 = vector.shape_cast %22 : vector<1x128x32xbf16> to vector<128x32xbf16>
    %24 = arith.extf %23 : vector<128x32xbf16> to vector<128x32xf32>
    %25 = vector.extract_strided_slice %18 {offsets = [0, 0], sizes = [128, 64], strides = [1, 1]} : vector<1024x64xf32> to vector<128x64xf32>
    %26 = arith.addf %25, %6 : vector<128x64xf32>
    %cst_20 = arith.constant 0.000000e+00 : f32
    %27 = vector.broadcast %cst_20 : f32 to vector<128x64xf32>
    %28 = arith.cmpf ogt, %26, %27 : vector<128x64xf32>
    %cst_21 = arith.constant 0.00999999977 : f32
    %29 = vector.broadcast %cst_21 : f32 to vector<128x64xf32>
    %30 = arith.mulf %29, %26 : vector<128x64xf32>
    %31 = arith.select %28, %26, %30 : vector<128x64xi1>, vector<128x64xf32>
    %32 = vector.extract_strided_slice %31 {offsets = [0, 0], sizes = [128, 32], strides = [1, 1]} : vector<128x64xf32> to vector<128x32xf32>
    %cst_22 = arith.constant 1.000000e+00 : f32
    %33 = vector.broadcast %cst_22 : f32 to vector<128x32xf32>
    %34 = arith.addf %32, %33 : vector<128x32xf32>
    %35 = vector.extract_strided_slice %31 {offsets = [0, 32], sizes = [128, 32], strides = [1, 1]} : vector<128x64xf32> to vector<128x32xf32>
    %36 = arith.mulf %34, %21 : vector<128x32xf32>
    %37 = arith.addf %24, %36 : vector<128x32xf32>
    %38 = arith.addf %37, %35 : vector<128x32xf32>
    %39 = arith.subf %38, %0 : vector<128x32xf32>
    %c1 = arith.constant 1 : index
    %c0_23 = arith.constant 0 : index
    %c0_24 = arith.constant 0 : index
    %40 = vector.load %arg1[%c1, %c0_23, %c0_24] : memref<8x128x32xbf16, #tpu.memory_space<vmem>>, vector<1x128x32xbf16>
    %41 = vector.shape_cast %40 : vector<1x128x32xbf16> to vector<128x32xbf16>
    %42 = arith.extf %41 : vector<128x32xbf16> to vector<128x32xf32>
    %43 = vector.extract_strided_slice %18 {offsets = [128, 0], sizes = [128, 64], strides = [1, 1]} : vector<1024x64xf32> to vector<128x64xf32>
    %44 = arith.addf %43, %6 : vector<128x64xf32>
    %cst_25 = arith.constant 0.000000e+00 : f32
    %45 = vector.broadcast %cst_25 : f32 to vector<128x64xf32>
    %46 = arith.cmpf ogt, %44, %45 : vector<128x64xf32>
    %cst_26 = arith.constant 0.00999999977 : f32
    %47 = vector.broadcast %cst_26 : f32 to vector<128x64xf32>
    %48 = arith.mulf %47, %44 : vector<128x64xf32>
    %49 = arith.select %46, %44, %48 : vector<128x64xi1>, vector<128x64xf32>
    %50 = vector.extract_strided_slice %49 {offsets = [0, 0], sizes = [128, 32], strides = [1, 1]} : vector<128x64xf32> to vector<128x32xf32>
    %cst_27 = arith.constant 1.000000e+00 : f32
    %51 = vector.broadcast %cst_27 : f32 to vector<128x32xf32>
    %52 = arith.addf %50, %51 : vector<128x32xf32>
    %53 = vector.extract_strided_slice %49 {offsets = [0, 32], sizes = [128, 32], strides = [1, 1]} : vector<128x64xf32> to vector<128x32xf32>
    %54 = arith.mulf %52, %21 : vector<128x32xf32>
    %55 = arith.addf %42, %54 : vector<128x32xf32>
    %56 = arith.addf %55, %53 : vector<128x32xf32>
    %57 = arith.subf %56, %0 : vector<128x32xf32>
    %c2 = arith.constant 2 : index
    %c0_28 = arith.constant 0 : index
    %c0_29 = arith.constant 0 : index
    %58 = vector.load %arg1[%c2, %c0_28, %c0_29] : memref<8x128x32xbf16, #tpu.memory_space<vmem>>, vector<1x128x32xbf16>
    %59 = vector.shape_cast %58 : vector<1x128x32xbf16> to vector<128x32xbf16>
    %60 = arith.extf %59 : vector<128x32xbf16> to vector<128x32xf32>
    %61 = vector.extract_strided_slice %18 {offsets = [256, 0], sizes = [128, 64], strides = [1, 1]} : vector<1024x64xf32> to vector<128x64xf32>
    %62 = arith.addf %61, %6 : vector<128x64xf32>
    %cst_30 = arith.constant 0.000000e+00 : f32
    %63 = vector.broadcast %cst_30 : f32 to vector<128x64xf32>
    %64 = arith.cmpf ogt, %62, %63 : vector<128x64xf32>
    %cst_31 = arith.constant 0.00999999977 : f32
    %65 = vector.broadcast %cst_31 : f32 to vector<128x64xf32>
    %66 = arith.mulf %65, %62 : vector<128x64xf32>
    %67 = arith.select %64, %62, %66 : vector<128x64xi1>, vector<128x64xf32>
    %68 = vector.extract_strided_slice %67 {offsets = [0, 0], sizes = [128, 32], strides = [1, 1]} : vector<128x64xf32> to vector<128x32xf32>
    %cst_32 = arith.constant 1.000000e+00 : f32
    %69 = vector.broadcast %cst_32 : f32 to vector<128x32xf32>
    %70 = arith.addf %68, %69 : vector<128x32xf32>
    %71 = vector.extract_strided_slice %67 {offsets = [0, 32], sizes = [128, 32], strides = [1, 1]} : vector<128x64xf32> to vector<128x32xf32>
    %72 = arith.mulf %70, %21 : vector<128x32xf32>
    %73 = arith.addf %60, %72 : vector<128x32xf32>
    %74 = arith.addf %73, %71 : vector<128x32xf32>
    %75 = arith.subf %74, %0 : vector<128x32xf32>
    %c3 = arith.constant 3 : index
    %c0_33 = arith.constant 0 : index
    %c0_34 = arith.constant 0 : index
    %76 = vector.load %arg1[%c3, %c0_33, %c0_34] : memref<8x128x32xbf16, #tpu.memory_space<vmem>>, vector<1x128x32xbf16>
    %77 = vector.shape_cast %76 : vector<1x128x32xbf16> to vector<128x32xbf16>
    %78 = arith.extf %77 : vector<128x32xbf16> to vector<128x32xf32>
    %79 = vector.extract_strided_slice %18 {offsets = [384, 0], sizes = [128, 64], strides = [1, 1]} : vector<1024x64xf32> to vector<128x64xf32>
    %80 = arith.addf %79, %6 : vector<128x64xf32>
    %cst_35 = arith.constant 0.000000e+00 : f32
    %81 = vector.broadcast %cst_35 : f32 to vector<128x64xf32>
    %82 = arith.cmpf ogt, %80, %81 : vector<128x64xf32>
    %cst_36 = arith.constant 0.00999999977 : f32
    %83 = vector.broadcast %cst_36 : f32 to vector<128x64xf32>
    %84 = arith.mulf %83, %80 : vector<128x64xf32>
    %85 = arith.select %82, %80, %84 : vector<128x64xi1>, vector<128x64xf32>
    %86 = vector.extract_strided_slice %85 {offsets = [0, 0], sizes = [128, 32], strides = [1, 1]} : vector<128x64xf32> to vector<128x32xf32>
    %cst_37 = arith.constant 1.000000e+00 : f32
    %87 = vector.broadcast %cst_37 : f32 to vector<128x32xf32>
    %88 = arith.addf %86, %87 : vector<128x32xf32>
    %89 = vector.extract_strided_slice %85 {offsets = [0, 32], sizes = [128, 32], strides = [1, 1]} : vector<128x64xf32> to vector<128x32xf32>
    %90 = arith.mulf %88, %21 : vector<128x32xf32>
    %91 = arith.addf %78, %90 : vector<128x32xf32>
    %92 = arith.addf %91, %89 : vector<128x32xf32>
    %93 = arith.subf %92, %0 : vector<128x32xf32>
    %94 = tpu.concatenate %39, %57, %75, %93 in 1 : vector<128x32xf32>, vector<128x32xf32>, vector<128x32xf32>, vector<128x32xf32> -> vector<128x128xf32>
    %95 = arith.truncf %94 : vector<128x128xf32> to vector<128x128xbf16>
    %c0_38 = arith.constant 0 : index
    %c0_39 = arith.constant 0 : index
    %96 = vector.load %arg8[%c0_38, %c0_39] : memref<128x256xbf16, #tpu.memory_space<vmem>>, vector<128x128xbf16>
    tpu.vector_store %arg8[%c0_38, %c0_39], %95 {strides = array<i32>} : memref<128x256xbf16, #tpu.memory_space<vmem>>, vector<128x128xbf16>,
    %c4 = arith.constant 4 : index
    %c0_40 = arith.constant 0 : index
    %c0_41 = arith.constant 0 : index
    %97 = vector.load %arg1[%c4, %c0_40, %c0_41] : memref<8x128x32xbf16, #tpu.memory_space<vmem>>, vector<1x128x32xbf16>
    %98 = vector.shape_cast %97 : vector<1x128x32xbf16> to vector<128x32xbf16>
    %99 = arith.extf %98 : vector<128x32xbf16> to vector<128x32xf32>
    %100 = vector.extract_strided_slice %18 {offsets = [512, 0], sizes = [128, 64], strides = [1, 1]} : vector<1024x64xf32> to vector<128x64xf32>
    %101 = arith.addf %100, %6 : vector<128x64xf32>
    %cst_42 = arith.constant 0.000000e+00 : f32
    %102 = vector.broadcast %cst_42 : f32 to vector<128x64xf32>
    %103 = arith.cmpf ogt, %101, %102 : vector<128x64xf32>
    %cst_43 = arith.constant 0.00999999977 : f32
    %104 = vector.broadcast %cst_43 : f32 to vector<128x64xf32>
    %105 = arith.mulf %104, %101 : vector<128x64xf32>
    %106 = arith.select %103, %101, %105 : vector<128x64xi1>, vector<128x64xf32>
    %107 = vector.extract_strided_slice %106 {offsets = [0, 0], sizes = [128, 32], strides = [1, 1]} : vector<128x64xf32> to vector<128x32xf32>
    %cst_44 = arith.constant 1.000000e+00 : f32
    %108 = vector.broadcast %cst_44 : f32 to vector<128x32xf32>
    %109 = arith.addf %107, %108 : vector<128x32xf32>
    %110 = vector.extract_strided_slice %106 {offsets = [0, 32], sizes = [128, 32], strides = [1, 1]} : vector<128x64xf32> to vector<128x32xf32>
    %111 = arith.mulf %109, %21 : vector<128x32xf32>
    %112 = arith.addf %99, %111 : vector<128x32xf32>
    %113 = arith.addf %112, %110 : vector<128x32xf32>
    %114 = arith.subf %113, %0 : vector<128x32xf32>
    %c5 = arith.constant 5 : index
    %c0_45 = arith.constant 0 : index
    %c0_46 = arith.constant 0 : index
    %115 = vector.load %arg1[%c5, %c0_45, %c0_46] : memref<8x128x32xbf16, #tpu.memory_space<vmem>>, vector<1x128x32xbf16>
    %116 = vector.shape_cast %115 : vector<1x128x32xbf16> to vector<128x32xbf16>
    %117 = arith.extf %116 : vector<128x32xbf16> to vector<128x32xf32>
    %118 = vector.extract_strided_slice %18 {offsets = [640, 0], sizes = [128, 64], strides = [1, 1]} : vector<1024x64xf32> to vector<128x64xf32>
    %119 = arith.addf %118, %6 : vector<128x64xf32>
    %cst_47 = arith.constant 0.000000e+00 : f32
    %120 = vector.broadcast %cst_47 : f32 to vector<128x64xf32>
    %121 = arith.cmpf ogt, %119, %120 : vector<128x64xf32>
    %cst_48 = arith.constant 0.00999999977 : f32
    %122 = vector.broadcast %cst_48 : f32 to vector<128x64xf32>
    %123 = arith.mulf %122, %119 : vector<128x64xf32>
    %124 = arith.select %121, %119, %123 : vector<128x64xi1>, vector<128x64xf32>
    %125 = vector.extract_strided_slice %124 {offsets = [0, 0], sizes = [128, 32], strides = [1, 1]} : vector<128x64xf32> to vector<128x32xf32>
    %cst_49 = arith.constant 1.000000e+00 : f32
    %126 = vector.broadcast %cst_49 : f32 to vector<128x32xf32>
    %127 = arith.addf %125, %126 : vector<128x32xf32>
    %128 = vector.extract_strided_slice %124 {offsets = [0, 32], sizes = [128, 32], strides = [1, 1]} : vector<128x64xf32> to vector<128x32xf32>
    %129 = arith.mulf %127, %21 : vector<128x32xf32>
    %130 = arith.addf %117, %129 : vector<128x32xf32>
    %131 = arith.addf %130, %128 : vector<128x32xf32>
    %132 = arith.subf %131, %0 : vector<128x32xf32>
    %c6 = arith.constant 6 : index
    %c0_50 = arith.constant 0 : index
    %c0_51 = arith.constant 0 : index
    %133 = vector.load %arg1[%c6, %c0_50, %c0_51] : memref<8x128x32xbf16, #tpu.memory_space<vmem>>, vector<1x128x32xbf16>
    %134 = vector.shape_cast %133 : vector<1x128x32xbf16> to vector<128x32xbf16>
    %135 = arith.extf %134 : vector<128x32xbf16> to vector<128x32xf32>
    %136 = vector.extract_strided_slice %18 {offsets = [768, 0], sizes = [128, 64], strides = [1, 1]} : vector<1024x64xf32> to vector<128x64xf32>
    %137 = arith.addf %136, %6 : vector<128x64xf32>
    %cst_52 = arith.constant 0.000000e+00 : f32
    %138 = vector.broadcast %cst_52 : f32 to vector<128x64xf32>
    %139 = arith.cmpf ogt, %137, %138 : vector<128x64xf32>
    %cst_53 = arith.constant 0.00999999977 : f32
    %140 = vector.broadcast %cst_53 : f32 to vector<128x64xf32>
    %141 = arith.mulf %140, %137 : vector<128x64xf32>
    %142 = arith.select %139, %137, %141 : vector<128x64xi1>, vector<128x64xf32>
    %143 = vector.extract_strided_slice %142 {offsets = [0, 0], sizes = [128, 32], strides = [1, 1]} : vector<128x64xf32> to vector<128x32xf32>
    %cst_54 = arith.constant 1.000000e+00 : f32
    %144 = vector.broadcast %cst_54 : f32 to vector<128x32xf32>
    %145 = arith.addf %143, %144 : vector<128x32xf32>
    %146 = vector.extract_strided_slice %142 {offsets = [0, 32], sizes = [128, 32], strides = [1, 1]} : vector<128x64xf32> to vector<128x32xf32>
    %147 = arith.mulf %145, %21 : vector<128x32xf32>
    %148 = arith.addf %135, %147 : vector<128x32xf32>
    %149 = arith.addf %148, %146 : vector<128x32xf32>
    %150 = arith.subf %149, %0 : vector<128x32xf32>
    %c7 = arith.constant 7 : index
    %c0_55 = arith.constant 0 : index
    %c0_56 = arith.constant 0 : index
    %151 = vector.load %arg1[%c7, %c0_55, %c0_56] : memref<8x128x32xbf16, #tpu.memory_space<vmem>>, vector<1x128x32xbf16>
    %152 = vector.shape_cast %151 : vector<1x128x32xbf16> to vector<128x32xbf16>
    %153 = arith.extf %152 : vector<128x32xbf16> to vector<128x32xf32>
    %154 = vector.extract_strided_slice %18 {offsets = [896, 0], sizes = [128, 64], strides = [1, 1]} : vector<1024x64xf32> to vector<128x64xf32>
    %155 = arith.addf %154, %6 : vector<128x64xf32>
    %cst_57 = arith.constant 0.000000e+00 : f32
    %156 = vector.broadcast %cst_57 : f32 to vector<128x64xf32>
    %157 = arith.cmpf ogt, %155, %156 : vector<128x64xf32>
    %cst_58 = arith.constant 0.00999999977 : f32
    %158 = vector.broadcast %cst_58 : f32 to vector<128x64xf32>
    %159 = arith.mulf %158, %155 : vector<128x64xf32>
    %160 = arith.select %157, %155, %159 : vector<128x64xi1>, vector<128x64xf32>
    %161 = vector.extract_strided_slice %160 {offsets = [0, 0], sizes = [128, 32], strides = [1, 1]} : vector<128x64xf32> to vector<128x32xf32>
    %cst_59 = arith.constant 1.000000e+00 : f32
    %162 = vector.broadcast %cst_59 : f32 to vector<128x32xf32>
    %163 = arith.addf %161, %162 : vector<128x32xf32>
    %164 = vector.extract_strided_slice %160 {offsets = [0, 32], sizes = [128, 32], strides = [1, 1]} : vector<128x64xf32> to vector<128x32xf32>
    %165 = arith.mulf %163, %21 : vector<128x32xf32>
    %166 = arith.addf %153, %165 : vector<128x32xf32>
    %167 = arith.addf %166, %164 : vector<128x32xf32>
    %168 = arith.subf %167, %0 : vector<128x32xf32>
    %169 = tpu.concatenate %114, %132, %150, %168 in 1 : vector<128x32xf32>, vector<128x32xf32>, vector<128x32xf32>, vector<128x32xf32> -> vector<128x128xf32>
    %170 = arith.truncf %169 : vector<128x128xf32> to vector<128x128xbf16>
    %c0_60 = arith.constant 0 : index
    %c128 = arith.constant 128 : index
    %171 = vector.load %arg8[%c0_60, %c128] : memref<128x256xbf16, #tpu.memory_space<vmem>>, vector<128x128xbf16>
    tpu.vector_store %arg8[%c0_60, %c128], %170 {strides = array<i32>} : memref<128x256xbf16, #tpu.memory_space<vmem>>, vector<128x128xbf16>,
    return
  }
  func.func @transform_0(%arg0: i32) -> (i32, i32, i32) {
    %c0_i32 = arith.constant 0 : i32
    %c0_i32_0 = arith.constant 0 : i32
    %c0_i32_1 = arith.constant 0 : i32
    return %c0_i32, %arg0, %c0_i32_0 : i32, i32, i32
  }
  func.func @transform_1(%arg0: i32) -> (i32, i32) {
    %c0_i32 = arith.constant 0 : i32
    %c0_i32_0 = arith.constant 0 : i32
    return %arg0, %c0_i32 : i32, i32
  }
  func.func @transform_2(%arg0: i32) -> (i32, i32) {
    %c0_i32 = arith.constant 0 : i32
    %c0_i32_0 = arith.constant 0 : i32
    return %arg0, %c0_i32 : i32, i32
  }
  func.func @transform_3(%arg0: i32) -> (i32, i32) {
    %c0_i32 = arith.constant 0 : i32
    %c0_i32_0 = arith.constant 0 : i32
    %c0_i32_1 = arith.constant 0 : i32
    return %c0_i32, %c0_i32_0 : i32, i32
  }
  func.func @transform_4(%arg0: i32) -> (i32, i32) {
    %c0_i32 = arith.constant 0 : i32
    %c0_i32_0 = arith.constant 0 : i32
    %c0_i32_1 = arith.constant 0 : i32
    return %c0_i32, %c0_i32_0 : i32, i32
  }
  func.func @transform_5(%arg0: i32) -> (i32, i32) {
    %c0_i32 = arith.constant 0 : i32
    %c0_i32_0 = arith.constant 0 : i32
    %c0_i32_1 = arith.constant 0 : i32
    return %c0_i32, %c0_i32_0 : i32, i32
  }
  func.func @transform_6(%arg0: i32) -> (i32, i32) {
    %c0_i32 = arith.constant 0 : i32
    %c0_i32_0 = arith.constant 0 : i32
    return %arg0, %c0_i32 : i32, i32
  }
  func.func @transform_7(%arg0: i32) -> (i32, i32) {
    %c0_i32 = arith.constant 0 : i32
    %c0_i32_0 = arith.constant 0 : i32
    return %arg0, %c0_i32 : i32, i32
  }
}

module attributes {stable_mosaic.version = 11 : i64} {
  func.func @lrgcn_layer_kernel(%arg0: i32, %arg1: memref<8x128x32xbf16, #tpu.memory_space<vmem>>, %arg2: memref<128x32xf32, #tpu.memory_space<vmem>>, %arg3: memref<128x32xf32, #tpu.memory_space<vmem>>, %arg4: memref<32x64xbf16, #tpu.memory_space<vmem>>, %arg5: memref<32x80xbf16, #tpu.memory_space<vmem>>, %arg6: memref<1x32xf32, #tpu.memory_space<vmem>>, %arg7: memref<128x16xf32, #tpu.memory_space<vmem>>, %arg8: memref<128x256xbf16, #tpu.memory_space<vmem>>) attributes {dimension_semantics = [#tpu.dimension_semantics<parallel>], iteration_bounds = array<i64: 2>, scalar_prefetch = 0 : i64, scratch_operands = 0 : i64, tpu.core_type = #tpu.core_type<tc>, window_params = [{transform_indices = @transform_0, window_bounds = array<i64: 8, 128, 32>}, {transform_indices = @transform_1, window_bounds = array<i64: 128, 32>}, {transform_indices = @transform_2, window_bounds = array<i64: 128, 32>}, {pipeline_mode = #tpu.pipeline_mode<synchronous>, transform_indices = @transform_3, window_bounds = array<i64: 32, 64>}, {pipeline_mode = #tpu.pipeline_mode<synchronous>, transform_indices = @transform_4, window_bounds = array<i64: 32, 80>}, {pipeline_mode = #tpu.pipeline_mode<synchronous>, transform_indices = @transform_5, window_bounds = array<i64: 1, 32>}, {transform_indices = @transform_6, window_bounds = array<i64: 128, 16>}, {transform_indices = @transform_7, window_bounds = array<i64: 128, 256>}]} {
    %c0 = arith.constant 0 : index
    %c0_0 = arith.constant 0 : index
    %0 = vector.load %arg2[%c0, %c0_0] : memref<128x32xf32, #tpu.memory_space<vmem>>, vector<128x32xf32>
    %c0_1 = arith.constant 0 : index
    %c0_2 = arith.constant 0 : index
    %1 = vector.load %arg3[%c0_1, %c0_2] : memref<128x32xf32, #tpu.memory_space<vmem>>, vector<128x32xf32>
    %2 = tpu.concatenate %0, %1 in 0 : vector<128x32xf32>, vector<128x32xf32> -> vector<256x32xf32>
    %3 = arith.truncf %2 : vector<256x32xf32> to vector<256x32xbf16>
    %c0_3 = arith.constant 0 : index
    %c0_4 = arith.constant 0 : index
    %4 = vector.load %arg5[%c0_3, %c0_4] : memref<32x80xbf16, #tpu.memory_space<vmem>>, vector<32x80xbf16>
    %cst = arith.constant dense<0.000000e+00> : vector<256x80xf32>
    %5 = tpu.matmul %3, %4, %cst {dimension_numbers = #tpu.dot_dimension_numbers<[1], [0], [0], [1], [0, 0, 1, 1], [], []>} : vector<256x32xbf16>, vector<32x80xbf16>, vector<256x80xf32> -> vector<256x80xf32>
    %6 = vector.extract_strided_slice %5 {offsets = [0, 0], sizes = [128, 64], strides = [1, 1]} : vector<256x80xf32> to vector<128x64xf32>
    %7 = vector.extract_strided_slice %5 {offsets = [128, 64], sizes = [128, 16], strides = [1, 1]} : vector<256x80xf32> to vector<128x16xf32>
    %c0_5 = arith.constant 0 : index
    %c0_6 = arith.constant 0 : index
    %8 = vector.load %arg7[%c0_5, %c0_6] : memref<128x16xf32, #tpu.memory_space<vmem>>, vector<128x16xf32>
    tpu.vector_store %arg7[%c0_5, %c0_6], %7 {strides = array<i32>} : memref<128x16xf32, #tpu.memory_space<vmem>>, vector<128x16xf32>,
    %c0_7 = arith.constant 0 : index
    %c0_8 = arith.constant 0 : index
    %c0_9 = arith.constant 0 : index
    %9 = vector.load %arg1[%c0_7, %c0_8, %c0_9] : memref<8x128x32xbf16, #tpu.memory_space<vmem>>, vector<8x128x32xbf16>
    %10 = vector.shape_cast %9 : vector<8x128x32xbf16> to vector<1024x32xbf16>
    %c0_10 = arith.constant 0 : index
    %c0_11 = arith.constant 0 : index
    %11 = vector.load %arg4[%c0_10, %c0_11] : memref<32x64xbf16, #tpu.memory_space<vmem>>, vector<32x64xbf16>
    %cst_12 = arith.constant dense<0.000000e+00> : vector<1024x64xf32>
    %12 = tpu.matmul %10, %11, %cst_12 {dimension_numbers = #tpu.dot_dimension_numbers<[1], [0], [0], [1], [0, 0, 1, 1], [], []>} : vector<1024x32xbf16>, vector<32x64xbf16>, vector<1024x64xf32> -> vector<1024x64xf32>
    %c0_13 = arith.constant 0 : index
    %c0_14 = arith.constant 0 : index
    %13 = vector.load %arg6[%c0_13, %c0_14] : memref<1x32xf32, #tpu.memory_space<vmem>>, vector<1x32xf32>
    %14 = vector.shape_cast %13 : vector<1x32xf32> to vector<1x32xf32>
    %15 = vector.broadcast %14 : vector<1x32xf32> to vector<128x32xf32>
    %c0_15 = arith.constant 0 : index
    %c0_16 = arith.constant 0 : index
    %c0_17 = arith.constant 0 : index
    %16 = vector.load %arg1[%c0_15, %c0_16, %c0_17] : memref<8x128x32xbf16, #tpu.memory_space<vmem>>, vector<1x128x32xbf16>
    %17 = vector.shape_cast %16 : vector<1x128x32xbf16> to vector<128x32xbf16>
    %18 = arith.extf %17 : vector<128x32xbf16> to vector<128x32xf32>
    %19 = vector.extract_strided_slice %12 {offsets = [0, 0], sizes = [128, 64], strides = [1, 1]} : vector<1024x64xf32> to vector<128x64xf32>
    %20 = arith.addf %19, %6 : vector<128x64xf32>
    %cst_18 = arith.constant 0.000000e+00 : f32
    %21 = vector.broadcast %cst_18 : f32 to vector<128x64xf32>
    %22 = arith.cmpf ogt, %20, %21 : vector<128x64xf32>
    %cst_19 = arith.constant 0.00999999977 : f32
    %23 = vector.broadcast %cst_19 : f32 to vector<128x64xf32>
    %24 = arith.mulf %23, %20 : vector<128x64xf32>
    %25 = arith.select %22, %20, %24 : vector<128x64xi1>, vector<128x64xf32>
    %26 = vector.extract_strided_slice %25 {offsets = [0, 0], sizes = [128, 32], strides = [1, 1]} : vector<128x64xf32> to vector<128x32xf32>
    %cst_20 = arith.constant 1.000000e+00 : f32
    %27 = vector.broadcast %cst_20 : f32 to vector<128x32xf32>
    %28 = arith.addf %26, %27 : vector<128x32xf32>
    %29 = vector.extract_strided_slice %25 {offsets = [0, 32], sizes = [128, 32], strides = [1, 1]} : vector<128x64xf32> to vector<128x32xf32>
    %30 = arith.mulf %28, %15 : vector<128x32xf32>
    %31 = arith.addf %18, %30 : vector<128x32xf32>
    %32 = arith.addf %31, %29 : vector<128x32xf32>
    %33 = arith.subf %32, %0 : vector<128x32xf32>
    %c1 = arith.constant 1 : index
    %c0_21 = arith.constant 0 : index
    %c0_22 = arith.constant 0 : index
    %34 = vector.load %arg1[%c1, %c0_21, %c0_22] : memref<8x128x32xbf16, #tpu.memory_space<vmem>>, vector<1x128x32xbf16>
    %35 = vector.shape_cast %34 : vector<1x128x32xbf16> to vector<128x32xbf16>
    %36 = arith.extf %35 : vector<128x32xbf16> to vector<128x32xf32>
    %37 = vector.extract_strided_slice %12 {offsets = [128, 0], sizes = [128, 64], strides = [1, 1]} : vector<1024x64xf32> to vector<128x64xf32>
    %38 = arith.addf %37, %6 : vector<128x64xf32>
    %cst_23 = arith.constant 0.000000e+00 : f32
    %39 = vector.broadcast %cst_23 : f32 to vector<128x64xf32>
    %40 = arith.cmpf ogt, %38, %39 : vector<128x64xf32>
    %cst_24 = arith.constant 0.00999999977 : f32
    %41 = vector.broadcast %cst_24 : f32 to vector<128x64xf32>
    %42 = arith.mulf %41, %38 : vector<128x64xf32>
    %43 = arith.select %40, %38, %42 : vector<128x64xi1>, vector<128x64xf32>
    %44 = vector.extract_strided_slice %43 {offsets = [0, 0], sizes = [128, 32], strides = [1, 1]} : vector<128x64xf32> to vector<128x32xf32>
    %cst_25 = arith.constant 1.000000e+00 : f32
    %45 = vector.broadcast %cst_25 : f32 to vector<128x32xf32>
    %46 = arith.addf %44, %45 : vector<128x32xf32>
    %47 = vector.extract_strided_slice %43 {offsets = [0, 32], sizes = [128, 32], strides = [1, 1]} : vector<128x64xf32> to vector<128x32xf32>
    %48 = arith.mulf %46, %15 : vector<128x32xf32>
    %49 = arith.addf %36, %48 : vector<128x32xf32>
    %50 = arith.addf %49, %47 : vector<128x32xf32>
    %51 = arith.subf %50, %0 : vector<128x32xf32>
    %c2 = arith.constant 2 : index
    %c0_26 = arith.constant 0 : index
    %c0_27 = arith.constant 0 : index
    %52 = vector.load %arg1[%c2, %c0_26, %c0_27] : memref<8x128x32xbf16, #tpu.memory_space<vmem>>, vector<1x128x32xbf16>
    %53 = vector.shape_cast %52 : vector<1x128x32xbf16> to vector<128x32xbf16>
    %54 = arith.extf %53 : vector<128x32xbf16> to vector<128x32xf32>
    %55 = vector.extract_strided_slice %12 {offsets = [256, 0], sizes = [128, 64], strides = [1, 1]} : vector<1024x64xf32> to vector<128x64xf32>
    %56 = arith.addf %55, %6 : vector<128x64xf32>
    %cst_28 = arith.constant 0.000000e+00 : f32
    %57 = vector.broadcast %cst_28 : f32 to vector<128x64xf32>
    %58 = arith.cmpf ogt, %56, %57 : vector<128x64xf32>
    %cst_29 = arith.constant 0.00999999977 : f32
    %59 = vector.broadcast %cst_29 : f32 to vector<128x64xf32>
    %60 = arith.mulf %59, %56 : vector<128x64xf32>
    %61 = arith.select %58, %56, %60 : vector<128x64xi1>, vector<128x64xf32>
    %62 = vector.extract_strided_slice %61 {offsets = [0, 0], sizes = [128, 32], strides = [1, 1]} : vector<128x64xf32> to vector<128x32xf32>
    %cst_30 = arith.constant 1.000000e+00 : f32
    %63 = vector.broadcast %cst_30 : f32 to vector<128x32xf32>
    %64 = arith.addf %62, %63 : vector<128x32xf32>
    %65 = vector.extract_strided_slice %61 {offsets = [0, 32], sizes = [128, 32], strides = [1, 1]} : vector<128x64xf32> to vector<128x32xf32>
    %66 = arith.mulf %64, %15 : vector<128x32xf32>
    %67 = arith.addf %54, %66 : vector<128x32xf32>
    %68 = arith.addf %67, %65 : vector<128x32xf32>
    %69 = arith.subf %68, %0 : vector<128x32xf32>
    %c3 = arith.constant 3 : index
    %c0_31 = arith.constant 0 : index
    %c0_32 = arith.constant 0 : index
    %70 = vector.load %arg1[%c3, %c0_31, %c0_32] : memref<8x128x32xbf16, #tpu.memory_space<vmem>>, vector<1x128x32xbf16>
    %71 = vector.shape_cast %70 : vector<1x128x32xbf16> to vector<128x32xbf16>
    %72 = arith.extf %71 : vector<128x32xbf16> to vector<128x32xf32>
    %73 = vector.extract_strided_slice %12 {offsets = [384, 0], sizes = [128, 64], strides = [1, 1]} : vector<1024x64xf32> to vector<128x64xf32>
    %74 = arith.addf %73, %6 : vector<128x64xf32>
    %cst_33 = arith.constant 0.000000e+00 : f32
    %75 = vector.broadcast %cst_33 : f32 to vector<128x64xf32>
    %76 = arith.cmpf ogt, %74, %75 : vector<128x64xf32>
    %cst_34 = arith.constant 0.00999999977 : f32
    %77 = vector.broadcast %cst_34 : f32 to vector<128x64xf32>
    %78 = arith.mulf %77, %74 : vector<128x64xf32>
    %79 = arith.select %76, %74, %78 : vector<128x64xi1>, vector<128x64xf32>
    %80 = vector.extract_strided_slice %79 {offsets = [0, 0], sizes = [128, 32], strides = [1, 1]} : vector<128x64xf32> to vector<128x32xf32>
    %cst_35 = arith.constant 1.000000e+00 : f32
    %81 = vector.broadcast %cst_35 : f32 to vector<128x32xf32>
    %82 = arith.addf %80, %81 : vector<128x32xf32>
    %83 = vector.extract_strided_slice %79 {offsets = [0, 32], sizes = [128, 32], strides = [1, 1]} : vector<128x64xf32> to vector<128x32xf32>
    %84 = arith.mulf %82, %15 : vector<128x32xf32>
    %85 = arith.addf %72, %84 : vector<128x32xf32>
    %86 = arith.addf %85, %83 : vector<128x32xf32>
    %87 = arith.subf %86, %0 : vector<128x32xf32>
    %88 = tpu.concatenate %33, %51, %69, %87 in 1 : vector<128x32xf32>, vector<128x32xf32>, vector<128x32xf32>, vector<128x32xf32> -> vector<128x128xf32>
    %89 = arith.truncf %88 : vector<128x128xf32> to vector<128x128xbf16>
    %c0_36 = arith.constant 0 : index
    %c0_37 = arith.constant 0 : index
    %90 = vector.load %arg8[%c0_36, %c0_37] : memref<128x256xbf16, #tpu.memory_space<vmem>>, vector<128x128xbf16>
    tpu.vector_store %arg8[%c0_36, %c0_37], %89 {strides = array<i32>} : memref<128x256xbf16, #tpu.memory_space<vmem>>, vector<128x128xbf16>,
    %c4 = arith.constant 4 : index
    %c0_38 = arith.constant 0 : index
    %c0_39 = arith.constant 0 : index
    %91 = vector.load %arg1[%c4, %c0_38, %c0_39] : memref<8x128x32xbf16, #tpu.memory_space<vmem>>, vector<1x128x32xbf16>
    %92 = vector.shape_cast %91 : vector<1x128x32xbf16> to vector<128x32xbf16>
    %93 = arith.extf %92 : vector<128x32xbf16> to vector<128x32xf32>
    %94 = vector.extract_strided_slice %12 {offsets = [512, 0], sizes = [128, 64], strides = [1, 1]} : vector<1024x64xf32> to vector<128x64xf32>
    %95 = arith.addf %94, %6 : vector<128x64xf32>
    %cst_40 = arith.constant 0.000000e+00 : f32
    %96 = vector.broadcast %cst_40 : f32 to vector<128x64xf32>
    %97 = arith.cmpf ogt, %95, %96 : vector<128x64xf32>
    %cst_41 = arith.constant 0.00999999977 : f32
    %98 = vector.broadcast %cst_41 : f32 to vector<128x64xf32>
    %99 = arith.mulf %98, %95 : vector<128x64xf32>
    %100 = arith.select %97, %95, %99 : vector<128x64xi1>, vector<128x64xf32>
    %101 = vector.extract_strided_slice %100 {offsets = [0, 0], sizes = [128, 32], strides = [1, 1]} : vector<128x64xf32> to vector<128x32xf32>
    %cst_42 = arith.constant 1.000000e+00 : f32
    %102 = vector.broadcast %cst_42 : f32 to vector<128x32xf32>
    %103 = arith.addf %101, %102 : vector<128x32xf32>
    %104 = vector.extract_strided_slice %100 {offsets = [0, 32], sizes = [128, 32], strides = [1, 1]} : vector<128x64xf32> to vector<128x32xf32>
    %105 = arith.mulf %103, %15 : vector<128x32xf32>
    %106 = arith.addf %93, %105 : vector<128x32xf32>
    %107 = arith.addf %106, %104 : vector<128x32xf32>
    %108 = arith.subf %107, %0 : vector<128x32xf32>
    %c5 = arith.constant 5 : index
    %c0_43 = arith.constant 0 : index
    %c0_44 = arith.constant 0 : index
    %109 = vector.load %arg1[%c5, %c0_43, %c0_44] : memref<8x128x32xbf16, #tpu.memory_space<vmem>>, vector<1x128x32xbf16>
    %110 = vector.shape_cast %109 : vector<1x128x32xbf16> to vector<128x32xbf16>
    %111 = arith.extf %110 : vector<128x32xbf16> to vector<128x32xf32>
    %112 = vector.extract_strided_slice %12 {offsets = [640, 0], sizes = [128, 64], strides = [1, 1]} : vector<1024x64xf32> to vector<128x64xf32>
    %113 = arith.addf %112, %6 : vector<128x64xf32>
    %cst_45 = arith.constant 0.000000e+00 : f32
    %114 = vector.broadcast %cst_45 : f32 to vector<128x64xf32>
    %115 = arith.cmpf ogt, %113, %114 : vector<128x64xf32>
    %cst_46 = arith.constant 0.00999999977 : f32
    %116 = vector.broadcast %cst_46 : f32 to vector<128x64xf32>
    %117 = arith.mulf %116, %113 : vector<128x64xf32>
    %118 = arith.select %115, %113, %117 : vector<128x64xi1>, vector<128x64xf32>
    %119 = vector.extract_strided_slice %118 {offsets = [0, 0], sizes = [128, 32], strides = [1, 1]} : vector<128x64xf32> to vector<128x32xf32>
    %cst_47 = arith.constant 1.000000e+00 : f32
    %120 = vector.broadcast %cst_47 : f32 to vector<128x32xf32>
    %121 = arith.addf %119, %120 : vector<128x32xf32>
    %122 = vector.extract_strided_slice %118 {offsets = [0, 32], sizes = [128, 32], strides = [1, 1]} : vector<128x64xf32> to vector<128x32xf32>
    %123 = arith.mulf %121, %15 : vector<128x32xf32>
    %124 = arith.addf %111, %123 : vector<128x32xf32>
    %125 = arith.addf %124, %122 : vector<128x32xf32>
    %126 = arith.subf %125, %0 : vector<128x32xf32>
    %c6 = arith.constant 6 : index
    %c0_48 = arith.constant 0 : index
    %c0_49 = arith.constant 0 : index
    %127 = vector.load %arg1[%c6, %c0_48, %c0_49] : memref<8x128x32xbf16, #tpu.memory_space<vmem>>, vector<1x128x32xbf16>
    %128 = vector.shape_cast %127 : vector<1x128x32xbf16> to vector<128x32xbf16>
    %129 = arith.extf %128 : vector<128x32xbf16> to vector<128x32xf32>
    %130 = vector.extract_strided_slice %12 {offsets = [768, 0], sizes = [128, 64], strides = [1, 1]} : vector<1024x64xf32> to vector<128x64xf32>
    %131 = arith.addf %130, %6 : vector<128x64xf32>
    %cst_50 = arith.constant 0.000000e+00 : f32
    %132 = vector.broadcast %cst_50 : f32 to vector<128x64xf32>
    %133 = arith.cmpf ogt, %131, %132 : vector<128x64xf32>
    %cst_51 = arith.constant 0.00999999977 : f32
    %134 = vector.broadcast %cst_51 : f32 to vector<128x64xf32>
    %135 = arith.mulf %134, %131 : vector<128x64xf32>
    %136 = arith.select %133, %131, %135 : vector<128x64xi1>, vector<128x64xf32>
    %137 = vector.extract_strided_slice %136 {offsets = [0, 0], sizes = [128, 32], strides = [1, 1]} : vector<128x64xf32> to vector<128x32xf32>
    %cst_52 = arith.constant 1.000000e+00 : f32
    %138 = vector.broadcast %cst_52 : f32 to vector<128x32xf32>
    %139 = arith.addf %137, %138 : vector<128x32xf32>
    %140 = vector.extract_strided_slice %136 {offsets = [0, 32], sizes = [128, 32], strides = [1, 1]} : vector<128x64xf32> to vector<128x32xf32>
    %141 = arith.mulf %139, %15 : vector<128x32xf32>
    %142 = arith.addf %129, %141 : vector<128x32xf32>
    %143 = arith.addf %142, %140 : vector<128x32xf32>
    %144 = arith.subf %143, %0 : vector<128x32xf32>
    %c7 = arith.constant 7 : index
    %c0_53 = arith.constant 0 : index
    %c0_54 = arith.constant 0 : index
    %145 = vector.load %arg1[%c7, %c0_53, %c0_54] : memref<8x128x32xbf16, #tpu.memory_space<vmem>>, vector<1x128x32xbf16>
    %146 = vector.shape_cast %145 : vector<1x128x32xbf16> to vector<128x32xbf16>
    %147 = arith.extf %146 : vector<128x32xbf16> to vector<128x32xf32>
    %148 = vector.extract_strided_slice %12 {offsets = [896, 0], sizes = [128, 64], strides = [1, 1]} : vector<1024x64xf32> to vector<128x64xf32>
    %149 = arith.addf %148, %6 : vector<128x64xf32>
    %cst_55 = arith.constant 0.000000e+00 : f32
    %150 = vector.broadcast %cst_55 : f32 to vector<128x64xf32>
    %151 = arith.cmpf ogt, %149, %150 : vector<128x64xf32>
    %cst_56 = arith.constant 0.00999999977 : f32
    %152 = vector.broadcast %cst_56 : f32 to vector<128x64xf32>
    %153 = arith.mulf %152, %149 : vector<128x64xf32>
    %154 = arith.select %151, %149, %153 : vector<128x64xi1>, vector<128x64xf32>
    %155 = vector.extract_strided_slice %154 {offsets = [0, 0], sizes = [128, 32], strides = [1, 1]} : vector<128x64xf32> to vector<128x32xf32>
    %cst_57 = arith.constant 1.000000e+00 : f32
    %156 = vector.broadcast %cst_57 : f32 to vector<128x32xf32>
    %157 = arith.addf %155, %156 : vector<128x32xf32>
    %158 = vector.extract_strided_slice %154 {offsets = [0, 32], sizes = [128, 32], strides = [1, 1]} : vector<128x64xf32> to vector<128x32xf32>
    %159 = arith.mulf %157, %15 : vector<128x32xf32>
    %160 = arith.addf %147, %159 : vector<128x32xf32>
    %161 = arith.addf %160, %158 : vector<128x32xf32>
    %162 = arith.subf %161, %0 : vector<128x32xf32>
    %163 = tpu.concatenate %108, %126, %144, %162 in 1 : vector<128x32xf32>, vector<128x32xf32>, vector<128x32xf32>, vector<128x32xf32> -> vector<128x128xf32>
    %164 = arith.truncf %163 : vector<128x128xf32> to vector<128x128xbf16>
    %c0_58 = arith.constant 0 : index
    %c128 = arith.constant 128 : index
    %165 = vector.load %arg8[%c0_58, %c128] : memref<128x256xbf16, #tpu.memory_space<vmem>>, vector<128x128xbf16>
    tpu.vector_store %arg8[%c0_58, %c128], %164 {strides = array<i32>} : memref<128x256xbf16, #tpu.memory_space<vmem>>, vector<128x128xbf16>,
    return
  }
  func.func @transform_0(%arg0: i32) -> (i32, i32, i32) {
    %c0_i32 = arith.constant 0 : i32
    %c0_i32_0 = arith.constant 0 : i32
    %c0_i32_1 = arith.constant 0 : i32
    return %c0_i32, %arg0, %c0_i32_0 : i32, i32, i32
  }
  func.func @transform_1(%arg0: i32) -> (i32, i32) {
    %c0_i32 = arith.constant 0 : i32
    %c0_i32_0 = arith.constant 0 : i32
    return %arg0, %c0_i32 : i32, i32
  }
  func.func @transform_2(%arg0: i32) -> (i32, i32) {
    %c0_i32 = arith.constant 0 : i32
    %c0_i32_0 = arith.constant 0 : i32
    return %arg0, %c0_i32 : i32, i32
  }
  func.func @transform_3(%arg0: i32) -> (i32, i32) {
    %c0_i32 = arith.constant 0 : i32
    %c0_i32_0 = arith.constant 0 : i32
    %c0_i32_1 = arith.constant 0 : i32
    return %c0_i32, %c0_i32_0 : i32, i32
  }
  func.func @transform_4(%arg0: i32) -> (i32, i32) {
    %c0_i32 = arith.constant 0 : i32
    %c0_i32_0 = arith.constant 0 : i32
    %c0_i32_1 = arith.constant 0 : i32
    return %c0_i32, %c0_i32_0 : i32, i32
  }
  func.func @transform_5(%arg0: i32) -> (i32, i32) {
    %c0_i32 = arith.constant 0 : i32
    %c0_i32_0 = arith.constant 0 : i32
    %c0_i32_1 = arith.constant 0 : i32
    return %c0_i32, %c0_i32_0 : i32, i32
  }
  func.func @transform_6(%arg0: i32) -> (i32, i32) {
    %c0_i32 = arith.constant 0 : i32
    %c0_i32_0 = arith.constant 0 : i32
    return %arg0, %c0_i32 : i32, i32
  }
  func.func @transform_7(%arg0: i32) -> (i32, i32) {
    %c0_i32 = arith.constant 0 : i32
    %c0_i32_0 = arith.constant 0 : i32
    return %arg0, %c0_i32 : i32, i32
  }
}

</mosaic_0001>

<bundles_post_ra>
// kernel: lrgcn_batch_forward.3
= control target key start
LH: loop header
LB: loop body
LE: loop exit
PB: predicated region body
PF: predicated region fallthrough
CT: control target
= control target key end

     0   :  { %s6523_s24 = smov 0   ;;  %s6525_s25 = smov 0   ;;  %s9051_s0 = inlined_call_operand.vmem [shape: bf16[8,256,32], index: 0, kind: input, shape index: {}]   ;;  %s9052_s1 = inlined_call_operand.vmem [shape: f32[256,32], index: 1, kind: input, shape index: {}]   ;;  %s9053_s2 = inlined_call_operand.vmem [shape: f32[256,32], index: 2, kind: input, shape index: {}]   ;;  %s9054_s3 = inlined_call_operand.vmem [shape: bf16[32,64], index: 3, kind: input, shape index: {}]   ;;  %s9055_s4 = inlined_call_operand.vmem [shape: bf16[32,80], index: 4, kind: input, shape index: {}]   ;;  %s9056_s5 = inlined_call_operand.vmem [shape: f32[1,32], index: 5, kind: input, shape index: {}]   ;;  %s9057_s6 = inlined_call_operand.vmem [shape: f32[256,16], index: 6, kind: output, shape index: {0}]   ;;  %s9058_s7 = inlined_call_operand.vmem [shape: bf16[256,256], index: 7, kind: output, shape index: {1}]  }
   0x1   :  { %s6527_s26 = smov 0  }
   0x2 LB: > { %s5148_s27 = sadd.s32 4294967295, %s6478_s26   ;;  %s6540_s28 = sadd.s32 1, %s6478_s26   ;;  %s6478_s26 = sphi %s6527_s26, %s9475_s26   ;;  %s6474_s25 = sphi %s6525_s25, %s9474_s25   ;;  %s6470_s24 = sphi %s6523_s24, %s9473_s24  }
   0x3   : > { %s22_s29 = ssub.s32 %s6478_s26, %s6540_s28  ;;  %s25_s30 = sadd.s32 1, %s6474_s25 }
   0x4   : > { %p23_p0 = scmp.eq.s32.totalorder %s22_s29, 0  ;;  %p32_p1 = scmp.ne.s32.totalorder %s6474_s25, %s6470_s24 }
   0x5   : > { %p33_p2 = scmp.eq.s32.totalorder %s6478_s26, 0  ;;  %p5151_p4 = scmp.ge.s32.totalorder %s6478_s26, 2 }
   0x6   : > { %s6549_s8 = scalar_select %p23_p0, %s6474_s25, %s25_s30  }
   0x7   : > { %p34_p3 = por %p33_p2, %p32_p1  ;;  %234 = sbr.rel (%p5151_p4) target bundleno = 48 (0x30), region = 28 }
   0xc   : > { %237 = sbr.rel (!%p34_p3) target bundleno = 48 (0x30), region = 32  ;;  %s239_s9 = sand.u32 (%p34_p3), 1, %s6474_s25  }
   0xd   : > { %s5461_s10 = sshll.u32 (%p34_p3), %s6478_s26, 6  ;;  %s5152_s11 = sshll.u32 (%p34_p3), %s239_s9, 9 }
   0xe   : > { %s6557_s14 = scalar_lea.vmem (%p34_p3), %s9051_s0, %s5461_s10  ;;  %s6562_s15 = scalar_lea.vmem (%p34_p3), [#allocation2], %s5152_s11 }
   0xf   : > { %v261_v0 = vld [vmem:[%s6557_s14] sm:$0xff] (%p34_p3)   ;;  %v265_v1 = vld [vmem:[%s6557_s14 + $0x8] sm:$0xff] (%p34_p3)   ;;  %v269_v2 = vld [vmem:[%s6557_s14 + $0x10] sm:$0xff] (%p34_p3)  }
  0x10   : > { %262 = vst [vmem:[%s6562_s15] sm:$0xff] (%p34_p3), %v261_v0   ;;  %266 = vst [vmem:[%s6562_s15 + $0x8] sm:$0xff] (%p34_p3), %v265_v1   ;;  %v273_v3 = vld [vmem:[%s6557_s14 + $0x18] sm:$0xff] (%p34_p3)   ;;  %v277_v4 = vld [vmem:[%s6557_s14 + $0x20] sm:$0xff] (%p34_p3)  }
  0x11   : > { %270 = vst [vmem:[%s6562_s15 + $0x10] sm:$0xff] %v269_v2   ;;  %v281_v5 = vld [vmem:[%s6557_s14 + $0x28] sm:$0xff]   ;;  %274 = vst [vmem:[%s6562_s15 + $0x18] sm:$0xff] %v273_v3   ;;  %v285_v6 = vld [vmem:[%s6557_s14 + $0x30] sm:$0xff]  }
  0x12   : > { %278 = vst [vmem:[%s6562_s15 + $0x20] sm:$0xff] %v277_v4   ;;  %282 = vst [vmem:[%s6562_s15 + $0x28] sm:$0xff] %v281_v5   ;;  %v289_v7 = vld [vmem:[%s6557_s14 + $0x38] sm:$0xff]   ;;  %v293_v8 = vld [vmem:[%s6557_s14 + $0x80] sm:$0xff]  }
  0x13   : > { %286 = vst [vmem:[%s6562_s15 + $0x30] sm:$0xff] %v285_v6   ;;  %290 = vst [vmem:[%s6562_s15 + $0x38] sm:$0xff] %v289_v7   ;;  %v297_v9 = vld [vmem:[%s6557_s14 + $0x88] sm:$0xff]   ;;  %v301_v10 = vld [vmem:[%s6557_s14 + $0x90] sm:$0xff]  }
  0x14   : > { %294 = vst [vmem:[%s6562_s15 + $0x40] sm:$0xff] %v293_v8   ;;  %v305_v11 = vld [vmem:[%s6557_s14 + $0x98] sm:$0xff]   ;;  %298 = vst [vmem:[%s6562_s15 + $0x48] sm:$0xff] %v297_v9   ;;  %v309_v12 = vld [vmem:[%s6557_s14 + $0xa0] sm:$0xff]  }
  0x15   : > { %302 = vst [vmem:[%s6562_s15 + $0x50] sm:$0xff] %v301_v10   ;;  %306 = vst [vmem:[%s6562_s15 + $0x58] sm:$0xff] %v305_v11   ;;  %v313_v13 = vld [vmem:[%s6557_s14 + $0xa8] sm:$0xff]   ;;  %v317_v14 = vld [vmem:[%s6557_s14 + $0xb0] sm:$0xff]  }
  0x16   : > { %310 = vst [vmem:[%s6562_s15 + $0x60] sm:$0xff] %v309_v12   ;;  %314 = vst [vmem:[%s6562_s15 + $0x68] sm:$0xff] %v313_v13   ;;  %v321_v15 = vld [vmem:[%s6557_s14 + $0xb8] sm:$0xff]   ;;  %v325_v16 = vld [vmem:[%s6557_s14 + $0x100] sm:$0xff]  }
  0x17   : > { %318 = vst [vmem:[%s6562_s15 + $0x70] sm:$0xff] %v317_v14   ;;  %v329_v17 = vld [vmem:[%s6557_s14 + $0x108] sm:$0xff]   ;;  %322 = vst [vmem:[%s6562_s15 + $0x78] sm:$0xff] %v321_v15   ;;  %v333_v18 = vld [vmem:[%s6557_s14 + $0x110] sm:$0xff]  }
  0x18   : > { %326 = vst [vmem:[%s6562_s15 + $0x80] sm:$0xff] %v325_v16   ;;  %330 = vst [vmem:[%s6562_s15 + $0x88] sm:$0xff] %v329_v17   ;;  %v337_v19 = vld [vmem:[%s6557_s14 + $0x118] sm:$0xff]   ;;  %v341_v20 = vld [vmem:[%s6557_s14 + $0x120] sm:$0xff]  }
  0x19   : > { %334 = vst [vmem:[%s6562_s15 + $0x90] sm:$0xff] %v333_v18   ;;  %338 = vst [vmem:[%s6562_s15 + $0x98] sm:$0xff] %v337_v19   ;;  %v345_v21 = vld [vmem:[%s6557_s14 + $0x128] sm:$0xff]   ;;  %v349_v22 = vld [vmem:[%s6557_s14 + $0x130] sm:$0xff]  }
  0x1a   : > { %342 = vst [vmem:[%s6562_s15 + $0xa0] sm:$0xff] %v341_v20   ;;  %v353_v23 = vld [vmem:[%s6557_s14 + $0x138] sm:$0xff]   ;;  %346 = vst [vmem:[%s6562_s15 + $0xa8] sm:$0xff] %v345_v21   ;;  %v357_v24 = vld [vmem:[%s6557_s14 + $0x180] sm:$0xff]  }
  0x1b   : > { %350 = vst [vmem:[%s6562_s15 + $0xb0] sm:$0xff] %v349_v22   ;;  %354 = vst [vmem:[%s6562_s15 + $0xb8] sm:$0xff] %v353_v23   ;;  %v361_v25 = vld [vmem:[%s6557_s14 + $0x188] sm:$0xff]   ;;  %v365_v26 = vld [vmem:[%s6557_s14 + $0x190] sm:$0xff]  }
  0x1c   : > { %358 = vst [vmem:[%s6562_s15 + $0xc0] sm:$0xff] %v357_v24   ;;  %362 = vst [vmem:[%s6562_s15 + $0xc8] sm:$0xff] %v361_v25   ;;  %v369_v27 = vld [vmem:[%s6557_s14 + $0x198] sm:$0xff]   ;;  %v373_v28 = vld [vmem:[%s6557_s14 + $0x1a0] sm:$0xff]  }
  0x1d   : > { %366 = vst [vmem:[%s6562_s15 + $0xd0] sm:$0xff] %v365_v26   ;;  %v377_v29 = vld [vmem:[%s6557_s14 + $0x1a8] sm:$0xff]   ;;  %370 = vst [vmem:[%s6562_s15 + $0xd8] sm:$0xff] %v369_v27   ;;  %v381_v30 = vld [vmem:[%s6557_s14 + $0x1b0] sm:$0xff]  }
  0x1e   : > { %374 = vst [vmem:[%s6562_s15 + $0xe0] sm:$0xff] %v373_v28   ;;  %378 = vst [vmem:[%s6562_s15 + $0xe8] sm:$0xff] %v377_v29   ;;  %v385_v31 = vld [vmem:[%s6557_s14 + $0x1b8] sm:$0xff]   ;;  %v389_v32 = vld [vmem:[%s6557_s14 + $0x200] sm:$0xff]  }
  0x1f   : > { %382 = vst [vmem:[%s6562_s15 + $0xf0] sm:$0xff] %v381_v30   ;;  %386 = vst [vmem:[%s6562_s15 + $0xf8] sm:$0xff] %v385_v31   ;;  %v393_v33 = vld [vmem:[%s6557_s14 + $0x208] sm:$0xff]   ;;  %v397_v34 = vld [vmem:[%s6557_s14 + $0x210] sm:$0xff]  }
  0x20   : > { %390 = vst [vmem:[%s6562_s15 + $0x100] sm:$0xff] %v389_v32   ;;  %v401_v35 = vld [vmem:[%s6557_s14 + $0x218] sm:$0xff]   ;;  %394 = vst [vmem:[%s6562_s15 + $0x108] sm:$0xff] %v393_v33   ;;  %v405_v36 = vld [vmem:[%s6557_s14 + $0x220] sm:$0xff]  }
  0x21   : > { %398 = vst [vmem:[%s6562_s15 + $0x110] sm:$0xff] %v397_v34   ;;  %402 = vst [vmem:[%s6562_s15 + $0x118] sm:$0xff] %v401_v35   ;;  %v409_v37 = vld [vmem:[%s6557_s14 + $0x228] sm:$0xff]   ;;  %v413_v38 = vld [vmem:[%s6557_s14 + $0x230] sm:$0xff]  }
  0x22   : > { %406 = vst [vmem:[%s6562_s15 + $0x120] sm:$0xff] %v405_v36   ;;  %410 = vst [vmem:[%s6562_s15 + $0x128] sm:$0xff] %v409_v37   ;;  %v417_v39 = vld [vmem:[%s6557_s14 + $0x238] sm:$0xff]   ;;  %v421_v40 = vld [vmem:[%s6557_s14 + $0x280] sm:$0xff]  }
  0x23   : > { %414 = vst [vmem:[%s6562_s15 + $0x130] sm:$0xff] %v413_v38   ;;  %v425_v41 = vld [vmem:[%s6557_s14 + $0x288] sm:$0xff]   ;;  %418 = vst [vmem:[%s6562_s15 + $0x138] sm:$0xff] %v417_v39   ;;  %v429_v42 = vld [vmem:[%s6557_s14 + $0x290] sm:$0xff]  }
  0x24   : > { %422 = vst [vmem:[%s6562_s15 + $0x140] sm:$0xff] %v421_v40   ;;  %426 = vst [vmem:[%s6562_s15 + $0x148] sm:$0xff] %v425_v41   ;;  %v433_v43 = vld [vmem:[%s6557_s14 + $0x298] sm:$0xff]   ;;  %v437_v44 = vld [vmem:[%s6557_s14 + $0x2a0] sm:$0xff]  }
  0x25   : > { %430 = vst [vmem:[%s6562_s15 + $0x150] sm:$0xff] %v429_v42   ;;  %434 = vst [vmem:[%s6562_s15 + $0x158] sm:$0xff] %v433_v43   ;;  %v441_v45 = vld [vmem:[%s6557_s14 + $0x2a8] sm:$0xff]   ;;  %v445_v46 = vld [vmem:[%s6557_s14 + $0x2b0] sm:$0xff]  }
  0x26   : > { %438 = vst [vmem:[%s6562_s15 + $0x160] sm:$0xff] %v437_v44   ;;  %v449_v47 = vld [vmem:[%s6557_s14 + $0x2b8] sm:$0xff]   ;;  %442 = vst [vmem:[%s6562_s15 + $0x168] sm:$0xff] %v441_v45   ;;  %v453_v48 = vld [vmem:[%s6557_s14 + $0x300] sm:$0xff]  }
  0x27   : > { %446 = vst [vmem:[%s6562_s15 + $0x170] sm:$0xff] %v445_v46   ;;  %450 = vst [vmem:[%s6562_s15 + $0x178] sm:$0xff] %v449_v47   ;;  %v457_v49 = vld [vmem:[%s6557_s14 + $0x308] sm:$0xff]   ;;  %v461_v50 = vld [vmem:[%s6557_s14 + $0x310] sm:$0xff]  }
  0x28   : > { %454 = vst [vmem:[%s6562_s15 + $0x180] sm:$0xff] %v453_v48   ;;  %458 = vst [vmem:[%s6562_s15 + $0x188] sm:$0xff] %v457_v49   ;;  %v465_v51 = vld [vmem:[%s6557_s14 + $0x318] sm:$0xff]   ;;  %v469_v52 = vld [vmem:[%s6557_s14 + $0x320] sm:$0xff]  }
  0x29   : > { %462 = vst [vmem:[%s6562_s15 + $0x190] sm:$0xff] %v461_v50   ;;  %v473_v53 = vld [vmem:[%s6557_s14 + $0x328] sm:$0xff]   ;;  %466 = vst [vmem:[%s6562_s15 + $0x198] sm:$0xff] %v465_v51   ;;  %v477_v54 = vld [vmem:[%s6557_s14 + $0x330] sm:$0xff]  }
  0x2a   : > { %470 = vst [vmem:[%s6562_s15 + $0x1a0] sm:$0xff] %v469_v52   ;;  %474 = vst [vmem:[%s6562_s15 + $0x1a8] sm:$0xff] %v473_v53   ;;  %v481_v55 = vld [vmem:[%s6557_s14 + $0x338] sm:$0xff]   ;;  %v485_v56 = vld [vmem:[%s6557_s14 + $0x380] sm:$0xff]  }
  0x2b   : > { %478 = vst [vmem:[%s6562_s15 + $0x1b0] sm:$0xff] %v477_v54   ;;  %482 = vst [vmem:[%s6562_s15 + $0x1b8] sm:$0xff] %v481_v55   ;;  %v489_v57 = vld [vmem:[%s6557_s14 + $0x388] sm:$0xff]   ;;  %v493_v58 = vld [vmem:[%s6557_s14 + $0x390] sm:$0xff]  }
  0x2c   : > { %486 = vst [vmem:[%s6562_s15 + $0x1c0] sm:$0xff] %v485_v56   ;;  %v497_v59 = vld [vmem:[%s6557_s14 + $0x398] sm:$0xff]   ;;  %490 = vst [vmem:[%s6562_s15 + $0x1c8] sm:$0xff] %v489_v57   ;;  %v501_v60 = vld [vmem:[%s6557_s14 + $0x3a0] sm:$0xff]  }
  0x2d   : > { %494 = vst [vmem:[%s6562_s15 + $0x1d0] sm:$0xff] %v493_v58   ;;  %498 = vst [vmem:[%s6562_s15 + $0x1d8] sm:$0xff] %v497_v59   ;;  %v505_v61 = vld [vmem:[%s6557_s14 + $0x3a8] sm:$0xff]   ;;  %v509_v62 = vld [vmem:[%s6557_s14 + $0x3b0] sm:$0xff]  }
  0x2e   : > { %502 = vst [vmem:[%s6562_s15 + $0x1e0] sm:$0xff] %v501_v60   ;;  %506 = vst [vmem:[%s6562_s15 + $0x1e8] sm:$0xff] %v505_v61   ;;  %v513_v63 = vld [vmem:[%s6557_s14 + $0x3b8] sm:$0xff]  }
  0x2f   : > { %510 = vst [vmem:[%s6562_s15 + $0x1f0] sm:$0xff] %v509_v62   ;;  %514 = vst [vmem:[%s6562_s15 + $0x1f8] sm:$0xff] %v513_v63  }
  0x30 PF: > { %p5155_p5 = scmp.ge.s32.totalorder %s6478_s26, 1  ;;  %p813_p6 = scmp.lt.s32.totalorder %s6478_s26, 3 }
  0x32   : > { %p814_p7 = pnand %p5155_p5, %p813_p6 }
  0x34   : > { %817 = sbr.rel (%p814_p7) target bundleno = 817 (0x331), region = 81 }
  0x39   : > { %v6337_v0 = vld [vmem:[%s9055_s4 + $0x8] sm:$0xff]   ;;  %s5157_s18 = sshll.u32 %s5148_s27, 4  ;;  %v6339_v2 = vld [vmem:[%s9055_s4] sm:$0xff]   ;;  %s820_s26 = sand.u32 1, %s6470_s24   ;;  %vm958_vm0 = vcmask 261120  }
  0x3a   : > { %v6338_v1 = vld [vmem:[%s9054_s3 + $0x8] sm:$0xff]   ;;  %p869_p8 = scmp.lt.s32.totalorder %s5157_s18, 31  ;;  %5898 = vmatprep.subr.bf16.mxu0 %v6337_v0  ;;  %v6340_v3 = vld [vmem:[%s9054_s3] sm:$0xff]   ;;  %s5156_s30 = sshll.u32 %s820_s26, 9 }
  0x3b   : > { %6066 = vmatprep.subr.bf16.mxu1 %v6338_v1  ;;  %5899 = vmatpush3.bf16.msra.mxu0 %v6337_v0  ;;  %s6717_s24 = scalar_lea.vmem [#allocation2], %s5156_s30  ;;  %s6480_s15 = smov 96  }
  0x3c   : > { %s9477_s18 = smov (!%p869_p8, %s5157_s18), 31  ;;  %6068 = vmatpush3.bf16.msra.mxu1 %v6338_v1  ;;  %5900 = vmatprep.subr.bf16.mxu0 %v6339_v2  ;;  %v6341_v8 = vld [vmem:[%s6717_s24 + $0xc0] sm:$0xff]   ;;  %v6342_v11 = vld [vmem:[%s6717_s24 + $0xc8] sm:$0xff]   ;;  %v6343_v15 = vld [vmem:[%s6717_s24 + $0xd0] sm:$0xff]   ;;  %s6481_s16 = smov 64  }
  0x3d   : > { %6067 = vmatprep.subr.bf16.mxu1 %v6340_v3  ;;  %s6706_s27 = sshll.u32 %s9477_s18, 3  ;;  %5986 = vmatprep.mubr.msk.bf16.mxu1 %vm958_vm0, %v6341_v8  ;;  %v6344_v21 = vld [vmem:[%s6717_s24 + $0xd8] sm:$0xff]   ;;  %v6345_v23 = vld [vmem:[%s6717_s24 + $0xe0] sm:$0xff]   ;;  %v6346_v29 = vld [vmem:[%s6717_s24 + $0xe8] sm:$0xff]   ;;  %s6482_s29 = smov 32  }
  0x3e   : > { %s6712_s11 = scalar_lea.vmem %s9052_s1, %s6706_s27  ;;  %v6347_v31 = vld [vmem:[%s6717_s24 + $0xf0] sm:$0xff]   ;;  %s6751_s14 = scalar_lea.vmem %s9053_s2, %s6706_s27  ;;  %v6348_v37 = vld [vmem:[%s6717_s24 + $0xf8] sm:$0xff]   ;;  %v6349_v39 = vld [vmem:[%s6717_s24 + $0x100] sm:$0xff]  }
  0x3f   : > { %5901 = vmatpush3.bf16.msra.mxu0 %v6339_v2  ;;  %v894_v4 = vld [vmem:[%s6712_s11] sm:$0xff]  ;;  %v895_v5 = vld [vmem:[%s6712_s11 + $0x8] sm:$0xff]  ;;  %v896_v6 = vld [vmem:[%s6712_s11 + $0x10] sm:$0xff]  ;;  %s7383_s21 = scalar_lea.vmem %s9057_s6, %s6706_s27 }
  0x40   : > { %6069 = vmatpush3.bf16.msra.mxu1 %v6340_v3  ;;  %v926_v7 = vpack.c.bf16 %v895_v5, %v894_v4  ;;  %5934 = vmatprep.subr.bf16.mxu0 %v6338_v1  ;;  %v897_v9 = vld [vmem:[%s6712_s11 + $0x18] sm:$0xff]  ;;  %v898_v12 = vld [vmem:[%s6712_s11 + $0x20] sm:$0xff]  ;;  %v899_v13 = vld [vmem:[%s6712_s11 + $0x28] sm:$0xff] }
  0x41   : > { %v927_v10 = vpack.c.bf16 %v897_v9, %v896_v6  ;;  %v928_v14 = vpack.c.bf16 %v899_v13, %v898_v12  ;;  %v900_v16 = vld [vmem:[%s6712_s11 + $0x30] sm:$0xff]  ;;  %v901_v17 = vld [vmem:[%s6712_s11 + $0x38] sm:$0xff]  ;;  %v902_v18 = vld [vmem:[%s6712_s11 + $0x40] sm:$0xff] }
  0x42   : > { %5902 = vmatprep.mubr.msk.bf16.mxu0 %vm958_vm0, %v926_v7  ;;  %v903_v19 = vld [vmem:[%s6712_s11 + $0x48] sm:$0xff]  ;;  %v929_v20 = vpack.c.bf16 %v901_v17, %v900_v16  ;;  %v904_v24 = vld [vmem:[%s6712_s11 + $0x50] sm:$0xff]  ;;  %v905_v25 = vld [vmem:[%s6712_s11 + $0x58] sm:$0xff] }
  0x43   : > { %5903 = vmatmul.mubr.msk.bf16.vlgmr.msra.gmra.mxu0 %vm958_vm0, %v927_v10  ;;  %5987 = vmatmul.mubr.msk.bf16.vlgmr.msra.gmra.mxu1 %vm958_vm0, %v6342_v11  ;;  %v930_v22 = vpack.c.bf16 %v903_v19, %v902_v18  ;;  %v906_v26 = vld [vmem:[%s6712_s11 + $0x60] sm:$0xff]  ;;  %v907_v27 = vld [vmem:[%s6712_s11 + $0x68] sm:$0xff]  ;;  %v931_v28 = vpack.c.bf16 %v905_v25, %v904_v24  ;;  %v908_v32 = vld [vmem:[%s6712_s11 + $0x70] sm:$0xff] }
  0x44   : > { %5906 = vmatprep.mubr.msk.bf16.mxu0 %vm958_vm0, %v928_v14  ;;  %5990 = vmatprep.mubr.msk.bf16.mxu1 %vm958_vm0, %v6343_v15  ;;  %v932_v30 = vpack.c.bf16 %v907_v27, %v906_v26  ;;  %v909_v33 = vld [vmem:[%s6712_s11 + $0x78] sm:$0xff]  ;;  %v910_v34 = vld [vmem:[%s6751_s14] sm:$0xff]  ;;  %v911_v35 = vld [vmem:[%s6751_s14 + $0x8] sm:$0xff] }
  0x45   : > { %5935 = vmatpush3.bf16.msra.mxu0 %v6338_v1  ;;  %v933_v36 = vpack.c.bf16 %v909_v33, %v908_v32  ;;  %v934_v38 = vpack.c.bf16 %v911_v35, %v910_v34  ;;  %v912_v40 = vld [vmem:[%s6751_s14 + $0x10] sm:$0xff]  ;;  %v913_v41 = vld [vmem:[%s6751_s14 + $0x18] sm:$0xff]  ;;  %v914_v42 = vld [vmem:[%s6751_s14 + $0x20] sm:$0xff] }
  0x46   : > { %5936 = vmatprep.subr.bf16.mxu0 %v6340_v3  ;;  %v915_v43 = vld [vmem:[%s6751_s14 + $0x28] sm:$0xff]  ;;  %v935_v44 = vpack.c.bf16 %v913_v41, %v912_v40  ;;  %v6351_v47 = vld [vmem:[%s6717_s24 + $0x110] sm:$0xff]   ;;  %v917_v49 = vld [vmem:[%s6751_s14 + $0x38] sm:$0xff] }
  0x47   : > { %v6350_v45 = vld [vmem:[%s6717_s24 + $0x108] sm:$0xff]   ;;  %v936_v46 = vpack.c.bf16 %v915_v43, %v914_v42  ;;  %v916_v48 = vld [vmem:[%s6751_s14 + $0x30] sm:$0xff]  ;;  %v918_v50 = vld [vmem:[%s6751_s14 + $0x40] sm:$0xff] }
  0x48   : > { %v919_v51 = vld [vmem:[%s6751_s14 + $0x48] sm:$0xff]  ;;  %v937_v52 = vpack.c.bf16 %v917_v49, %v916_v48  ;;  %v6352_v53 = vld [vmem:[%s6717_s24 + $0x118] sm:$0xff]   ;;  %v6353_v55 = vld [vmem:[%s6717_s24 + $0x120] sm:$0xff]  }
  0x49   : > { %5937 = vmatpush3.bf16.msra.mxu0 %v6340_v3  ;;  %v938_v54 = vpack.c.bf16 %v919_v51, %v918_v50  ;;  %v920_v56 = vld [vmem:[%s6751_s14 + $0x50] sm:$0xff]  ;;  %v921_v57 = vld [vmem:[%s6751_s14 + $0x58] sm:$0xff]  ;;  %v922_v58 = vld [vmem:[%s6751_s14 + $0x60] sm:$0xff] }
  0x4a   : > { %v923_v59 = vld [vmem:[%s6751_s14 + $0x68] sm:$0xff]  ;;  %v939_v60 = vpack.c.bf16 %v921_v57, %v920_v56  ;;  %v6355_v63 = vld [vmem:[%s6717_s24 + $0x130] sm:$0xff]   ;;  %v925_v1 = vld [vmem:[%s6751_s14 + $0x78] sm:$0xff] }
  0x4b   : > { %5907 = vmatmul.mubr.msk.bf16.gmra.mxu0 %vm958_vm0, %v929_v20  ;;  %5991 = vmatmul.mubr.msk.bf16.gmra.mxu1 %vm958_vm0, %v6344_v21  ;;  %v6354_v61 = vld [vmem:[%s6717_s24 + $0x128] sm:$0xff]   ;;  %v940_v62 = vpack.c.bf16 %v923_v59, %v922_v58  ;;  %v924_v0 = vld [vmem:[%s6751_s14 + $0x70] sm:$0xff]  ;;  %v6356_v2 = vld [vmem:[%s6717_s24 + $0x138] sm:$0xff]   ;;  %s8790_s14 = scalar_lea.vmem %s9058_s7, %s6706_s27 }
  0x4c   : > { %5910 = vmatprep.mubr.msk.bf16.mxu0 %vm958_vm0, %v930_v22  ;;  %5994 = vmatprep.mubr.msk.bf16.mxu1 %vm958_vm0, %v6345_v23  ;;  %v941_v3 = vpack.c.bf16 %v925_v1, %v924_v0  ;;  %v6357_v4 = vld [vmem:[%s6717_s24] sm:$0xff]   ;;  %v6359_v6 = vld [vmem:[%s6717_s24 + $0x8] sm:$0xff]   ;;  %v6361_v8 = vld [vmem:[%s6717_s24 + $0x10] sm:$0xff]  }
  0x4d   : > { %v6358_v5 = vld [vmem:[%s6717_s24 + $0x140] sm:$0xff]   ;;  %v6360_v7 = vld [vmem:[%s6717_s24 + $0x148] sm:$0xff]   ;;  %v6362_v9 = vld [vmem:[%s6717_s24 + $0x150] sm:$0xff]  }
  0x4e   : > { %v6363_v10 = vld [vmem:[%s6717_s24 + $0x18] sm:$0xff]   ;;  %v6365_v12 = vld [vmem:[%s6717_s24 + $0x20] sm:$0xff]   ;;  %v6367_v14 = vld [vmem:[%s6717_s24 + $0x28] sm:$0xff]  }
  0x4f   : > { %v6364_v11 = vld [vmem:[%s6717_s24 + $0x158] sm:$0xff]   ;;  %v6366_v13 = vld [vmem:[%s6717_s24 + $0x160] sm:$0xff]   ;;  %v6368_v15 = vld [vmem:[%s6717_s24 + $0x168] sm:$0xff]  }
  0x50   : > { %v6369_v16 = vld [vmem:[%s6717_s24 + $0x30] sm:$0xff]   ;;  %v6371_v18 = vld [vmem:[%s6717_s24 + $0x38] sm:$0xff]   ;;  %v6373_v20 = vld [vmem:[%s6717_s24 + $0x40] sm:$0xff]  }
  0x51   : > { %v6370_v17 = vld [vmem:[%s6717_s24 + $0x170] sm:$0xff]   ;;  %v6372_v19 = vld [vmem:[%s6717_s24 + $0x178] sm:$0xff]   ;;  %v6374_v21 = vld [vmem:[%s6717_s24 + $0x180] sm:$0xff]  }
  0x52   : > { %v6375_v22 = vld [vmem:[%s6717_s24 + $0x48] sm:$0xff]   ;;  %v6377_v24 = vld [vmem:[%s6717_s24 + $0x50] sm:$0xff]   ;;  %v6379_v26 = vld [vmem:[%s6717_s24 + $0x58] sm:$0xff]  }
  0x53   : > { %5911 = vmatmul.mubr.msk.bf16.gmra.mxu0 %vm958_vm0, %v931_v28  ;;  %5995 = vmatmul.mubr.msk.bf16.gmra.mxu1 %vm958_vm0, %v6346_v29  ;;  %v6376_v23 = vld [vmem:[%s6717_s24 + $0x188] sm:$0xff]   ;;  %v6378_v25 = vld [vmem:[%s6717_s24 + $0x190] sm:$0xff]   ;;  %v6380_v27 = vld [vmem:[%s6717_s24 + $0x198] sm:$0xff]  }
  0x54   : > { %5914 = vmatprep.mubr.msk.bf16.mxu0 %vm958_vm0, %v932_v30  ;;  %5998 = vmatprep.mubr.msk.bf16.mxu1 %vm958_vm0, %v6347_v31  ;;  %v6381_v28 = vld [vmem:[%s6717_s24 + $0x60] sm:$0xff]   ;;  %v6383_v30 = vld [vmem:[%s6717_s24 + $0x68] sm:$0xff]   ;;  %v6385_v32 = vld [vmem:[%s6717_s24 + $0x70] sm:$0xff]  }
  0x55   : > { %v6382_v29 = vld [vmem:[%s6717_s24 + $0x1a0] sm:$0xff]   ;;  %v6384_v31 = vld [vmem:[%s6717_s24 + $0x1a8] sm:$0xff]   ;;  %v6386_v33 = vld [vmem:[%s6717_s24 + $0x1b0] sm:$0xff]  }
  0x56   : > { %v6387_v34 = vld [vmem:[%s6717_s24 + $0x78] sm:$0xff]   ;;  %v6393_v40 = vld [vmem:[%s6717_s24 + $0x90] sm:$0xff]  }
  0x57   : > { %v6388_v35 = vld [vmem:[%s6717_s24 + $0x1b8] sm:$0xff]   ;;  %v6394_v41 = vld [vmem:[%s6717_s24 + $0x1d0] sm:$0xff]  }
  0x58   : > { %v6395_v42 = vld [vmem:[%s6717_s24 + $0x98] sm:$0xff]   ;;  %v6401_v48 = vld [vmem:[%s6717_s24 + $0xb0] sm:$0xff]  }
  0x59   : > { %v6396_v43 = vld [vmem:[%s6717_s24 + $0x1d8] sm:$0xff]   ;;  %v6402_v49 = vld [vmem:[%s6717_s24 + $0x1f0] sm:$0xff]  }
  0x5a   : > { %v6403_v50 = vld [vmem:[%s6717_s24 + $0xb8] sm:$0xff]  }
  0x5b   : > { %5915 = vmatmul.mubr.msk.bf16.gmra.mxu0 %vm958_vm0, %v933_v36  ;;  %5999 = vmatmul.mubr.msk.bf16.gmra.mxu1 %vm958_vm0, %v6348_v37  ;;  %v6389_v36 = vld [vmem:[%s6717_s24 + $0x80] sm:$0xff]   ;;  %v6404_v51 = vld [vmem:[%s6717_s24 + $0x1f8] sm:$0xff]  }
  0x5c   : > { %5918 = vmatprep.mubr.msk.bf16.mxu0 %vm958_vm0, %v934_v38  ;;  %6002 = vmatprep.mubr.msk.bf16.mxu1 %vm958_vm0, %v6349_v39  ;;  %v6390_v37 = vld [vmem:[%s6717_s24 + $0x1c0] sm:$0xff]   ;;  %v6391_v38 = vld [vmem:[%s6717_s24 + $0x88] sm:$0xff]  }
  0x5d   : > { %v6392_v39 = vld [vmem:[%s6717_s24 + $0x1c8] sm:$0xff]  }
  0x63   : > { %5919 = vmatmul.mubr.msk.bf16.gmra.mxu0 %vm958_vm0, %v935_v44  ;;  %6003 = vmatmul.mubr.msk.bf16.gmra.mxu1 %vm958_vm0, %v6350_v45  ;;  %v6397_v44 = vld [vmem:[%s6717_s24 + $0xa0] sm:$0xff]  }
  0x64   : > { %5922 = vmatprep.mubr.msk.bf16.mxu0 %vm958_vm0, %v936_v46  ;;  %6006 = vmatprep.mubr.msk.bf16.mxu1 %vm958_vm0, %v6351_v47  ;;  %v6398_v45 = vld [vmem:[%s6717_s24 + $0x1e0] sm:$0xff]   ;;  %v6399_v46 = vld [vmem:[%s6717_s24 + $0xa8] sm:$0xff]  }
  0x65   : > { %v6400_v47 = vld [vmem:[%s6717_s24 + $0x1e8] sm:$0xff]  }
  0x6b   : > { %5923 = vmatmul.mubr.msk.bf16.gmra.mxu0 %vm958_vm0, %v937_v52  ;;  %6007 = vmatmul.mubr.msk.bf16.gmra.mxu1 %vm958_vm0, %v6352_v53 }
  0x6c   : > { %5926 = vmatprep.mubr.msk.bf16.mxu0 %vm958_vm0, %v938_v54  ;;  %6010 = vmatprep.mubr.msk.bf16.mxu1 %vm958_vm0, %v6353_v55 }
  0x73   : > { %5927 = vmatmul.mubr.msk.bf16.gmra.mxu0 %vm958_vm0, %v939_v60  ;;  %6011 = vmatmul.mubr.msk.bf16.gmra.mxu1 %vm958_vm0, %v6354_v61 }
  0x74   : > { %5930 = vmatprep.mubr.msk.bf16.mxu0 %vm958_vm0, %v940_v62  ;;  %6014 = vmatprep.mubr.msk.bf16.mxu1 %vm958_vm0, %v6355_v63 }
  0x7b   : > { %5931 = vmatmul.mubr.msk.bf16.gmra.mxu0 %vm958_vm0, %v941_v3  ;;  %6015 = vmatmul.mubr.msk.bf16.gmra.mxu1 %vm958_vm0, %v6356_v2 }
  0x7c   : > { %5938 = vmatprep.mubr.msk.bf16.mxu0 %vm958_vm0, %v6357_v4  ;;  %6018 = vmatprep.mubr.msk.bf16.mxu1 %vm958_vm0, %v6358_v5 }
  0x83   : > { %5939 = vmatmul.mubr.msk.bf16.vlgmr.msra.gmra.mxu0 %vm958_vm0, %v6359_v6  ;;  %6019 = vmatmul.mubr.msk.bf16.gmra.mxu1 %vm958_vm0, %v6360_v7 }
  0x84   : > { %5942 = vmatprep.mubr.msk.bf16.mxu0 %vm958_vm0, %v6361_v8  ;;  %6022 = vmatprep.mubr.msk.bf16.mxu1 %vm958_vm0, %v6362_v9 }
  0x8b   : > { %5943 = vmatmul.mubr.msk.bf16.gmra.mxu0 %vm958_vm0, %v6363_v10  ;;  %6023 = vmatmul.mubr.msk.bf16.gmra.mxu1 %vm958_vm0, %v6364_v11 }
  0x8c   : > { %5946 = vmatprep.mubr.msk.bf16.mxu0 %vm958_vm0, %v6365_v12  ;;  %6026 = vmatprep.mubr.msk.bf16.mxu1 %vm958_vm0, %v6366_v13 }
  0x93   : > { %5947 = vmatmul.mubr.msk.bf16.gmra.mxu0 %vm958_vm0, %v6367_v14  ;;  %6027 = vmatmul.mubr.msk.bf16.gmra.mxu1 %vm958_vm0, %v6368_v15 }
  0x94   : > { %5950 = vmatprep.mubr.msk.bf16.mxu0 %vm958_vm0, %v6369_v16  ;;  %6030 = vmatprep.mubr.msk.bf16.mxu1 %vm958_vm0, %v6370_v17 }
  0x9b   : > { %5951 = vmatmul.mubr.msk.bf16.gmra.mxu0 %vm958_vm0, %v6371_v18  ;;  %6031 = vmatmul.mubr.msk.bf16.gmra.mxu1 %vm958_vm0, %v6372_v19 }
  0x9c   : > { %5954 = vmatprep.mubr.msk.bf16.mxu0 %vm958_vm0, %v6373_v20  ;;  %6034 = vmatprep.mubr.msk.bf16.mxu1 %vm958_vm0, %v6374_v21 }
  0xa3   : > { %5955 = vmatmul.mubr.msk.bf16.gmra.mxu0 %vm958_vm0, %v6375_v22  ;;  %6035 = vmatmul.mubr.msk.bf16.gmra.mxu1 %vm958_vm0, %v6376_v23 }
  0xa4   : > { %5958 = vmatprep.mubr.msk.bf16.mxu0 %vm958_vm0, %v6377_v24  ;;  %6038 = vmatprep.mubr.msk.bf16.mxu1 %vm958_vm0, %v6378_v25 }
  0xab   : > { %5959 = vmatmul.mubr.msk.bf16.gmra.mxu0 %vm958_vm0, %v6379_v26  ;;  %6039 = vmatmul.mubr.msk.bf16.gmra.mxu1 %vm958_vm0, %v6380_v27 }
  0xac   : > { %5962 = vmatprep.mubr.msk.bf16.mxu0 %vm958_vm0, %v6381_v28  ;;  %6042 = vmatprep.mubr.msk.bf16.mxu1 %vm958_vm0, %v6382_v29 }
  0xb3   : > { %5963 = vmatmul.mubr.msk.bf16.gmra.mxu0 %vm958_vm0, %v6383_v30  ;;  %6043 = vmatmul.mubr.msk.bf16.gmra.mxu1 %vm958_vm0, %v6384_v31 }
  0xb4   : > { %5966 = vmatprep.mubr.msk.bf16.mxu0 %vm958_vm0, %v6385_v32  ;;  %6046 = vmatprep.mubr.msk.bf16.mxu1 %vm958_vm0, %v6386_v33 }
  0xbb   : > { %5967 = vmatmul.mubr.msk.bf16.gmra.mxu0 %vm958_vm0, %v6387_v34  ;;  %6047 = vmatmul.mubr.msk.bf16.gmra.mxu1 %vm958_vm0, %v6388_v35 }
  0xbc   : > { %5970 = vmatprep.mubr.msk.bf16.mxu0 %vm958_vm0, %v6389_v36  ;;  %6050 = vmatprep.mubr.msk.bf16.mxu1 %vm958_vm0, %v6390_v37 }
  0xc3   : > { %5971 = vmatmul.mubr.msk.bf16.gmra.mxu0 %vm958_vm0, %v6391_v38  ;;  %6051 = vmatmul.mubr.msk.bf16.gmra.mxu1 %vm958_vm0, %v6392_v39 }
  0xc4   : > { %5974 = vmatprep.mubr.msk.bf16.mxu0 %vm958_vm0, %v6393_v40  ;;  %6054 = vmatprep.mubr.msk.bf16.mxu1 %vm958_vm0, %v6394_v41 }
  0xcb   : > { %5975 = vmatmul.mubr.msk.bf16.gmra.mxu0 %vm958_vm0, %v6395_v42  ;;  %6055 = vmatmul.mubr.msk.bf16.gmra.mxu1 %vm958_vm0, %v6396_v43 }
  0xcc   : > { %5978 = vmatprep.mubr.msk.bf16.mxu0 %vm958_vm0, %v6397_v44  ;;  %6058 = vmatprep.mubr.msk.bf16.mxu1 %vm958_vm0, %v6398_v45 }
  0xd3   : > { %5979 = vmatmul.mubr.msk.bf16.gmra.mxu0 %vm958_vm0, %v6399_v46  ;;  %6059 = vmatmul.mubr.msk.bf16.gmra.mxu1 %vm958_vm0, %v6400_v47 }
  0xd4   : > { %5982 = vmatprep.mubr.msk.bf16.mxu0 %vm958_vm0, %v6401_v48  ;;  %6062 = vmatprep.mubr.msk.bf16.mxu1 %vm958_vm0, %v6402_v49 }
  0xdb   : > { %5983 = vmatmul.mubr.msk.bf16.gmra.mxu0 %vm958_vm0, %v6403_v50  ;;  %6063 = vmatmul.mubr.msk.bf16.gmra.mxu1 %vm958_vm0, %v6404_v51 }
 0x103   : > { %v6898_v52 = vpop.f32.mrf.mxu0  ;;  %v5988_v53 = vpop.f32.mrf.mxu1 }
 0x104   : > { %v3214_v54 = vadd.f32 %v5988_v53, %v6898_v52 }
 0x105   : > { %v6901_v55 = vpop.f32.mrf.mxu0  ;;  %v2131_v56 = vpop.f32.mrf.mxu1 }
 0x106   : > { %v3212_v57 = vadd.f32 %v2131_v56, %v6901_v55  ;;  %vm3230_vm1 = vcmp.gt.f32.partialorder %v3214_v54, 0.0  ;;  %v3246_v58 = vmul.f32 0.01, %v3214_v54 }
 0x107   : > { %v6904_v59 = vpop.f32.mrf.mxu0  ;;  %v5989_v60 = vpop.f32.mrf.mxu1 }
 0x108   : > { %v3244_v61 = vmul.f32 0.01, %v3212_v57  ;;  %v3215_v62 = vadd.f32 %v5989_v60, %v6904_v59  ;;  %v6907_v63 = vsel %vm3230_vm1, %v3214_v54, %v3246_v58  ;;  %vm3228_vm2 = vcmp.gt.f32.partialorder %v3212_v57, 0.0 }
 0x109   : > { %v6909_v0 = vpop.f32.mrf.mxu0  ;;  %3344 = vrot.lane.b32.xlu0 %v6907_v63, %s6480_s15  ;;  %v2134_v1 = vpop.f32.mrf.mxu1 }
 0x10a   : > { %v3213_v2 = vadd.f32 %v2134_v1, %v6909_v0  ;;  %vm3231_vm3 = vcmp.gt.f32.partialorder %v3215_v62, 0.0  ;;  %v3247_v3 = vmul.f32 0.01, %v3215_v62  ;;  %v6917_v8 = vsel %vm3228_vm2, %v3212_v57, %v3244_v61 }
 0x10b   : > { %v6914_v4 = vpop.f32.mrf.mxu0  ;;  %v5992_v5 = vpop.f32.mrf.mxu1 }
 0x10c   : > { %v3245_v6 = vmul.f32 0.01, %v3213_v2  ;;  %v3218_v7 = vadd.f32 %v5992_v5, %v6914_v4  ;;  %v6919_v9 = vsel %vm3231_vm3, %v3215_v62, %v3247_v3  ;;  %vm3229_vm4 = vcmp.gt.f32.partialorder %v3213_v2, 0.0 }
 0x10d   : > { %v6921_v10 = vpop.f32.mrf.mxu0  ;;  %3340 = vrot.lane.b32.xlu0 %v6917_v8, %s6480_s15  ;;  %3346 = vrot.lane.b32.xlu1 %v6919_v9, %s6480_s15  ;;  %v2147_v11 = vpop.f32.mrf.mxu1 }
 0x10e   : > { %v3250_v12 = vmul.f32 0.01, %v3218_v7  ;;  %v3216_v13 = vadd.f32 %v2147_v11, %v6921_v10  ;;  %vm3234_vm5 = vcmp.gt.f32.partialorder %v3218_v7, 0.0  ;;  %v6931_v18 = vsel %vm3229_vm4, %v3213_v2, %v3245_v6 }
 0x10f   : > { %v6928_v14 = vpop.f32.mrf.mxu0  ;;  %v5993_v15 = vpop.f32.mrf.mxu1 }
 0x110   : > { %v3248_v16 = vmul.f32 0.01, %v3216_v13  ;;  %v3219_v17 = vadd.f32 %v5993_v15, %v6928_v14  ;;  %v6933_v19 = vsel %vm3234_vm5, %v3218_v7, %v3250_v12  ;;  %vm3232_vm6 = vcmp.gt.f32.partialorder %v3216_v13, 0.0 }
 0x111   : > { %v6935_v20 = vpop.f32.mrf.mxu0  ;;  %3342 = vrot.lane.b32.xlu1 %v6931_v18, %s6480_s15  ;;  %3352 = vrot.lane.b32.xlu0 %v6933_v19, %s6480_s15  ;;  %v2150_v21 = vpop.f32.mrf.mxu1 }
 0x112   : > { %v3251_v22 = vmul.f32 0.01, %v3219_v17  ;;  %v3217_v23 = vadd.f32 %v2150_v21, %v6935_v20  ;;  %vm3235_vm7 = vcmp.gt.f32.partialorder %v3219_v17, 0.0  ;;  %v6945_v28 = vsel %vm3232_vm6, %v3216_v13, %v3248_v16 }
 0x113   : > { %v6942_v24 = vpop.f32.mrf.mxu0  ;;  %v5996_v25 = vpop.f32.mrf.mxu1 }
 0x114   : > { %v3249_v26 = vmul.f32 0.01, %v3217_v23  ;;  %v3222_v27 = vadd.f32 %v5996_v25, %v6942_v24  ;;  %v6947_v29 = vsel %vm3235_vm7, %v3219_v17, %v3251_v22  ;;  %vm3233_vm8 = vcmp.gt.f32.partialorder %v3217_v23, 0.0 }
 0x115   : > { %v6949_v30 = vpop.f32.mrf.mxu0  ;;  %3348 = vrot.lane.b32.xlu0 %v6945_v28, %s6480_s15  ;;  %3354 = vrot.lane.b32.xlu1 %v6947_v29, %s6480_s15  ;;  %v2163_v31 = vpop.f32.mrf.mxu1 }
 0x116   : > { %v3254_v32 = vmul.f32 0.01, %v3222_v27  ;;  %v3220_v33 = vadd.f32 %v2163_v31, %v6949_v30  ;;  %vm3238_vm9 = vcmp.gt.f32.partialorder %v3222_v27, 0.0  ;;  %v6959_v38 = vsel %vm3233_vm8, %v3217_v23, %v3249_v26 }
 0x117   : > { %v6956_v34 = vpop.f32.mrf.mxu0  ;;  %v5997_v35 = vpop.f32.mrf.mxu1 }
 0x118   : > { %v3252_v36 = vmul.f32 0.01, %v3220_v33  ;;  %v3223_v37 = vadd.f32 %v5997_v35, %v6956_v34  ;;  %v6961_v39 = vsel %vm3238_vm9, %v3222_v27, %v3254_v32  ;;  %vm3236_vm10 = vcmp.gt.f32.partialorder %v3220_v33, 0.0 }
 0x119   : > { %v6963_v40 = vpop.f32.mrf.mxu0  ;;  %3350 = vrot.lane.b32.xlu1 %v6959_v38, %s6480_s15  ;;  %3360 = vrot.lane.b32.xlu0 %v6961_v39, %s6480_s15  ;;  %v2166_v41 = vpop.f32.mrf.mxu1 }
 0x11a   : > { %v3255_v42 = vmul.f32 0.01, %v3223_v37  ;;  %v3221_v43 = vadd.f32 %v2166_v41, %v6963_v40  ;;  %vm3239_vm11 = vcmp.gt.f32.partialorder %v3223_v37, 0.0  ;;  %v6973_v48 = vsel %vm3236_vm10, %v3220_v33, %v3252_v36 }
 0x11b   : > { %v6970_v44 = vpop.f32.mrf.mxu0  ;;  %v6000_v45 = vpop.f32.mrf.mxu1 }
 0x11c   : > { %9167 = vst [vmem:[#allocation3_spill] sm:$0xff] %v6970_v44  ;;  %v3253_v46 = vmul.f32 0.01, %v3221_v43  ;;  %v3226_v47 = vadd.f32 %v6000_v45, %v6970_v44  ;;  %v6975_v49 = vsel %vm3239_vm11, %v3223_v37, %v3255_v42  ;;  %vm3237_vm12 = vcmp.gt.f32.partialorder %v3221_v43, 0.0 }
 0x11d   : > { %v6977_v50 = vpop.f32.mrf.mxu0  ;;  %3356 = vrot.lane.b32.xlu0 %v6973_v48, %s6480_s15  ;;  %3362 = vrot.lane.b32.xlu1 %v6975_v49, %s6480_s15  ;;  %v2179_v51 = vpop.f32.mrf.mxu1 }
 0x11e   : > { %v3258_v53 = vmul.f32 0.01, %v3226_v47  ;;  %v3224_v54 = vadd.f32 %v2179_v51, %v6977_v50  ;;  %vm3242_vm13 = vcmp.gt.f32.partialorder %v3226_v47, 0.0  ;;  %v6987_v61 = vsel %vm3237_vm12, %v3221_v43, %v3253_v46 }
 0x11f   : > { %v6984_v56 = vpop.f32.mrf.mxu0  ;;  %v6001_v57 = vpop.f32.mrf.mxu1 }
 0x120   : > { %v3256_v58 = vmul.f32 0.01, %v3224_v54  ;;  %v3227_v60 = vadd.f32 %v6001_v57, %v6984_v56  ;;  %v6989_v62 = vsel %vm3242_vm13, %v3226_v47, %v3258_v53  ;;  %vm3240_vm14 = vcmp.gt.f32.partialorder %v3224_v54, 0.0 }
 0x121   : > { %v6991_v1 = vpop.f32.mrf.mxu0  ;;  %3358 = vrot.lane.b32.xlu1 %v6987_v61, %s6480_s15  ;;  %3368 = vrot.lane.b32.xlu0 %v6989_v62, %s6480_s15  ;;  %v2182_v2 = vpop.f32.mrf.mxu1 }
 0x122   : > { %v3259_v6 = vmul.f32 0.01, %v3227_v60  ;;  %v3225_v7 = vadd.f32 %v2182_v2, %v6991_v1  ;;  %v6999_v12 = vsel %vm3240_vm14, %v3224_v54, %v3256_v58  ;;  %vm3243_vm15 = vcmp.gt.f32.partialorder %v3227_v60, 0.0 }
 0x123   : > { %v5920_v3 = vpop.f32.mrf.mxu0  ;;  %v6004_v5 = vpop.f32.mrf.mxu1 }
 0x124   : > { %v3777_v11 = vadd.f32 %v6004_v5, %v6898_v52  ;;  %v3257_v21 = vmul.f32 0.01, %v3225_v7  ;;  %v7004_v23 = vsel %vm3243_vm15, %v3227_v60, %v3259_v6  ;;  %vm3241_vm1 = vcmp.gt.f32.partialorder %v3225_v7, 0.0 }
 0x125   : > { %v1105_v13 = vpop.f32.mrf.mxu0  ;;  %1188 = vrot.lane.b32.xlu1 %v5920_v3, %s6481_s16  ;;  %3364 = vrot.lane.b32.xlu0 %v6999_v12, %s6480_s15  ;;  %v2195_v15 = vpop.f32.mrf.mxu1 }
 0x126   : > { %v3809_v22 = vmul.f32 0.01, %v3777_v11  ;;  %vm3793_vm2 = vcmp.gt.f32.partialorder %v3777_v11, 0.0  ;;  %v3775_v31 = vadd.f32 %v2195_v15, %v6901_v55  ;;  %v7011_v33 = vsel %vm3241_vm1, %v3225_v7, %v3257_v21 }
 0x127   : > { %v5921_v16 = vpop.f32.mrf.mxu0  ;;  %v6005_v17 = vpop.f32.mrf.mxu1 }
 0x128   : > { %v3778_v32 = vadd.f32 %v6005_v17, %v6904_v59  ;;  %v7013_v35 = vsel %vm3793_vm2, %v3777_v11, %v3809_v22  ;;  %v3807_v41 = vmul.f32 0.01, %v3775_v31  ;;  %vm3791_vm3 = vcmp.gt.f32.partialorder %v3775_v31, 0.0 }
 0x129   : > { %v1108_v25 = vpop.f32.mrf.mxu0  ;;  %1184 = vrot.lane.b32.xlu0 %v1105_v13, %s6481_s16  ;;  %3370 = vrot.lane.b32.xlu1 %v7004_v23, %s6480_s15  ;;  %v2198_v26 = vpop.f32.mrf.mxu1  ;;  %9168 = vst [vmem:[#allocation4_spill] sm:$0xff] %v7013_v35 }
 0x12a   : > { %v3810_v42 = vmul.f32 0.01, %v3778_v32  ;;  %v3776_v43 = vadd.f32 %v2198_v26, %v6909_v0  ;;  %vm3794_vm4 = vcmp.gt.f32.partialorder %v3778_v32, 0.0  ;;  %v7022_v53 = vsel %vm3791_vm3, %v3775_v31, %v3807_v41 }
 0x12b   : > { %v5924_v27 = vpop.f32.mrf.mxu0  ;;  %v6008_v36 = vpop.f32.mrf.mxu1  ;;  %9169 = vst [vmem:[#allocation5_spill] sm:$0xff] %v7022_v53 }
 0x12c   : > { %v3808_v47 = vmul.f32 0.01, %v3776_v43  ;;  %v7024_v54 = vsel %vm3794_vm4, %v3778_v32, %v3810_v42  ;;  %vm3792_vm5 = vcmp.gt.f32.partialorder %v3776_v43, 0.0  ;;  %v3781_v58 = vadd.f32 %v6008_v36, %v6914_v4 }
 0x12d   : > { %v1121_v37 = vpop.f32.mrf.mxu0  ;;  %3366 = vrot.lane.b32.xlu1 %v7011_v33, %s6480_s15  ;;  %3907 = vrot.lane.b32.xlu0 %v7013_v35, %s6480_s15  ;;  %v2211_v46 = vpop.f32.mrf.mxu1  ;;  %9170 = vst [vmem:[#allocation6_spill] sm:$0xff] %v7024_v54  ;;  %v7125_v35 = vld [vmem:[%s6717_s24 + $0xc0] sm:$0xff]  }
 0x12e   : > { %v7031_v2 = vsel %vm3792_vm5, %v3776_v43, %v3808_v47  ;;  %v3813_v5 = vmul.f32 0.01, %v3781_v58  ;;  %v3779_v6 = vadd.f32 %v2211_v46, %v6921_v10  ;;  %vm3797_vm6 = vcmp.gt.f32.partialorder %v3781_v58, 0.0 }
 0x12f   : > { %v5925_v45 = vpop.f32.mrf.mxu0  ;;  %v6009_v57 = vpop.f32.mrf.mxu1  ;;  %9171 = vst [vmem:[#allocation7_spill] sm:$0xff] %v7031_v2 }
 0x130   : > { %v3782_v7 = vadd.f32 %v6009_v57, %v6928_v14  ;;  %v3811_v15 = vmul.f32 0.01, %v3779_v6  ;;  %v7041_v22 = vsel %vm3797_vm6, %v3781_v58, %v3813_v5  ;;  %vm3795_vm7 = vcmp.gt.f32.partialorder %v3779_v6, 0.0 }
 0x131   : > { %1190 = vrot.lane.b32.xlu1 %v5921_v16, %s6481_s16  ;;  %1186 = vrot.lane.b32.xlu0 %v1108_v25, %s6481_s16  ;;  %v1124_v51 = vpop.f32.mrf.mxu0  ;;  %v2214_v3 = vpop.f32.mrf.mxu1  ;;  %9172 = vst [vmem:[#allocation8_spill] sm:$0xff] %v7041_v22 }
 0x132   : > { %v3814_v16 = vmul.f32 0.01, %v3782_v7  ;;  %v3780_v17 = vadd.f32 %v2214_v3, %v6935_v20  ;;  %vm3798_vm8 = vcmp.gt.f32.partialorder %v3782_v7, 0.0  ;;  %v7046_v31 = vsel %vm3795_vm7, %v3779_v6, %v3811_v15 }
 0x133   : > { %v5928_v60 = vpop.f32.mrf.mxu0  ;;  %v6012_v13 = vpop.f32.mrf.mxu1  ;;  %9173 = vst [vmem:[#allocation9_spill] sm:$0xff] %v7046_v31 }
 0x134   : > { %v3812_v26 = vmul.f32 0.01, %v3780_v17  ;;  %v7048_v32 = vsel %vm3798_vm8, %v3782_v7, %v3814_v16  ;;  %vm3796_vm9 = vcmp.gt.f32.partialorder %v3780_v17, 0.0 }
 0x135   : > { %3903 = vrot.lane.b32.xlu0 %v7022_v53, %s6480_s15  ;;  %3909 = vrot.lane.b32.xlu1 %v7024_v54, %s6480_s15  ;;  %v1137_v11 = vpop.f32.mrf.mxu0  ;;  %v2227_v25 = vpop.f32.mrf.mxu1  ;;  %9174 = vst [vmem:[#allocation10_spill] sm:$0xff] %v7048_v32 }
 0x136   : > { %v7055_v42 = vsel %vm3796_vm9, %v3780_v17, %v3812_v26  ;;  %v3783_v46 = vadd.f32 %v2227_v25, %v6949_v30 }
 0x137   : > { %v5929_v21 = vpop.f32.mrf.mxu0  ;;  %v6013_v36 = vpop.f32.mrf.mxu1  ;;  %9175 = vst [vmem:[#allocation11_spill] sm:$0xff] %v7055_v42 }
 0x138   : > { %v3786_v47 = vadd.f32 %v6013_v36, %v6956_v34  ;;  %v3815_v58 = vmul.f32 0.01, %v3783_v46  ;;  %vm3799_vm11 = vcmp.gt.f32.partialorder %v3783_v46, 0.0 }
 0x139   : > { %1196 = vrot.lane.b32.xlu0 %v5924_v27, %s6481_s16  ;;  %3905 = vrot.lane.b32.xlu1 %v7031_v2, %s6480_s15  ;;  %v1140_v27 = vpop.f32.mrf.mxu0  ;;  %v2230_v43 = vpop.f32.mrf.mxu1 }
 0x13a   : > { %v3818_v3 = vmul.f32 0.01, %v3786_v47  ;;  %v3784_v5 = vadd.f32 %v2230_v43, %v6963_v40  ;;  %vm3802_vm12 = vcmp.gt.f32.partialorder %v3786_v47, 0.0  ;;  %v7070_v15 = vsel %vm3799_vm11, %v3783_v46, %v3815_v58 }
 0x13b   : > { %v5932_v41 = vpop.f32.mrf.mxu0  ;;  %v6016_v57 = vpop.f32.mrf.mxu1  ;;  %9177 = vst [vmem:[#allocation13_spill] sm:$0xff] %v7070_v15 }
 0x13c   : > { %v7072_v16 = vsel %vm3802_vm12, %v3786_v47, %v3818_v3  ;;  %vm3800_vm13 = vcmp.gt.f32.partialorder %v3784_v5, 0.0 }
 0x13d   : > { %1192 = vrot.lane.b32.xlu0 %v1121_v37, %s6481_s16  ;;  %1198 = vrot.lane.b32.xlu1 %v5925_v45, %s6481_s16  ;;  %v3785_v37 = vadd.f32 %v6012_v13, %v6942_v24  ;;  %v2243_v7 = vpop.f32.mrf.mxu1  ;;  %v3816_v13 = vmul.f32 0.01, %v3784_v5  ;;  %9178 = vst [vmem:[#allocation14_spill] sm:$0xff] %v7072_v16 }
 0x13f   : > { %v3817_v45 = vmul.f32 0.01, %v3785_v37  ;;  %vm3801_vm10 = vcmp.gt.f32.partialorder %v3785_v37, 0.0  ;;  %v6017_v17 = vpop.f32.mrf.mxu1  ;;  %v7079_v26 = vsel %vm3800_vm13, %v3784_v5, %v3816_v13 }
 0x140   : > { %9179 = vst [vmem:[#allocation15_spill] sm:$0xff] %v7079_v26  ;;  %v3790_v43 = vadd.f32 %v6017_v17, %v6984_v56 }
 0x141   : > { %1194 = vrot.lane.b32.xlu1 %v1124_v51, %s6481_s16  ;;  %3915 = vrot.lane.b32.xlu0 %v7041_v22, %s6480_s15  ;;  %v1153_v51 = vpop.f32.mrf.mxu0  ;;  %v7065_v6 = vsel %vm3801_vm10, %v3785_v37, %v3817_v45  ;;  %v3787_v37 = vadd.f32 %v2243_v7, %v6977_v50 }
 0x142   : > { %9176 = vst [vmem:[#allocation12_spill] sm:$0xff] %v7065_v6  ;;  %v3822_v58 = vmul.f32 0.01, %v3790_v43  ;;  %vm3806_vm1 = vcmp.gt.f32.partialorder %v3790_v43, 0.0 }
 0x143   : > { %v3819_v47 = vmul.f32 0.01, %v3787_v37  ;;  %vm3803_vm15 = vcmp.gt.f32.partialorder %v3787_v37, 0.0 }
 0x145   : > { %3911 = vrot.lane.b32.xlu0 %v7046_v31, %s6480_s15  ;;  %3917 = vrot.lane.b32.xlu1 %v7048_v32, %s6480_s15  ;;  %v3276_v32 = vadd.f32 1.0, %v6917_v8  ;;  %v3282_v8 = vadd.f32 1.0, %v6933_v19  ;;  %v7190_v31 = vld [vmem:[%s6717_s24 + $0xf8] sm:$0xff]  }
 0x149   : > { %1204 = vrot.lane.b32.xlu0 %v5928_v60, %s6481_s16  ;;  %3913 = vrot.lane.b32.xlu1 %v7055_v42, %s6480_s15  ;;  %v5933_v60 = vpop.f32.mrf.mxu0 }
 0x14d   : > { %1200 = vrot.lane.b32.xlu0 %v1137_v11, %s6481_s16  ;;  %1206 = vrot.lane.b32.xlu1 %v5929_v21, %s6481_s16  ;;  %v1156_v11 = vpop.f32.mrf.mxu0  ;;  %v3789_v21 = vadd.f32 %v6016_v57, %v6970_v44 }
 0x14f   : > { %v5940_v25 = vpop.f32.mrf.mxu0  ;;  %v3821_v36 = vmul.f32 0.01, %v3789_v21  ;;  %vm3805_vm14 = vcmp.gt.f32.partialorder %v3789_v21, 0.0 }
 0x150   : > { %v2491_v3 = vadd.f32 %v5940_v25, %v6898_v52 }
 0x151   : > { %1202 = vrot.lane.b32.xlu1 %v1140_v27, %s6481_s16  ;;  %3923 = vrot.lane.b32.xlu0 %v7065_v6, %s6480_s15  ;;  %v2246_v27 = vpop.f32.mrf.mxu1  ;;  %v1939_v45 = vpop.f32.mrf.mxu0  ;;  %v7088_v57 = vsel %vm3805_vm14, %v3789_v21, %v3821_v36  ;;  %v7099_v36 = vsel %vm3806_vm1, %v3790_v43, %v3822_v58  ;;  %v7167_v6 = vld [vmem:[%s6717_s24 + $0xe0] sm:$0xff]  }
 0x152   : > { %9180 = vst [vmem:[#allocation16_spill] sm:$0xff] %v7088_v57  ;;  %v2523_v17 = vmul.f32 0.01, %v2491_v3  ;;  %9182 = vst [vmem:[#allocation18_spill] sm:$0xff] %v7099_v36  ;;  %vm2507_vm3 = vcmp.gt.f32.partialorder %v2491_v3, 0.0 }
 0x153   : > { %v6020_v46 = vpop.f32.mrf.mxu1  ;;  %v5941_v5 = vpop.f32.mrf.mxu0 }
 0x154   : > { %v2492_v21 = vadd.f32 %v5941_v5, %v6904_v59  ;;  %v7109_v58 = vsel %vm2507_vm3, %v2491_v3, %v2523_v17  ;;  %v7122_v17 = vld [vmem:[%s6717_s24 + $0xc8] sm:$0xff]  }
 0x155   : > { %3919 = vrot.lane.b32.xlu0 %v7070_v15, %s6480_s15  ;;  %3925 = vrot.lane.b32.xlu1 %v7072_v16, %s6480_s15  ;;  %v2259_v7 = vpop.f32.mrf.mxu1  ;;  %9184 = vst [vmem:[#allocation20_spill] sm:$0xff] %v7109_v58 }
 0x156   : > { %vm2508_vm5 = vcmp.gt.f32.partialorder %v2492_v21, 0.0  ;;  %v4016_v54 = vadd.f32 %v2259_v7, %v6901_v55 }
 0x157   : > { %v6021_v25 = vpop.f32.mrf.mxu1 }
 0x158   : > { %v4048_v7 = vmul.f32 0.01, %v4016_v54  ;;  %vm4032_vm8 = vcmp.gt.f32.partialorder %v4016_v54, 0.0 }
 0x159   : > { %1212 = vrot.lane.b32.xlu0 %v5932_v41, %s6481_s16  ;;  %3921 = vrot.lane.b32.xlu1 %v7079_v26, %s6480_s15  ;;  %v3788_v41 = vadd.f32 %v2246_v27, %v6991_v1  ;;  %v1942_v27 = vpop.f32.mrf.mxu0  ;;  %v2262_v2 = vpop.f32.mrf.mxu1  ;;  %v7146_v26 = vld [vmem:[%s6717_s24 + $0xe8] sm:$0xff]  }
 0x15a   : > { %v2490_v53 = vadd.f32 %v1942_v27, %v6909_v0  ;;  %v7161_v27 = vld [vmem:[%s9056_s5] ss:$0 sm:$0xff] }
 0x15b   : > { %v3820_v13 = vmul.f32 0.01, %v3788_v41  ;;  %vm3804_vm2 = vcmp.gt.f32.partialorder %v3788_v41, 0.0  ;;  %v5944_v5 = vpop.f32.mrf.mxu0 }
 0x15c   : > { %vm2506_vm9 = vcmp.gt.f32.partialorder %v2490_v53, 0.0 }
 0x15d   : > { %1208 = vrot.lane.b32.xlu0 %v1153_v51, %s6481_s16  ;;  %1214 = vrot.lane.b32.xlu1 %v5933_v60, %s6481_s16  ;;  %v4018_v51 = vadd.f32 %v6020_v46, %v6898_v52  ;;  %v7096_v60 = vsel %vm3803_vm15, %v3787_v37, %v3819_v47  ;;  %v2489_v37 = vadd.f32 %v1939_v45, %v6901_v55  ;;  %v2524_v46 = vmul.f32 0.01, %v2492_v21 }
 0x15e   : > { %9181 = vst [vmem:[#allocation17_spill] sm:$0xff] %v7096_v60  ;;  %v4019_v47 = vadd.f32 %v6021_v25, %v6904_v59  ;;  %v7107_v43 = vsel %vm3804_vm2, %v3788_v41, %v3820_v13  ;;  %v1955_v41 = vpop.f32.mrf.mxu0 }
 0x15f   : > { %9183 = vst [vmem:[#allocation19_spill] sm:$0xff] %v7107_v43  ;;  %vm4034_vm4 = vcmp.gt.f32.partialorder %v4018_v51, 0.0  ;;  %v2521_v45 = vmul.f32 0.01, %v2489_v37  ;;  %v7119_v13 = vsel %vm2508_vm5, %v2492_v21, %v2524_v46  ;;  %vm2505_vm6 = vcmp.gt.f32.partialorder %v2489_v37, 0.0  ;;  %v7138_v46 = vld [vmem:[%s6717_s24 + $0xd0] sm:$0xff]  }
 0x160   : > { %v4051_v25 = vmul.f32 0.01, %v4019_v47  ;;  %9186 = vst [vmem:[#allocation22_spill] sm:$0xff] %v7119_v13  ;;  %vm4035_vm7 = vcmp.gt.f32.partialorder %v4019_v47, 0.0  ;;  %v5597_v21 = vunpack.c.l.bf16 %v7122_v17 }
 0x161   : > { %1210 = vrot.lane.b32.xlu1 %v1156_v11, %s6481_s16  ;;  %3931 = vrot.lane.b32.xlu0 %v7088_v57, %s6480_s15  ;;  %v4050_v11 = vmul.f32 0.01, %v4018_v51  ;;  %v2495_v57 = vadd.f32 %v5944_v5, %v6914_v4 }
 0x163   : > { %v7117_v3 = vsel %vm4034_vm4, %v4018_v51, %v4050_v11  ;;  %v4017_v51 = vadd.f32 %v2262_v2, %v6909_v0  ;;  %v7135_v11 = vld [vmem:[%s6717_s24 + $0xd8] sm:$0xff]   ;;  %vm2511_vm11 = vcmp.gt.f32.partialorder %v2495_v57, 0.0 }
 0x164   : > { %9185 = vst [vmem:[#allocation21_spill] sm:$0xff] %v7117_v3 }
 0x165   : > { %3927 = vrot.lane.b32.xlu0 %v7096_v60, %s6480_s15  ;;  %3933 = vrot.lane.b32.xlu1 %v7099_v36, %s6480_s15  ;;  %v2522_v36 = vmul.f32 0.01, %v2490_v53  ;;  %v7141_v60 = vsel %vm2505_vm6, %v2489_v37, %v2521_v45  ;;  %v3278_v37 = vadd.f32 1.0, %v6907_v63  ;;  %v2527_v63 = vmul.f32 0.01, %v2495_v57 }
 0x166   : > { %9187 = vst [vmem:[#allocation23_spill] sm:$0xff] %v7141_v60  ;;  %vm4033_vm10 = vcmp.gt.f32.partialorder %v4017_v51, 0.0 }
 0x167   : > { %v7174_v42 = vsel %vm2506_vm9, %v2490_v53, %v2522_v36  ;;  %v3292_v53 = vmul.f32 %v7161_v27, %v3276_v32  ;;  %v3298_v32 = vmul.f32 %v7161_v27, %v3282_v8  ;;  %vm1232_vm9 = vcmask 130048  }
 0x168   : > { %9190 = vst [vmem:[#allocation26_spill] sm:$0xff] %v7174_v42 }
 0x169   : > { %3929 = vrot.lane.b32.xlu1 %v7107_v43, %s6480_s15  ;;  %2621 = vrot.lane.b32.xlu0 %v7109_v58, %s6480_s15  ;;  %v6024_v58 = vpop.f32.mrf.mxu1  ;;  %v5945_v43 = vpop.f32.mrf.mxu0 }
 0x16a   : > { %v4022_v15 = vadd.f32 %v6024_v58, %v6914_v4  ;;  %v3279_v58 = vadd.f32 1.0, %v6919_v9 }
 0x16b   : > { %v2275_v16 = vpop.f32.mrf.mxu1  ;;  %v1958_v45 = vpop.f32.mrf.mxu0 }
 0x16c   : > { %v4054_v9 = vmul.f32 0.01, %v4022_v15  ;;  %v3295_v36 = vmul.f32 %v7161_v27, %v3279_v58  ;;  %vm4038_vm12 = vcmp.gt.f32.partialorder %v4022_v15, 0.0  ;;  %v4020_v58 = vadd.f32 %v2275_v16, %v6921_v10 }
 0x16d   : > { %4148 = vrot.lane.b32.xlu0 %v7117_v3, %s6480_s15  ;;  %2623 = vrot.lane.b32.xlu1 %v7119_v13, %s6480_s15  ;;  %v7143_v13 = vsel %vm4035_vm7, %v4019_v47, %v4051_v25  ;;  %v2496_v47 = vadd.f32 %v5945_v43, %v6928_v14  ;;  %v7171_v25 = vsel %vm4032_vm8, %v4016_v54, %v4048_v7  ;;  %v6025_v2 = vpop.f32.mrf.mxu1  ;;  %v3277_v43 = vadd.f32 1.0, %v6931_v18 }
 0x16e   : > { %9188 = vst [vmem:[#allocation24_spill] sm:$0xff] %v7143_v13  ;;  %9189 = vst [vmem:[#allocation25_spill] sm:$0xff] %v7171_v25  ;;  %v3294_v54 = vmul.f32 %v7161_v27, %v3278_v37  ;;  %v2493_v7 = vadd.f32 %v1955_v41, %v6921_v10  ;;  %v4023_v22 = vadd.f32 %v6025_v2, %v6928_v14  ;;  %v3283_v2 = vadd.f32 1.0, %v6947_v29 }
 0x16f   : > { %v7195_v18 = vsel %vm2511_vm11, %v2495_v57, %v2527_v63  ;;  %v2278_v19 = vpop.f32.mrf.mxu1  ;;  %vm2512_vm13 = vcmp.gt.f32.partialorder %v2496_v47, 0.0  ;;  %v3293_v41 = vmul.f32 %v7161_v27, %v3277_v43  ;;  %v7212_v3 = vsel %vm4038_vm12, %v4022_v15, %v4054_v9 }
 0x170   : > { %9192 = vst [vmem:[#allocation28_spill] sm:$0xff] %v7195_v18  ;;  %v2525_v63 = vmul.f32 0.01, %v2493_v7  ;;  %9193 = vst [vmem:[#allocation29_spill] sm:$0xff] %v7212_v3  ;;  %v9195_v29 = vunpack.c.l.bf16 %v7125_v35  ;;  %vm2509_vm14 = vcmp.gt.f32.partialorder %v2493_v7, 0.0  ;;  %vm4039_vm15 = vcmp.gt.f32.partialorder %v4023_v22, 0.0 }
 0x171   : > { %2617 = vrot.lane.b32.xlu0 %v7141_v60, %s6480_s15  ;;  %4150 = vrot.lane.b32.xlu1 %v7143_v13, %s6480_s15  ;;  %v4049_v60 = vmul.f32 0.01, %v4017_v51  ;;  %v3299_v9 = vmul.f32 %v7161_v27, %v3283_v2  ;;  %v4052_v57 = vmul.f32 0.01, %v4020_v58  ;;  %vm4036_vm1 = vcmp.gt.f32.partialorder %v4020_v58, 0.0 }
 0x172   : > { %v3308_v16 = vadd.f32 %v9195_v29, %v3292_v53 }
 0x173   : > { %v7193_v37 = vsel %vm4033_vm10, %v4017_v51, %v4049_v60  ;;  %v3280_v60 = vadd.f32 1.0, %v6945_v28  ;;  %v3310_v51 = vadd.f32 %v5597_v21, %v3294_v54  ;;  %v6028_v28 = vpop.f32.mrf.mxu1  ;;  %v9196_v21 = vunpack.c.h.bf16 %v7122_v17 }
 0x174   : > { %9191 = vst [vmem:[#allocation27_spill] sm:$0xff] %v7193_v37  ;;  %v9198_v17 = vunpack.c.l.bf16 %v7135_v11 }
 0x175   : > { %4144 = vrot.lane.b32.xlu0 %v7171_v25, %s6480_s15  ;;  %2619 = vrot.lane.b32.xlu1 %v7174_v42, %s6480_s15  ;;  %v2528_v42 = vmul.f32 0.01, %v2496_v47  ;;  %v5948_v25 = vpop.f32.mrf.mxu0  ;;  %v3311_v54 = vadd.f32 %v9196_v21, %v3295_v36  ;;  %v3296_v15 = vmul.f32 %v7161_v27, %v3280_v60 }
 0x176   : > { %v3314_v36 = vadd.f32 %v9198_v17, %v3298_v32  ;;  %v7244_v32 = vld [vmem:[%s6712_s11 + $0x10] sm:$0xff] }
 0x177   : > { %v7210_v13 = vpop.f32.mrf.mxu0  ;;  %v7214_v43 = vsel %vm2512_vm13, %v2496_v47, %v2528_v42  ;;  %v3281_v42 = vadd.f32 1.0, %v6959_v38  ;;  %v7232_v38 = vsel %vm2509_vm14, %v2493_v7, %v2525_v63  ;;  %v7248_v7 = vld [vmem:[%s6712_s11 + $0x18] sm:$0xff]  ;;  %v4026_v63 = vadd.f32 %v6028_v28, %v6942_v24 }
 0x178   : > { %9194 = vst [vmem:[#allocation30_spill] sm:$0xff] %v7214_v43  ;;  %9199 = vst [vmem:[#allocation31_spill] sm:$0xff] %v7232_v38 }
 0x179   : > { %4146 = vrot.lane.b32.xlu1 %v7193_v37, %s6480_s15  ;;  %2629 = vrot.lane.b32.xlu0 %v7195_v18, %s6480_s15  ;;  %v4055_v37 = vmul.f32 0.01, %v4023_v22  ;;  %v2494_v18 = vadd.f32 %v1958_v45, %v6935_v20  ;;  %v9197_v45 = vunpack.c.h.bf16 %v7125_v35  ;;  %v5949_v60 = vpop.f32.mrf.mxu0  ;;  %v3286_v35 = vadd.f32 1.0, %v6961_v39 }
 0x17a   : > { %vm4042_vm6 = vcmp.gt.f32.partialorder %v4026_v63, 0.0 }
 0x17b   : > { %v3345_v5 = vpop.permute.xlu0 %3344  ;;  %v3309_v8 = vadd.f32 %v9197_v45, %v3293_v41  ;;  %v2526_v29 = vmul.f32 0.01, %v2494_v18  ;;  %v2499_v41 = vadd.f32 %v5948_v25, %v6942_v24  ;;  %vm2510_vm2 = vcmp.gt.f32.partialorder %v2494_v18, 0.0 }
 0x17c   : > { %v3390_v47 = vadd.f32 %v3345_v5, %v3310_v51  ;;  %v7234_v5 = vsel %vm4039_vm15, %v4023_v22, %v4055_v37  ;;  %v2291_v51 = vpop.f32.mrf.mxu1  ;;  %v9201_v25 = vunpack.c.l.bf16 %v7138_v46 }
 0x17d   : > { %4156 = vrot.lane.b32.xlu0 %v7212_v3, %s6480_s15  ;;  %2631 = vrot.lane.b32.xlu1 %v7214_v43, %s6480_s15  ;;  %v4021_v43 = vadd.f32 %v2278_v19, %v6935_v20  ;;  %9200 = vst [vmem:[#allocation32_spill] sm:$0xff] %v7234_v5  ;;  %v3297_v19 = vmul.f32 %v7161_v27, %v3281_v42  ;;  %v1974_v42 = vpop.f32.mrf.mxu0  ;;  %v2531_v28 = vmul.f32 0.01, %v2499_v41  ;;  %vm2515_vm4 = vcmp.gt.f32.partialorder %v2499_v41, 0.0 }
 0x17e   : > { %v3406_v22 = vsub.f32 %v3390_v47, %v7244_v32  ;;  %v3312_v37 = vadd.f32 %v9201_v25, %v3296_v15  ;;  %v3302_v15 = vmul.f32 %v7161_v27, %v3286_v35  ;;  %v6029_v25 = vpop.f32.mrf.mxu1 }
 0x17f   : > { %v3341_v3 = vpop.permute.xlu0 %3340  ;;  %v3347_v53 = vpop.permute.xlu1 %3346  ;;  %v4053_v2 = vmul.f32 0.01, %v4021_v43  ;;  %vm4037_vm3 = vcmp.gt.f32.partialorder %v4021_v43, 0.0 }
 0x180   : > { %v3391_v21 = vadd.f32 %v3347_v53, %v3311_v54  ;;  %v2500_v54 = vadd.f32 %v5949_v60, %v6956_v34  ;;  %v3388_v45 = vadd.f32 %v3341_v3, %v3308_v16  ;;  %v9203_v3 = vunpack.c.h.bf16 %v7135_v11  ;;  %v7275_v60 = vld [vmem:[%s6712_s11] sm:$0xff] }
 0x181   : > { %2625 = vrot.lane.b32.xlu0 %v7232_v38, %s6480_s15  ;;  %4158 = vrot.lane.b32.xlu1 %v7234_v5, %s6480_s15  ;;  %v7258_v5 = vsel %vm4036_vm1, %v4020_v58, %v4052_v57  ;;  %v3284_v57 = vadd.f32 1.0, %v6973_v48  ;;  %v3287_v58 = vadd.f32 1.0, %v6975_v49  ;;  %v2497_v48 = vadd.f32 %v7210_v13, %v6949_v30 }
 0x182   : > { %v3407_v39 = vsub.f32 %v3391_v21, %v7248_v7  ;;  %v7261_v21 = vsel %vm2510_vm2, %v2494_v18, %v2526_v29  ;;  %v3315_v16 = vadd.f32 %v9203_v3, %v3299_v9  ;;  %v9204_v18 = vunpack.c.h.bf16 %v7138_v46 }
 0x183   : > { %v3343_v53 = vpop.permute.xlu1 %3342  ;;  %v3353_v17 = vpop.permute.xlu0 %3352  ;;  %9202 = vst [vmem:[#allocation33_spill] sm:$0xff] %v7261_v21  ;;  %v4058_v29 = vmul.f32 0.01, %v4026_v63  ;;  %v3404_v35 = vsub.f32 %v3388_v45, %v7275_v60  ;;  %v2532_v49 = vmul.f32 0.01, %v2500_v54  ;;  %v4027_v46 = vadd.f32 %v6029_v25, %v6956_v34 }
 0x184   : > { %v7255_v38 = vpack.i.bf16 %v3407_v39, %v3406_v22  ;;  %v3389_v47 = vadd.f32 %v3343_v53, %v3309_v8  ;;  %v3313_v8 = vadd.f32 %v9204_v18, %v3297_v19  ;;  %v7279_v22 = vld [vmem:[%s6712_s11 + $0x8] sm:$0xff]  ;;  %v3394_v11 = vadd.f32 %v3353_v17, %v3314_v36  ;;  %v5952_v19 = vpop.f32.mrf.mxu0 }
 0x185   : > { %4152 = vrot.lane.b32.xlu0 %v7258_v5, %s6480_s15  ;;  %2627 = vrot.lane.b32.xlu1 %v7261_v21, %s6480_s15  ;;  %v7286_v3 = vsel %vm4037_vm3, %v4021_v43, %v4053_v2  ;;  %v7293_v36 = vsel %vm2515_vm4, %v2499_v41, %v2531_v28  ;;  %vm2516_vm5 = vcmp.gt.f32.partialorder %v2500_v54, 0.0  ;;  %v3300_v13 = vmul.f32 %v7161_v27, %v3284_v57  ;;  %v7304_v2 = vld [vmem:[%s6712_s11 + $0x30] sm:$0xff]  ;;  %v7308_v28 = vld [vmem:[%s6712_s11 + $0x38] sm:$0xff] }
 0x186   : > { %v3405_v39 = vsub.f32 %v3389_v47, %v7279_v22  ;;  %9205 = vst [vmem:[#allocation34_spill] sm:$0xff] %v7293_v36  ;;  %v3303_v17 = vmul.f32 %v7161_v27, %v3287_v58  ;;  %v3285_v47 = vadd.f32 1.0, %v6987_v61  ;;  %v7301_v43 = vadd.f32 %v2291_v51, %v6949_v30 }
 0x187   : > { %v3349_v9 = vpop.permute.xlu0 %3348  ;;  %v3355_v53 = vpop.permute.xlu1 %3354  ;;  %v3410_v25 = vsub.f32 %v3394_v11, %v7304_v2  ;;  %v2498_v61 = vadd.f32 %v1974_v42, %v6963_v40  ;;  %v2529_v11 = vmul.f32 0.01, %v2497_v48  ;;  %vm4043_vm7 = vcmp.gt.f32.partialorder %v4027_v46, 0.0 }
 0x188   : > { %v7288_v45 = vpack.i.bf16 %v3405_v39, %v3404_v35  ;;  %v3395_v18 = vadd.f32 %v3355_v53, %v3315_v16  ;;  %v3392_v41 = vadd.f32 %v3349_v9, %v3312_v37  ;;  %v4059_v35 = vmul.f32 0.01, %v4027_v46  ;;  %v2294_v39 = vpop.f32.mrf.mxu1  ;;  %v7312_v53 = vpop.f32.mrf.mxu0 }
 0x189   : > { %4154 = vrot.lane.b32.xlu1 %v7286_v3, %s6480_s15  ;;  %2637 = vrot.lane.b32.xlu0 %v7293_v36, %s6480_s15  ;;  %v7315_v36 = vsel %vm2516_vm5, %v2500_v54, %v2532_v49  ;;  %v7320_v9 = vsel %vm4042_vm6, %v4026_v63, %v4058_v29  ;;  %v3301_v42 = vmul.f32 %v7161_v27, %v3285_v47  ;;  %vm2513_vm8 = vcmp.gt.f32.partialorder %v2497_v48, 0.0  ;;  %v7335_v29 = vld [vmem:[%s6712_s11 + $0x28] sm:$0xff] }
 0x18a   : > { %v3411_v16 = vsub.f32 %v3395_v18, %v7308_v28  ;;  %9206 = vst [vmem:[#allocation35_spill] sm:$0xff] %v7315_v36  ;;  %9208 = vst [vmem:[#allocation37_spill] sm:$0xff] %v7320_v9  ;;  %v9209_v18 = vunpack.c.l.bf16 %v7146_v26  ;;  %v4025_v54 = vadd.f32 %v2294_v39, %v6963_v40  ;;  %v7342_v39 = vsel %vm4043_vm7, %v4027_v46, %v4059_v35 }
 0x18b   : > { %v3351_v57 = vpop.permute.xlu1 %3350  ;;  %v3361_v58 = vpop.permute.xlu0 %3360  ;;  %vm2514_vm10 = vcmp.gt.f32.partialorder %v2498_v61, 0.0  ;;  %vm4040_vm11 = vcmp.gt.f32.partialorder %v7301_v43, 0.0 }
 0x18c   : > { %v3393_v51 = vadd.f32 %v3351_v57, %v3313_v8  ;;  %v7317_v37 = vpack.i.bf16 %v3411_v16, %v3410_v25  ;;  %v3318_v21 = vadd.f32 %v9209_v18, %v3302_v15  ;;  %v7331_v8 = vld [vmem:[%s6712_s11 + $0x20] sm:$0xff]  ;;  %v9210_v16 = vunpack.c.h.bf16 %v7146_v26 }
 0x18d   : > { %2639 = vrot.lane.b32.xlu1 %v7315_v36, %s6480_s15  ;;  %4164 = vrot.lane.b32.xlu0 %v7320_v9, %s6480_s15  ;;  %v3408_v63 = vsub.f32 %v3392_v41, %v7331_v8  ;;  %v4056_v57 = vmul.f32 0.01, %v7301_v43  ;;  %v2530_v18 = vmul.f32 0.01, %v2498_v61  ;;  %v5953_v36 = vpop.f32.mrf.mxu0  ;;  %v2503_v9 = vadd.f32 %v5952_v19, %v6970_v44 }
 0x18e   : > { %9207 = vst [vmem:[#allocation36_spill] sm:$0xff] %v7317_v37  ;;  %v3409_v49 = vsub.f32 %v3393_v51, %v7335_v29  ;;  %v3319_v15 = vadd.f32 %v9210_v16, %v3303_v17  ;;  %v3398_v37 = vadd.f32 %v3361_v58, %v3318_v21  ;;  %v7348_v51 = vsel %vm2513_vm8, %v2497_v48, %v2529_v11  ;;  %v6032_v17 = vpop.f32.mrf.mxu1  ;;  %v7363_v16 = vld [vmem:[%s6712_s11 + $0x50] sm:$0xff] }
 0x18f   : > { %v3357_v25 = vpop.permute.xlu0 %3356  ;;  %v3363_v47 = vpop.permute.xlu1 %3362  ;;  %9211 = vst [vmem:[#allocation38_spill] sm:$0xff] %v7348_v51  ;;  %v3290_v26 = vadd.f32 1.0, %v6989_v62  ;;  %v9212_v21 = vunpack.c.l.bf16 %v7167_v6  ;;  %v3291_v48 = vadd.f32 1.0, %v7004_v23  ;;  %v4057_v19 = vmul.f32 0.01, %v4025_v54 }
 0x190   : > { %v7345_v41 = vpack.i.bf16 %v3409_v49, %v3408_v63  ;;  %v3399_v58 = vadd.f32 %v3363_v47, %v3319_v15  ;;  %v2504_v35 = vadd.f32 %v5953_v36, %v6984_v56  ;;  %v9213_v63 = vunpack.c.h.bf16 %v7167_v6  ;;  %v7367_v15 = vld [vmem:[%s6712_s11 + $0x58] sm:$0xff] }
 0x191   : > { %4166 = vrot.lane.b32.xlu1 %v7342_v39, %s6480_s15  ;;  %v3316_v46 = vadd.f32 %v9212_v21, %v3300_v13  ;;  %2633 = vrot.lane.b32.xlu0 %v7348_v51, %s6480_s15  ;;  %v3414_v13 = vsub.f32 %v3398_v37, %v7363_v16  ;;  %v7371_v23 = vsel %vm2514_vm10, %v2498_v61, %v2530_v18  ;;  %v2535_v51 = vmul.f32 0.01, %v2503_v9 }
 0x192   : > { %v3317_v62 = vadd.f32 %v9213_v63, %v3301_v42  ;;  %v3415_v21 = vsub.f32 %v3399_v58, %v7367_v15  ;;  %9214 = vst [vmem:[#allocation39_spill] sm:$0xff] %v7371_v23  ;;  %v4030_v36 = vadd.f32 %v6032_v17, %v6970_v44  ;;  %v7375_v6 = vsel %vm4040_vm11, %v7301_v43, %v4056_v57  ;;  %v7394_v58 = vld [vmem:[%s6712_s11 + $0x40] sm:$0xff]  ;;  %v7398_v63 = vld [vmem:[%s6712_s11 + $0x48] sm:$0xff] }
 0x193   : > { %v3359_v11 = vpop.permute.xlu1 %3358  ;;  %v3369_v49 = vpop.permute.xlu0 %3368  ;;  %v3396_v47 = vadd.f32 %v3357_v25, %v3316_v46  ;;  %vm4041_vm12 = vcmp.gt.f32.partialorder %v4025_v54, 0.0  ;;  %v3306_v61 = vmul.f32 %v7161_v27, %v3290_v26  ;;  %vm2519_vm13 = vcmp.gt.f32.partialorder %v2503_v9, 0.0  ;;  %9215 = vst [vmem:[#allocation40_spill] sm:$0xff] %v7394_v58  ;;  %9216 = vst [vmem:[#allocation41_spill] sm:$0xff] %v7398_v63 }
 0x194   : > { %v7386_v37 = vpack.i.bf16 %v3415_v21, %v3414_v13  ;;  %v3397_v42 = vadd.f32 %v3359_v11, %v3317_v62  ;;  %v3288_v43 = vadd.f32 1.0, %v6999_v12  ;;  %v3307_v25 = vmul.f32 %v7161_v27, %v3291_v48  ;;  %v5780_v62 = vld [vmem:[%s6717_s24 + $0xf0] sm:$0xff]   ;;  %v2307_v21 = vpop.f32.mrf.mxu1 }
 0x195   : > { %2635 = vrot.lane.b32.xlu1 %v7371_v23, %s6480_s15  ;;  %4160 = vrot.lane.b32.xlu0 %v7375_v6, %s6480_s15  ;;  %v5622_v17 = vunpack.c.h.bf16 %v7190_v31  ;;  %v2536_v46 = vmul.f32 0.01, %v2504_v35  ;;  %v3412_v26 = vsub.f32 %v3396_v47, %v7394_v58  ;;  %v7405_v12 = vsel %vm4041_vm12, %v4025_v54, %v4057_v19 }
 0x196   : > { %v3413_v11 = vsub.f32 %v3397_v42, %v7398_v63  ;;  %v3289_v48 = vadd.f32 1.0, %v7011_v33  ;;  %v4062_v13 = vmul.f32 0.01, %v4030_v36  ;;  %v7411_v47 = vsel %vm2519_vm13, %v2503_v9, %v2535_v51 }
 0x197   : > { %v1189_v57 = vpop.permute.xlu1 %1188  ;;  %v3365_v18 = vpop.permute.xlu0 %3364  ;;  %9217 = vst [vmem:[#allocation42_spill] sm:$0xff] %v7411_v47  ;;  %vm2520_vm14 = vcmp.gt.f32.partialorder %v2504_v35, 0.0  ;;  %v9219_v42 = vunpack.c.l.bf16 %v7190_v31  ;;  %vm4046_vm15 = vcmp.gt.f32.partialorder %v4030_v36, 0.0  ;;  %v3304_v33 = vmul.f32 %v7161_v27, %v3288_v43 }
 0x198   : > { %1235 = vst.msk [vmem:[%s7383_s21 + $0x10] sm:$0xff] %vm1232_vm9, %v1189_v57  ;;  %v7413_v23 = vpack.i.bf16 %v3413_v11, %v3412_v26  ;;  %v5617_v54 = vunpack.c.l.bf16 %v5780_v62  ;;  %v2501_v58 = vadd.f32 %v7312_v53, %v6977_v50  ;;  %v3323_v51 = vadd.f32 %v5622_v17, %v3307_v25  ;;  %v1990_v11 = vpop.f32.mrf.mxu0 }
 0x199   : > { %4162 = vrot.lane.b32.xlu1 %v7405_v12, %s6480_s15  ;;  %v3322_v57 = vadd.f32 %v9219_v42, %v3306_v61  ;;  %2645 = vrot.lane.b32.xlu0 %v7411_v47, %s6480_s15  ;;  %v7424_v26 = vsel %vm2520_vm14, %v2504_v35, %v2536_v46  ;;  %v3305_v31 = vmul.f32 %v7161_v27, %v3289_v48  ;;  %v6033_v61 = vpop.f32.mrf.mxu1  ;;  %v5618_v43 = vunpack.c.h.bf16 %v5780_v62  ;;  %v6417_v46 = vld [vmem:[%s6712_s11 + $0x70] sm:$0xff] }
 0x19a   : > { %9218 = vst [vmem:[#allocation43_spill] sm:$0xff] %v7413_v23  ;;  %9220 = vst [vmem:[#allocation44_spill] sm:$0xff] %v7424_v26  ;;  %v7427_v42 = vsel %vm4046_vm15, %v4030_v36, %v4062_v13  ;;  %v3320_v53 = vadd.f32 %v5617_v54, %v3304_v33  ;;  %v2533_v35 = vmul.f32 0.01, %v2501_v58  ;;  %v4031_v17 = vadd.f32 %v6033_v61, %v6984_v56  ;;  %v6418_v36 = vld [vmem:[%s6712_s11 + $0x78] sm:$0xff] }
 0x19b   : > { %v1185_v19 = vpop.permute.xlu0 %1184  ;;  %v3371_v63 = vpop.permute.xlu1 %3370  ;;  %v3402_v9 = vadd.f32 %v3369_v49, %v3322_v57  ;;  %v3321_v62 = vadd.f32 %v5618_v43, %v3305_v31  ;;  %vm2517_vm1 = vcmp.gt.f32.partialorder %v2501_v58, 0.0  ;;  %v4028_v33 = vadd.f32 %v2307_v21, %v6977_v50  ;;  %v6419_v31 = vld [vmem:[%s6712_s11 + $0x60] sm:$0xff] }
 0x19c   : > { %1233 = vst.msk [vmem:[%s7383_s21] sm:$0xff] %vm1232_vm9, %v1185_v19  ;;  %v3403_v47 = vadd.f32 %v3371_v63, %v3323_v51  ;;  %v2310_v57 = vpop.f32.mrf.mxu1  ;;  %v5956_v19 = vpop.f32.mrf.mxu0  ;;  %v3400_v63 = vadd.f32 %v3365_v18, %v3320_v53  ;;  %v6420_v53 = vld [vmem:[%s6712_s11 + $0x68] sm:$0xff]  ;;  %vm4047_vm2 = vcmp.gt.f32.partialorder %v4031_v17, 0.0 }
 0x19d   : > { %2647 = vrot.lane.b32.xlu1 %v7424_v26, %s6480_s15  ;;  %4172 = vrot.lane.b32.xlu0 %v7427_v42, %s6480_s15  ;;  %v3418_v48 = vsub.f32 %v3402_v9, %v6417_v46  ;;  %v2502_v9 = vadd.f32 %v1990_v11, %v6991_v1  ;;  %v7442_v46 = vsel %vm2517_vm1, %v2501_v58, %v2533_v35  ;;  %vm4044_vm3 = vcmp.gt.f32.partialorder %v4028_v33, 0.0 }
 0x19e   : > { %v3419_v13 = vsub.f32 %v3403_v47, %v6418_v36  ;;  %9223 = vst [vmem:[#allocation47_spill] sm:$0xff] %v7442_v46  ;;  %v6036_v18 = vpop.f32.mrf.mxu1  ;;  %v2003_v47 = vpop.f32.mrf.mxu0  ;;  %v3416_v43 = vsub.f32 %v3400_v63, %v6419_v31  ;;  %v4029_v35 = vadd.f32 %v2310_v57, %v6991_v1 }
 0x19f   : > { %v3367_v49 = vpop.permute.xlu1 %3366  ;;  %v7433_v25 = vpop.permute.xlu0 %3907  ;;  %v2534_v11 = vmul.f32 0.01, %v2502_v9  ;;  %vm2518_vm4 = vcmp.gt.f32.partialorder %v2502_v9, 0.0 }
 0x1a0   : > { %9221 = vst [vmem:[#allocation45_spill] sm:$0xff] %v7433_v25  ;;  %v7439_v54 = vpack.i.bf16 %v3419_v13, %v3418_v48  ;;  %v3401_v51 = vadd.f32 %v3367_v49, %v3321_v62  ;;  %v4063_v25 = vmul.f32 0.01, %v4031_v17  ;;  %v4060_v49 = vmul.f32 0.01, %v4028_v33  ;;  %v2323_v63 = vpop.f32.mrf.mxu1  ;;  %v5957_v62 = vpop.f32.mrf.mxu0 }
 0x1a1   : > { %2641 = vrot.lane.b32.xlu0 %v7442_v46, %s6480_s15  ;;  %v2732_v48 = vadd.f32 %v5956_v19, %v6898_v52  ;;  %vm4045_vm6 = vcmp.gt.f32.partialorder %v4029_v35, 0.0 }
 0x1a2   : > { %9222 = vst [vmem:[#allocation46_spill] sm:$0xff] %v7439_v54  ;;  %v3417_v21 = vsub.f32 %v3401_v51, %v6420_v53  ;;  %v7460_v13 = vsel %vm4047_vm2, %v4031_v17, %v4063_v25  ;;  %v4259_v51 = vadd.f32 %v6036_v18, %v6898_v52  ;;  %v4061_v25 = vmul.f32 0.01, %v4029_v35  ;;  %v6037_v53 = vpop.f32.mrf.mxu1  ;;  %v2006_v18 = vpop.f32.mrf.mxu0 }
 0x1a3   : > { %v1191_v26 = vpop.permute.xlu1 %1190  ;;  %v1187_v61 = vpop.permute.xlu0 %1186  ;;  %4174 = vrot.lane.b32.xlu1 %v7460_v13, %s6480_s15  ;;  %v2764_v19 = vmul.f32 0.01, %v2732_v48  ;;  %v2733_v17 = vadd.f32 %v5957_v62, %v6904_v59  ;;  %vm2748_vm5 = vcmp.gt.f32.partialorder %v2732_v48, 0.0 }
 0x1a4   : > { %1236 = vst.msk [vmem:[%s7383_s21 + $0x18] sm:$0xff] %vm1232_vm9, %v1191_v26  ;;  %1234 = vst.msk [vmem:[%s7383_s21 + $0x8] sm:$0xff] %vm1232_vm9, %v1187_v61  ;;  %v7453_v36 = vpack.i.bf16 %v3417_v21, %v3416_v43  ;;  %v7465_v61 = vsel %vm4044_vm3, %v4028_v33, %v4060_v49  ;;  %v7472_v43 = vsel %vm2518_vm4, %v2502_v9, %v2534_v11  ;;  %v4291_v33 = vmul.f32 0.01, %v4259_v51 }
 0x1a5   : > { %9227 = vst [vmem:[#allocation51_spill] sm:$0xff] %v7465_v61  ;;  %4168 = vrot.lane.b32.xlu0 %v7465_v61, %s6480_s15  ;;  %9229 = vst [vmem:[#allocation53_spill] sm:$0xff] %v7472_v43  ;;  %v2730_v21 = vadd.f32 %v2003_v47, %v6901_v55  ;;  %v7479_v49 = vsel %vm2748_vm5, %v2732_v48, %v2764_v19  ;;  %vm4275_vm7 = vcmp.gt.f32.partialorder %v4259_v51, 0.0  ;;  %v2765_v62 = vmul.f32 0.01, %v2733_v17  ;;  %v5960_v47 = vpop.f32.mrf.mxu0 }
 0x1a6   : > { %9224 = vst [vmem:[#allocation48_spill] sm:$0xff] %v7453_v36  ;;  %9230 = vst [vmem:[#allocation54_spill] sm:$0xff] %v7479_v49  ;;  %v7484_v46 = vsel %vm4045_vm6, %v4029_v35, %v4061_v25  ;;  %vm2749_vm8 = vcmp.gt.f32.partialorder %v2733_v17, 0.0  ;;  %v4257_v19 = vadd.f32 %v2323_v63, %v6901_v55 }
 0x1a7   : > { %v7455_v58 = vpop.permute.xlu0 %3903  ;;  %v7457_v26 = vpop.permute.xlu1 %3909  ;;  %2643 = vrot.lane.b32.xlu1 %v7472_v43, %s6480_s15  ;;  %9231 = vst [vmem:[#allocation55_spill] sm:$0xff] %v7484_v46  ;;  %v2762_v48 = vmul.f32 0.01, %v2730_v21  ;;  %vm2746_vm10 = vcmp.gt.f32.partialorder %v2730_v21, 0.0 }
 0x1a8   : > { %9225 = vst [vmem:[#allocation49_spill] sm:$0xff] %v7455_v58  ;;  %9226 = vst [vmem:[#allocation50_spill] sm:$0xff] %v7457_v26  ;;  %v2326_v43 = vpop.f32.mrf.mxu1  ;;  %v2019_v58 = vpop.f32.mrf.mxu0  ;;  %v4289_v63 = vmul.f32 0.01, %v4257_v19  ;;  %vm4273_vm12 = vcmp.gt.f32.partialorder %v4257_v19, 0.0 }
 0x1a9   : > { %2862 = vrot.lane.b32.xlu0 %v7479_v49, %s6480_s15 }
 0x1aa   : > { %v6040_v26 = vpop.f32.mrf.mxu1  ;;  %v5961_v54 = vpop.f32.mrf.mxu0 }
 0x1ab   : > { %v1197_v31 = vpop.permute.xlu0 %1196  ;;  %v7469_v57 = vpop.permute.xlu1 %3905  ;;  %4170 = vrot.lane.b32.xlu1 %v7484_v46, %s6480_s15  ;;  %v9273_v46 = vld [vmem:[#allocation27_spill] sm:$0xff] }
 0x1ac   : > { %9228 = vst [vmem:[#allocation52_spill] sm:$0xff] %v7469_v57  ;;  %1239 = vst.msk [vmem:[%s7383_s21 + $0x30] sm:$0xff] %vm1232_vm9, %v1197_v31  ;;  %v4260_v31 = vadd.f32 %v6037_v53, %v6904_v59  ;;  %v7493_v57 = vsel %vm4275_vm7, %v4259_v51, %v4291_v33  ;;  %v2736_v51 = vadd.f32 %v5960_v47, %v6914_v4  ;;  %v2339_v36 = vpop.f32.mrf.mxu1 }
 0x1ad   : > { %9232 = vst [vmem:[#allocation56_spill] sm:$0xff] %v7493_v57  ;;  %4389 = vrot.lane.b32.xlu0 %v7493_v57, %s6480_s15  ;;  %v7507_v33 = vsel %vm2746_vm10, %v2730_v21, %v2762_v48  ;;  %v4263_v47 = vadd.f32 %v6040_v26, %v6914_v4  ;;  %v7521_v48 = vsel %vm4273_vm12, %v4257_v19, %v4289_v63  ;;  %v2022_v26 = vpop.f32.mrf.mxu0 }
 0x1ae   : > { %v4292_v53 = vmul.f32 0.01, %v4260_v31  ;;  %vm4276_vm11 = vcmp.gt.f32.partialorder %v4260_v31, 0.0  ;;  %9235 = vst [vmem:[#allocation59_spill] sm:$0xff] %v7507_v33  ;;  %v2768_v21 = vmul.f32 0.01, %v2736_v51  ;;  %v2734_v63 = vadd.f32 %v2019_v58, %v6921_v10 }
 0x1af   : > { %v1193_v9 = vpop.permute.xlu0 %1192  ;;  %v1199_v11 = vpop.permute.xlu1 %1198  ;;  %9239 = vst [vmem:[#allocation63_spill] sm:$0xff] %v7521_v48  ;;  %vm2752_vm14 = vcmp.gt.f32.partialorder %v2736_v51, 0.0  ;;  %v4295_v19 = vmul.f32 0.01, %v4263_v47  ;;  %vm4279_vm1 = vcmp.gt.f32.partialorder %v4263_v47, 0.0 }
 0x1b0   : > { %1237 = vst.msk [vmem:[%s7383_s21 + $0x20] sm:$0xff] %vm1232_vm9, %v1193_v9  ;;  %1240 = vst.msk [vmem:[%s7383_s21 + $0x38] sm:$0xff] %vm1232_vm9, %v1199_v11  ;;  %v2731_v9 = vadd.f32 %v2006_v18, %v6909_v0  ;;  %v7500_v11 = vsel %vm2749_vm8, %v2733_v17, %v2765_v62  ;;  %v4258_v62 = vadd.f32 %v2326_v43, %v6909_v0  ;;  %v5964_v58 = vpop.f32.mrf.mxu0  ;;  %vm2750_vm3 = vcmp.gt.f32.partialorder %v2734_v63, 0.0 }
 0x1b1   : > { %9234 = vst [vmem:[#allocation58_spill] sm:$0xff] %v7500_v11  ;;  %2864 = vrot.lane.b32.xlu1 %v7500_v11, %s6480_s15  ;;  %2858 = vrot.lane.b32.xlu0 %v7507_v33, %s6480_s15  ;;  %v6041_v33 = vpop.f32.mrf.mxu1 }
 0x1b2   : > { %vm2747_vm13 = vcmp.gt.f32.partialorder %v2731_v9, 0.0  ;;  %vm4274_vm15 = vcmp.gt.f32.partialorder %v4258_v62, 0.0 }
 0x1b3   : > { %v1195_v35 = vpop.permute.xlu1 %1194  ;;  %v7497_v25 = vpop.permute.xlu0 %3915 }
 0x1b4   : > { %9233 = vst [vmem:[#allocation57_spill] sm:$0xff] %v7497_v25  ;;  %1238 = vst.msk [vmem:[%s7383_s21 + $0x28] sm:$0xff] %vm1232_vm9, %v1195_v35  ;;  %v2763_v35 = vmul.f32 0.01, %v2731_v9  ;;  %v7516_v25 = vsel %vm4276_vm11, %v4260_v31, %v4292_v53  ;;  %v4290_v31 = vmul.f32 0.01, %v4258_v62  ;;  %v2737_v53 = vadd.f32 %v5961_v54, %v6928_v14 }
 0x1b5   : > { %9238 = vst [vmem:[#allocation62_spill] sm:$0xff] %v7516_v25  ;;  %4391 = vrot.lane.b32.xlu1 %v7516_v25, %s6480_s15  ;;  %4385 = vrot.lane.b32.xlu0 %v7521_v48, %s6480_s15  ;;  %v7535_v48 = vsel %vm2752_vm14, %v2736_v51, %v2768_v21  ;;  %v4261_v51 = vadd.f32 %v2339_v36, %v6921_v10  ;;  %v2766_v21 = vmul.f32 0.01, %v2734_v63  ;;  %v2035_v25 = vpop.f32.mrf.mxu0 }
 0x1b6   : > { %9242 = vst [vmem:[#allocation66_spill] sm:$0xff] %v7535_v48  ;;  %vm2753_vm2 = vcmp.gt.f32.partialorder %v2737_v53, 0.0 }
 0x1b7   : > { %v7511_v18 = vpop.permute.xlu0 %3911  ;;  %v7513_v17 = vpop.permute.xlu1 %3917  ;;  %v4293_v36 = vmul.f32 0.01, %v4261_v51  ;;  %vm4277_vm5 = vcmp.gt.f32.partialorder %v4261_v51, 0.0 }
 0x1b8   : > { %9236 = vst [vmem:[#allocation60_spill] sm:$0xff] %v7511_v18  ;;  %9237 = vst [vmem:[#allocation61_spill] sm:$0xff] %v7513_v17  ;;  %v7528_v18 = vsel %vm2747_vm13, %v2731_v9, %v2763_v35  ;;  %v2769_v35 = vmul.f32 0.01, %v2737_v53 }
 0x1b9   : > { %9241 = vst [vmem:[#allocation65_spill] sm:$0xff] %v7528_v18  ;;  %2860 = vrot.lane.b32.xlu1 %v7528_v18, %s6480_s15  ;;  %2870 = vrot.lane.b32.xlu0 %v7535_v48, %s6480_s15  ;;  %v2342_v18 = vpop.f32.mrf.mxu1  ;;  %v7549_v48 = vsel %vm4279_vm1, %v4263_v47, %v4295_v19  ;;  %v2740_v47 = vadd.f32 %v5964_v58, %v6942_v24 }
 0x1ba   : > { %9244 = vst [vmem:[#allocation68_spill] sm:$0xff] %v7549_v48  ;;  %v7563_v19 = vsel %vm2750_vm3, %v2734_v63, %v2766_v21  ;;  %v7577_v21 = vsel %vm4277_vm5, %v4261_v51, %v4293_v36  ;;  %v2738_v51 = vadd.f32 %v2035_v25, %v6949_v30 }
 0x1bb   : > { %v1205_v43 = vpop.permute.xlu0 %1204  ;;  %v7525_v17 = vpop.permute.xlu1 %3913  ;;  %9247 = vst [vmem:[#allocation71_spill] sm:$0xff] %v7563_v19  ;;  %v2772_v63 = vmul.f32 0.01, %v2740_v47  ;;  %9251 = vst [vmem:[#allocation75_spill] sm:$0xff] %v7577_v21  ;;  %vm2756_vm7 = vcmp.gt.f32.partialorder %v2740_v47, 0.0 }
 0x1bc   : > { %9240 = vst [vmem:[#allocation64_spill] sm:$0xff] %v7525_v17  ;;  %1243 = vst.msk [vmem:[%s7383_s21 + $0x50] sm:$0xff] %vm1232_vm9, %v1205_v43  ;;  %v4264_v43 = vadd.f32 %v6041_v33, %v6928_v14  ;;  %v7540_v17 = vsel %vm4274_vm15, %v4258_v62, %v4290_v31  ;;  %vm2754_vm12 = vcmp.gt.f32.partialorder %v2738_v51, 0.0 }
 0x1bd   : > { %9243 = vst [vmem:[#allocation67_spill] sm:$0xff] %v7540_v17  ;;  %4387 = vrot.lane.b32.xlu1 %v7540_v17, %s6480_s15  ;;  %4397 = vrot.lane.b32.xlu0 %v7549_v48, %s6480_s15  ;;  %v6044_v17 = vpop.f32.mrf.mxu1 }
 0x1be   : > { %v4296_v31 = vmul.f32 0.01, %v4264_v43  ;;  %vm4280_vm4 = vcmp.gt.f32.partialorder %v4264_v43, 0.0  ;;  %v4267_v58 = vadd.f32 %v6044_v17, %v6942_v24 }
 0x1bf   : > { %v1201_v54 = vpop.permute.xlu0 %1200  ;;  %v1207_v9 = vpop.permute.xlu1 %1206 }
 0x1c0   : > { %1241 = vst.msk [vmem:[%s7383_s21 + $0x40] sm:$0xff] %vm1232_vm9, %v1201_v54  ;;  %1244 = vst.msk [vmem:[%s7383_s21 + $0x58] sm:$0xff] %vm1232_vm9, %v1207_v9  ;;  %v2735_v54 = vadd.f32 %v2022_v26, %v6935_v20  ;;  %v7556_v9 = vsel %vm2753_vm2, %v2737_v53, %v2769_v35  ;;  %v4262_v35 = vadd.f32 %v2342_v18, %v6935_v20  ;;  %v2355_v48 = vpop.f32.mrf.mxu1  ;;  %v4299_v17 = vmul.f32 0.01, %v4267_v58 }
 0x1c1   : > { %9246 = vst [vmem:[#allocation70_spill] sm:$0xff] %v7556_v9  ;;  %2872 = vrot.lane.b32.xlu1 %v7556_v9, %s6480_s15  ;;  %2866 = vrot.lane.b32.xlu0 %v7563_v19, %s6480_s15  ;;  %v5965_v9 = vpop.f32.mrf.mxu0  ;;  %vm4283_vm10 = vcmp.gt.f32.partialorder %v4267_v58, 0.0  ;;  %v4265_v25 = vadd.f32 %v2355_v48, %v6949_v30 }
 0x1c2   : > { %vm2751_vm6 = vcmp.gt.f32.partialorder %v2735_v54, 0.0  ;;  %v6045_v19 = vpop.f32.mrf.mxu1  ;;  %vm4278_vm8 = vcmp.gt.f32.partialorder %v4262_v35, 0.0 }
 0x1c3   : > { %v1203_v33 = vpop.permute.xlu1 %1202  ;;  %v7553_v62 = vpop.permute.xlu0 %3923  ;;  %v4297_v48 = vmul.f32 0.01, %v4265_v25  ;;  %vm4281_vm14 = vcmp.gt.f32.partialorder %v4265_v25, 0.0 }
 0x1c4   : > { %9245 = vst [vmem:[#allocation69_spill] sm:$0xff] %v7553_v62  ;;  %1242 = vst.msk [vmem:[%s7383_s21 + $0x48] sm:$0xff] %vm1232_vm9, %v1203_v33  ;;  %v2767_v33 = vmul.f32 0.01, %v2735_v54  ;;  %v7572_v62 = vsel %vm4280_vm4, %v4264_v43, %v4296_v31  ;;  %v4294_v43 = vmul.f32 0.01, %v4262_v35  ;;  %v2741_v31 = vadd.f32 %v5965_v9, %v6956_v34  ;;  %v2038_v36 = vpop.f32.mrf.mxu0 }
 0x1c5   : > { %9250 = vst [vmem:[#allocation74_spill] sm:$0xff] %v7572_v62  ;;  %4399 = vrot.lane.b32.xlu1 %v7572_v62, %s6480_s15  ;;  %4393 = vrot.lane.b32.xlu0 %v7577_v21, %s6480_s15  ;;  %v7591_v21 = vsel %vm2756_vm7, %v2740_v47, %v2772_v63  ;;  %v2770_v47 = vmul.f32 0.01, %v2738_v51  ;;  %v2358_v63 = vpop.f32.mrf.mxu1  ;;  %v9264_v62 = vld [vmem:[#allocation24_spill] sm:$0xff] }
 0x1c6   : > { %9254 = vst [vmem:[#allocation78_spill] sm:$0xff] %v7591_v21  ;;  %vm2757_vm11 = vcmp.gt.f32.partialorder %v2741_v31, 0.0 }
 0x1c7   : > { %v7567_v26 = vpop.permute.xlu0 %3919  ;;  %v7569_v53 = vpop.permute.xlu1 %3925 }
 0x1c8   : > { %9248 = vst [vmem:[#allocation72_spill] sm:$0xff] %v7567_v26  ;;  %9249 = vst [vmem:[#allocation73_spill] sm:$0xff] %v7569_v53  ;;  %v7584_v26 = vsel %vm2751_vm6, %v2735_v54, %v2767_v33  ;;  %v2773_v33 = vmul.f32 0.01, %v2741_v31 }
 0x1c9   : > { %9253 = vst [vmem:[#allocation77_spill] sm:$0xff] %v7584_v26  ;;  %2868 = vrot.lane.b32.xlu1 %v7584_v26, %s6480_s15  ;;  %2878 = vrot.lane.b32.xlu0 %v7591_v21, %s6480_s15  ;;  %v5968_v21 = vpop.f32.mrf.mxu0  ;;  %v7605_v26 = vsel %vm4283_vm10, %v4267_v58, %v4299_v17  ;;  %v6048_v17 = vpop.f32.mrf.mxu1 }
 0x1ca   : > { %9256 = vst [vmem:[#allocation80_spill] sm:$0xff] %v7605_v26  ;;  %v2744_v58 = vadd.f32 %v5968_v21, %v6970_v44  ;;  %v4083_v21 = vadd.f32 1.0, %v9264_v62 }
 0x1cb   : > { %v1213_v18 = vpop.permute.xlu0 %1212  ;;  %v7581_v53 = vpop.permute.xlu1 %3921 }
 0x1cc   : > { %9252 = vst [vmem:[#allocation76_spill] sm:$0xff] %v7581_v53  ;;  %1247 = vst.msk [vmem:[%s7383_s21 + $0x70] sm:$0xff] %vm1232_vm9, %v1213_v18  ;;  %v4268_v18 = vadd.f32 %v6045_v19, %v6956_v34  ;;  %v7596_v53 = vsel %vm4278_vm8, %v4262_v35, %v4294_v43  ;;  %v2371_v57 = vpop.f32.mrf.mxu1  ;;  %vm2760_vm15 = vcmp.gt.f32.partialorder %v2744_v58, 0.0 }
 0x1cd   : > { %9255 = vst [vmem:[#allocation79_spill] sm:$0xff] %v7596_v53  ;;  %4395 = vrot.lane.b32.xlu1 %v7596_v53, %s6480_s15  ;;  %4405 = vrot.lane.b32.xlu0 %v7605_v26, %s6480_s15  ;;  %v7619_v26 = vsel %vm2754_vm12, %v2738_v51, %v2770_v47  ;;  %v2051_v51 = vpop.f32.mrf.mxu0  ;;  %v5791_v47 = vld [vmem:[%s6717_s24 + $0x148] sm:$0xff]  }
 0x1ce   : > { %v4300_v43 = vmul.f32 0.01, %v4268_v18  ;;  %vm4284_vm13 = vcmp.gt.f32.partialorder %v4268_v18, 0.0  ;;  %9259 = vst [vmem:[#allocation83_spill] sm:$0xff] %v7619_v26 }
 0x1cf   : > { %v1209_v54 = vpop.permute.xlu0 %1208  ;;  %v1215_v9 = vpop.permute.xlu1 %1214 }
 0x1d0   : > { %1245 = vst.msk [vmem:[%s7383_s21 + $0x60] sm:$0xff] %vm1232_vm9, %v1209_v54  ;;  %1248 = vst.msk [vmem:[%s7383_s21 + $0x78] sm:$0xff] %vm1232_vm9, %v1215_v9  ;;  %v2739_v54 = vadd.f32 %v2038_v36, %v6963_v40  ;;  %v7612_v9 = vsel %vm2757_vm11, %v2741_v31, %v2773_v33  ;;  %v9262_v33 = vld [vmem:[#allocation21_spill] sm:$0xff]  ;;  %v7629_v53 = vsel %vm4284_vm13, %v4268_v18, %v4300_v43  ;;  %v5969_v11 = vpop.f32.mrf.mxu0 }
 0x1d1   : > { %9258 = vst [vmem:[#allocation82_spill] sm:$0xff] %v7612_v9  ;;  %2880 = vrot.lane.b32.xlu1 %v7612_v9, %s6480_s15  ;;  %2874 = vrot.lane.b32.xlu0 %v7619_v26, %s6480_s15  ;;  %9263 = vst [vmem:[#allocation21_spill] sm:$0xff] %v7629_v53  ;;  %v2776_v26 = vmul.f32 0.01, %v2744_v58  ;;  %v2745_v49 = vadd.f32 %v5969_v11, %v6984_v56 }
 0x1d2   : > { %v2771_v9 = vmul.f32 0.01, %v2739_v54  ;;  %v2054_v23 = vpop.f32.mrf.mxu0 }
 0x1d3   : > { %v1211_v19 = vpop.permute.xlu1 %1210  ;;  %v7609_v35 = vpop.permute.xlu0 %3931  ;;  %vm2761_vm4 = vcmp.gt.f32.partialorder %v2745_v49, 0.0 }
 0x1d4   : > { %9257 = vst [vmem:[#allocation81_spill] sm:$0xff] %v7609_v35  ;;  %1246 = vst.msk [vmem:[%s7383_s21 + $0x68] sm:$0xff] %vm1232_vm9, %v1211_v19  ;;  %v4082_v19 = vadd.f32 1.0, %v9262_v33  ;;  %v4266_v35 = vadd.f32 %v2358_v63, %v6963_v40  ;;  %vm2755_vm9 = vcmp.gt.f32.partialorder %v2739_v54, 0.0 }
 0x1d5   : > { %4407 = vrot.lane.b32.xlu1 %v7629_v53, %s6480_s15  ;;  %v7646_v33 = vsel %vm2755_vm9, %v2739_v54, %v2771_v9  ;;  %v5661_v53 = vunpack.c.l.bf16 %v5791_v47 }
 0x1d6   : > { %v4098_v63 = vmul.f32 %v7161_v27, %v4082_v19  ;;  %v4298_v43 = vmul.f32 0.01, %v4266_v35  ;;  %9268 = vst [vmem:[#allocation88_spill] sm:$0xff] %v7646_v33  ;;  %vm4282_vm1 = vcmp.gt.f32.partialorder %v4266_v35, 0.0  ;;  %v9271_v19 = vld [vmem:[#allocation25_spill] sm:$0xff] }
 0x1d7   : > { %v7623_v36 = vpop.permute.xlu0 %3927  ;;  %v7625_v31 = vpop.permute.xlu1 %3933 }
 0x1d8   : > { %9260 = vst [vmem:[#allocation84_spill] sm:$0xff] %v7623_v36  ;;  %9261 = vst [vmem:[#allocation85_spill] sm:$0xff] %v7625_v31  ;;  %v4271_v36 = vadd.f32 %v6048_v17, %v6970_v44  ;;  %v7637_v31 = vsel %vm4281_vm14, %v4265_v25, %v4297_v48  ;;  %v4099_v17 = vmul.f32 %v7161_v27, %v4083_v21  ;;  %v4080_v21 = vadd.f32 1.0, %v9271_v19 }
 0x1d9   : > { %9265 = vst [vmem:[#allocation24_spill] sm:$0xff] %v7637_v31  ;;  %4401 = vrot.lane.b32.xlu0 %v7637_v31, %s6480_s15  ;;  %2876 = vrot.lane.b32.xlu1 %v7646_v33, %s6480_s15  ;;  %v2742_v48 = vadd.f32 %v2051_v51, %v6977_v50  ;;  %v7652_v31 = vsel %vm2760_vm15, %v2744_v58, %v2776_v26  ;;  %v4081_v51 = vadd.f32 1.0, %v9273_v46  ;;  %v5790_v58 = vld [vmem:[%s6717_s24 + $0x140] sm:$0xff]  }
 0x1da   : > { %v4303_v25 = vmul.f32 0.01, %v4271_v36  ;;  %9269 = vst [vmem:[#allocation89_spill] sm:$0xff] %v7652_v31  ;;  %vm4287_vm2 = vcmp.gt.f32.partialorder %v4271_v36, 0.0  ;;  %v7660_v33 = vsel %vm4282_vm1, %v4266_v35, %v4298_v43  ;;  %v4114_v44 = vadd.f32 %v5661_v53, %v4098_v63 }
 0x1db   : > { %v7641_v18 = vpop.permute.xlu1 %3929  ;;  %v7643_v62 = vpop.permute.xlu0 %2621  ;;  %9272 = vst [vmem:[#allocation25_spill] sm:$0xff] %v7660_v33  ;;  %v4269_v26 = vadd.f32 %v2371_v57, %v6977_v50  ;;  %vm2758_vm3 = vcmp.gt.f32.partialorder %v2742_v48, 0.0  ;;  %v4096_v53 = vmul.f32 %v7161_v27, %v4080_v21  ;;  %v2777_v35 = vmul.f32 0.01, %v2745_v49  ;;  %v9275_v21 = vld [vmem:[#allocation29_spill] sm:$0xff] }
 0x1dc   : > { %9266 = vst [vmem:[#allocation86_spill] sm:$0xff] %v7641_v18  ;;  %9267 = vst [vmem:[#allocation87_spill] sm:$0xff] %v7643_v62  ;;  %v6049_v18 = vpop.f32.mrf.mxu1  ;;  %v5662_v62 = vunpack.c.h.bf16 %v5791_v47  ;;  %v2774_v47 = vmul.f32 0.01, %v2742_v48  ;;  %v7667_v61 = vsel %vm4287_vm2, %v4271_v36, %v4303_v25  ;;  %v5657_v43 = vunpack.c.l.bf16 %v5790_v58 }
 0x1dd   : > { %2886 = vrot.lane.b32.xlu0 %v7652_v31, %s6480_s15  ;;  %4403 = vrot.lane.b32.xlu1 %v7660_v33, %s6480_s15  ;;  %v4272_v11 = vadd.f32 %v6049_v18, %v6984_v56  ;;  %v4097_v33 = vmul.f32 %v7161_v27, %v4081_v51  ;;  %v4301_v36 = vmul.f32 0.01, %v4269_v26  ;;  %vm4285_vm5 = vcmp.gt.f32.partialorder %v4269_v26, 0.0 }
 0x1de   : > { %v2374_v31 = vpop.f32.mrf.mxu1  ;;  %v4115_v19 = vadd.f32 %v5662_v62, %v4099_v17  ;;  %v7680_v17 = vsel %vm2758_vm3, %v2742_v48, %v2774_v47  ;;  %v5793_v47 = vld [vmem:[%s6717_s24 + $0x158] sm:$0xff]  }
 0x1df   : > { %v4149_v54 = vpop.permute.xlu0 %4148  ;;  %v7656_v9 = vpop.permute.xlu1 %2623  ;;  %v4304_v27 = vmul.f32 0.01, %v4272_v11  ;;  %vm4288_vm6 = vcmp.gt.f32.partialorder %v4272_v11, 0.0 }
 0x1e0   : > { %9270 = vst [vmem:[#allocation90_spill] sm:$0xff] %v7656_v9  ;;  %v4194_v9 = vadd.f32 %v4149_v54, %v4114_v44  ;;  %v5972_v44 = vpop.f32.mrf.mxu0  ;;  %v6052_v18 = vpop.f32.mrf.mxu1  ;;  %v5658_v54 = vunpack.c.h.bf16 %v5790_v58 }
 0x1e1   : > { %4413 = vrot.lane.b32.xlu0 %v7667_v61, %s6480_s15  ;;  %6098 = vrot.lane.b32.xlu1 %v7255_v38, %s6480_s15 }
 0x1e2   : > { %v4210_v62 = vsub.f32 %v4194_v9, %v7244_v32  ;;  %v7689_v32 = vsel %vm2761_vm4, %v2745_v49, %v2777_v35  ;;  %v4112_v9 = vadd.f32 %v5657_v43, %v4096_v53  ;;  %v4113_v49 = vadd.f32 %v5658_v54, %v4097_v33  ;;  %v7704_v53 = vld [vmem:[%s9056_s5] ss:$0 sm:$0xff] }
 0x1e3   : > { %v7672_v46 = vpop.permute.xlu0 %2617  ;;  %v4151_v57 = vpop.permute.xlu1 %4150  ;;  %v4270_v43 = vadd.f32 %v2374_v31, %v6991_v1 }
 0x1e4   : > { %9274 = vst [vmem:[#allocation27_spill] sm:$0xff] %v7672_v46  ;;  %v4195_v63 = vadd.f32 %v4151_v57, %v4115_v19  ;;  %v4086_v19 = vadd.f32 1.0, %v9275_v21  ;;  %v2743_v57 = vadd.f32 %v2054_v23, %v6991_v1  ;;  %v2387_v21 = vpop.f32.mrf.mxu1  ;;  %v2067_v46 = vpop.f32.mrf.mxu0 }
 0x1e5   : > { %2882 = vrot.lane.b32.xlu0 %v7680_v17, %s6480_s15  ;;  %2888 = vrot.lane.b32.xlu1 %v7689_v32, %s6480_s15  ;;  %vm4286_vm10 = vcmp.gt.f32.partialorder %v4270_v43, 0.0 }
 0x1e6   : > { %v4211_v25 = vsub.f32 %v4195_v63, %v7248_v7  ;;  %v9277_v7 = vld [vmem:[#allocation32_spill] sm:$0xff]  ;;  %v2973_v63 = vadd.f32 %v5972_v44, %v6898_v52  ;;  %v4102_v35 = vmul.f32 %v7704_v53, %v4086_v19  ;;  %vm2759_vm7 = vcmp.gt.f32.partialorder %v2743_v57, 0.0  ;;  %v5973_v19 = vpop.f32.mrf.mxu0 }
 0x1e7   : > { %v4145_v51 = vpop.permute.xlu0 %4144  ;;  %v7686_v38 = vpop.permute.xlu1 %2619  ;;  %v4087_v58 = vadd.f32 1.0, %v9277_v7 }
 0x1e8   : > { %9276 = vst [vmem:[#allocation29_spill] sm:$0xff] %v7686_v38  ;;  %v7691_v48 = vpack.i.bf16 %v4211_v25, %v4210_v62  ;;  %v7699_v38 = vsel %vm4285_vm5, %v4269_v26, %v4301_v36  ;;  %v4192_v23 = vadd.f32 %v4145_v51, %v4112_v9  ;;  %v2775_v25 = vmul.f32 0.01, %v2743_v57  ;;  %v6053_v9 = vpop.f32.mrf.mxu1 }
 0x1e9   : > { %9278 = vst [vmem:[#allocation32_spill] sm:$0xff] %v7699_v38  ;;  %4409 = vrot.lane.b32.xlu0 %v7699_v38, %s6480_s15  ;;  %v7713_v26 = vsel %vm4288_vm6, %v4272_v11, %v4304_v27  ;;  %v5669_v36 = vunpack.c.l.bf16 %v5793_v47  ;;  %v4103_v54 = vmul.f32 %v7704_v53, %v4087_v58  ;;  %v4500_v51 = vadd.f32 %v6052_v18, %v6898_v52 }
 0x1ea   : > { %4415 = vrot.lane.b32.xlu1 %v7713_v26, %s6480_s15  ;;  %v3005_v31 = vmul.f32 0.01, %v2973_v63  ;;  %v4208_v7 = vsub.f32 %v4192_v23, %v7275_v60  ;;  %v5670_v11 = vunpack.c.h.bf16 %v5793_v47  ;;  %vm2989_vm8 = vcmp.gt.f32.partialorder %v2973_v63, 0.0  ;;  %v2070_v23 = vpop.f32.mrf.mxu0 }
 0x1eb   : > { %v4147_v44 = vpop.permute.xlu1 %4146  ;;  %v7710_v62 = vpop.permute.xlu0 %2629  ;;  %v4084_v27 = vadd.f32 1.0, %v7258_v5  ;;  %v4302_v18 = vmul.f32 0.01, %v4270_v43  ;;  %v4118_v38 = vadd.f32 %v5669_v36, %v4102_v35  ;;  %v2971_v60 = vadd.f32 %v2067_v46, %v6901_v55  ;;  %v5792_v5 = vld [vmem:[%s6717_s24 + $0x150] sm:$0xff]  }
 0x1ec   : > { %9279 = vst [vmem:[#allocation91_spill] sm:$0xff] %v7710_v62  ;;  %v4193_v33 = vadd.f32 %v4147_v44, %v4113_v49  ;;  %v7726_v49 = vsel %vm2759_vm7, %v2743_v57, %v2775_v25  ;;  %v4532_v47 = vmul.f32 0.01, %v4500_v51  ;;  %v4119_v25 = vadd.f32 %v5670_v11, %v4103_v54 }
 0x1ed   : > { %6103 = vrot.lane.b32.xlu0 %v7288_v45, %s6480_s15  ;;  %v2390_v45 = vpop.f32.mrf.mxu1  ;;  %vm4516_vm11 = vcmp.gt.f32.partialorder %v4500_v51, 0.0  ;;  %v4100_v35 = vmul.f32 %v7704_v53, %v4084_v27  ;;  %v7745_v36 = vsel %vm4286_vm10, %v4270_v43, %v4302_v18  ;;  %vm2987_vm12 = vcmp.gt.f32.partialorder %v2971_v60, 0.0  ;;  %v9283_v18 = vld [vmem:[#allocation37_spill] sm:$0xff] }
 0x1ee   : > { %v4209_v62 = vsub.f32 %v4193_v33, %v7279_v22  ;;  %v4085_v22 = vadd.f32 1.0, %v7286_v3  ;;  %2884 = vrot.lane.b32.xlu1 %v7726_v49, %s6480_s15  ;;  %v7736_v33 = vsel %vm2989_vm8, %v2973_v63, %v3005_v31  ;;  %v4498_v63 = vadd.f32 %v2387_v21, %v6901_v55  ;;  %v5976_v31 = vpop.f32.mrf.mxu0 }
 0x1ef   : > { %v4157_v58 = vpop.permute.xlu0 %4156  ;;  %v7724_v52 = vpop.permute.xlu1 %2631  ;;  %v4090_v55 = vadd.f32 1.0, %v9283_v18 }
 0x1f0   : > { %9280 = vst [vmem:[#allocation92_spill] sm:$0xff] %v7724_v52  ;;  %v7728_v44 = vpack.i.bf16 %v4209_v62, %v4208_v7  ;;  %v4198_v57 = vadd.f32 %v4157_v58, %v4118_v38  ;;  %v2974_v62 = vadd.f32 %v5973_v19, %v6904_v59  ;;  %v5665_v52 = vunpack.c.l.bf16 %v5792_v5  ;;  %v6056_v11 = vpop.f32.mrf.mxu1 }
 0x1f1   : > { %3103 = vrot.lane.b32.xlu0 %v7736_v33, %s6480_s15  ;;  %v3003_v38 = vmul.f32 0.01, %v2971_v60  ;;  %v4101_v54 = vmul.f32 %v7704_v53, %v4085_v22  ;;  %v7753_v19 = vsel %vm4516_vm11, %v4500_v51, %v4532_v47  ;;  %v5666_v58 = vunpack.c.h.bf16 %v5792_v5  ;;  %v5795_v5 = vld [vmem:[%s6717_s24 + $0x168] sm:$0xff]  }
 0x1f2   : > { %4411 = vrot.lane.b32.xlu1 %v7745_v36, %s6480_s15  ;;  %v4214_v27 = vsub.f32 %v4198_v57, %v7304_v2  ;;  %9282 = vst [vmem:[#allocation94_spill] sm:$0xff] %v7753_v19  ;;  %v4116_v57 = vadd.f32 %v5665_v52, %v4100_v35  ;;  %vm2990_vm13 = vcmp.gt.f32.partialorder %v2974_v62, 0.0  ;;  %v4091_v51 = vadd.f32 1.0, %v7342_v39  ;;  %v2083_v52 = vpop.f32.mrf.mxu0 }
 0x1f3   : > { %v7741_v46 = vpop.permute.xlu0 %2625  ;;  %v4159_v3 = vpop.permute.xlu1 %4158  ;;  %v4530_v47 = vmul.f32 0.01, %v4498_v63  ;;  %v7770_v18 = vsel %vm2987_vm12, %v2971_v60, %v3003_v38  ;;  %vm4514_vm14 = vcmp.gt.f32.partialorder %v4498_v63, 0.0  ;;  %v5677_v60 = vunpack.c.l.bf16 %v5795_v5 }
 0x1f4   : > { %9281 = vst [vmem:[#allocation93_spill] sm:$0xff] %v7741_v46  ;;  %v4199_v7 = vadd.f32 %v4159_v3, %v4119_v25  ;;  %v3006_v25 = vmul.f32 0.01, %v2974_v62  ;;  %v4501_v3 = vadd.f32 %v6053_v9, %v6904_v59  ;;  %v2972_v59 = vadd.f32 %v2070_v23, %v6909_v0 }
 0x1f5   : > { %4630 = vrot.lane.b32.xlu0 %v7753_v19, %s6480_s15  ;;  %v4106_v9 = vmul.f32 %v7704_v53, %v4090_v55  ;;  %v2977_v38 = vadd.f32 %v5976_v31, %v6914_v4  ;;  %v4107_v23 = vmul.f32 %v7704_v53, %v4091_v51  ;;  %v7789_v55 = vsel %vm4514_vm14, %v4498_v63, %v4530_v47  ;;  %v9332_v19 = vld [vmem:[#allocation48_spill] sm:$0xff] }
 0x1f6   : > { %v4215_v43 = vsub.f32 %v4199_v7, %v7308_v28  ;;  %v9285_v28 = vld [vmem:[#allocation36_spill] sm:$0xff]  ;;  %v7768_v7 = vpop.f32.mrf.mxu1  ;;  %v4533_v35 = vmul.f32 0.01, %v4501_v3  ;;  %vm4517_vm9 = vcmp.gt.f32.partialorder %v4501_v3, 0.0  ;;  %9289 = vst [vmem:[#allocation97_spill] sm:$0xff] %v7789_v55  ;;  %v4088_v31 = vadd.f32 1.0, %v7375_v6 }
 0x1f7   : > { %v4153_v21 = vpop.permute.xlu0 %4152  ;;  %v7759_v22 = vpop.permute.xlu1 %2627  ;;  %6108 = vrot.lane.b32.xlu1 %v9285_v28, %s6480_s15  ;;  %9286 = vst [vmem:[#allocation36_spill] sm:$0xff] %v7770_v18  ;;  %v3004_v51 = vmul.f32 0.01, %v2972_v59  ;;  %vm2988_vm15 = vcmp.gt.f32.partialorder %v2972_v59, 0.0  ;;  %v5794_v6 = vld [vmem:[%s6717_s24 + $0x160] sm:$0xff]   ;;  %vm2993_vm1 = vcmp.gt.f32.partialorder %v2977_v38, 0.0 }
 0x1f8   : > { %9284 = vst [vmem:[#allocation37_spill] sm:$0xff] %v7759_v22  ;;  %v7762_v2 = vpack.i.bf16 %v4215_v43, %v4214_v27  ;;  %v4196_v46 = vadd.f32 %v4153_v21, %v4116_v57  ;;  %v4117_v22 = vadd.f32 %v5666_v58, %v4101_v54  ;;  %v7777_v27 = vsel %vm2990_vm13, %v2974_v62, %v3006_v25  ;;  %v7785_v54 = vpop.f32.mrf.mxu1  ;;  %v5977_v25 = vpop.f32.mrf.mxu0 }
 0x1f9   : > { %3099 = vrot.lane.b32.xlu0 %v7770_v18, %s6480_s15  ;;  %9287 = vst [vmem:[#allocation95_spill] sm:$0xff] %v7777_v27  ;;  %v5678_v21 = vunpack.c.h.bf16 %v5795_v5 }
 0x1fa   : > { %v4212_v58 = vsub.f32 %v4196_v46, %v7331_v8  ;;  %v4122_v46 = vadd.f32 %v5677_v60, %v4106_v9  ;;  %v2406_v5 = vpop.f32.mrf.mxu1 }
 0x1fb   : > { %v4155_v39 = vpop.permute.xlu1 %4154  ;;  %v7779_v28 = vpop.permute.xlu0 %2637  ;;  %3105 = vrot.lane.b32.xlu1 %v7777_v27, %s6480_s15 }
 0x1fc   : > { %v4197_v43 = vadd.f32 %v4155_v39, %v4117_v22  ;;  %9288 = vst [vmem:[#allocation96_spill] sm:$0xff] %v7779_v28  ;;  %v4499_v22 = vadd.f32 %v2390_v45, %v6909_v0  ;;  %v7798_v39 = vsel %vm4517_vm9, %v4501_v3, %v4533_v35  ;;  %v4089_v0 = vadd.f32 1.0, %v7405_v12  ;;  %v2086_v3 = vpop.f32.mrf.mxu0 }
 0x1fd   : > { %4626 = vrot.lane.b32.xlu0 %v7789_v55, %s6480_s15  ;;  %9291 = vst [vmem:[#allocation99_spill] sm:$0xff] %v7798_v39  ;;  %v3009_v45 = vmul.f32 0.01, %v2977_v38  ;;  %v4104_v35 = vmul.f32 %v7704_v53, %v4088_v31 }
 0x1fe   : > { %v4213_v62 = vsub.f32 %v4197_v43, %v7335_v29  ;;  %v4504_v29 = vadd.f32 %v6056_v11, %v6914_v4  ;;  %v4123_v43 = vadd.f32 %v5678_v21, %v4107_v23  ;;  %v4531_v60 = vmul.f32 0.01, %v4499_v22  ;;  %v6060_v21 = vpop.f32.mrf.mxu1 }
 0x1ff   : > { %v7796_v57 = vpop.permute.xlu1 %2639  ;;  %v4165_v63 = vpop.permute.xlu0 %4164  ;;  %4632 = vrot.lane.b32.xlu1 %v7798_v39, %s6480_s15  ;;  %v7810_v4 = vsel %vm2988_vm15, %v2972_v59, %v3004_v51  ;;  %vm4515_vm2 = vcmp.gt.f32.partialorder %v4499_v22, 0.0  ;;  %v4105_v23 = vmul.f32 %v7704_v53, %v4089_v0  ;;  %v7820_v31 = vsel %vm2993_vm1, %v2977_v38, %v3009_v45 }
 0x200   : > { %9290 = vst [vmem:[#allocation98_spill] sm:$0xff] %v7796_v57  ;;  %v7800_v8 = vpack.i.bf16 %v4213_v62, %v4212_v58  ;;  %v4202_v47 = vadd.f32 %v4165_v63, %v4122_v46  ;;  %9292 = vst [vmem:[#allocation100_spill] sm:$0xff] %v7810_v4  ;;  %v5673_v58 = vunpack.c.l.bf16 %v5794_v6  ;;  %v4536_v62 = vmul.f32 0.01, %v4504_v29  ;;  %v5980_v63 = vpop.f32.mrf.mxu0 }
 0x201   : > { %6113 = vrot.lane.b32.xlu0 %v7345_v41, %s6480_s15  ;;  %v2975_v46 = vadd.f32 %v2083_v52, %v6921_v10  ;;  %9294 = vst [vmem:[#allocation102_spill] sm:$0xff] %v7820_v31  ;;  %v5674_v51 = vunpack.c.h.bf16 %v5794_v6  ;;  %vm4520_vm3 = vcmp.gt.f32.partialorder %v4504_v29, 0.0  ;;  %v2978_v0 = vadd.f32 %v5977_v25, %v6928_v14  ;;  %v2419_v6 = vpop.f32.mrf.mxu1 }
 0x202   : > { %v4218_v41 = vsub.f32 %v4202_v47, %v7363_v16  ;;  %v4120_v16 = vadd.f32 %v5673_v58, %v4104_v35  ;;  %v4502_v38 = vadd.f32 %v7768_v7, %v6921_v10  ;;  %v7836_v45 = vsel %vm4520_vm3, %v4504_v29, %v4536_v62  ;;  %v2099_v25 = vpop.f32.mrf.mxu0  ;;  %v9299_v62 = vld [vmem:[#allocation40_spill] sm:$0xff] }
 0x203   : > { %v4167_v9 = vpop.permute.xlu1 %4166  ;;  %v7812_v12 = vpop.permute.xlu0 %2633  ;;  %3101 = vrot.lane.b32.xlu1 %v7810_v4, %s6480_s15  ;;  %9297 = vst [vmem:[#allocation105_spill] sm:$0xff] %v7836_v45  ;;  %vm2991_vm4 = vcmp.gt.f32.partialorder %v2975_v46, 0.0  ;;  %v3010_v35 = vmul.f32 0.01, %v2978_v0  ;;  %vm2994_vm5 = vcmp.gt.f32.partialorder %v2978_v0, 0.0  ;;  %v5799_v4 = vld [vmem:[%s6717_s24 + $0x188] sm:$0xff]  }
 0x204   : > { %9293 = vst [vmem:[#allocation101_spill] sm:$0xff] %v7812_v12  ;;  %v4203_v11 = vadd.f32 %v4167_v9, %v4123_v43  ;;  %v7828_v43 = vsel %vm4515_vm2, %v4499_v22, %v4531_v60  ;;  %v4505_v60 = vadd.f32 %v7785_v54, %v6928_v14  ;;  %v4534_v29 = vmul.f32 0.01, %v4502_v38  ;;  %v6061_v58 = vpop.f32.mrf.mxu1  ;;  %v5981_v14 = vpop.f32.mrf.mxu0 }
 0x205   : > { %3111 = vrot.lane.b32.xlu0 %v7820_v31, %s6480_s15  ;;  %9296 = vst [vmem:[#allocation104_spill] sm:$0xff] %v7828_v43  ;;  %vm4518_vm6 = vcmp.gt.f32.partialorder %v4502_v38, 0.0  ;;  %v4094_v54 = vadd.f32 1.0, %v7427_v42  ;;  %v7866_v42 = vadd.f32 %v6060_v21, %v6942_v24  ;;  %v7881_v21 = vadd.f32 %v2099_v25, %v6949_v30 }
 0x206   : > { %v4219_v59 = vsub.f32 %v4203_v11, %v7367_v15  ;;  %v3007_v15 = vmul.f32 0.01, %v2975_v46  ;;  %vm4521_vm7 = vcmp.gt.f32.partialorder %v4505_v60, 0.0 }
 0x207   : > { %v7825_v52 = vpop.permute.xlu1 %2635  ;;  %v4161_v47 = vpop.permute.xlu0 %4160  ;;  %4628 = vrot.lane.b32.xlu1 %v7828_v43, %s6480_s15  ;;  %vm4524_vm12 = vcmp.gt.f32.partialorder %v7866_v42, 0.0  ;;  %vm2995_vm13 = vcmp.gt.f32.partialorder %v7881_v21, 0.0 }
 0x208   : > { %9295 = vst [vmem:[#allocation103_spill] sm:$0xff] %v7825_v52  ;;  %v7830_v9 = vpack.i.bf16 %v4219_v59, %v4218_v41  ;;  %v4200_v11 = vadd.f32 %v4161_v47, %v4120_v16  ;;  %v4121_v52 = vadd.f32 %v5674_v51, %v4105_v23  ;;  %v7847_v41 = vsel %vm2991_vm4, %v2975_v46, %v3007_v15  ;;  %v9301_v59 = vld [vmem:[#allocation41_spill] sm:$0xff] }
 0x209   : > { %4638 = vrot.lane.b32.xlu0 %v7836_v45, %s6480_s15  ;;  %9300 = vst [vmem:[#allocation40_spill] sm:$0xff] %v7847_v41  ;;  %v7851_v16 = vadd.f32 %v2406_v5, %v6935_v20  ;;  %v7857_v47 = vsel %vm2994_vm5, %v2978_v0, %v3010_v35  ;;  %v2981_v46 = vadd.f32 %v5980_v63, %v6942_v24  ;;  %v5797_v5 = vld [vmem:[%s6717_s24 + $0x178] sm:$0xff]   ;;  %v2102_v0 = vpop.f32.mrf.mxu0  ;;  %v9317_v45 = vld [vmem:[#allocation56_spill] sm:$0xff] }
 0x20a   : > { %v4216_v23 = vsub.f32 %v4200_v11, %v9299_v62  ;;  %9302 = vst [vmem:[#allocation41_spill] sm:$0xff] %v7857_v47  ;;  %v7875_v63 = vadd.f32 %v2419_v6, %v6949_v30  ;;  %v4110_v35 = vmul.f32 %v7704_v53, %v4094_v54  ;;  %v7887_v6 = vadd.f32 %v5981_v14, %v6956_v34 }
 0x20b   : > { %v4163_v22 = vpop.permute.xlu1 %4162  ;;  %v7842_v7 = vpop.permute.xlu0 %2645  ;;  %6118 = vrot.lane.b32.xlu1 %v7386_v37, %s6480_s15  ;;  %v4537_v37 = vmul.f32 0.01, %v4505_v60  ;;  %vm4519_vm8 = vcmp.gt.f32.partialorder %v7851_v16, 0.0  ;;  %vm2997_vm11 = vcmp.gt.f32.partialorder %v2981_v46, 0.0  ;;  %v7895_v30 = vadd.f32 %v6061_v58, %v6956_v34 }
 0x20c   : > { %v4201_v10 = vadd.f32 %v4163_v22, %v4121_v52  ;;  %9298 = vst [vmem:[#allocation106_spill] sm:$0xff] %v7842_v7  ;;  %v2976_v52 = vadd.f32 %v2086_v3, %v6935_v20  ;;  %v2422_v22 = vpop.f32.mrf.mxu1  ;;  %v7870_v20 = vsel %vm4518_vm6, %v4502_v38, %v4534_v29  ;;  %v4535_v3 = vmul.f32 0.01, %v7851_v16  ;;  %v5984_v54 = vpop.f32.mrf.mxu0  ;;  %v9307_v7 = vld [vmem:[#allocation43_spill] sm:$0xff] }
 0x20d   : > { %3107 = vrot.lane.b32.xlu0 %v7847_v41, %s6480_s15  ;;  %9303 = vst [vmem:[#allocation107_spill] sm:$0xff] %v7870_v20  ;;  %v5685_v38 = vunpack.c.l.bf16 %v5797_v5  ;;  %v3013_v29 = vmul.f32 0.01, %v2981_v46  ;;  %v7903_v14 = vadd.f32 %v2422_v22, %v6963_v40  ;;  %v7912_v58 = vmul.f32 0.01, %v7881_v21 }
 0x20e   : > { %v4217_v51 = vsub.f32 %v4201_v10, %v9301_v59  ;;  %v4095_v10 = vadd.f32 1.0, %v7460_v13  ;;  %v3008_v24 = vmul.f32 0.01, %v2976_v52  ;;  %v7884_v13 = vsel %vm4521_vm7, %v4505_v60, %v4537_v37  ;;  %v6064_v25 = vpop.f32.mrf.mxu1  ;;  %v9306_v37 = vld [vmem:[#allocation51_spill] sm:$0xff] }
 0x20f   : > { %3113 = vrot.lane.b32.xlu1 %v7857_v47, %s6480_s15  ;;  %v4173_v15 = vpop.permute.xlu0 %4172  ;;  %9304 = vst [vmem:[#allocation108_spill] sm:$0xff] %v7884_v13  ;;  %vm2992_vm10 = vcmp.gt.f32.partialorder %v2976_v52, 0.0  ;;  %v7891_v62 = vpop.permute.xlu1 %2647  ;;  %v4540_v59 = vmul.f32 0.01, %v7866_v42  ;;  %vm2998_vm14 = vcmp.gt.f32.partialorder %v7887_v6, 0.0  ;;  %vm4522_vm9 = vcmp.gt.f32.partialorder %v7875_v63, 0.0 }
 0x210   : > { %v7859_v11 = vpack.i.bf16 %v4217_v51, %v4216_v23  ;;  %9305 = vst [vmem:[#allocation109_spill] sm:$0xff] %v7891_v62  ;;  %v4111_v60 = vmul.f32 %v7704_v53, %v4095_v10  ;;  %v5686_v23 = vunpack.c.h.bf16 %v5797_v5  ;;  %v7900_v51 = vmul.f32 0.01, %v7875_v63 }
 0x211   : > { %4634 = vrot.lane.b32.xlu0 %v7870_v20, %s6480_s15  ;;  %v4092_v62 = vadd.f32 1.0, %v9306_v37  ;;  %v4126_v5 = vadd.f32 %v5685_v38, %v4110_v35  ;;  %v7915_v10 = vsel %vm2992_vm10, %v2976_v52, %v3008_v24  ;;  %v7919_v22 = vmul.f32 0.01, %v7887_v6  ;;  %v2435_v52 = vpop.f32.mrf.mxu1  ;;  %v2115_v20 = vpop.f32.mrf.mxu0 }
 0x212   : > { %9309 = vst [vmem:[#allocation43_spill] sm:$0xff] %v7915_v10  ;;  %v7922_v37 = vadd.f32 %v2102_v0, %v6963_v40  ;;  %v7930_v35 = vmul.f32 0.01, %v7895_v30  ;;  %v4127_v38 = vadd.f32 %v5686_v23, %v4111_v60  ;;  %v7933_v57 = vsel %vm2997_vm11, %v2981_v46, %v3013_v29  ;;  %v9312_v0 = vld [vmem:[#allocation3_spill] sm:$0xff]  ;;  %v9313_v46 = vld [vmem:[#allocation54_spill] sm:$0xff] }
 0x213   : > { %4640 = vrot.lane.b32.xlu1 %v7884_v13, %s6480_s15  ;;  %v7908_v34 = vpop.permute.xlu0 %2641  ;;  %v4206_v24 = vadd.f32 %v4173_v15, %v4126_v5  ;;  %v7936_v40 = vmul.f32 0.01, %v7903_v14  ;;  %v7942_v28 = vadd.f32 %v6064_v25, %v9312_v0  ;;  %vm4525_vm15 = vcmp.gt.f32.partialorder %v7895_v30, 0.0  ;;  %v9315_v5 = vld [vmem:[#allocation58_spill] sm:$0xff] }
 0x214   : > { %9308 = vst [vmem:[#allocation51_spill] sm:$0xff] %v7908_v34  ;;  %v5796_v34 = vld [vmem:[%s6717_s24 + $0x170] sm:$0xff]   ;;  %v2796_v15 = vadd.f32 1.0, %v9313_v46  ;;  %v7952_v25 = vsel %vm4519_vm8, %v7851_v16, %v4535_v3  ;;  %v7955_v23 = vmul.f32 0.01, %v7922_v37  ;;  %v7970_v3 = vld [vmem:[%s6712_s11 + $0x78] sm:$0xff]  ;;  %v7985_v13 = vadd.f32 %v2115_v20, %v6977_v50 }
 0x215   : > { %6123 = vrot.lane.b32.xlu0 %v9307_v7, %s6480_s15  ;;  %v9310_v7 = vld [vmem:[#allocation55_spill] sm:$0xff]  ;;  %v4175_v41 = vpop.permute.xlu1 %4174  ;;  %9314 = vst [vmem:[#allocation3_spill] sm:$0xff] %v7952_v25  ;;  %v5681_v60 = vunpack.c.l.bf16 %v5796_v34  ;;  %v7966_v46 = vld [vmem:[%s6712_s11 + $0x70] sm:$0xff]  ;;  %v4323_v47 = vadd.f32 1.0, %v9317_v45  ;;  %vm2996_vm1 = vcmp.gt.f32.partialorder %v7922_v37, 0.0  ;;  %v9319_v45 = vld [vmem:[#allocation62_spill] sm:$0xff] }
 0x216   : > { %v4093_v12 = vadd.f32 1.0, %v9310_v7  ;;  %9311 = vst [vmem:[#allocation55_spill] sm:$0xff] %v7933_v57  ;;  %v7939_v7 = vadd.f32 %v5984_v54, %v9312_v0  ;;  %v4207_v29 = vadd.f32 %v4175_v41, %v4127_v38  ;;  %v2797_v0 = vadd.f32 1.0, %v9315_v5  ;;  %v5759_v38 = vld [vmem:[%s6717_s24 + $0x48] sm:$0xff]  }
 0x217   : > { %3109 = vrot.lane.b32.xlu1 %v7915_v10, %s6480_s15  ;;  %v4108_v10 = vmul.f32 %v7704_v53, %v4092_v62  ;;  %v7958_v62 = vadd.f32 %v2435_v52, %v6977_v50  ;;  %v4169_v41 = vpop.permute.xlu0 %4168  ;;  %v4222_v16 = vsub.f32 %v4206_v24, %v7966_v46  ;;  %v7976_v52 = vsel %vm4524_vm12, %v7866_v42, %v4540_v59  ;;  %v5985_v24 = vpop.f32.mrf.mxu0 }
 0x218   : > { %v4109_v54 = vmul.f32 %v7704_v53, %v4093_v12  ;;  %9316 = vst [vmem:[#allocation54_spill] sm:$0xff] %v7976_v52  ;;  %v5682_v12 = vunpack.c.h.bf16 %v5796_v34  ;;  %v7979_v5 = vmul.f32 0.01, %v7939_v7  ;;  %v6065_v42 = vpop.f32.mrf.mxu1  ;;  %v2812_v59 = vmul.f32 %v7704_v53, %v2796_v15 }
 0x219   : > { %3119 = vrot.lane.b32.xlu0 %v7933_v57, %s6480_s15  ;;  %v4223_v57 = vsub.f32 %v4207_v29, %v7970_v3  ;;  %v7988_v29 = vpop.permute.xlu1 %2643  ;;  %v4124_v31 = vadd.f32 %v5681_v60, %v4108_v10  ;;  %v5533_v43 = vunpack.c.l.bf16 %v5759_v38  ;;  %v7997_v50 = vmul.f32 0.01, %v7958_v62 }
 0x21a   : > { %9318 = vst [vmem:[#allocation58_spill] sm:$0xff] %v7988_v29  ;;  %v2813_v20 = vmul.f32 %v7704_v53, %v2797_v0  ;;  %v4324_v55 = vadd.f32 1.0, %v9319_v45  ;;  %v9320_v29 = vld [vmem:[#allocation46_spill] sm:$0xff]  ;;  %v5534_v18 = vunpack.c.h.bf16 %v5759_v38  ;;  %v4125_v15 = vadd.f32 %v5682_v12, %v4109_v54 }
 0x21b   : > { %4636 = vrot.lane.b32.xlu1 %v7952_v25, %s6480_s15  ;;  %v7982_v25 = vmul.f32 0.01, %v7942_v28  ;;  %v7993_v34 = vpack.i.bf16 %v4223_v57, %v4222_v16  ;;  %v8005_v57 = vadd.f32 %v5985_v24, %v6984_v56  ;;  %v4204_v10 = vadd.f32 %v4169_v41, %v4124_v31  ;;  %v9322_v24 = vld [vmem:[#allocation59_spill] sm:$0xff] }
 0x21c   : > { %v8011_v60 = vsel %vm2995_vm13, %v7881_v21, %v7912_v58  ;;  %vm3001_vm2 = vcmp.gt.f32.partialorder %v7939_v7, 0.0  ;;  %v8015_v0 = vmul.f32 0.01, %v7985_v13  ;;  %v8018_v16 = vadd.f32 %v6065_v42, %v6984_v56  ;;  %v2438_v21 = vpop.f32.mrf.mxu1 }
 0x21d   : > { %4646 = vrot.lane.b32.xlu0 %v7976_v52, %s6480_s15  ;;  %v2863_v52 = vpop.permute.xlu0 %2862  ;;  %9321 = vst [vmem:[#allocation56_spill] sm:$0xff] %v8011_v60  ;;  %v4339_v38 = vmul.f32 %v7704_v53, %v4323_v47  ;;  %v2794_v31 = vadd.f32 1.0, %v9322_v24  ;;  %v4171_v54 = vpop.permute.xlu1 %4170  ;;  %v2828_v41 = vadd.f32 %v5533_v43, %v2812_v59  ;;  %v8028_v56 = vsel %vm2998_vm14, %v7887_v6, %v7919_v22  ;;  %v5758_v6 = vld [vmem:[%s6717_s24 + $0x40] sm:$0xff]   ;;  %v8048_v59 = vld [vmem:[%s6712_s11 + $0x68] sm:$0xff] }
 0x21e   : > { %v4205_v58 = vadd.f32 %v4171_v54, %v4125_v15  ;;  %9323 = vst [vmem:[#allocation62_spill] sm:$0xff] %v8028_v56  ;;  %v5693_v12 = vunpack.c.l.bf16 %v5799_v4  ;;  %vm4523_vm3 = vcmp.gt.f32.partialorder %v7903_v14, 0.0  ;;  %v4340_v47 = vmul.f32 %v7704_v53, %v4324_v55  ;;  %v8044_v22 = vld [vmem:[%s6712_s11 + $0x60] sm:$0xff] }
 0x21f   : > { %6128 = vrot.lane.b32.xlu1 %v9320_v29, %s6480_s15  ;;  %v9324_v29 = vld [vmem:[#allocation65_spill] sm:$0xff]  ;;  %v2829_v24 = vadd.f32 %v5534_v18, %v2813_v20  ;;  %v8039_v43 = vsel %vm4522_vm9, %v7875_v63, %v7900_v51  ;;  %vm4528_vm4 = vcmp.gt.f32.partialorder %v7942_v28, 0.0  ;;  %9326 = vst [vmem:[#allocation59_spill] sm:$0xff] %v8044_v22  ;;  %v4220_v55 = vsub.f32 %v4204_v10, %v8044_v22  ;;  %v9328_v51 = vld [vmem:[#allocation63_spill] sm:$0xff] }
 0x220   : > { %v2795_v42 = vadd.f32 1.0, %v9324_v29  ;;  %9325 = vst [vmem:[#allocation46_spill] sm:$0xff] %v8039_v43  ;;  %9327 = vst [vmem:[#allocation65_spill] sm:$0xff] %v8048_v59  ;;  %v4221_v15 = vsub.f32 %v4205_v58, %v8048_v59  ;;  %v2908_v54 = vadd.f32 %v2863_v52, %v2828_v41  ;;  %v5694_v18 = vunpack.c.h.bf16 %v5799_v4  ;;  %v5798_v58 = vld [vmem:[%s6717_s24 + $0x180] sm:$0xff]  }
 0x221   : > { %3115 = vrot.lane.b32.xlu0 %v8011_v60, %s6480_s15  ;;  %v4390_v45 = vpop.permute.xlu0 %4389  ;;  %v8052_v20 = vadd.f32 %v2438_v21, %v6991_v1  ;;  %v2810_v63 = vmul.f32 %v7704_v53, %v2794_v31  ;;  %v4321_v29 = vadd.f32 1.0, %v9328_v51  ;;  %v8062_v10 = vsel %vm4525_vm15, %v7895_v30, %v7930_v35 }
 0x222   : > { %9329 = vst [vmem:[#allocation63_spill] sm:$0xff] %v8062_v10  ;;  %vm3002_vm5 = vcmp.gt.f32.partialorder %v8005_v57, 0.0  ;;  %v8065_v4 = vpack.i.bf16 %v4221_v15, %v4220_v55  ;;  %v4355_v52 = vadd.f32 %v5693_v12, %v4339_v38  ;;  %v5529_v21 = vunpack.c.l.bf16 %v5758_v6  ;;  %v8077_v55 = vld [vmem:[%s6712_s11 + $0x10] sm:$0xff]  ;;  %v8081_v12 = vld [vmem:[%s6712_s11 + $0x18] sm:$0xff] }
 0x223   : > { %3121 = vrot.lane.b32.xlu1 %v8028_v56, %s6480_s15  ;;  %v2865_v60 = vpop.permute.xlu1 %2864  ;;  %v8069_v41 = vmul.f32 0.01, %v8005_v57  ;;  %v2811_v51 = vmul.f32 %v7704_v53, %v2795_v42  ;;  %v5530_v35 = vunpack.c.h.bf16 %v5758_v6  ;;  %vm2999_vm6 = vcmp.gt.f32.partialorder %v7985_v13, 0.0 }
 0x224   : > { %v2909_v31 = vadd.f32 %v2865_v60, %v2829_v24  ;;  %v2924_v60 = vsub.f32 %v2908_v54, %v8077_v55  ;;  %v4435_v38 = vadd.f32 %v4390_v45, %v4355_v52  ;;  %v4356_v15 = vadd.f32 %v5694_v18, %v4340_v47  ;;  %v2118_v45 = vpop.f32.mrf.mxu0 }
 0x225   : > { %4642 = vrot.lane.b32.xlu0 %v8039_v43, %s6480_s15  ;;  %v9330_v43 = vld [vmem:[#allocation67_spill] sm:$0xff]  ;;  %v2859_v30 = vpop.permute.xlu0 %2858  ;;  %v8085_v42 = vmul.f32 0.01, %v8018_v16  ;;  %v5689_v59 = vunpack.c.l.bf16 %v5798_v58  ;;  %vm4529_vm7 = vcmp.gt.f32.partialorder %v8018_v16, 0.0  ;;  %v2826_v52 = vadd.f32 %v5529_v21, %v2810_v63 }
 0x226   : > { %v4322_v56 = vadd.f32 1.0, %v9330_v43  ;;  %v2925_v24 = vsub.f32 %v2909_v31, %v8081_v12  ;;  %v4337_v43 = vmul.f32 %v7704_v53, %v4321_v29  ;;  %v8098_v18 = vsel %vm2996_vm1, %v7922_v37, %v7955_v23 }
 0x227   : > { %4648 = vrot.lane.b32.xlu1 %v8062_v10, %s6480_s15  ;;  %v9331_v10 = vld [vmem:[#allocation66_spill] sm:$0xff]  ;;  %v4392_v6 = vpop.permute.xlu1 %4391  ;;  %v2827_v22 = vadd.f32 %v5530_v35, %v2811_v51  ;;  %v5690_v27 = vunpack.c.h.bf16 %v5798_v58  ;;  %vm4526_vm8 = vcmp.gt.f32.partialorder %v7958_v62, 0.0  ;;  %v4451_v63 = vsub.f32 %v4435_v38, %v8077_v55  ;;  %v9334_v58 = vld [vmem:[#allocation68_spill] sm:$0xff] }
 0x228   : > { %v2800_v39 = vadd.f32 1.0, %v9331_v10  ;;  %v8092_v54 = vpack.i.bf16 %v2925_v24, %v2924_v60  ;;  %v4436_v47 = vadd.f32 %v4392_v6, %v4356_v15  ;;  %v4338_v29 = vmul.f32 %v7704_v53, %v4322_v56  ;;  %v9333_v10 = vld [vmem:[#allocation70_spill] sm:$0xff] }
 0x229   : > { %6133 = vrot.lane.b32.xlu0 %v9332_v19, %s6480_s15  ;;  %v2801_v31 = vadd.f32 1.0, %v9333_v10  ;;  %v4386_v19 = vpop.permute.xlu0 %4385  ;;  %v5761_v60 = vld [vmem:[%s6717_s24 + $0x58] sm:$0xff]   ;;  %v2906_v21 = vadd.f32 %v2859_v30, %v2826_v52  ;;  %v8112_v37 = vsel %vm3001_vm2, %v7939_v7, %v7979_v5  ;;  %v8115_v23 = vadd.f32 %v2118_v45, %v6991_v1  ;;  %v8141_v52 = vld [vmem:[%s6712_s11] sm:$0xff] }
 0x22a   : > { %v4452_v24 = vsub.f32 %v4436_v47, %v8081_v12  ;;  %v2816_v56 = vmul.f32 %v7704_v53, %v2800_v39  ;;  %v4327_v51 = vadd.f32 1.0, %v9334_v58  ;;  %v4353_v35 = vadd.f32 %v5689_v59, %v4337_v43  ;;  %v9335_v5 = vld [vmem:[#allocation74_spill] sm:$0xff]  ;;  %v8145_v47 = vld [vmem:[%s6712_s11 + $0x8] sm:$0xff] }
 0x22b   : > { %3117 = vrot.lane.b32.xlu1 %v8098_v18, %s6480_s15  ;;  %v2861_v38 = vpop.permute.xlu1 %2860  ;;  %v8127_v1 = vsel %vm4523_vm3, %v7903_v14, %v7936_v40  ;;  %v5541_v7 = vunpack.c.l.bf16 %v5761_v60  ;;  %v2817_v39 = vmul.f32 %v7704_v53, %v2801_v31  ;;  %v4328_v6 = vadd.f32 1.0, %v9335_v5  ;;  %v5801_v45 = vld [vmem:[%s6717_s24 + $0x198] sm:$0xff]  }
 0x22c   : > { %v8121_v30 = vpack.i.bf16 %v4452_v24, %v4451_v63  ;;  %v2907_v15 = vadd.f32 %v2861_v38, %v2827_v22  ;;  %v4354_v59 = vadd.f32 %v5690_v27, %v4338_v29  ;;  %v8137_v22 = vsel %vm4528_vm4, %v7942_v28, %v7982_v25  ;;  %v9336_v29 = vld [vmem:[#allocation71_spill] sm:$0xff] }
 0x22d   : > { %3127 = vrot.lane.b32.xlu0 %v8112_v37, %s6480_s15  ;;  %v2871_v43 = vpop.permute.xlu0 %2870  ;;  %v2922_v14 = vsub.f32 %v2906_v21, %v8141_v52  ;;  %v4433_v40 = vadd.f32 %v4386_v19, %v4353_v35  ;;  %v5542_v31 = vunpack.c.h.bf16 %v5761_v60  ;;  %vm3000_vm10 = vcmp.gt.f32.partialorder %v8115_v23, 0.0 }
 0x22e   : > { %v2923_v10 = vsub.f32 %v2907_v15, %v8145_v47  ;;  %v4343_v27 = vmul.f32 %v7704_v53, %v4327_v51  ;;  %v2798_v63 = vadd.f32 1.0, %v9336_v29  ;;  %v8157_v25 = vsel %vm3002_vm5, %v8005_v57, %v8069_v41  ;;  %v9337_v51 = vld [vmem:[#allocation77_spill] sm:$0xff] }
 0x22f   : > { %4644 = vrot.lane.b32.xlu1 %v8127_v1, %s6480_s15  ;;  %v4388_v28 = vpop.permute.xlu1 %4387  ;;  %vm4527_vm11 = vcmp.gt.f32.partialorder %v8052_v20, 0.0  ;;  %v2832_v21 = vadd.f32 %v5541_v7, %v2816_v56  ;;  %v5701_v24 = vunpack.c.l.bf16 %v5801_v45  ;;  %v4344_v58 = vmul.f32 %v7704_v53, %v4328_v6  ;;  %v5760_v41 = vld [vmem:[%s6717_s24 + $0x50] sm:$0xff]  }
 0x230   : > { %v8160_v19 = vpack.i.bf16 %v2923_v10, %v2922_v14  ;;  %v4434_v60 = vadd.f32 %v4388_v28, %v4354_v59  ;;  %v2799_v35 = vadd.f32 1.0, %v9337_v51  ;;  %v8170_v57 = vsel %vm2999_vm6, %v7985_v13, %v8015_v0  ;;  %v9339_v10 = vld [vmem:[#allocation75_spill] sm:$0xff] }
 0x231   : > { %4654 = vrot.lane.b32.xlu0 %v8137_v22, %s6480_s15  ;;  %v4398_v38 = vpop.permute.xlu0 %4397  ;;  %9338 = vst [vmem:[#allocation67_spill] sm:$0xff] %v8170_v57  ;;  %v5702_v15 = vunpack.c.h.bf16 %v5801_v45  ;;  %v4449_v56 = vsub.f32 %v4433_v40, %v8141_v52  ;;  %v2912_v5 = vadd.f32 %v2871_v43, %v2832_v21  ;;  %v2833_v6 = vadd.f32 %v5542_v31, %v2817_v39  ;;  %v5800_v40 = vld [vmem:[%s6717_s24 + $0x190] sm:$0xff]  }
 0x232   : > { %v4450_v7 = vsub.f32 %v4434_v60, %v8145_v47  ;;  %v3016_v59 = vmul.f32 0.01, %v8115_v23  ;;  %v2814_v14 = vmul.f32 %v7704_v53, %v2798_v63  ;;  %v4325_v29 = vadd.f32 1.0, %v9339_v10  ;;  %v9340_v63 = vld [vmem:[#allocation79_spill] sm:$0xff] }
 0x233   : > { %3129 = vrot.lane.b32.xlu1 %v8157_v25, %s6480_s15  ;;  %v2873_v28 = vpop.permute.xlu1 %2872  ;;  %v8184_v13 = vsel %vm4529_vm7, %v8018_v16, %v8085_v42  ;;  %v4359_v39 = vadd.f32 %v5701_v24, %v4343_v27  ;;  %v5537_v45 = vunpack.c.l.bf16 %v5760_v41  ;;  %v2815_v31 = vmul.f32 %v7704_v53, %v2799_v35  ;;  %v8200_v42 = vld [vmem:[%s6712_s11 + $0x30] sm:$0xff] }
 0x234   : > { %v8186_v0 = vpack.i.bf16 %v4450_v7, %v4449_v56  ;;  %v2913_v43 = vadd.f32 %v2873_v28, %v2833_v6  ;;  %v4326_v60 = vadd.f32 1.0, %v9340_v63  ;;  %v4360_v51 = vadd.f32 %v5702_v15, %v4344_v58  ;;  %v8204_v56 = vld [vmem:[%s6712_s11 + $0x38] sm:$0xff] }
 0x235   : > { %3123 = vrot.lane.b32.xlu0 %v8170_v57, %s6480_s15  ;;  %v2867_v21 = vpop.permute.xlu0 %2866  ;;  %v8197_v16 = vsel %vm4526_vm8, %v7958_v62, %v7997_v50  ;;  %v2928_v27 = vsub.f32 %v2912_v5, %v8200_v42  ;;  %v4439_v24 = vadd.f32 %v4398_v38, %v4359_v39  ;;  %v5538_v7 = vunpack.c.h.bf16 %v5760_v41  ;;  %v9342_v58 = vld [vmem:[#allocation78_spill] sm:$0xff] }
 0x236   : > { %9341 = vst [vmem:[#allocation66_spill] sm:$0xff] %v8197_v16  ;;  %v2929_v35 = vsub.f32 %v2913_v43, %v8204_v56  ;;  %v4543_v6 = vmul.f32 0.01, %v8052_v20  ;;  %v2804_v15 = vadd.f32 1.0, %v9342_v58  ;;  %v5697_v62 = vunpack.c.l.bf16 %v5800_v40  ;;  %v9344_v39 = vld [vmem:[#allocation82_spill] sm:$0xff] }
 0x237   : > { %4656 = vrot.lane.b32.xlu1 %v8184_v13, %s6480_s15  ;;  %v4400_v10 = vpop.permute.xlu1 %4399  ;;  %v4341_v50 = vmul.f32 %v7704_v53, %v4325_v29  ;;  %v2830_v38 = vadd.f32 %v5537_v45, %v2814_v14  ;;  %v8217_v41 = vsel %vm3000_vm10, %v8115_v23, %v3016_v59  ;;  %v2805_v43 = vadd.f32 1.0, %v9344_v39  ;;  %v5763_v29 = vld [vmem:[%s6717_s24 + $0x68] sm:$0xff]   ;;  %v8242_v39 = vld [vmem:[%s6712_s11 + $0x20] sm:$0xff]  ;;  %v8278_v57 = vld [vmem:[%s6712_s11 + $0x58] sm:$0xff] }
 0x238   : > { %v8212_v28 = vpack.i.bf16 %v2929_v35, %v2928_v27  ;;  %v4440_v5 = vadd.f32 %v4400_v10, %v4360_v51  ;;  %9343 = vst [vmem:[#allocation48_spill] sm:$0xff] %v8217_v41  ;;  %v5698_v58 = vunpack.c.h.bf16 %v5800_v40  ;;  %v4455_v27 = vsub.f32 %v4439_v24, %v8200_v42  ;;  %v9345_v35 = vld [vmem:[#allocation80_spill] sm:$0xff] }
 0x239   : > { %4650 = vrot.lane.b32.xlu0 %v8197_v16, %s6480_s15  ;;  %v4394_v63 = vpop.permute.xlu0 %4393  ;;  %v4342_v16 = vmul.f32 %v7704_v53, %v4326_v60  ;;  %v2910_v14 = vadd.f32 %v2867_v21, %v2830_v38  ;;  %v2831_v51 = vadd.f32 %v5538_v7, %v2815_v31  ;;  %v4331_v23 = vadd.f32 1.0, %v9345_v35  ;;  %v5803_v7 = vld [vmem:[%s6717_s24 + $0x1a8] sm:$0xff]   ;;  %v9347_v38 = vld [vmem:[#allocation21_spill] sm:$0xff] }
 0x23a   : > { %v4456_v45 = vsub.f32 %v4440_v5, %v8204_v56  ;;  %v4357_v59 = vadd.f32 %v5697_v62, %v4341_v50  ;;  %v8232_v40 = vsel %vm4527_vm11, %v8052_v20, %v4543_v6  ;;  %v5549_v24 = vunpack.c.l.bf16 %v5763_v29 }
 0x23b   : > { %3125 = vrot.lane.b32.xlu1 %v8217_v41, %s6480_s15  ;;  %v2869_v10 = vpop.permute.xlu1 %2868  ;;  %9346 = vst [vmem:[#allocation70_spill] sm:$0xff] %v8232_v40  ;;  %v2820_v31 = vmul.f32 %v7704_v53, %v2804_v15  ;;  %v4332_v62 = vadd.f32 1.0, %v9347_v38  ;;  %v4358_v50 = vadd.f32 %v5698_v58, %v4342_v16  ;;  %v2926_v20 = vsub.f32 %v2910_v14, %v8242_v39 }
 0x23c   : > { %v8234_v60 = vpack.i.bf16 %v4456_v45, %v4455_v27  ;;  %v2911_v21 = vadd.f32 %v2869_v10, %v2831_v51  ;;  %v4437_v6 = vadd.f32 %v4394_v63, %v4357_v59  ;;  %v8246_v27 = vld [vmem:[%s6712_s11 + $0x28] sm:$0xff]  ;;  %v2821_v15 = vmul.f32 %v7704_v53, %v2805_v43  ;;  %v9348_v51 = vld [vmem:[#allocation83_spill] sm:$0xff] }
 0x23d   : > { %6143 = vrot.lane.b32.xlu0 %v7728_v44, %s6482_s29  ;;  %v2879_v5 = vpop.permute.xlu0 %2878  ;;  %v5550_v44 = vunpack.c.h.bf16 %v5763_v29  ;;  %v2802_v35 = vadd.f32 1.0, %v9348_v51  ;;  %v5709_v16 = vunpack.c.l.bf16 %v5803_v7  ;;  %v2836_v38 = vadd.f32 %v5549_v24, %v2820_v31  ;;  %v5762_v63 = vld [vmem:[%s6717_s24 + $0x60] sm:$0xff]   ;;  %v9349_v59 = vld [vmem:[#allocation88_spill] sm:$0xff] }
 0x23e   : > { %v2927_v45 = vsub.f32 %v2911_v21, %v8246_v27  ;;  %v4347_v14 = vmul.f32 %v7704_v53, %v4331_v23  ;;  %v5710_v21 = vunpack.c.h.bf16 %v5803_v7  ;;  %v4348_v51 = vmul.f32 %v7704_v53, %v4332_v62 }
 0x23f   : > { %4652 = vrot.lane.b32.xlu1 %v8232_v40, %s6480_s15  ;;  %v4396_v10 = vpop.permute.xlu1 %4395  ;;  %v2803_v40 = vadd.f32 1.0, %v9349_v59  ;;  %v4453_v41 = vsub.f32 %v4437_v6, %v8242_v39  ;;  %v2837_v24 = vadd.f32 %v5550_v44, %v2821_v15  ;;  %v5545_v23 = vunpack.c.l.bf16 %v5762_v63  ;;  %v5802_v15 = vld [vmem:[%s6717_s24 + $0x1a0] sm:$0xff]  }
 0x240   : > { %v8253_v58 = vpack.i.bf16 %v2927_v45, %v2926_v20  ;;  %v4438_v29 = vadd.f32 %v4396_v10, %v4358_v50  ;;  %v2916_v20 = vadd.f32 %v2879_v5, %v2836_v38  ;;  %v9350_v50 = vld [vmem:[#allocation24_spill] sm:$0xff]  ;;  %v4363_v62 = vadd.f32 %v5709_v16, %v4347_v14  ;;  %v9351_v10 = vld [vmem:[#allocation25_spill] sm:$0xff] }
 0x241   : > { %6153 = vrot.lane.b32.xlu0 %v7800_v8, %s6482_s29  ;;  %v4406_v43 = vpop.permute.xlu0 %4405  ;;  %v4329_v7 = vadd.f32 1.0, %v9350_v50  ;;  %v4330_v59 = vadd.f32 1.0, %v9351_v10  ;;  %v4364_v44 = vadd.f32 %v5710_v21, %v4348_v51  ;;  %v2819_v16 = vmul.f32 %v7704_v53, %v2803_v40  ;;  %v9352_v50 = vld [vmem:[#allocation89_spill] sm:$0xff] }
 0x242   : > { %v4454_v8 = vsub.f32 %v4438_v29, %v8246_v27  ;;  %v5546_v29 = vunpack.c.h.bf16 %v5762_v63  ;;  %v5705_v63 = vunpack.c.l.bf16 %v5802_v15  ;;  %v2809_v10 = vadd.f32 1.0, %v7689_v32 }
 0x243   : > { %6138 = vrot.lane.b32.xlu1 %v7691_v48, %s6482_s29  ;;  %v2881_v31 = vpop.permute.xlu1 %2880  ;;  %v2818_v48 = vmul.f32 %v7704_v53, %v2802_v35  ;;  %v4443_v35 = vadd.f32 %v4406_v43, %v4363_v62  ;;  %v4345_v51 = vmul.f32 %v7704_v53, %v4329_v7  ;;  %v4346_v40 = vmul.f32 %v7704_v53, %v4330_v59  ;;  %v5765_v53 = vld [vmem:[%s6717_s24 + $0x78] sm:$0xff]  }
 0x244   : > { %v8267_v45 = vpack.i.bf16 %v4454_v8, %v4453_v41  ;;  %v2917_v6 = vadd.f32 %v2881_v31, %v2837_v24  ;;  %v2808_v7 = vadd.f32 1.0, %v9352_v50  ;;  %vm3628_vm12 = vcmask 523264  }
 0x245   : > { %6163 = vrot.lane.b32.xlu0 %v7859_v11, %s6482_s29  ;;  %v2875_v5 = vpop.permute.xlu0 %2874  ;;  %v8274_v11 = vld [vmem:[%s6712_s11 + $0x50] sm:$0xff]  ;;  %v2834_v14 = vadd.f32 %v5545_v23, %v2818_v48  ;;  %v2835_v23 = vadd.f32 %v5546_v29, %v2819_v16  ;;  %v4361_v62 = vadd.f32 %v5705_v63, %v4345_v51  ;;  %v5557_v16 = vunpack.c.l.bf16 %v5765_v53 }
 0x246   : > { %v2932_v38 = vsub.f32 %v2916_v20, %v8274_v11  ;;  %v2933_v41 = vsub.f32 %v2917_v6, %v8278_v57  ;;  %v5706_v20 = vunpack.c.h.bf16 %v5802_v15  ;;  %v4459_v24 = vsub.f32 %v4443_v35, %v8274_v11 }
 0x247   : > { %6148 = vrot.lane.b32.xlu1 %v7762_v2, %s6482_s29  ;;  %v4408_v8 = vpop.permute.xlu1 %4407  ;;  %v2914_v31 = vadd.f32 %v2875_v5, %v2834_v14  ;;  %v8302_v5 = vld [vmem:[%s6712_s11 + $0x40] sm:$0xff]  ;;  %v4335_v35 = vadd.f32 1.0, %v7667_v61  ;;  %v5805_v61 = vld [vmem:[%s6717_s24 + $0x1b8] sm:$0xff]   ;;  %vm3645_vm13 = vcmask 785408  }
 0x248   : > { %v8284_v2 = vpack.i.bf16 %v2933_v41, %v2932_v38  ;;  %v4444_v21 = vadd.f32 %v4408_v8, %v4364_v44  ;;  %v4362_v38 = vadd.f32 %v5706_v20, %v4346_v40  ;;  %v8315_v14 = vld [vmem:[%s9056_s5] ss:$0 sm:$0xff]  ;;  %v2806_v40 = vadd.f32 1.0, %v7680_v17 }
 0x249   : > { %6173 = vrot.lane.b32.xlu0 %v8065_v4, %s6482_s29  ;;  %v2930_v44 = vsub.f32 %v2914_v31, %v8302_v5  ;;  %v2824_v8 = vmul.f32 %v8315_v14, %v2808_v7  ;;  %v2825_v20 = vmul.f32 %v8315_v14, %v2809_v10  ;;  %v5718_v50 = vunpack.c.h.bf16 %v5805_v61  ;;  %v9353_v10 = vld [vmem:[#allocation32_spill] sm:$0xff] }
 0x24a   : > { %v4460_v4 = vsub.f32 %v4444_v21, %v8278_v57  ;;  %v4336_v21 = vadd.f32 1.0, %v7713_v26  ;;  %v2807_v17 = vadd.f32 1.0, %v7726_v49 }
 0x24b   : > { %6158 = vrot.lane.b32.xlu1 %v7830_v9, %s6482_s29  ;;  %v4402_v43 = vpop.permute.xlu0 %4401  ;;  %v2877_v48 = vpop.permute.xlu1 %2876  ;;  %v2840_v31 = vadd.f32 %v5557_v16, %v2824_v8 }
 0x24c   : > { %v8295_v9 = vpack.i.bf16 %v4460_v4, %v4459_v24  ;;  %v2915_v6 = vadd.f32 %v2877_v48, %v2835_v23  ;;  %v4441_v15 = vadd.f32 %v4402_v43, %v4361_v62  ;;  %v5558_v43 = vunpack.c.h.bf16 %v5765_v53  ;;  %v5764_v23 = vld [vmem:[%s6717_s24 + $0x70] sm:$0xff]  }
 0x24d   : > { %6188 = vrot.lane.b32.xlu0 %v8160_v19, %s6482_s29  ;;  %v8306_v19 = vld [vmem:[%s6712_s11 + $0x48] sm:$0xff]  ;;  %v5717_v4 = vunpack.c.l.bf16 %v5805_v61  ;;  %v4352_v7 = vmul.f32 %v8315_v14, %v4336_v21 }
 0x24e   : > { %v2931_v29 = vsub.f32 %v2915_v6, %v8306_v19  ;;  %v2841_v6 = vadd.f32 %v5558_v43, %v2825_v20 }
 0x24f   : > { %6168 = vrot.lane.b32.xlu1 %v7993_v34, %s6482_s29  ;;  %v2887_v59 = vpop.permute.xlu0 %2886  ;;  %v4404_v41 = vpop.permute.xlu1 %4403 }
 0x250   : > { %v6227_v32 = vpack.i.bf16 %v2931_v29, %v2930_v44  ;;  %v4442_v34 = vadd.f32 %v4404_v41, %v4362_v38  ;;  %v2920_v62 = vadd.f32 %v2887_v59, %v2840_v31  ;;  %v2822_v29 = vmul.f32 %v8315_v14, %v2806_v40  ;;  %v5804_v38 = vld [vmem:[%s6717_s24 + $0x1b0] sm:$0xff]  }
 0x251   : > { %6193 = vrot.lane.b32.xlu0 %v8186_v0, %s6481_s16  ;;  %v4457_v0 = vsub.f32 %v4441_v15, %v8302_v5  ;;  %v5553_v15 = vunpack.c.l.bf16 %v5764_v23  ;;  %v4368_v59 = vadd.f32 %v5718_v50, %v4352_v7  ;;  %v5554_v41 = vunpack.c.h.bf16 %v5764_v23 }
 0x252   : > { %v4458_v51 = vsub.f32 %v4442_v34, %v8306_v19  ;;  %v2936_v34 = vsub.f32 %v2920_v62, %v7966_v46  ;;  %v5713_v21 = vunpack.c.l.bf16 %v5804_v38  ;;  %v3037_v23 = vadd.f32 1.0, %v7736_v33 }
 0x253   : > { %6178 = vrot.lane.b32.xlu1 %v8092_v54, %s6482_s29  ;;  %v4414_v63 = vpop.permute.xlu0 %4413  ;;  %v8326_v24 = vpop.permute.xlu1 %6098  ;;  %v4351_v54 = vmul.f32 %v8315_v14, %v4335_v35  ;;  %v4334_v35 = vadd.f32 1.0, %v7745_v36 }
 0x254   : > { %v6232_v26 = vpack.i.bf16 %v4458_v51, %v4457_v0  ;;  %v2838_v0 = vadd.f32 %v5553_v15, %v2822_v29 }
 0x255   : > { %6208 = vrot.lane.b32.xlu0 %v8253_v58, %s6482_s29  ;;  %v4333_v58 = vadd.f32 1.0, %v9353_v10  ;;  %v4367_v44 = vadd.f32 %v5717_v4, %v4351_v54  ;;  %v4350_v20 = vmul.f32 %v8315_v14, %v4334_v35  ;;  %v3053_v35 = vmul.f32 %v8315_v14, %v3037_v23 }
 0x257   : > { %6183 = vrot.lane.b32.xlu1 %v8121_v30, %s6481_s16  ;;  %v2883_v48 = vpop.permute.xlu0 %2882  ;;  %v2889_v53 = vpop.permute.xlu1 %2888  ;;  %v4447_v16 = vadd.f32 %v4414_v63, %v4367_v44  ;;  %v4349_v36 = vmul.f32 %v8315_v14, %v4333_v58  ;;  %v5714_v63 = vunpack.c.h.bf16 %v5804_v38  ;;  %v9356_v58 = vld [vmem:[#allocation65_spill] sm:$0xff] }
 0x258   : > { %v2921_v30 = vadd.f32 %v2889_v53, %v2841_v6  ;;  %v2918_v31 = vadd.f32 %v2883_v48, %v2838_v0  ;;  %v5767_v6 = vld [vmem:[%s6717_s24 + $0x88] sm:$0xff]   ;;  %v9355_v48 = vld [vmem:[#allocation59_spill] sm:$0xff] }
 0x259   : > { %6213 = vrot.lane.b32.xlu0 %v8267_v45, %s6481_s16  ;;  %v2823_v45 = vmul.f32 %v8315_v14, %v2807_v17  ;;  %v4463_v40 = vsub.f32 %v4447_v16, %v7966_v46  ;;  %v4365_v50 = vadd.f32 %v5713_v21, %v4349_v36  ;;  %v9354_v17 = vld [vmem:[#allocation95_spill] sm:$0xff]  ;;  %v4366_v44 = vadd.f32 %v5714_v63, %v4350_v20  ;;  %v9359_v21 = vld [vmem:[#allocation36_spill] sm:$0xff] }
 0x25a   : > { %v2937_v8 = vsub.f32 %v2921_v30, %v7970_v3  ;;  %v3038_v62 = vadd.f32 1.0, %v9354_v17  ;;  %v2934_v10 = vsub.f32 %v2918_v31, %v9355_v48  ;;  %v5565_v38 = vunpack.c.l.bf16 %v5767_v6  ;;  %v9360_v20 = vld [vmem:[#allocation100_spill] sm:$0xff]  ;;  %v5766_v31 = vld [vmem:[%s6717_s24 + $0x80] sm:$0xff]  }
 0x25b   : > { %6198 = vrot.lane.b32.xlu1 %v8212_v28, %s6482_s29  ;;  %v4410_v49 = vpop.permute.xlu0 %4409 }
 0x25c   : > { %v4416_v61 = vpop.permute.xlu1 %4415  ;;  %v6237_v51 = vpack.i.bf16 %v2937_v8, %v2936_v34  ;;  %v5566_v8 = vunpack.c.h.bf16 %v5767_v6 }
 0x25d   : > { %6228 = vrot.lane.b32.xlu0 %v6227_v32, %s6482_s29  ;;  %v4448_v43 = vadd.f32 %v4416_v61, %v4368_v59  ;;  %v2839_v32 = vadd.f32 %v5554_v41, %v2823_v45  ;;  %v9358_v59 = vld [vmem:[#allocation99_spill] sm:$0xff]  ;;  %v3054_v45 = vmul.f32 %v8315_v14, %v3038_v62  ;;  %v3035_v61 = vadd.f32 1.0, %v9359_v21 }
 0x25e   : > { %v4565_v41 = vadd.f32 1.0, %v9358_v59 }
 0x25f   : > { %6203 = vrot.lane.b32.xlu1 %v8234_v60, %s6481_s16  ;;  %v8351_v28 = vpop.permute.xlu0 %6103  ;;  %v4464_v4 = vsub.f32 %v4448_v43, %v7970_v3  ;;  %v4445_v3 = vadd.f32 %v4410_v49, %v4365_v50  ;;  %v3069_v43 = vadd.f32 %v5565_v38, %v3053_v35 }
 0x260   : > { %v2885_v54 = vpop.permute.xlu1 %2884  ;;  %v4581_v50 = vmul.f32 %v8315_v14, %v4565_v41 }
 0x261   : > { %6233 = vrot.lane.b32.xlu0 %v6232_v26, %s6481_s16  ;;  %v6242_v7 = vpack.i.bf16 %v4464_v4, %v4463_v40  ;;  %v2919_v60 = vadd.f32 %v2885_v54, %v2839_v32  ;;  %v9357_v26 = vld [vmem:[#allocation94_spill] sm:$0xff]  ;;  %v4461_v49 = vsub.f32 %v4445_v3, %v9355_v48  ;;  %v3036_v40 = vadd.f32 1.0, %v9360_v20 }
 0x262   : > { %v4564_v15 = vadd.f32 1.0, %v9357_v26  ;;  %v3070_v54 = vadd.f32 %v5566_v8, %v3054_v45  ;;  %v5561_v48 = vunpack.c.l.bf16 %v5766_v31 }
 0x263   : > { %6218 = vrot.lane.b32.xlu1 %v8284_v2, %s6482_s29  ;;  %v3104_v46 = vpop.permute.xlu0 %3103  ;;  %v2935_v53 = vsub.f32 %v2919_v60, %v9356_v58  ;;  %v5807_v2 = vld [vmem:[%s6717_s24 + $0x1c8] sm:$0xff]   ;;  %v9361_v60 = vld [vmem:[#allocation97_spill] sm:$0xff]  ;;  %v3052_v26 = vmul.f32 %v8315_v14, %v3036_v40 }
 0x264   : > { %v4412_v33 = vpop.permute.xlu1 %4411  ;;  %v5725_v63 = vunpack.c.l.bf16 %v5807_v2  ;;  %v3149_v32 = vadd.f32 %v3104_v46, %v3069_v43  ;;  %v5726_v23 = vunpack.c.h.bf16 %v5807_v2  ;;  %v4562_v17 = vadd.f32 1.0, %v9361_v60  ;;  %v9363_v43 = vld [vmem:[#allocation102_spill] sm:$0xff]  ;;  %v9365_v60 = vld [vmem:[#allocation105_spill] sm:$0xff] }
 0x265   : > { %v6247_v29 = vpack.i.bf16 %v2935_v53, %v2934_v10  ;;  %v4446_v30 = vadd.f32 %v4412_v33, %v4366_v44  ;;  %v3051_v10 = vmul.f32 %v8315_v14, %v3035_v61  ;;  %v9362_v53 = vld [vmem:[#allocation104_spill] sm:$0xff]  ;;  %v5562_v44 = vunpack.c.h.bf16 %v5766_v31  ;;  %v9364_v31 = vld [vmem:[#allocation41_spill] sm:$0xff] }
 0x266   : > { %v4578_v2 = vmul.f32 %v8315_v14, %v4562_v17  ;;  %v4568_v17 = vadd.f32 1.0, %v9365_v60 }
 0x267   : > { %6223 = vrot.lane.b32.xlu1 %v8295_v9, %s6481_s16  ;;  %v4631_v34 = vpop.permute.xlu0 %4630  ;;  %v4462_v16 = vsub.f32 %v4446_v30, %v9356_v58  ;;  %6248 = vrot.lane.b32.xlu0 %v6247_v29, %s6482_s29  ;;  %v4580_v9 = vmul.f32 %v8315_v14, %v4564_v15  ;;  %v5806_v58 = vld [vmem:[%s6717_s24 + $0x1c0] sm:$0xff]   ;;  %v3165_v15 = vsub.f32 %v3149_v32, %v8077_v55  ;;  %v3042_v32 = vadd.f32 1.0, %v9364_v31 }
 0x268   : > { %v4597_v30 = vadd.f32 %v5726_v23, %v4581_v50  ;;  %v5721_v38 = vunpack.c.l.bf16 %v5806_v58  ;;  %v3067_v59 = vadd.f32 %v5561_v48, %v3051_v10  ;;  %v3068_v61 = vadd.f32 %v5562_v44, %v3052_v26  ;;  %v9370_v31 = vld [vmem:[#allocation3_spill] sm:$0xff] }
 0x269   : > { %v8375_v0 = vpop.permute.xlu1 %6108  ;;  %v6252_v36 = vpack.i.bf16 %v4462_v16, %v4461_v49  ;;  %v4596_v6 = vadd.f32 %v5725_v63, %v4580_v9  ;;  %v3041_v63 = vadd.f32 1.0, %v9363_v43 }
 0x26a   : > { %v4594_v9 = vadd.f32 %v5721_v38, %v4578_v2  ;;  %v4584_v2 = vmul.f32 %v8315_v14, %v4568_v17 }
 0x26b   : > { %6238 = vrot.lane.b32.xlu1 %v6237_v51, %s6482_s29  ;;  %v3100_v4 = vpop.permute.xlu0 %3099  ;;  %6253 = vrot.lane.b32.xlu0 %v6252_v36, %s6481_s16  ;;  %v4563_v51 = vadd.f32 1.0, %v9362_v53  ;;  %v4676_v33 = vadd.f32 %v4631_v34, %v4596_v6 }
 0x26c   : > { %v3147_v21 = vadd.f32 %v3100_v4, %v3067_v59 }
 0x26d   : > { %v3106_v62 = vpop.permute.xlu1 %3105  ;;  %v4579_v8 = vmul.f32 %v8315_v14, %v4563_v51  ;;  %v4692_v45 = vsub.f32 %v4676_v33, %v8077_v55  ;;  %v5809_v51 = vld [vmem:[%s6717_s24 + $0x1d8] sm:$0xff]   ;;  %v3058_v33 = vmul.f32 %v8315_v14, %v3042_v32  ;;  %v4567_v32 = vadd.f32 1.0, %v9370_v31 }
 0x26e   : > { %v3150_v3 = vadd.f32 %v3106_v62, %v3070_v54  ;;  %v5769_v54 = vld [vmem:[%s6717_s24 + $0x98] sm:$0xff]   ;;  %v3163_v50 = vsub.f32 %v3147_v21, %v8141_v52  ;;  %v5734_v21 = vunpack.c.h.bf16 %v5809_v51 }
 0x26f   : > { %6243 = vrot.lane.b32.xlu1 %v6242_v7, %s6481_s16  ;;  %v4627_v46 = vpop.permute.xlu0 %4626  ;;  %v5722_v7 = vunpack.c.h.bf16 %v5806_v58  ;;  %v5573_v10 = vunpack.c.l.bf16 %v5769_v54  ;;  %v9366_v58 = vld [vmem:[#allocation108_spill] sm:$0xff] }
 0x270   : > { %v3166_v29 = vsub.f32 %v3150_v3, %v8081_v12  ;;  %v4674_v55 = vadd.f32 %v4627_v46, %v4594_v9  ;;  %v3057_v3 = vmul.f32 %v8315_v14, %v3041_v63  ;;  %v4569_v53 = vadd.f32 1.0, %v9366_v58  ;;  %v9369_v63 = vld [vmem:[#allocation107_spill] sm:$0xff] }
 0x271   : > { %v4633_v35 = vpop.permute.xlu1 %4632  ;;  %v4566_v9 = vadd.f32 1.0, %v9369_v63 }
 0x272   : > { %v6257_v41 = vpack.i.bf16 %v3166_v29, %v3165_v15  ;;  %v4677_v49 = vadd.f32 %v4633_v35, %v4597_v30  ;;  %v4690_v46 = vsub.f32 %v4674_v55, %v8141_v52  ;;  %v5574_v15 = vunpack.c.h.bf16 %v5769_v54  ;;  %v9367_v29 = vld [vmem:[#allocation40_spill] sm:$0xff]  ;;  %v5808_v54 = vld [vmem:[%s6717_s24 + $0x1d0] sm:$0xff]  }
 0x273   : > { %v8392_v16 = vpop.permute.xlu0 %6113  ;;  %v3039_v30 = vadd.f32 1.0, %v9367_v29  ;;  %v3073_v59 = vadd.f32 %v5573_v10, %v3057_v3  ;;  %v5729_v10 = vunpack.c.l.bf16 %v5808_v54  ;;  %v4582_v3 = vmul.f32 %v8315_v14, %v4566_v9 }
 0x274   : > { %v4693_v34 = vsub.f32 %v4677_v49, %v8081_v12  ;;  %6258 = vrot.lane.b32.xlu1 %v6257_v41, %s6481_s16  ;;  %v4595_v12 = vadd.f32 %v5722_v7, %v4579_v8  ;;  %v5733_v41 = vunpack.c.l.bf16 %v5809_v51  ;;  %v5768_v49 = vld [vmem:[%s6717_s24 + $0x90] sm:$0xff]   ;;  %v9368_v7 = vld [vmem:[#allocation43_spill] sm:$0xff]  ;;  %v5730_v51 = vunpack.c.h.bf16 %v5808_v54 }
 0x275   : > { %v3102_v36 = vpop.permute.xlu1 %3101  ;;  %v3040_v52 = vadd.f32 1.0, %v9368_v7  ;;  %v5570_v55 = vunpack.c.h.bf16 %v5768_v49 }
 0x276   : > { %v6262_v20 = vpack.i.bf16 %v4693_v34, %v4692_v45  ;;  %v3148_v40 = vadd.f32 %v3102_v36, %v3068_v61  ;;  %v3074_v45 = vadd.f32 %v5574_v15, %v3058_v33  ;;  %v4585_v34 = vmul.f32 %v8315_v14, %v4569_v53 }
 0x277   : > { %v3112_v23 = vpop.permute.xlu0 %3111  ;;  %v5569_v61 = vunpack.c.l.bf16 %v5768_v49  ;;  %v3055_v36 = vmul.f32 %v8315_v14, %v3039_v30  ;;  %v9371_v30 = vld [vmem:[#allocation55_spill] sm:$0xff]  ;;  %v9372_v49 = vld [vmem:[#allocation62_spill] sm:$0xff] }
 0x278   : > { %v3164_v4 = vsub.f32 %v3148_v40, %v8145_v47  ;;  %6263 = vrot.lane.b32.xlu1 %v6262_v20, %s6480_s15  ;;  %v4600_v20 = vadd.f32 %v5733_v41, %v4584_v2  ;;  %v4601_v17 = vadd.f32 %v5734_v21, %v4585_v34  ;;  %v3046_v7 = vadd.f32 1.0, %v9372_v49  ;;  %v9373_v34 = vld [vmem:[#allocation54_spill] sm:$0xff] }
 0x279   : > { %v4629_v62 = vpop.permute.xlu1 %4628 }
 0x27a   : > { %v6267_v6 = vpack.i.bf16 %v3164_v4, %v3163_v50  ;;  %v4675_v48 = vadd.f32 %v4629_v62, %v4595_v12  ;;  %v3071_v62 = vadd.f32 %v5569_v61, %v3055_v36  ;;  %v4572_v61 = vadd.f32 1.0, %v9373_v34 }
 0x27b   : > { %v4639_v44 = vpop.permute.xlu0 %4638 }
 0x27c   : > { %v4691_v26 = vsub.f32 %v4675_v48, %v8145_v47  ;;  %6268 = vrot.lane.b32.xlu0 %v6267_v6, %s6481_s16  ;;  %v3153_v47 = vadd.f32 %v3112_v23, %v3073_v59  ;;  %v3056_v23 = vmul.f32 %v8315_v14, %v3040_v52  ;;  %v4680_v12 = vadd.f32 %v4639_v44, %v4600_v20  ;;  %v5771_v52 = vld [vmem:[%s6717_s24 + $0xa8] sm:$0xff]  }
 0x27d   : > { %v8413_v38 = vpop.permute.xlu1 %6118  ;;  %v4598_v59 = vadd.f32 %v5729_v10, %v4582_v3  ;;  %v5581_v20 = vunpack.c.l.bf16 %v5771_v52  ;;  %v9375_v3 = vld [vmem:[#allocation56_spill] sm:$0xff] }
 0x27e   : > { %v6272_v35 = vpack.i.bf16 %v4691_v26, %v4690_v46  ;;  %v3169_v4 = vsub.f32 %v3153_v47, %v8200_v42  ;;  %v4583_v46 = vmul.f32 %v8315_v14, %v4567_v32  ;;  %v4696_v26 = vsub.f32 %v4680_v12, %v8200_v42  ;;  %v9374_v32 = vld [vmem:[#allocation63_spill] sm:$0xff] }
 0x27f   : > { %v3108_v8 = vpop.permute.xlu0 %3107  ;;  %v3072_v33 = vadd.f32 %v5570_v55, %v3056_v23  ;;  %v4573_v54 = vadd.f32 1.0, %v9374_v32  ;;  %v8452_v23 = vld [vmem:[%s6717_s24 + $0x128] sm:$0xff]   ;;  %v5810_v32 = vld [vmem:[%s6717_s24 + $0x1e0] sm:$0xff]  }
 0x280   : > { %6273 = vrot.lane.b32.xlu0 %v6272_v35, %s6480_s15  ;;  %v3151_v44 = vadd.f32 %v3108_v8, %v3071_v62  ;;  %v3045_v35 = vadd.f32 1.0, %v9371_v30  ;;  %v4599_v21 = vadd.f32 %v5730_v51, %v4583_v46  ;;  %v3062_v62 = vmul.f32 %v8315_v14, %v3046_v7  ;;  %v8468_v46 = vld [vmem:[%s6717_s24 + $0x138] sm:$0xff]  }
 0x281   : > { %v3114_v43 = vpop.permute.xlu1 %3113  ;;  %v5653_v34 = vunpack.c.l.bf16 %v8468_v46 }
 0x282   : > { %v3154_v40 = vadd.f32 %v3114_v43, %v3074_v45  ;;  %v8438_v45 = vld [vmem:[%s6717_s24 + $0x118] sm:$0xff]   ;;  %v3167_v42 = vsub.f32 %v3151_v44, %v8242_v39  ;;  %v8445_v43 = vld [vmem:[%s6717_s24 + $0x110] sm:$0xff]  }
 0x283   : > { %v4635_v50 = vpop.permute.xlu0 %4634  ;;  %v5637_v31 = vunpack.c.l.bf16 %v8438_v45  ;;  %v5634_v10 = vunpack.c.h.bf16 %v8445_v43 }
 0x284   : > { %v3170_v60 = vsub.f32 %v3154_v40, %v8204_v56  ;;  %v3061_v40 = vmul.f32 %v8315_v14, %v3045_v35  ;;  %v5646_v35 = vunpack.c.h.bf16 %v8452_v23 }
 0x285   : > { %v4641_v6 = vpop.permute.xlu1 %4640 }
 0x286   : > { %v6277_v48 = vpack.i.bf16 %v3170_v60, %v3169_v4  ;;  %v4681_v58 = vadd.f32 %v4641_v6, %v4601_v17  ;;  %v8455_v4 = vld [vmem:[%s6717_s24 + $0x120] sm:$0xff]   ;;  %v5582_v17 = vunpack.c.h.bf16 %v5771_v52  ;;  %v5633_v6 = vunpack.c.l.bf16 %v8445_v43 }
 0x287   : > { %v8428_v53 = vpop.permute.xlu0 %6123  ;;  %v3077_v44 = vadd.f32 %v5581_v20, %v3061_v40  ;;  %v5641_v30 = vunpack.c.l.bf16 %v8455_v4 }
 0x288   : > { %v4697_v15 = vsub.f32 %v4681_v58, %v8204_v56  ;;  %6278 = vrot.lane.b32.xlu1 %v6277_v48, %s6481_s16  ;;  %v4678_v56 = vadd.f32 %v4635_v50, %v4598_v59  ;;  %v5811_v50 = vld [vmem:[%s6717_s24 + $0x1e8] sm:$0xff]   ;;  %v5638_v48 = vunpack.c.h.bf16 %v8438_v45  ;;  %v3043_v58 = vadd.f32 1.0, %v9375_v3 }
 0x289   : > { %v3110_v29 = vpop.permute.xlu1 %3109  ;;  %v3044_v59 = vadd.f32 1.0, %v8098_v18  ;;  %v3078_v7 = vadd.f32 %v5582_v17, %v3062_v62  ;;  %v5742_v52 = vunpack.c.h.bf16 %v5811_v50  ;;  %v8483_v18 = vld [vmem:[%s6717_s24 + $0x130] sm:$0xff]  }
 0x28a   : > { %v6282_v41 = vpack.i.bf16 %v4697_v15, %v4696_v26  ;;  %v3152_v2 = vadd.f32 %v3110_v29, %v3072_v33  ;;  %v4694_v12 = vsub.f32 %v4678_v56, %v8242_v39  ;;  %v5741_v15 = vunpack.c.l.bf16 %v5811_v50  ;;  %v9377_v56 = vld [vmem:[#allocation8_spill] sm:$0xff]  ;;  %v9379_v50 = vld [vmem:[#allocation9_spill] sm:$0xff] }
 0x28b   : > { %v3120_v47 = vpop.permute.xlu0 %3119  ;;  %v4588_v33 = vmul.f32 %v8315_v14, %v4572_v61  ;;  %v5645_v29 = vunpack.c.l.bf16 %v8452_v23  ;;  %v9378_v61 = vld [vmem:[#allocation46_spill] sm:$0xff]  ;;  %v3060_v62 = vmul.f32 %v8315_v14, %v3044_v59 }
 0x28c   : > { %v3168_v8 = vsub.f32 %v3152_v2, %v8246_v27  ;;  %6283 = vrot.lane.b32.xlu1 %v6282_v41, %s6480_s15  ;;  %v5770_v41 = vld [vmem:[%s6717_s24 + $0xa0] sm:$0xff]   ;;  %v3157_v49 = vadd.f32 %v3120_v47, %v3077_v44  ;;  %v3059_v47 = vmul.f32 %v8315_v14, %v3043_v58  ;;  %v5649_v58 = vunpack.c.l.bf16 %v8483_v18 }
 0x28d   : > { %v4637_v36 = vpop.permute.xlu1 %4636  ;;  %v5577_v20 = vunpack.c.l.bf16 %v5770_v41  ;;  %v5578_v17 = vunpack.c.h.bf16 %v5770_v41 }
 0x28e   : > { %v6287_v63 = vpack.i.bf16 %v3168_v8, %v3167_v42  ;;  %v4679_v9 = vadd.f32 %v4637_v36, %v4599_v21  ;;  %v4589_v42 = vmul.f32 %v8315_v14, %v4573_v54  ;;  %v3845_v8 = vadd.f32 1.0, %v9377_v56 }
 0x28f   : > { %v4647_v55 = vpop.permute.xlu0 %4646  ;;  %v5642_v21 = vunpack.c.h.bf16 %v8455_v4  ;;  %v4570_v36 = vadd.f32 1.0, %v9378_v61  ;;  %v4571_v54 = vadd.f32 1.0, %v8127_v1  ;;  %v3173_v3 = vsub.f32 %v3157_v49, %v8274_v11 }
 0x290   : > { %v4695_v60 = vsub.f32 %v4679_v9, %v8246_v27  ;;  %6288 = vrot.lane.b32.xlu0 %v6287_v63, %s6481_s16  ;;  %v4604_v9 = vadd.f32 %v5741_v15, %v4588_v33  ;;  %v4605_v15 = vadd.f32 %v5742_v52, %v4589_v42  ;;  %v3861_v33 = vmul.f32 %v8315_v14, %v3845_v8  ;;  %v5773_v8 = vld [vmem:[%s6717_s24 + $0xb8] sm:$0xff]  }
 0x291   : > { %v8465_v51 = vpop.permute.xlu1 %6128  ;;  %v4586_v56 = vmul.f32 %v8315_v14, %v4570_v36  ;;  %v3049_v1 = vadd.f32 1.0, %v8112_v37  ;;  %v3075_v41 = vadd.f32 %v5577_v20, %v3059_v47  ;;  %v5738_v52 = vunpack.c.h.bf16 %v5810_v32  ;;  %v9381_v20 = vld [vmem:[#allocation10_spill] sm:$0xff] }
 0x292   : > { %9376 = vst [vmem:[#allocation68_spill] sm:$0xff] %v8465_v51  ;;  %v6292_v26 = vpack.i.bf16 %v4695_v60, %v4694_v12  ;;  %v3843_v12 = vadd.f32 1.0, %v9379_v50  ;;  %v4587_v42 = vmul.f32 %v8315_v14, %v4571_v54  ;;  %v3076_v37 = vadd.f32 %v5578_v17, %v3060_v62 }
 0x293   : > { %v3116_v2 = vpop.permute.xlu0 %3115  ;;  %v3846_v47 = vadd.f32 1.0, %v9381_v20  ;;  %v4577_v17 = vadd.f32 1.0, %v8184_v13  ;;  %v9383_v13 = vld [vmem:[#allocation67_spill] sm:$0xff] }
 0x294   : > { %6293 = vrot.lane.b32.xlu0 %v6292_v26, %s6480_s15  ;;  %v4684_v26 = vadd.f32 %v4647_v55, %v4604_v9  ;;  %v3859_v49 = vmul.f32 %v8315_v14, %v3843_v12  ;;  %v3050_v55 = vadd.f32 1.0, %v8157_v25  ;;  %v3155_v36 = vadd.f32 %v3116_v2, %v3075_v41 }
 0x295   : > { %v3122_v63 = vpop.permute.xlu1 %3121  ;;  %v8508_v25 = vadd.f32 %v5637_v31, %v3861_v33  ;;  %v3065_v2 = vmul.f32 %v8315_v14, %v3049_v1  ;;  %v3862_v1 = vmul.f32 %v8315_v14, %v3846_v47 }
 0x296   : > { %v3158_v40 = vadd.f32 %v3122_v63, %v3078_v7  ;;  %v5737_v7 = vunpack.c.l.bf16 %v5810_v32  ;;  %v4576_v32 = vadd.f32 1.0, %v8137_v22  ;;  %v3066_v31 = vmul.f32 %v8315_v14, %v3050_v55 }
 0x297   : > { %v4643_v60 = vpop.permute.xlu0 %4642  ;;  %v3171_v33 = vsub.f32 %v3155_v36, %v8302_v5  ;;  %v5772_v36 = vld [vmem:[%s6717_s24 + $0xb0] sm:$0xff]  }
 0x298   : > { %v3174_v44 = vsub.f32 %v3158_v40, %v8278_v57  ;;  %v4700_v40 = vsub.f32 %v4684_v26, %v8274_v11  ;;  %v4602_v12 = vadd.f32 %v5737_v7, %v4586_v56  ;;  %v5813_v26 = vld [vmem:[%s6717_s24 + $0x1f8] sm:$0xff]   ;;  %v4603_v56 = vadd.f32 %v5738_v52, %v4587_v42 }
 0x299   : > { %v4649_v61 = vpop.permute.xlu1 %4648 }
 0x29a   : > { %v6297_v63 = vpack.i.bf16 %v3174_v44, %v3173_v3  ;;  %v4685_v59 = vadd.f32 %v4649_v61, %v4605_v15  ;;  %v5589_v15 = vunpack.c.l.bf16 %v5773_v8  ;;  %v9382_v61 = vld [vmem:[#allocation11_spill] sm:$0xff]  ;;  %v4682_v22 = vadd.f32 %v4643_v60, %v4602_v12 }
 0x29b   : > { %v8498_v9 = vpop.permute.xlu0 %6133  ;;  %v3844_v41 = vadd.f32 1.0, %v9382_v61  ;;  %v4592_v60 = vmul.f32 %v8315_v14, %v4576_v32  ;;  %v8536_v61 = vadd.f32 %v5638_v48, %v3862_v1  ;;  %v8545_v48 = vld [vmem:[%s6712_s11 + $0x70] sm:$0xff] }
 0x29c   : > { %9380 = vst [vmem:[#allocation74_spill] sm:$0xff] %v8498_v9  ;;  %v4701_v50 = vsub.f32 %v4685_v59, %v8278_v57  ;;  %6298 = vrot.lane.b32.xlu1 %v6297_v63, %s6481_s16  ;;  %v5590_v63 = vunpack.c.h.bf16 %v5773_v8  ;;  %v8522_v59 = vadd.f32 %v5633_v6, %v3859_v49  ;;  %v3081_v20 = vadd.f32 %v5589_v15, %v3065_v2  ;;  %v9385_v2 = vld [vmem:[#allocation12_spill] sm:$0xff]  ;;  %v9424_v9 = vld [vmem:[#allocation30_spill] sm:$0xff] }
 0x29d   : > { %v3118_v54 = vpop.permute.xlu1 %3117  ;;  %v3860_v12 = vmul.f32 %v8315_v14, %v3844_v41  ;;  %v4698_v6 = vsub.f32 %v4682_v22, %v8302_v5  ;;  %v4593_v15 = vmul.f32 %v8315_v14, %v4577_v17  ;;  %v3849_v32 = vadd.f32 1.0, %v9385_v2  ;;  %v9386_v41 = vld [vmem:[#allocation66_spill] sm:$0xff]  ;;  %9389 = vst [vmem:[#allocation71_spill] sm:$0xff] %v8545_v48 }
 0x29e   : > { %v6302_v3 = vpack.i.bf16 %v4701_v50, %v4700_v40  ;;  %v3156_v44 = vadd.f32 %v3118_v54, %v3076_v37  ;;  %v3047_v40 = vadd.f32 1.0, %v9383_v13  ;;  %v5749_v50 = vunpack.c.l.bf16 %v5813_v26  ;;  %v9384_v54 = vld [vmem:[#allocation48_spill] sm:$0xff]  ;;  %v9387_v13 = vld [vmem:[#allocation13_spill] sm:$0xff]  ;;  %v8549_v2 = vld [vmem:[%s6712_s11 + $0x78] sm:$0xff] }
 0x29f   : > { %v3128_v62 = vpop.permute.xlu0 %3127  ;;  %v3048_v52 = vadd.f32 1.0, %v9384_v54  ;;  %v3082_v47 = vadd.f32 %v5590_v63, %v3066_v31  ;;  %v4574_v63 = vadd.f32 1.0, %v9386_v41  ;;  %v5585_v31 = vunpack.c.l.bf16 %v5772_v36  ;;  %9390 = vst [vmem:[#allocation77_spill] sm:$0xff] %v8549_v2 }
 0x2a0   : > { %v3172_v7 = vsub.f32 %v3156_v44, %v8306_v19  ;;  %6303 = vrot.lane.b32.xlu1 %v6302_v3, %s6480_s15  ;;  %v5750_v3 = vunpack.c.h.bf16 %v5813_v26  ;;  %v3161_v44 = vadd.f32 %v3128_v62, %v3081_v20  ;;  %v4608_v22 = vadd.f32 %v5749_v50, %v4592_v60 }
 0x2a1   : > { %v4645_v8 = vpop.permute.xlu1 %4644  ;;  %v3063_v62 = vmul.f32 %v8315_v14, %v3047_v40  ;;  %v3847_v17 = vadd.f32 1.0, %v9387_v13  ;;  %v5586_v20 = vunpack.c.h.bf16 %v5772_v36  ;;  %v3064_v45 = vmul.f32 %v8315_v14, %v3048_v52 }
 0x2a2   : > { %v6307_v37 = vpack.i.bf16 %v3172_v7, %v3171_v33  ;;  %v4683_v55 = vadd.f32 %v4645_v8, %v4603_v56  ;;  %v5812_v56 = vld [vmem:[%s6717_s24 + $0x1f0] sm:$0xff]   ;;  %v9388_v8 = vld [vmem:[#allocation70_spill] sm:$0xff]  ;;  %v3177_v1 = vsub.f32 %v3161_v44, %v8545_v48  ;;  %v4609_v40 = vadd.f32 %v5750_v3, %v4593_v15 }
 0x2a3   : > { %v4655_v42 = vpop.permute.xlu0 %4654  ;;  %v3865_v60 = vmul.f32 %v8315_v14, %v3849_v32  ;;  %v5745_v52 = vunpack.c.l.bf16 %v5812_v56  ;;  %v3079_v13 = vadd.f32 %v5585_v31, %v3063_v62  ;;  %v3863_v44 = vmul.f32 %v8315_v14, %v3847_v17  ;;  %v9393_v62 = vld [vmem:[#allocation17_spill] sm:$0xff] }
 0x2a4   : > { %v4699_v49 = vsub.f32 %v4683_v55, %v8306_v19  ;;  %6308 = vrot.lane.b32.xlu0 %v6307_v37, %s6481_s16  ;;  %v4575_v37 = vadd.f32 1.0, %v9388_v8  ;;  %v4688_v54 = vadd.f32 %v4655_v42, %v4608_v22  ;;  %v4590_v42 = vmul.f32 %v8315_v14, %v4574_v63 }
 0x2a5   : > { %v3130_v26 = vpop.permute.xlu1 %3129  ;;  %v3876_v22 = vadd.f32 %v5634_v10, %v3860_v12  ;;  %v3080_v3 = vadd.f32 %v5586_v20, %v3064_v45  ;;  %v5746_v15 = vunpack.c.h.bf16 %v5812_v56  ;;  %v3851_v17 = vadd.f32 1.0, %v9393_v62 }
 0x2a6   : > { %v6312_v33 = vpack.i.bf16 %v4699_v49, %v4698_v6  ;;  %v3162_v7 = vadd.f32 %v3130_v26, %v3082_v47  ;;  %v9391_v47 = vld [vmem:[#allocation14_spill] sm:$0xff]  ;;  %v9392_v49 = vld [vmem:[#allocation15_spill] sm:$0xff]  ;;  %v4704_v32 = vsub.f32 %v4688_v54, %v8545_v48  ;;  %v4591_v31 = vmul.f32 %v8315_v14, %v4575_v37  ;;  %v9395_v54 = vld [vmem:[#allocation16_spill] sm:$0xff] }
 0x2a7   : > { %v3124_v55 = vpop.permute.xlu0 %3123  ;;  %v3850_v6 = vadd.f32 1.0, %v9391_v47  ;;  %v3848_v36 = vadd.f32 1.0, %v9392_v49  ;;  %v3881_v10 = vadd.f32 %v5645_v29, %v3865_v60  ;;  %v4606_v20 = vadd.f32 %v5745_v52, %v4590_v42  ;;  %v9396_v37 = vld [vmem:[#allocation60_spill] sm:$0xff] }
 0x2a8   : > { %v3178_v50 = vsub.f32 %v3162_v7, %v8549_v2  ;;  %6313 = vrot.lane.b32.xlu0 %v6312_v33, %s6480_s15  ;;  %v3159_v7 = vadd.f32 %v3124_v55, %v3079_v13  ;;  %v9397_v49 = vld [vmem:[#allocation64_spill] sm:$0xff]  ;;  %v8579_v13 = vld [vmem:[%s6712_s11 + $0x60] sm:$0xff] }
 0x2a9   : > { %v4657_v41 = vpop.permute.xlu1 %4656  ;;  %v3864_v63 = vmul.f32 %v8315_v14, %v3848_v36  ;;  %v3866_v56 = vmul.f32 %v8315_v14, %v3850_v6  ;;  %v3956_v36 = vadd.f32 %v9397_v49, %v3876_v22  ;;  %9398 = vst [vmem:[#allocation75_spill] sm:$0xff] %v8579_v13  ;;  %v8583_v6 = vld [vmem:[%s6712_s11 + $0x68] sm:$0xff] }
 0x2aa   : > { %v6317_v26 = vpack.i.bf16 %v3178_v50, %v3177_v1  ;;  %v4689_v8 = vadd.f32 %v4657_v41, %v4609_v40  ;;  %v9394_v1 = vld [vmem:[#allocation19_spill] sm:$0xff]  ;;  %v3853_v50 = vadd.f32 1.0, %v9395_v54  ;;  %v3955_v40 = vadd.f32 %v9396_v37, %v8522_v59  ;;  %9399 = vst [vmem:[#allocation79_spill] sm:$0xff] %v8583_v6 }
 0x2ab   : > { %v4651_v33 = vpop.permute.xlu0 %4650  ;;  %v3852_v43 = vadd.f32 1.0, %v9394_v1  ;;  %v3879_v41 = vadd.f32 %v5641_v30, %v3863_v44  ;;  %v3175_v29 = vsub.f32 %v3159_v7, %v8579_v13  ;;  %v3867_v59 = vmul.f32 %v8315_v14, %v3851_v17  ;;  %v9402_v1 = vld [vmem:[#allocation76_spill] sm:$0xff] }
 0x2ac   : > { %v4705_v47 = vsub.f32 %v4689_v8, %v8549_v2  ;;  %6318 = vrot.lane.b32.xlu1 %v6317_v26, %s6481_s16  ;;  %v4686_v60 = vadd.f32 %v4651_v33, %v4606_v20  ;;  %v4607_v8 = vadd.f32 %v5746_v15, %v4591_v31  ;;  %v3880_v30 = vadd.f32 %v5642_v21, %v3864_v63  ;;  %v9401_v31 = vld [vmem:[#allocation72_spill] sm:$0xff] }
 0x2ad   : > { %v3126_v12 = vpop.permute.xlu1 %3125  ;;  %v3868_v42 = vmul.f32 %v8315_v14, %v3852_v43  ;;  %v5650_v44 = vunpack.c.h.bf16 %v8483_v18  ;;  %v3882_v33 = vadd.f32 %v5646_v35, %v3866_v56  ;;  %v3971_v62 = vsub.f32 %v3955_v40, %v8242_v39  ;;  %v9403_v35 = vld [vmem:[#allocation57_spill] sm:$0xff] }
 0x2ae   : > { %v6332_v55 = vpack.i.bf16 %v4705_v47, %v4704_v32  ;;  %v3160_v45 = vadd.f32 %v3126_v12, %v3080_v3  ;;  %v9400_v3 = vld [vmem:[#allocation18_spill] sm:$0xff]  ;;  %v3972_v15 = vsub.f32 %v3956_v36, %v8246_v27  ;;  %v3959_v17 = vadd.f32 %v9401_v31, %v3879_v41  ;;  %v9404_v39 = vld [vmem:[#allocation61_spill] sm:$0xff] }
 0x2af   : > { %v8576_v26 = vpop.permute.xlu0 %6143  ;;  %v3854_v32 = vadd.f32 1.0, %v9400_v3  ;;  %v3960_v43 = vadd.f32 %v9402_v1, %v3880_v30  ;;  %v4702_v21 = vsub.f32 %v4686_v60, %v8579_v13  ;;  %v3957_v56 = vadd.f32 %v9403_v35, %v8508_v25  ;;  %v8629_v30 = vld [vmem:[%s6712_s11 + $0x38] sm:$0xff]  ;;  %v9410_v35 = vld [vmem:[#allocation85_spill] sm:$0xff] }
 0x2b0   : > { %v3176_v52 = vsub.f32 %v3160_v45, %v8583_v6  ;;  %6333 = vrot.lane.b32.xlu1 %v6332_v55, %s6480_s15  ;;  %v3958_v55 = vadd.f32 %v9404_v39, %v8536_v61  ;;  %v3883_v27 = vadd.f32 %v5649_v58, %v3867_v59  ;;  %v3884_v20 = vadd.f32 %v5650_v44, %v3868_v42  ;;  %v9405_v61 = vld [vmem:[#allocation84_spill] sm:$0xff]  ;;  %v9406_v58 = vld [vmem:[#allocation86_spill] sm:$0xff]  ;;  %v8625_v59 = vld [vmem:[%s6712_s11 + $0x30] sm:$0xff] }
 0x2b1   : > { %v4653_v22 = vpop.permute.xlu1 %4652  ;;  %v3869_v54 = vmul.f32 %v8315_v14, %v3853_v50  ;;  %v3870_v25 = vmul.f32 %v8315_v14, %v3854_v32  ;;  %v5654_v18 = vunpack.c.h.bf16 %v8468_v46  ;;  %v3975_v60 = vsub.f32 %v3959_v17, %v8302_v5  ;;  %v9408_v32 = vld [vmem:[#allocation73_spill] sm:$0xff] }
 0x2b2   : > { %v6322_v7 = vpack.i.bf16 %v3176_v52, %v3175_v29  ;;  %v4687_v47 = vadd.f32 %v4653_v22, %v4607_v8  ;;  %v3963_v36 = vadd.f32 %v9405_v61, %v3883_v27  ;;  %v3964_v41 = vadd.f32 %v9406_v58, %v3884_v20  ;;  %v9407_v22 = vld [vmem:[#allocation69_spill] sm:$0xff] }
 0x2b3   : > { %v6154_v4 = vpop.permute.xlu0 %6153  ;;  %v3976_v50 = vsub.f32 %v3960_v43, %v8306_v19  ;;  %v3973_v42 = vsub.f32 %v3957_v56, %v8625_v59  ;;  %v3974_v44 = vsub.f32 %v3958_v55, %v8629_v30  ;;  %v3961_v3 = vadd.f32 %v9407_v22, %v3881_v10  ;;  %v9409_v46 = vld [vmem:[#allocation81_spill] sm:$0xff] }
 0x2b4   : > { %v4703_v63 = vsub.f32 %v4687_v47, %v8583_v6  ;;  %6323 = vrot.lane.b32.xlu0 %v6322_v7, %s6481_s16  ;;  %v6156_v12 = vunpack.i.h.bf16 %v6154_v4  ;;  %v6155_v23 = vunpack.i.l.bf16 %v6154_v4  ;;  %v3962_v7 = vadd.f32 %v9408_v32, %v3882_v33 }
 0x2b5   : > { %v8608_v45 = vpop.permute.xlu1 %6138  ;;  %v3885_v31 = vadd.f32 %v5653_v34, %v3869_v54  ;;  %v3979_v17 = vsub.f32 %v3963_v36, %v8579_v13  ;;  %v3886_v1 = vadd.f32 %v5654_v18, %v3870_v25  ;;  %v3980_v43 = vsub.f32 %v3964_v41, %v8583_v6  ;;  %v5496_v6 = vld [vmem:[%s6717_s24] sm:$0xff]  }
 0x2b6   : > { %v6327_v37 = vpack.i.bf16 %v4703_v63, %v4702_v21  ;;  %v8612_v40 = vsel %vm958_vm0, %v3972_v15, %v6156_v12  ;;  %v8615_v49 = vsel %vm958_vm0, %v3971_v62, %v6155_v23  ;;  %v3977_v12 = vsub.f32 %v3961_v3, %v8274_v11  ;;  %v9415_v3 = vld [vmem:[#allocation4_spill] sm:$0xff] }
 0x2b7   : > { %v6164_v29 = vpop.permute.xlu0 %6163  ;;  %v3978_v23 = vsub.f32 %v3962_v7, %v8278_v57  ;;  %v3965_v34 = vadd.f32 %v9409_v46, %v3885_v31  ;;  %v3966_v56 = vadd.f32 %v9410_v35, %v3886_v1  ;;  %v3841_v32 = vadd.f32 1.0, %v9415_v3  ;;  %v9416_v7 = vld [vmem:[#allocation5_spill] sm:$0xff]  ;;  %v5783_v31 = vld [vmem:[%s6717_s24 + $0x108] sm:$0xff]   ;;  %v9418_v1 = vld [vmem:[#allocation7_spill] sm:$0xff] }
 0x2b8   : > { %6328 = vrot.lane.b32.xlu0 %v6327_v37, %s6480_s15  ;;  %v6166_v52 = vunpack.i.h.bf16 %v6164_v29  ;;  %v6165_v8 = vunpack.i.l.bf16 %v6164_v29  ;;  %v5629_v46 = vunpack.c.l.bf16 %v5783_v31 }
 0x2b9   : > { %v6149_v47 = vpop.permute.xlu1 %6148  ;;  %v3981_v61 = vsub.f32 %v3965_v34, %v8545_v48  ;;  %v3982_v36 = vsub.f32 %v3966_v56, %v8549_v2  ;;  %v3857_v35 = vmul.f32 %v8315_v14, %v3841_v32  ;;  %v6141_v2 = vunpack.i.h.bf16 %v8608_v45 }
 0x2ba   : > { %v8635_v5 = vsel %vm958_vm0, %v3976_v50, %v6166_v52  ;;  %v8638_v19 = vsel %vm958_vm0, %v3975_v60, %v6165_v8  ;;  %v6151_v62 = vunpack.i.h.bf16 %v6149_v47  ;;  %v6150_v15 = vunpack.i.l.bf16 %v6149_v47 }
 0x2bb   : > { %v6174_v10 = vpop.permute.xlu0 %6173  ;;  %v3839_v47 = vadd.f32 1.0, %v9416_v7 }
 0x2bc   : > { %v8645_v33 = vsel %vm958_vm0, %v3974_v44, %v6151_v62  ;;  %v8648_v4 = vsel %vm958_vm0, %v3973_v42, %v6150_v15  ;;  %v6176_v21 = vunpack.i.h.bf16 %v6174_v10  ;;  %v6175_v63 = vunpack.i.l.bf16 %v6174_v10  ;;  %v9417_v62 = vld [vmem:[#allocation6_spill] sm:$0xff] }
 0x2bd   : > { %v6159_v39 = vpop.permute.xlu1 %6158  ;;  %v3842_v15 = vadd.f32 1.0, %v9417_v62  ;;  %v3855_v56 = vmul.f32 %v8315_v14, %v3839_v47  ;;  %v9421_v62 = vld [vmem:[#allocation23_spill] sm:$0xff] }
 0x2be   : > { %v8655_v55 = vsel %vm958_vm0, %v3980_v43, %v6176_v21  ;;  %v8658_v27 = vsel %vm958_vm0, %v3979_v17, %v6175_v63  ;;  %v6161_v20 = vunpack.i.h.bf16 %v6159_v39  ;;  %v6160_v54 = vunpack.i.l.bf16 %v6159_v39  ;;  %v5782_v17 = vld [vmem:[%s6717_s24 + $0x100] sm:$0xff]   ;;  %v9419_v21 = vld [vmem:[#allocation20_spill] sm:$0xff] }
 0x2bf   : > { %9411 = vst [vmem:[#allocation78_spill] sm:$0xff] %v8655_v55  ;;  %9412 = vst [vmem:[#allocation82_spill] sm:$0xff] %v8658_v27  ;;  %v8666_v57 = vpop.permute.xlu0 %6188  ;;  %v3840_v43 = vadd.f32 1.0, %v9418_v1  ;;  %v2555_v63 = vadd.f32 1.0, %v9419_v21  ;;  %v5625_v34 = vunpack.c.l.bf16 %v5782_v17  ;;  %v3858_v39 = vmul.f32 %v8315_v14, %v3842_v15  ;;  %v9422_v21 = vld [vmem:[#allocation26_spill] sm:$0xff]  ;;  %v9423_v55 = vld [vmem:[#allocation28_spill] sm:$0xff] }
 0x2c0   : > { %v8661_v37 = vsel %vm958_vm0, %v3978_v23, %v6161_v20  ;;  %v8664_v11 = vsel %vm958_vm0, %v3977_v12, %v6160_v54  ;;  %v9420_v12 = vld [vmem:[#allocation22_spill] sm:$0xff]  ;;  %v5630_v20 = vunpack.c.h.bf16 %v5783_v31  ;;  %v5751_v54 = vld [vmem:[%s6717_s24 + $0x8] sm:$0xff]   ;;  %v2553_v47 = vadd.f32 1.0, %v9421_v62 }
 0x2c1   : > { %v6169_v25 = vpop.permute.xlu1 %6168  ;;  %v2556_v23 = vadd.f32 1.0, %v9420_v12  ;;  %v5501_v7 = vunpack.c.l.bf16 %v5751_v54  ;;  %v5502_v32 = vunpack.c.h.bf16 %v5751_v54  ;;  %v3873_v1 = vadd.f32 %v5629_v46, %v3857_v35  ;;  %v9427_v54 = vld [vmem:[#allocation45_spill] sm:$0xff] }
 0x2c2   : > { %v6171_v18 = vunpack.i.h.bf16 %v6169_v25  ;;  %v6170_v58 = vunpack.i.l.bf16 %v6169_v25  ;;  %v3871_v15 = vadd.f32 %v5625_v34, %v3855_v56  ;;  %v3874_v31 = vadd.f32 %v5630_v20, %v3858_v39  ;;  %v9428_v46 = vld [vmem:[#allocation49_spill] sm:$0xff]  ;;  %v9429_v56 = vld [vmem:[#allocation50_spill] sm:$0xff]  ;;  %v9430_v39 = vld [vmem:[#allocation52_spill] sm:$0xff] }
 0x2c3   : > { %v8678_v50 = vpop.permute.xlu0 %6193  ;;  %v2572_v3 = vmul.f32 %v8315_v14, %v2556_v23  ;;  %v2554_v12 = vadd.f32 1.0, %v9422_v21  ;;  %v2559_v27 = vadd.f32 1.0, %v9423_v55  ;;  %v3953_v62 = vadd.f32 %v9427_v54, %v3873_v1 }
 0x2c4   : > { %v8671_v41 = vsel %vm958_vm0, %v3982_v36, %v6171_v18  ;;  %v8674_v29 = vsel %vm958_vm0, %v3981_v61, %v6170_v58  ;;  %v3856_v61 = vmul.f32 %v8315_v14, %v3840_v43  ;;  %v5626_v36 = vunpack.c.h.bf16 %v5782_v17 }
 0x2c5   : > { %9413 = vst [vmem:[#allocation80_spill] sm:$0xff] %v8671_v41  ;;  %9414 = vst [vmem:[#allocation21_spill] sm:$0xff] %v8674_v29  ;;  %v8676_v60 = vpop.permute.xlu1 %6178  ;;  %v2571_v58 = vmul.f32 %v8315_v14, %v2555_v63  ;;  %v2560_v43 = vadd.f32 1.0, %v9424_v9  ;;  %v9425_v63 = vld [vmem:[#allocation31_spill] sm:$0xff]  ;;  %v9426_v14 = vld [vmem:[#allocation33_spill] sm:$0xff]  ;;  %v8722_v34 = vadd.f32 %v9428_v46, %v3871_v15  ;;  %v3954_v55 = vadd.f32 %v9429_v56, %v3874_v31 }
 0x2c6   : > { %v3872_v17 = vadd.f32 %v5626_v36, %v3856_v61  ;;  %v2557_v41 = vadd.f32 1.0, %v9425_v63  ;;  %v2558_v23 = vadd.f32 1.0, %v9426_v14  ;;  %v2588_v61 = vadd.f32 %v5502_v32, %v2572_v3  ;;  %v8733_v36 = vld [vmem:[%s9056_s5] ss:$0 sm:$0xff]  ;;  %v6446_v46 = vld [vmem:[%s6712_s11 + $0x10] sm:$0xff] }
 0x2c7   : > { %v8682_v8 = vpop.permute.xlu0 %6208  ;;  %v2587_v20 = vadd.f32 %v5501_v7, %v2571_v58  ;;  %v2569_v1 = vmul.f32 %v8733_v36, %v2553_v47  ;;  %v5497_v15 = vunpack.c.l.bf16 %v5496_v6  ;;  %v2570_v21 = vmul.f32 %v8733_v36, %v2554_v12  ;;  %v9431_v63 = vld [vmem:[#allocation87_spill] sm:$0xff]  ;;  %v8740_v58 = vld [vmem:[%s6717_s24 + $0x18] sm:$0xff]  }
 0x2c8   : > { %v8728_v9 = vadd.f32 %v9430_v39, %v3872_v17  ;;  %v9432_v17 = vld [vmem:[#allocation90_spill] sm:$0xff]  ;;  %v5498_v54 = vunpack.c.h.bf16 %v5496_v6  ;;  %v8745_v7 = vmul.f32 %v8733_v36, %v2559_v27  ;;  %v8748_v32 = vmul.f32 %v8733_v36, %v2560_v43  ;;  %v8758_v39 = vld [vmem:[%s6712_s11] sm:$0xff]  ;;  %v8764_v27 = vld [vmem:[%s6712_s11 + $0x8] sm:$0xff] }
 0x2c9   : > { %v8680_v52 = vpop.permute.xlu1 %6183  ;;  %v2667_v31 = vadd.f32 %v9431_v63, %v2587_v20  ;;  %v2668_v14 = vadd.f32 %v9432_v17, %v2588_v61  ;;  %v8751_v47 = vmul.f32 %v8733_v36, %v2557_v41  ;;  %v8754_v12 = vmul.f32 %v8733_v36, %v2558_v23  ;;  %v6448_v20 = vld [vmem:[%s6712_s11 + $0x18] sm:$0xff]  ;;  %v9436_v6 = vld [vmem:[#allocation29_spill] sm:$0xff] }
 0x2ca   : > { %v3969_v56 = vsub.f32 %v3953_v62, %v6446_v46  ;;  %v3970_v61 = vsub.f32 %v3954_v55, %v6448_v20  ;;  %v2585_v63 = vadd.f32 %v5497_v15, %v2569_v1  ;;  %v6181_v23 = vunpack.i.h.bf16 %v8676_v60 }
 0x2cb   : > { %v8688_v22 = vpop.permute.xlu0 %6213  ;;  %v6180_v17 = vunpack.i.l.bf16 %v8676_v60  ;;  %v2683_v29 = vsub.f32 %v2667_v31, %v6446_v46  ;;  %v2586_v51 = vadd.f32 %v5498_v54, %v2570_v21  ;;  %v6101_v55 = vunpack.i.h.bf16 %v8326_v24  ;;  %v9435_v46 = vld [vmem:[#allocation27_spill] sm:$0xff] }
 0x2cc   : > { %v6140_v1 = vunpack.i.l.bf16 %v8608_v45  ;;  %v6100_v41 = vunpack.i.l.bf16 %v8326_v24  ;;  %v6185_v54 = vunpack.i.l.bf16 %v8680_v52  ;;  %v4901_v24 = vsel %vm958_vm0, %v3970_v61, %v6141_v2 }
 0x2cd   : > { %v8684_v42 = vpop.permute.xlu1 %6198  ;;  %v3614_v21 = vsel %vm958_vm0, %v2683_v29, %v6180_v17 }
 0x2ce   : > { %v4900_v29 = vsel %vm958_vm0, %v3969_v56, %v6140_v1 }
 0x2cf   : > { %v8704_v25 = vpop.permute.xlu0 %6228  ;;  %v4916_v2 = vsel %vm3628_vm12, %v4900_v29, %v6185_v54  ;;  %v6106_v54 = vunpack.i.h.bf16 %v8351_v28  ;;  %v6196_v29 = vunpack.i.h.bf16 %v8678_v50 }
 0x2d1   : > { %v8686_v44 = vpop.permute.xlu1 %6203 }
 0x2d3   : > { %v8724_v35 = vpop.permute.xlu0 %6233 }
 0x2d5   : > { %v8696_v10 = vpop.permute.xlu1 %6218 }
 0x2d9   : > { %v8707_v18 = vpop.permute.xlu1 %6223  ;;  %v8771_v62 = vpop.permute.xlu0 %6248 }
 0x2da   : > { %9434 = vst [vmem:[#allocation88_spill] sm:$0xff] %v8771_v62  ;;  %v2666_v62 = vadd.f32 %v9436_v6, %v2586_v51 }
 0x2dc   : > { %v2682_v1 = vsub.f32 %v2666_v62, %v8764_v27  ;;  %v6105_v62 = vunpack.i.l.bf16 %v8351_v28 }
 0x2dd   : > { %v8716_v13 = vpop.permute.xlu1 %6238 }
 0x2e1   : > { %v8742_v3 = vpop.permute.xlu1 %6243 }
 0x2e2   : > { %9433 = vst [vmem:[#allocation83_spill] sm:$0xff] %v8742_v3  ;;  %v2684_v3 = vsub.f32 %v2668_v14, %v6448_v20  ;;  %v6186_v14 = vunpack.i.h.bf16 %v8680_v52  ;;  %v2665_v20 = vadd.f32 %v9435_v46, %v2585_v63  ;;  %v8794_v52 = vpop.permute.xlu0 %6253 }
 0x2e4   : > { %v3615_v31 = vsel %vm958_vm0, %v2684_v3, %v6181_v23  ;;  %v4917_v56 = vsel %vm3628_vm12, %v4901_v24, %v6186_v14  ;;  %v2681_v61 = vsub.f32 %v2665_v20, %v8758_v39 }
 0x2e6   : > { %v6259_v15 = vpop.permute.xlu1 %6258 }
 0x2e7   : > { %v6261_v60 = vunpack.i.h.bf16 %v6259_v15  ;;  %v6260_v43 = vunpack.i.l.bf16 %v6259_v15  ;;  %v6191_v15 = vunpack.i.h.bf16 %v8666_v57 }
 0x2e9   : > { %v3631_v45 = vsel %vm3628_vm12, %v3614_v21, %v6260_v43  ;;  %v3632_v48 = vsel %vm3628_vm12, %v3615_v31, %v6261_v60  ;;  %v6190_v60 = vunpack.i.l.bf16 %v8666_v57  ;;  %v6145_v57 = vunpack.i.l.bf16 %v8576_v26 }
 0x2ea   : > { %v3648_v3 = vsel %vm3645_vm13, %v3631_v45, %v6100_v41  ;;  %v3649_v51 = vsel %vm3645_vm13, %v3632_v48, %v6101_v55  ;;  %v6264_v6 = vpop.permute.xlu1 %6263  ;;  %v6146_v55 = vunpack.i.h.bf16 %v8576_v26  ;;  %v3613_v45 = vsel %vm958_vm0, %v2682_v1, %v6191_v15  ;;  %v9437_v26 = vld [vmem:[#allocation34_spill] sm:$0xff] }
 0x2eb   : > { %v5465_v43 = vpack.c.bf16 %v3648_v3, %v3648_v3  ;;  %v5466_v63 = vpack.c.bf16 %v3649_v51, %v3649_v51  ;;  %v6266_v23 = vunpack.i.h.bf16 %v6264_v6  ;;  %v6265_v17 = vunpack.i.l.bf16 %v6264_v6  ;;  %v9438_v6 = vld [vmem:[#allocation35_spill] sm:$0xff] }
 0x2ec   : > { %v3612_v24 = vsel %vm958_vm0, %v2681_v61, %v6190_v60  ;;  %v6195_v3 = vunpack.i.l.bf16 %v8678_v50  ;;  %v2563_v51 = vadd.f32 1.0, %v9437_v26  ;;  %v9440_v50 = vsub.f32 %v8722_v34, %v8758_v39 }
 0x2ed   : > { %3728 = vst [vmem:[%s8790_s14 + $0x10] sm:$0xf] %v5465_v43  ;;  %3729 = vst [vmem:[%s8790_s14 + $0x18] sm:$0xf] %v5466_v63  ;;  %v4932_v48 = vsel %vm3645_vm13, %v4916_v2, %v6265_v17  ;;  %v4933_v41 = vsel %vm3645_vm13, %v4917_v56, %v6266_v23  ;;  %v2564_v43 = vadd.f32 1.0, %v9438_v6  ;;  %v5752_v23 = vld [vmem:[%s6717_s24 + $0x10] sm:$0xff]   ;;  %v9439_v17 = vsub.f32 %v8728_v9, %v8764_v27 }
 0x2ee   : > { %v5481_v31 = vpack.c.bf16 %v4932_v48, %v4932_v48  ;;  %v5482_v21 = vpack.c.bf16 %v4933_v41, %v4933_v41  ;;  %v6269_v14 = vpop.permute.xlu0 %6268  ;;  %v4898_v60 = vsel %vm958_vm0, %v9440_v50, %v6145_v57  ;;  %v9441_v9 = vunpack.c.l.bf16 %v8740_v58  ;;  %v9445_v6 = vld [vmem:[#allocation38_spill] sm:$0xff] }
 0x2ef   : > { %v6271_v46 = vunpack.i.h.bf16 %v6269_v14  ;;  %v6270_v20 = vunpack.i.l.bf16 %v6269_v14  ;;  %v4899_v15 = vsel %vm958_vm0, %v9439_v17, %v6146_v55  ;;  %v9442_v55 = vunpack.c.h.bf16 %v8740_v58 }
 0x2f0   : > { %5012 = vst [vmem:[%s8790_s14 + $0x14] sm:$0xf] %v5481_v31  ;;  %5013 = vst [vmem:[%s8790_s14 + $0x1c] sm:$0xf] %v5482_v21  ;;  %v2591_v27 = vadd.f32 %v9441_v9, %v8745_v7  ;;  %v4914_v39 = vsel %vm3628_vm12, %v4898_v60, %v6195_v3  ;;  %v4915_v57 = vsel %vm3628_vm12, %v4899_v15, %v6196_v29  ;;  %v5505_v21 = vunpack.c.l.bf16 %v5752_v23  ;;  %v9448_v9 = vld [vmem:[#allocation37_spill] sm:$0xff] }
 0x2f1   : > { %v3629_v63 = vsel %vm3628_vm12, %v3612_v24, %v6270_v20  ;;  %v3630_v28 = vsel %vm3628_vm12, %v3613_v45, %v6271_v46  ;;  %v2592_v34 = vadd.f32 %v9442_v55, %v8748_v32  ;;  %v5506_v14 = vunpack.c.h.bf16 %v5752_v23  ;;  %v9443_v46 = vld [vmem:[#allocation91_spill] sm:$0xff]  ;;  %v9444_v20 = vld [vmem:[#allocation92_spill] sm:$0xff] }
 0x2f2   : > { %v3646_v2 = vsel %vm3645_vm13, %v3629_v63, %v6105_v62  ;;  %v3647_v56 = vsel %vm3645_vm13, %v3630_v28, %v6106_v54  ;;  %v6274_v61 = vpop.permute.xlu0 %6273  ;;  %v2671_v7 = vadd.f32 %v9443_v46, %v2591_v27  ;;  %v6201_v32 = vunpack.i.h.bf16 %v8684_v42  ;;  %v9446_v28 = vld [vmem:[#allocation39_spill] sm:$0xff]  ;;  %v5755_v55 = vld [vmem:[%s6717_s24 + $0x28] sm:$0xff]  }
 0x2f3   : > { %v5463_v1 = vpack.c.bf16 %v3646_v2, %v3646_v2  ;;  %v5464_v48 = vpack.c.bf16 %v3647_v56, %v3647_v56  ;;  %v6276_v41 = vunpack.i.h.bf16 %v6274_v61  ;;  %v6275_v31 = vunpack.i.l.bf16 %v6274_v61 }
 0x2f4   : > { %v2672_v45 = vadd.f32 %v9444_v20, %v2592_v34  ;;  %v6200_v3 = vunpack.i.l.bf16 %v8684_v42  ;;  %v8852_v29 = vmul.f32 %v8733_v36, %v2563_v51  ;;  %v8855_v26 = vmul.f32 %v8733_v36, %v2564_v43 }
 0x2f5   : > { %3726 = vst [vmem:[%s8790_s14] sm:$0xf] %v5463_v1  ;;  %3727 = vst [vmem:[%s8790_s14 + $0x8] sm:$0xf] %v5464_v48  ;;  %v4930_v54 = vsel %vm3645_vm13, %v4914_v39, %v6275_v31  ;;  %v4931_v62 = vsel %vm3645_vm13, %v4915_v57, %v6276_v41  ;;  %v2561_v63 = vadd.f32 1.0, %v9445_v6  ;;  %v2562_v23 = vadd.f32 1.0, %v9446_v28  ;;  %v9447_v41 = vld [vmem:[#allocation93_spill] sm:$0xff] }
 0x2f6   : > { %v5479_v58 = vpack.c.bf16 %v4930_v54, %v4930_v54  ;;  %v5480_v24 = vpack.c.bf16 %v4931_v62, %v4931_v62  ;;  %v2687_v17 = vsub.f32 %v2671_v7, %v8625_v59  ;;  %v2688_v15 = vsub.f32 %v2672_v45, %v8629_v30 }
 0x2f7   : > { %v2589_v50 = vadd.f32 %v5505_v21, %v8751_v47  ;;  %v2590_v42 = vadd.f32 %v5506_v14, %v8754_v12  ;;  %v6111_v51 = vunpack.i.h.bf16 %v8375_v0  ;;  %v6110_v2 = vunpack.i.l.bf16 %v8375_v0 }
 0x2f8   : > { %5010 = vst [vmem:[%s8790_s14 + $0x4] sm:$0xf] %v5479_v58  ;;  %5011 = vst [vmem:[%s8790_s14 + $0xc] sm:$0xf] %v5480_v24  ;;  %v3619_v61 = vsel %vm958_vm0, %v2688_v15, %v6201_v32  ;;  %v3618_v1 = vsel %vm958_vm0, %v2687_v17, %v6200_v3  ;;  %v6206_v59 = vunpack.i.h.bf16 %v8686_v44  ;;  %v6205_v30 = vunpack.i.l.bf16 %v8686_v44  ;;  %v6450_v3 = vld [vmem:[%s6712_s11 + $0x20] sm:$0xff] }
 0x2f9   : > { %v8870_v47 = vmul.f32 %v8733_v36, %v2561_v63  ;;  %v8873_v12 = vmul.f32 %v8733_v36, %v2562_v23  ;;  %v2669_v31 = vadd.f32 %v9447_v41, %v2589_v50  ;;  %v2670_v27 = vadd.f32 %v9448_v9, %v2590_v42  ;;  %v6451_v63 = vld [vmem:[%s6712_s11 + $0x28] sm:$0xff] }
 0x2fa   : > { %v6279_v60 = vpop.permute.xlu1 %6278  ;;  %v6211_v62 = vunpack.i.h.bf16 %v8682_v8  ;;  %v6210_v46 = vunpack.i.l.bf16 %v8682_v8  ;;  %v4920_v7 = vsel %vm3628_vm12, %v8648_v4, %v6205_v30  ;;  %v4921_v20 = vsel %vm3628_vm12, %v8645_v33, %v6206_v59  ;;  %v9451_v30 = vld [vmem:[#allocation47_spill] sm:$0xff] }
 0x2fb   : > { %v6281_v43 = vunpack.i.h.bf16 %v6279_v60  ;;  %v6280_v56 = vunpack.i.l.bf16 %v6279_v60  ;;  %v5517_v45 = vunpack.c.l.bf16 %v5755_v55  ;;  %v5518_v58 = vunpack.c.h.bf16 %v5755_v55 }
 0x2fc   : > { %v2685_v6 = vsub.f32 %v2669_v31, %v6450_v3  ;;  %v2686_v8 = vsub.f32 %v2670_v27, %v6451_v63  ;;  %v6116_v17 = vunpack.i.h.bf16 %v8392_v16  ;;  %v6115_v33 = vunpack.i.l.bf16 %v8392_v16  ;;  %v5754_v31 = vld [vmem:[%s6717_s24 + $0x20] sm:$0xff]  }
 0x2fd   : > { %v3635_v48 = vsel %vm3628_vm12, %v3618_v1, %v6280_v56  ;;  %v3636_v0 = vsel %vm3628_vm12, %v3619_v61, %v6281_v43  ;;  %v9449_v43 = vld [vmem:[#allocation42_spill] sm:$0xff]  ;;  %v9450_v61 = vld [vmem:[#allocation44_spill] sm:$0xff] }
 0x2fe   : > { %v3652_v34 = vsel %vm3645_vm13, %v3635_v48, %v6110_v2  ;;  %v3653_v44 = vsel %vm3645_vm13, %v3636_v0, %v6111_v51  ;;  %v6284_v39 = vpop.permute.xlu1 %6283  ;;  %v3617_v42 = vsel %vm958_vm0, %v2686_v8, %v6211_v62  ;;  %v3616_v60 = vsel %vm958_vm0, %v2685_v6, %v6210_v46  ;;  %v9452_v0 = vld [vmem:[#allocation53_spill] sm:$0xff] }
 0x2ff   : > { %v5469_v57 = vpack.c.bf16 %v3652_v34, %v3652_v34  ;;  %v5470_v21 = vpack.c.bf16 %v3653_v44, %v3653_v44  ;;  %v6286_v14 = vunpack.i.h.bf16 %v6284_v39  ;;  %v6285_v54 = vunpack.i.l.bf16 %v6284_v39 }
 0x300   : > { %v6216_v51 = vunpack.i.h.bf16 %v8688_v22  ;;  %v6215_v2 = vunpack.i.l.bf16 %v8688_v22  ;;  %v2567_v56 = vadd.f32 1.0, %v9449_v43  ;;  %v2568_v1 = vadd.f32 1.0, %v9450_v61 }
 0x301   : > { %3732 = vst [vmem:[%s8790_s14 + $0x30] sm:$0xf] %v5469_v57  ;;  %3733 = vst [vmem:[%s8790_s14 + $0x38] sm:$0xf] %v5470_v21  ;;  %v4936_v24 = vsel %vm3645_vm13, %v4920_v7, %v6285_v54  ;;  %v4937_v32 = vsel %vm3645_vm13, %v4921_v20, %v6286_v14  ;;  %v2565_v48 = vadd.f32 1.0, %v9451_v30  ;;  %v2566_v41 = vadd.f32 1.0, %v9452_v0 }
 0x302   : > { %v5485_v28 = vpack.c.bf16 %v4936_v24, %v4936_v24  ;;  %v5486_v23 = vpack.c.bf16 %v4937_v32, %v4937_v32  ;;  %v6289_v4 = vpop.permute.xlu0 %6288  ;;  %v2595_v57 = vadd.f32 %v5517_v45, %v8852_v29  ;;  %v2596_v21 = vadd.f32 %v5518_v58, %v8855_v26  ;;  %v9453_v20 = vld [vmem:[#allocation96_spill] sm:$0xff]  ;;  %v9454_v26 = vld [vmem:[#allocation98_spill] sm:$0xff] }
 0x303   : > { %v6291_v15 = vunpack.i.h.bf16 %v6289_v4  ;;  %v6290_v50 = vunpack.i.l.bf16 %v6289_v4  ;;  %v4918_v14 = vsel %vm3628_vm12, %v8615_v49, %v6215_v2  ;;  %v4919_v54 = vsel %vm3628_vm12, %v8612_v40, %v6216_v51  ;;  %v6453_v4 = vld [vmem:[%s6712_s11 + $0x58] sm:$0xff] }
 0x304   : > { %5016 = vst [vmem:[%s8790_s14 + $0x34] sm:$0xf] %v5485_v28  ;;  %5017 = vst [vmem:[%s8790_s14 + $0x3c] sm:$0xf] %v5486_v23  ;;  %v5513_v62 = vunpack.c.l.bf16 %v5754_v31  ;;  %v5514_v46 = vunpack.c.h.bf16 %v5754_v31  ;;  %v2675_v45 = vadd.f32 %v9453_v20, %v2595_v57  ;;  %v2676_v58 = vadd.f32 %v9454_v26, %v2596_v21  ;;  %v6452_v28 = vld [vmem:[%s6712_s11 + $0x50] sm:$0xff] }
 0x305   : > { %v3633_v59 = vsel %vm3628_vm12, %v3616_v60, %v6290_v50  ;;  %v3634_v16 = vsel %vm3628_vm12, %v3617_v42, %v6291_v15  ;;  %v6221_v32 = vunpack.i.h.bf16 %v8696_v10  ;;  %v6220_v40 = vunpack.i.l.bf16 %v8696_v10  ;;  %v5757_v15 = vld [vmem:[%s6717_s24 + $0x38] sm:$0xff]  }
 0x306   : > { %v3650_v9 = vsel %vm3645_vm13, %v3633_v59, %v6115_v33  ;;  %v3651_v22 = vsel %vm3645_vm13, %v3634_v16, %v6116_v17  ;;  %v6294_v27 = vpop.permute.xlu0 %6293  ;;  %v2583_v3 = vmul.f32 %v8733_v36, %v2567_v56  ;;  %v2584_v6 = vmul.f32 %v8733_v36, %v2568_v1  ;;  %v9455_v16 = vld [vmem:[#allocation101_spill] sm:$0xff] }
 0x307   : > { %v5467_v55 = vpack.c.bf16 %v3650_v9, %v3650_v9  ;;  %v5468_v34 = vpack.c.bf16 %v3651_v22, %v3651_v22  ;;  %v6296_v44 = vunpack.i.h.bf16 %v6294_v27  ;;  %v6295_v39 = vunpack.i.l.bf16 %v6294_v27 }
 0x308   : > { %v8930_v63 = vmul.f32 %v8733_v36, %v2565_v48  ;;  %v8933_v8 = vmul.f32 %v8733_v36, %v2566_v41  ;;  %v2691_v23 = vsub.f32 %v2675_v45, %v6452_v28  ;;  %v2692_v17 = vsub.f32 %v2676_v58, %v6453_v4 }
 0x309   : > { %3730 = vst [vmem:[%s8790_s14 + $0x20] sm:$0xf] %v5467_v55  ;;  %3731 = vst [vmem:[%s8790_s14 + $0x28] sm:$0xf] %v5468_v34  ;;  %v4934_v7 = vsel %vm3645_vm13, %v4918_v14, %v6295_v39  ;;  %v4935_v29 = vsel %vm3645_vm13, %v4919_v54, %v6296_v44  ;;  %v2593_v33 = vadd.f32 %v5513_v62, %v8870_v47  ;;  %v6121_v42 = vunpack.i.h.bf16 %v8413_v38  ;;  %v6454_v62 = vld [vmem:[%s6712_s11 + $0x40] sm:$0xff] }
 0x30a   : > { %v5483_v24 = vpack.c.bf16 %v4934_v7, %v4934_v7  ;;  %v5484_v49 = vpack.c.bf16 %v4935_v29, %v4935_v29  ;;  %v2594_v10 = vadd.f32 %v5514_v46, %v8873_v12  ;;  %v6120_v60 = vunpack.i.l.bf16 %v8413_v38  ;;  %v9456_v38 = vld [vmem:[#allocation103_spill] sm:$0xff]  ;;  %v6455_v7 = vld [vmem:[%s6712_s11 + $0x48] sm:$0xff]  ;;  %v5756_v29 = vld [vmem:[%s6717_s24 + $0x30] sm:$0xff]  }
 0x30b   : > { %v3623_v43 = vsel %vm958_vm0, %v2692_v17, %v6221_v32  ;;  %v3622_v36 = vsel %vm958_vm0, %v2691_v23, %v6220_v40  ;;  %v6226_v56 = vunpack.i.h.bf16 %v8707_v18  ;;  %v6225_v61 = vunpack.i.l.bf16 %v8707_v18  ;;  %v9457_v17 = vld [vmem:[#allocation106_spill] sm:$0xff] }
 0x30c   : > { %5014 = vst [vmem:[%s8790_s14 + $0x24] sm:$0xf] %v5483_v24  ;;  %5015 = vst [vmem:[%s8790_s14 + $0x2c] sm:$0xf] %v5484_v49  ;;  %v5525_v1 = vunpack.c.l.bf16 %v5757_v15  ;;  %v5526_v47 = vunpack.c.h.bf16 %v5757_v15  ;;  %v2673_v30 = vadd.f32 %v9455_v16, %v2593_v33  ;;  %v2674_v48 = vadd.f32 %v9456_v38, %v2594_v10  ;;  %v9458_v33 = vld [vmem:[#allocation109_spill] sm:$0xff] }
 0x30d   : > { %v6231_v55 = vunpack.i.h.bf16 %v8704_v25  ;;  %v6230_v34 = vunpack.i.l.bf16 %v8704_v25  ;;  %v4924_v44 = vsel %vm3628_vm12, %v8664_v11, %v6225_v61  ;;  %v4925_v39 = vsel %vm3628_vm12, %v8661_v37, %v6226_v56 }
 0x30e   : > { %v6299_v50 = vpop.permute.xlu1 %6298  ;;  %v2599_v57 = vadd.f32 %v5525_v1, %v2583_v3  ;;  %v2600_v21 = vadd.f32 %v5526_v47, %v2584_v6  ;;  %v2689_v46 = vsub.f32 %v2673_v30, %v6454_v62  ;;  %v2690_v25 = vsub.f32 %v2674_v48, %v6455_v7  ;;  %v9460_v30 = vld [vmem:[#allocation77_spill] sm:$0xff] }
 0x30f   : > { %v6301_v51 = vunpack.i.h.bf16 %v6299_v50  ;;  %v6300_v2 = vunpack.i.l.bf16 %v6299_v50  ;;  %v6126_v37 = vunpack.i.h.bf16 %v8428_v53  ;;  %v6125_v26 = vunpack.i.l.bf16 %v8428_v53 }
 0x310   : > { %v3621_v49 = vsel %vm958_vm0, %v2690_v25, %v6231_v55  ;;  %v3620_v32 = vsel %vm958_vm0, %v2689_v46, %v6230_v34  ;;  %v6236_v40 = vunpack.i.h.bf16 %v8724_v35  ;;  %v6235_v3 = vunpack.i.l.bf16 %v8724_v35 }
 0x311   : > { %v3639_v12 = vsel %vm3628_vm12, %v3622_v36, %v6300_v2  ;;  %v3640_v59 = vsel %vm3628_vm12, %v3623_v43, %v6301_v51  ;;  %v5521_v6 = vunpack.c.l.bf16 %v5756_v29  ;;  %v5522_v28 = vunpack.c.h.bf16 %v5756_v29 }
 0x312   : > { %v3656_v0 = vsel %vm3645_vm13, %v3639_v12, %v6120_v60  ;;  %v3657_v41 = vsel %vm3645_vm13, %v3640_v59, %v6121_v42  ;;  %v6304_v31 = vpop.permute.xlu1 %6303  ;;  %v2679_v53 = vadd.f32 %v9457_v17, %v2599_v57  ;;  %v2680_v10 = vadd.f32 %v9458_v33, %v2600_v21  ;;  %v9464_v21 = vld [vmem:[#allocation58_spill] sm:$0xff] }
 0x313   : > { %v5473_v9 = vpack.c.bf16 %v3656_v0, %v3656_v0  ;;  %v5474_v18 = vpack.c.bf16 %v3657_v41, %v3657_v41  ;;  %v6306_v22 = vunpack.i.h.bf16 %v6304_v31  ;;  %v6305_v27 = vunpack.i.l.bf16 %v6304_v31  ;;  %v9470_v33 = vld [vmem:[#allocation74_spill] sm:$0xff] }
 0x314   : > { %v4922_v43 = vsel %vm3628_vm12, %v8638_v19, %v6235_v3  ;;  %v4923_v36 = vsel %vm3628_vm12, %v8635_v5, %v6236_v40  ;;  %v6241_v56 = vunpack.i.h.bf16 %v8716_v13  ;;  %v6240_v61 = vunpack.i.l.bf16 %v8716_v13  ;;  %v9459_v19 = vld [vmem:[#allocation71_spill] sm:$0xff]  ;;  %v9461_v13 = vld [vmem:[#allocation68_spill] sm:$0xff] }
 0x315   : > { %3736 = vst [vmem:[%s8790_s14 + $0x50] sm:$0xf] %v5473_v9  ;;  %3737 = vst [vmem:[%s8790_s14 + $0x58] sm:$0xf] %v5474_v18  ;;  %v4940_v14 = vsel %vm3645_vm13, %v4924_v44, %v6305_v27  ;;  %v4941_v54 = vsel %vm3645_vm13, %v4925_v39, %v6306_v22  ;;  %v2597_v1 = vadd.f32 %v5521_v6, %v8930_v63  ;;  %v6131_v41 = vunpack.i.h.bf16 %v9461_v13  ;;  %v9462_v22 = vld [vmem:[#allocation83_spill] sm:$0xff] }
 0x316   : > { %v5489_v20 = vpack.c.bf16 %v4940_v14, %v4940_v14  ;;  %v5490_v11 = vpack.c.bf16 %v4941_v54, %v4941_v54  ;;  %v6309_v45 = vpop.permute.xlu0 %6308  ;;  %v2598_v47 = vadd.f32 %v5522_v28, %v8933_v8  ;;  %v2695_v16 = vsub.f32 %v2679_v53, %v9459_v19  ;;  %v9463_v39 = vld [vmem:[#allocation51_spill] sm:$0xff] }
 0x317   : > { %v6311_v58 = vunpack.i.h.bf16 %v6309_v45  ;;  %v6310_v24 = vunpack.i.l.bf16 %v6309_v45  ;;  %v2696_v5 = vsub.f32 %v2680_v10, %v9460_v30  ;;  %v6130_v63 = vunpack.i.l.bf16 %v9461_v13  ;;  %v9468_v3 = vld [vmem:[#allocation75_spill] sm:$0xff]  ;;  %v9472_v30 = vld [vmem:[#allocation78_spill] sm:$0xff] }
 0x318   : > { %5020 = vst [vmem:[%s8790_s14 + $0x54] sm:$0xf] %v5489_v20  ;;  %5021 = vst [vmem:[%s8790_s14 + $0x5c] sm:$0xf] %v5490_v11  ;;  %v3626_v18 = vsel %vm958_vm0, %v2695_v16, %v6240_v61  ;;  %v6246_v27 = vunpack.i.h.bf16 %v9462_v22  ;;  %v6245_v55 = vunpack.i.l.bf16 %v9462_v22  ;;  %v2677_v57 = vadd.f32 %v9463_v39, %v2597_v1  ;;  %v9465_v11 = vld [vmem:[#allocation88_spill] sm:$0xff]  ;;  %v9469_v28 = vld [vmem:[#allocation79_spill] sm:$0xff] }
 0x319   : > { %v3637_v23 = vsel %vm3628_vm12, %v3620_v32, %v6310_v24  ;;  %v3638_v4 = vsel %vm3628_vm12, %v3621_v49, %v6311_v58  ;;  %v3627_v9 = vsel %vm958_vm0, %v2696_v5, %v6241_v56  ;;  %v2678_v14 = vadd.f32 %v9464_v21, %v2598_v47  ;;  %v9467_v24 = vld [vmem:[#allocation80_spill] sm:$0xff]  ;;  %v9471_v16 = vld [vmem:[#allocation82_spill] sm:$0xff] }
 0x31a   : > { %v3654_v15 = vsel %vm3645_vm13, %v3637_v23, %v6125_v26  ;;  %v3655_v50 = vsel %vm3645_vm13, %v3638_v4, %v6126_v37  ;;  %v6314_v42 = vpop.permute.xlu0 %6313  ;;  %v6251_v45 = vunpack.i.h.bf16 %v9465_v11  ;;  %v6250_v37 = vunpack.i.l.bf16 %v9465_v11  ;;  %v9466_v26 = vld [vmem:[#allocation21_spill] sm:$0xff] }
 0x31b   : > { %v5471_v35 = vpack.c.bf16 %v3654_v15, %v3654_v15  ;;  %v5472_v60 = vpack.c.bf16 %v3655_v50, %v3655_v50  ;;  %v6316_v51 = vunpack.i.h.bf16 %v6314_v42  ;;  %v6315_v2 = vunpack.i.l.bf16 %v6314_v42 }
 0x31c   : > { %v4928_v58 = vsel %vm3628_vm12, %v9466_v26, %v6245_v55  ;;  %v4929_v49 = vsel %vm3628_vm12, %v9467_v24, %v6246_v27  ;;  %v2693_v6 = vsub.f32 %v2677_v57, %v9468_v3  ;;  %v2694_v23 = vsub.f32 %v2678_v14, %v9469_v28 }
 0x31d   : > { %3734 = vst [vmem:[%s8790_s14 + $0x40] sm:$0xf] %v5471_v35  ;;  %3735 = vst [vmem:[%s8790_s14 + $0x48] sm:$0xf] %v5472_v60  ;;  %v4938_v12 = vsel %vm3645_vm13, %v4922_v43, %v6315_v2  ;;  %v4939_v59 = vsel %vm3645_vm13, %v4923_v36, %v6316_v51  ;;  %v6136_v10 = vunpack.i.h.bf16 %v9470_v33  ;;  %v6135_v15 = vunpack.i.l.bf16 %v9470_v33 }
 0x31e   : > { %v5487_v38 = vpack.c.bf16 %v4938_v12, %v4938_v12  ;;  %v5488_v48 = vpack.c.bf16 %v4939_v59, %v4939_v59  ;;  %v6319_v0 = vpop.permute.xlu1 %6318  ;;  %v3625_v35 = vsel %vm958_vm0, %v2694_v23, %v6251_v45  ;;  %v3624_v60 = vsel %vm958_vm0, %v2693_v6, %v6250_v37 }
 0x31f   : > { %v6321_v8 = vunpack.i.h.bf16 %v6319_v0  ;;  %v6320_v31 = vunpack.i.l.bf16 %v6319_v0  ;;  %v6256_v51 = vunpack.i.h.bf16 %v8794_v52  ;;  %v6255_v2 = vunpack.i.l.bf16 %v8794_v52 }
 0x320   : > { %5018 = vst [vmem:[%s8790_s14 + $0x44] sm:$0xf] %v5487_v38  ;;  %5019 = vst [vmem:[%s8790_s14 + $0x4c] sm:$0xf] %v5488_v48 }
 0x321   : > { %v3643_v34 = vsel %vm3628_vm12, %v3626_v18, %v6320_v31  ;;  %v3644_v44 = vsel %vm3628_vm12, %v3627_v9, %v6321_v8  ;;  %v4926_v52 = vsel %vm3628_vm12, %v9471_v16, %v6255_v2  ;;  %v4927_v5 = vsel %vm3628_vm12, %v9472_v30, %v6256_v51 }
 0x322   : > { %v3660_v54 = vsel %vm3645_vm13, %v3643_v34, %v6130_v63  ;;  %v3661_v62 = vsel %vm3645_vm13, %v3644_v44, %v6131_v41  ;;  %v6334_v46 = vpop.permute.xlu1 %6333 }
 0x323   : > { %v5477_v7 = vpack.c.bf16 %v3660_v54, %v3660_v54  ;;  %v5478_v25 = vpack.c.bf16 %v3661_v62, %v3661_v62  ;;  %v6336_v29 = vunpack.i.h.bf16 %v6334_v46  ;;  %v6335_v20 = vunpack.i.l.bf16 %v6334_v46 }
 0x325   : > { %3740 = vst [vmem:[%s8790_s14 + $0x70] sm:$0xf] %v5477_v7  ;;  %3741 = vst [vmem:[%s8790_s14 + $0x78] sm:$0xf] %v5478_v25  ;;  %v4944_v32 = vsel %vm3645_vm13, %v4928_v58, %v6335_v20  ;;  %v4945_v40 = vsel %vm3645_vm13, %v4929_v49, %v6336_v29 }
 0x326   : > { %v5493_v4 = vpack.c.bf16 %v4944_v32, %v4944_v32  ;;  %v5494_v17 = vpack.c.bf16 %v4945_v40, %v4945_v40  ;;  %v6324_v53 = vpop.permute.xlu0 %6323 }
 0x327   : > { %v6326_v50 = vunpack.i.h.bf16 %v6324_v53  ;;  %v6325_v42 = vunpack.i.l.bf16 %v6324_v53 }
 0x328   : > { %5024 = vst [vmem:[%s8790_s14 + $0x74] sm:$0xf] %v5493_v4  ;;  %5025 = vst [vmem:[%s8790_s14 + $0x7c] sm:$0xf] %v5494_v17 }
 0x329   : > { %v3642_v43 = vsel %vm3628_vm12, %v3625_v35, %v6326_v50  ;;  %v3641_v36 = vsel %vm3628_vm12, %v3624_v60, %v6325_v42 }
 0x32a   : > { %v3659_v56 = vsel %vm3645_vm13, %v3642_v43, %v6136_v10  ;;  %v3658_v61 = vsel %vm3645_vm13, %v3641_v36, %v6135_v15  ;;  %v6329_v1 = vpop.permute.xlu0 %6328 }
 0x32b   : > { %v5476_v47 = vpack.c.bf16 %v3659_v56, %v3659_v56  ;;  %v5475_v12 = vpack.c.bf16 %v3658_v61, %v3658_v61  ;;  %v6331_v59 = vunpack.i.h.bf16 %v6329_v1  ;;  %v6330_v19 = vunpack.i.l.bf16 %v6329_v1 }
 0x32d   : > { %3739 = vst [vmem:[%s8790_s14 + $0x68] sm:$0xf] %v5476_v47  ;;  %3738 = vst [vmem:[%s8790_s14 + $0x60] sm:$0xf] %v5475_v12  ;;  %v4943_v38 = vsel %vm3645_vm13, %v4927_v5, %v6331_v59  ;;  %v4942_v48 = vsel %vm3645_vm13, %v4926_v52, %v6330_v19 }
 0x32e   : > { %v5492_v0 = vpack.c.bf16 %v4943_v38, %v4943_v38  ;;  %v5491_v13 = vpack.c.bf16 %v4942_v48, %v4942_v48 }
 0x330   : > { %5023 = vst [vmem:[%s8790_s14 + $0x6c] sm:$0xf] %v5492_v0  ;;  %5022 = vst [vmem:[%s8790_s14 + $0x64] sm:$0xf] %v5491_v13 }
 0x331 PF: > { %p15_p9 = scmp.ge.s32.totalorder %s6540_s28, 4   ;;  %s9473_s24 = smov %s6474_s25 }
 0x332   : > { %s9474_s25 = smov %s6549_s8  ;;  %s9475_s26 = smov %s6540_s28 }
 0x333   :  { %17 = sbr.rel (!%p15_p9) target bundleno = 2 (0x2), region = 145 }

// kernel: lrgcn_batch_forward.2
= control target key start
LH: loop header
LB: loop body
LE: loop exit
PB: predicated region body
PF: predicated region fallthrough
CT: control target
= control target key end

     0   :  { %s6650_s24 = smov 0   ;;  %s6652_s25 = smov 0   ;;  %s9187_s0 = inlined_call_operand.vmem [shape: bf16[8,256,32], index: 0, kind: input, shape index: {}]   ;;  %s9188_s1 = inlined_call_operand.vmem [shape: f32[256,32], index: 1, kind: input, shape index: {}]   ;;  %s9189_s2 = inlined_call_operand.vmem [shape: f32[256,32], index: 2, kind: input, shape index: {}]   ;;  %s9190_s3 = inlined_call_operand.vmem [shape: bf16[32,64], index: 3, kind: input, shape index: {}]   ;;  %s9191_s4 = inlined_call_operand.vmem [shape: bf16[32,96], index: 4, kind: input, shape index: {}]   ;;  %s9192_s5 = inlined_call_operand.vmem [shape: f32[1,32], index: 5, kind: input, shape index: {}]   ;;  %s9193_s6 = inlined_call_operand.vmem [shape: f32[256,32], index: 6, kind: output, shape index: {0}]   ;;  %s9194_s7 = inlined_call_operand.vmem [shape: bf16[256,256], index: 7, kind: output, shape index: {1}]  }
   0x1   :  { %s6654_s26 = smov 0  }
   0x2 LB: > { %s5227_s27 = sadd.s32 4294967295, %s6605_s26   ;;  %s6667_s28 = sadd.s32 1, %s6605_s26   ;;  %s6605_s26 = sphi %s6654_s26, %s9585_s26   ;;  %s6601_s25 = sphi %s6652_s25, %s9584_s25   ;;  %s6597_s24 = sphi %s6650_s24, %s9583_s24  }
   0x3   : > { %s22_s29 = ssub.s32 %s6605_s26, %s6667_s28  ;;  %s25_s30 = sadd.s32 1, %s6601_s25 }
   0x4   : > { %p23_p0 = scmp.eq.s32.totalorder %s22_s29, 0  ;;  %p32_p1 = scmp.ne.s32.totalorder %s6601_s25, %s6597_s24 }
   0x5   : > { %p33_p2 = scmp.eq.s32.totalorder %s6605_s26, 0  ;;  %p5230_p4 = scmp.ge.s32.totalorder %s6605_s26, 2 }
   0x6   : > { %s6676_s8 = scalar_select %p23_p0, %s6601_s25, %s25_s30  }
   0x7   : > { %p34_p3 = por %p33_p2, %p32_p1  ;;  %234 = sbr.rel (%p5230_p4) target bundleno = 48 (0x30), region = 28 }
   0xc   : > { %237 = sbr.rel (!%p34_p3) target bundleno = 48 (0x30), region = 32  ;;  %s239_s9 = sand.u32 (%p34_p3), 1, %s6601_s25  }
   0xd   : > { %s5556_s10 = sshll.u32 (%p34_p3), %s6605_s26, 6  ;;  %s5231_s11 = sshll.u32 (%p34_p3), %s239_s9, 9 }
   0xe   : > { %s6684_s14 = scalar_lea.vmem (%p34_p3), %s9187_s0, %s5556_s10  ;;  %s6689_s15 = scalar_lea.vmem (%p34_p3), [#allocation2], %s5231_s11 }
   0xf   : > { %v261_v0 = vld [vmem:[%s6684_s14] sm:$0xff] (%p34_p3)   ;;  %v265_v1 = vld [vmem:[%s6684_s14 + $0x8] sm:$0xff] (%p34_p3)   ;;  %v269_v2 = vld [vmem:[%s6684_s14 + $0x10] sm:$0xff] (%p34_p3)  }
  0x10   : > { %262 = vst [vmem:[%s6689_s15] sm:$0xff] (%p34_p3), %v261_v0   ;;  %266 = vst [vmem:[%s6689_s15 + $0x8] sm:$0xff] (%p34_p3), %v265_v1   ;;  %v273_v3 = vld [vmem:[%s6684_s14 + $0x18] sm:$0xff] (%p34_p3)   ;;  %v277_v4 = vld [vmem:[%s6684_s14 + $0x20] sm:$0xff] (%p34_p3)  }
  0x11   : > { %270 = vst [vmem:[%s6689_s15 + $0x10] sm:$0xff] %v269_v2   ;;  %v281_v5 = vld [vmem:[%s6684_s14 + $0x28] sm:$0xff]   ;;  %274 = vst [vmem:[%s6689_s15 + $0x18] sm:$0xff] %v273_v3   ;;  %v285_v6 = vld [vmem:[%s6684_s14 + $0x30] sm:$0xff]  }
  0x12   : > { %278 = vst [vmem:[%s6689_s15 + $0x20] sm:$0xff] %v277_v4   ;;  %282 = vst [vmem:[%s6689_s15 + $0x28] sm:$0xff] %v281_v5   ;;  %v289_v7 = vld [vmem:[%s6684_s14 + $0x38] sm:$0xff]   ;;  %v293_v8 = vld [vmem:[%s6684_s14 + $0x80] sm:$0xff]  }
  0x13   : > { %286 = vst [vmem:[%s6689_s15 + $0x30] sm:$0xff] %v285_v6   ;;  %290 = vst [vmem:[%s6689_s15 + $0x38] sm:$0xff] %v289_v7   ;;  %v297_v9 = vld [vmem:[%s6684_s14 + $0x88] sm:$0xff]   ;;  %v301_v10 = vld [vmem:[%s6684_s14 + $0x90] sm:$0xff]  }
  0x14   : > { %294 = vst [vmem:[%s6689_s15 + $0x40] sm:$0xff] %v293_v8   ;;  %v305_v11 = vld [vmem:[%s6684_s14 + $0x98] sm:$0xff]   ;;  %298 = vst [vmem:[%s6689_s15 + $0x48] sm:$0xff] %v297_v9   ;;  %v309_v12 = vld [vmem:[%s6684_s14 + $0xa0] sm:$0xff]  }
  0x15   : > { %302 = vst [vmem:[%s6689_s15 + $0x50] sm:$0xff] %v301_v10   ;;  %306 = vst [vmem:[%s6689_s15 + $0x58] sm:$0xff] %v305_v11   ;;  %v313_v13 = vld [vmem:[%s6684_s14 + $0xa8] sm:$0xff]   ;;  %v317_v14 = vld [vmem:[%s6684_s14 + $0xb0] sm:$0xff]  }
  0x16   : > { %310 = vst [vmem:[%s6689_s15 + $0x60] sm:$0xff] %v309_v12   ;;  %314 = vst [vmem:[%s6689_s15 + $0x68] sm:$0xff] %v313_v13   ;;  %v321_v15 = vld [vmem:[%s6684_s14 + $0xb8] sm:$0xff]   ;;  %v325_v16 = vld [vmem:[%s6684_s14 + $0x100] sm:$0xff]  }
  0x17   : > { %318 = vst [vmem:[%s6689_s15 + $0x70] sm:$0xff] %v317_v14   ;;  %v329_v17 = vld [vmem:[%s6684_s14 + $0x108] sm:$0xff]   ;;  %322 = vst [vmem:[%s6689_s15 + $0x78] sm:$0xff] %v321_v15   ;;  %v333_v18 = vld [vmem:[%s6684_s14 + $0x110] sm:$0xff]  }
  0x18   : > { %326 = vst [vmem:[%s6689_s15 + $0x80] sm:$0xff] %v325_v16   ;;  %330 = vst [vmem:[%s6689_s15 + $0x88] sm:$0xff] %v329_v17   ;;  %v337_v19 = vld [vmem:[%s6684_s14 + $0x118] sm:$0xff]   ;;  %v341_v20 = vld [vmem:[%s6684_s14 + $0x120] sm:$0xff]  }
  0x19   : > { %334 = vst [vmem:[%s6689_s15 + $0x90] sm:$0xff] %v333_v18   ;;  %338 = vst [vmem:[%s6689_s15 + $0x98] sm:$0xff] %v337_v19   ;;  %v345_v21 = vld [vmem:[%s6684_s14 + $0x128] sm:$0xff]   ;;  %v349_v22 = vld [vmem:[%s6684_s14 + $0x130] sm:$0xff]  }
  0x1a   : > { %342 = vst [vmem:[%s6689_s15 + $0xa0] sm:$0xff] %v341_v20   ;;  %v353_v23 = vld [vmem:[%s6684_s14 + $0x138] sm:$0xff]   ;;  %346 = vst [vmem:[%s6689_s15 + $0xa8] sm:$0xff] %v345_v21   ;;  %v357_v24 = vld [vmem:[%s6684_s14 + $0x180] sm:$0xff]  }
  0x1b   : > { %350 = vst [vmem:[%s6689_s15 + $0xb0] sm:$0xff] %v349_v22   ;;  %354 = vst [vmem:[%s6689_s15 + $0xb8] sm:$0xff] %v353_v23   ;;  %v361_v25 = vld [vmem:[%s6684_s14 + $0x188] sm:$0xff]   ;;  %v365_v26 = vld [vmem:[%s6684_s14 + $0x190] sm:$0xff]  }
  0x1c   : > { %358 = vst [vmem:[%s6689_s15 + $0xc0] sm:$0xff] %v357_v24   ;;  %362 = vst [vmem:[%s6689_s15 + $0xc8] sm:$0xff] %v361_v25   ;;  %v369_v27 = vld [vmem:[%s6684_s14 + $0x198] sm:$0xff]   ;;  %v373_v28 = vld [vmem:[%s6684_s14 + $0x1a0] sm:$0xff]  }
  0x1d   : > { %366 = vst [vmem:[%s6689_s15 + $0xd0] sm:$0xff] %v365_v26   ;;  %v377_v29 = vld [vmem:[%s6684_s14 + $0x1a8] sm:$0xff]   ;;  %370 = vst [vmem:[%s6689_s15 + $0xd8] sm:$0xff] %v369_v27   ;;  %v381_v30 = vld [vmem:[%s6684_s14 + $0x1b0] sm:$0xff]  }
  0x1e   : > { %374 = vst [vmem:[%s6689_s15 + $0xe0] sm:$0xff] %v373_v28   ;;  %378 = vst [vmem:[%s6689_s15 + $0xe8] sm:$0xff] %v377_v29   ;;  %v385_v31 = vld [vmem:[%s6684_s14 + $0x1b8] sm:$0xff]   ;;  %v389_v32 = vld [vmem:[%s6684_s14 + $0x200] sm:$0xff]  }
  0x1f   : > { %382 = vst [vmem:[%s6689_s15 + $0xf0] sm:$0xff] %v381_v30   ;;  %386 = vst [vmem:[%s6689_s15 + $0xf8] sm:$0xff] %v385_v31   ;;  %v393_v33 = vld [vmem:[%s6684_s14 + $0x208] sm:$0xff]   ;;  %v397_v34 = vld [vmem:[%s6684_s14 + $0x210] sm:$0xff]  }
  0x20   : > { %390 = vst [vmem:[%s6689_s15 + $0x100] sm:$0xff] %v389_v32   ;;  %v401_v35 = vld [vmem:[%s6684_s14 + $0x218] sm:$0xff]   ;;  %394 = vst [vmem:[%s6689_s15 + $0x108] sm:$0xff] %v393_v33   ;;  %v405_v36 = vld [vmem:[%s6684_s14 + $0x220] sm:$0xff]  }
  0x21   : > { %398 = vst [vmem:[%s6689_s15 + $0x110] sm:$0xff] %v397_v34   ;;  %402 = vst [vmem:[%s6689_s15 + $0x118] sm:$0xff] %v401_v35   ;;  %v409_v37 = vld [vmem:[%s6684_s14 + $0x228] sm:$0xff]   ;;  %v413_v38 = vld [vmem:[%s6684_s14 + $0x230] sm:$0xff]  }
  0x22   : > { %406 = vst [vmem:[%s6689_s15 + $0x120] sm:$0xff] %v405_v36   ;;  %410 = vst [vmem:[%s6689_s15 + $0x128] sm:$0xff] %v409_v37   ;;  %v417_v39 = vld [vmem:[%s6684_s14 + $0x238] sm:$0xff]   ;;  %v421_v40 = vld [vmem:[%s6684_s14 + $0x280] sm:$0xff]  }
  0x23   : > { %414 = vst [vmem:[%s6689_s15 + $0x130] sm:$0xff] %v413_v38   ;;  %v425_v41 = vld [vmem:[%s6684_s14 + $0x288] sm:$0xff]   ;;  %418 = vst [vmem:[%s6689_s15 + $0x138] sm:$0xff] %v417_v39   ;;  %v429_v42 = vld [vmem:[%s6684_s14 + $0x290] sm:$0xff]  }
  0x24   : > { %422 = vst [vmem:[%s6689_s15 + $0x140] sm:$0xff] %v421_v40   ;;  %426 = vst [vmem:[%s6689_s15 + $0x148] sm:$0xff] %v425_v41   ;;  %v433_v43 = vld [vmem:[%s6684_s14 + $0x298] sm:$0xff]   ;;  %v437_v44 = vld [vmem:[%s6684_s14 + $0x2a0] sm:$0xff]  }
  0x25   : > { %430 = vst [vmem:[%s6689_s15 + $0x150] sm:$0xff] %v429_v42   ;;  %434 = vst [vmem:[%s6689_s15 + $0x158] sm:$0xff] %v433_v43   ;;  %v441_v45 = vld [vmem:[%s6684_s14 + $0x2a8] sm:$0xff]   ;;  %v445_v46 = vld [vmem:[%s6684_s14 + $0x2b0] sm:$0xff]  }
  0x26   : > { %438 = vst [vmem:[%s6689_s15 + $0x160] sm:$0xff] %v437_v44   ;;  %v449_v47 = vld [vmem:[%s6684_s14 + $0x2b8] sm:$0xff]   ;;  %442 = vst [vmem:[%s6689_s15 + $0x168] sm:$0xff] %v441_v45   ;;  %v453_v48 = vld [vmem:[%s6684_s14 + $0x300] sm:$0xff]  }
  0x27   : > { %446 = vst [vmem:[%s6689_s15 + $0x170] sm:$0xff] %v445_v46   ;;  %450 = vst [vmem:[%s6689_s15 + $0x178] sm:$0xff] %v449_v47   ;;  %v457_v49 = vld [vmem:[%s6684_s14 + $0x308] sm:$0xff]   ;;  %v461_v50 = vld [vmem:[%s6684_s14 + $0x310] sm:$0xff]  }
  0x28   : > { %454 = vst [vmem:[%s6689_s15 + $0x180] sm:$0xff] %v453_v48   ;;  %458 = vst [vmem:[%s6689_s15 + $0x188] sm:$0xff] %v457_v49   ;;  %v465_v51 = vld [vmem:[%s6684_s14 + $0x318] sm:$0xff]   ;;  %v469_v52 = vld [vmem:[%s6684_s14 + $0x320] sm:$0xff]  }
  0x29   : > { %462 = vst [vmem:[%s6689_s15 + $0x190] sm:$0xff] %v461_v50   ;;  %v473_v53 = vld [vmem:[%s6684_s14 + $0x328] sm:$0xff]   ;;  %466 = vst [vmem:[%s6689_s15 + $0x198] sm:$0xff] %v465_v51   ;;  %v477_v54 = vld [vmem:[%s6684_s14 + $0x330] sm:$0xff]  }
  0x2a   : > { %470 = vst [vmem:[%s6689_s15 + $0x1a0] sm:$0xff] %v469_v52   ;;  %474 = vst [vmem:[%s6689_s15 + $0x1a8] sm:$0xff] %v473_v53   ;;  %v481_v55 = vld [vmem:[%s6684_s14 + $0x338] sm:$0xff]   ;;  %v485_v56 = vld [vmem:[%s6684_s14 + $0x380] sm:$0xff]  }
  0x2b   : > { %478 = vst [vmem:[%s6689_s15 + $0x1b0] sm:$0xff] %v477_v54   ;;  %482 = vst [vmem:[%s6689_s15 + $0x1b8] sm:$0xff] %v481_v55   ;;  %v489_v57 = vld [vmem:[%s6684_s14 + $0x388] sm:$0xff]   ;;  %v493_v58 = vld [vmem:[%s6684_s14 + $0x390] sm:$0xff]  }
  0x2c   : > { %486 = vst [vmem:[%s6689_s15 + $0x1c0] sm:$0xff] %v485_v56   ;;  %v497_v59 = vld [vmem:[%s6684_s14 + $0x398] sm:$0xff]   ;;  %490 = vst [vmem:[%s6689_s15 + $0x1c8] sm:$0xff] %v489_v57   ;;  %v501_v60 = vld [vmem:[%s6684_s14 + $0x3a0] sm:$0xff]  }
  0x2d   : > { %494 = vst [vmem:[%s6689_s15 + $0x1d0] sm:$0xff] %v493_v58   ;;  %498 = vst [vmem:[%s6689_s15 + $0x1d8] sm:$0xff] %v497_v59   ;;  %v505_v61 = vld [vmem:[%s6684_s14 + $0x3a8] sm:$0xff]   ;;  %v509_v62 = vld [vmem:[%s6684_s14 + $0x3b0] sm:$0xff]  }
  0x2e   : > { %502 = vst [vmem:[%s6689_s15 + $0x1e0] sm:$0xff] %v501_v60   ;;  %506 = vst [vmem:[%s6689_s15 + $0x1e8] sm:$0xff] %v505_v61   ;;  %v513_v63 = vld [vmem:[%s6684_s14 + $0x3b8] sm:$0xff]  }
  0x2f   : > { %510 = vst [vmem:[%s6689_s15 + $0x1f0] sm:$0xff] %v509_v62   ;;  %514 = vst [vmem:[%s6689_s15 + $0x1f8] sm:$0xff] %v513_v63  }
  0x30 PF: > { %p5234_p5 = scmp.ge.s32.totalorder %s6605_s26, 1  ;;  %p813_p6 = scmp.lt.s32.totalorder %s6605_s26, 3 }
  0x32   : > { %p814_p7 = pnand %p5234_p5, %p813_p6 }
  0x34   : > { %817 = sbr.rel (%p814_p7) target bundleno = 824 (0x338), region = 81 }
  0x39   : > { %v6432_v0 = vld [vmem:[%s9191_s4 + $0x8] sm:$0xff]   ;;  %s5236_s18 = sshll.u32 %s5227_s27, 4  ;;  %v6434_v2 = vld [vmem:[%s9191_s4] sm:$0xff]   ;;  %s820_s26 = sand.u32 1, %s6597_s24   ;;  %vm958_vm0 = vcmask 261120  }
  0x3a   : > { %v6433_v1 = vld [vmem:[%s9190_s3 + $0x8] sm:$0xff]   ;;  %p869_p8 = scmp.lt.s32.totalorder %s5236_s18, 31  ;;  %5993 = vmatprep.subr.bf16.mxu0 %v6432_v0  ;;  %v6435_v3 = vld [vmem:[%s9190_s3] sm:$0xff]   ;;  %s5235_s30 = sshll.u32 %s820_s26, 9 }
  0x3b   : > { %6161 = vmatprep.subr.bf16.mxu1 %v6433_v1  ;;  %5994 = vmatpush3.bf16.msra.mxu0 %v6432_v0  ;;  %s6844_s24 = scalar_lea.vmem [#allocation2], %s5235_s30  ;;  %s6607_s15 = smov 96  }
  0x3c   : > { %s9587_s18 = smov (!%p869_p8, %s5236_s18), 31  ;;  %6163 = vmatpush3.bf16.msra.mxu1 %v6433_v1  ;;  %5995 = vmatprep.subr.bf16.mxu0 %v6434_v2  ;;  %v6436_v8 = vld [vmem:[%s6844_s24 + $0xc0] sm:$0xff]   ;;  %v6437_v11 = vld [vmem:[%s6844_s24 + $0xc8] sm:$0xff]   ;;  %v6438_v15 = vld [vmem:[%s6844_s24 + $0xd0] sm:$0xff]   ;;  %s6608_s16 = smov 64  }
  0x3d   : > { %6162 = vmatprep.subr.bf16.mxu1 %v6435_v3  ;;  %s6833_s27 = sshll.u32 %s9587_s18, 3  ;;  %6081 = vmatprep.mubr.msk.bf16.mxu1 %vm958_vm0, %v6436_v8  ;;  %v6439_v21 = vld [vmem:[%s6844_s24 + $0xd8] sm:$0xff]   ;;  %v6440_v23 = vld [vmem:[%s6844_s24 + $0xe0] sm:$0xff]   ;;  %v6441_v29 = vld [vmem:[%s6844_s24 + $0xe8] sm:$0xff]   ;;  %s6609_s29 = smov 32  }
  0x3e   : > { %s6839_s11 = scalar_lea.vmem %s9188_s1, %s6833_s27  ;;  %v6442_v31 = vld [vmem:[%s6844_s24 + $0xf0] sm:$0xff]   ;;  %s6878_s14 = scalar_lea.vmem %s9189_s2, %s6833_s27  ;;  %v6443_v37 = vld [vmem:[%s6844_s24 + $0xf8] sm:$0xff]   ;;  %v6444_v39 = vld [vmem:[%s6844_s24 + $0x100] sm:$0xff]  }
  0x3f   : > { %5996 = vmatpush3.bf16.msra.mxu0 %v6434_v2  ;;  %v894_v4 = vld [vmem:[%s6839_s11] sm:$0xff]  ;;  %v895_v5 = vld [vmem:[%s6839_s11 + $0x8] sm:$0xff]  ;;  %v896_v6 = vld [vmem:[%s6839_s11 + $0x10] sm:$0xff]  ;;  %s7588_s21 = scalar_lea.vmem %s9193_s6, %s6833_s27 }
  0x40   : > { %6164 = vmatpush3.bf16.msra.mxu1 %v6435_v3  ;;  %v926_v7 = vpack.c.bf16 %v895_v5, %v894_v4  ;;  %6029 = vmatprep.subr.bf16.mxu0 %v6433_v1  ;;  %v897_v9 = vld [vmem:[%s6839_s11 + $0x18] sm:$0xff]  ;;  %v898_v12 = vld [vmem:[%s6839_s11 + $0x20] sm:$0xff]  ;;  %v899_v13 = vld [vmem:[%s6839_s11 + $0x28] sm:$0xff] }
  0x41   : > { %v927_v10 = vpack.c.bf16 %v897_v9, %v896_v6  ;;  %v928_v14 = vpack.c.bf16 %v899_v13, %v898_v12  ;;  %v900_v16 = vld [vmem:[%s6839_s11 + $0x30] sm:$0xff]  ;;  %v901_v17 = vld [vmem:[%s6839_s11 + $0x38] sm:$0xff]  ;;  %v902_v18 = vld [vmem:[%s6839_s11 + $0x40] sm:$0xff] }
  0x42   : > { %5997 = vmatprep.mubr.msk.bf16.mxu0 %vm958_vm0, %v926_v7  ;;  %v903_v19 = vld [vmem:[%s6839_s11 + $0x48] sm:$0xff]  ;;  %v929_v20 = vpack.c.bf16 %v901_v17, %v900_v16  ;;  %v904_v24 = vld [vmem:[%s6839_s11 + $0x50] sm:$0xff]  ;;  %v905_v25 = vld [vmem:[%s6839_s11 + $0x58] sm:$0xff] }
  0x43   : > { %5998 = vmatmul.mubr.msk.bf16.vlgmr.msra.gmra.mxu0 %vm958_vm0, %v927_v10  ;;  %6082 = vmatmul.mubr.msk.bf16.vlgmr.msra.gmra.mxu1 %vm958_vm0, %v6437_v11  ;;  %v930_v22 = vpack.c.bf16 %v903_v19, %v902_v18  ;;  %v906_v26 = vld [vmem:[%s6839_s11 + $0x60] sm:$0xff]  ;;  %v907_v27 = vld [vmem:[%s6839_s11 + $0x68] sm:$0xff]  ;;  %v931_v28 = vpack.c.bf16 %v905_v25, %v904_v24  ;;  %v908_v32 = vld [vmem:[%s6839_s11 + $0x70] sm:$0xff] }
  0x44   : > { %6001 = vmatprep.mubr.msk.bf16.mxu0 %vm958_vm0, %v928_v14  ;;  %6085 = vmatprep.mubr.msk.bf16.mxu1 %vm958_vm0, %v6438_v15  ;;  %v932_v30 = vpack.c.bf16 %v907_v27, %v906_v26  ;;  %v909_v33 = vld [vmem:[%s6839_s11 + $0x78] sm:$0xff]  ;;  %v910_v34 = vld [vmem:[%s6878_s14] sm:$0xff]  ;;  %v911_v35 = vld [vmem:[%s6878_s14 + $0x8] sm:$0xff] }
  0x45   : > { %6030 = vmatpush3.bf16.msra.mxu0 %v6433_v1  ;;  %v933_v36 = vpack.c.bf16 %v909_v33, %v908_v32  ;;  %v934_v38 = vpack.c.bf16 %v911_v35, %v910_v34  ;;  %v912_v40 = vld [vmem:[%s6878_s14 + $0x10] sm:$0xff]  ;;  %v913_v41 = vld [vmem:[%s6878_s14 + $0x18] sm:$0xff]  ;;  %v914_v42 = vld [vmem:[%s6878_s14 + $0x20] sm:$0xff] }
  0x46   : > { %6031 = vmatprep.subr.bf16.mxu0 %v6435_v3  ;;  %v915_v43 = vld [vmem:[%s6878_s14 + $0x28] sm:$0xff]  ;;  %v935_v44 = vpack.c.bf16 %v913_v41, %v912_v40  ;;  %v6446_v47 = vld [vmem:[%s6844_s24 + $0x110] sm:$0xff]   ;;  %v917_v49 = vld [vmem:[%s6878_s14 + $0x38] sm:$0xff] }
  0x47   : > { %v6445_v45 = vld [vmem:[%s6844_s24 + $0x108] sm:$0xff]   ;;  %v936_v46 = vpack.c.bf16 %v915_v43, %v914_v42  ;;  %v916_v48 = vld [vmem:[%s6878_s14 + $0x30] sm:$0xff]  ;;  %v918_v50 = vld [vmem:[%s6878_s14 + $0x40] sm:$0xff] }
  0x48   : > { %v919_v51 = vld [vmem:[%s6878_s14 + $0x48] sm:$0xff]  ;;  %v937_v52 = vpack.c.bf16 %v917_v49, %v916_v48  ;;  %v6447_v53 = vld [vmem:[%s6844_s24 + $0x118] sm:$0xff]   ;;  %v6448_v55 = vld [vmem:[%s6844_s24 + $0x120] sm:$0xff]  }
  0x49   : > { %6032 = vmatpush3.bf16.msra.mxu0 %v6435_v3  ;;  %v938_v54 = vpack.c.bf16 %v919_v51, %v918_v50  ;;  %v920_v56 = vld [vmem:[%s6878_s14 + $0x50] sm:$0xff]  ;;  %v921_v57 = vld [vmem:[%s6878_s14 + $0x58] sm:$0xff]  ;;  %v922_v58 = vld [vmem:[%s6878_s14 + $0x60] sm:$0xff] }
  0x4a   : > { %v923_v59 = vld [vmem:[%s6878_s14 + $0x68] sm:$0xff]  ;;  %v939_v60 = vpack.c.bf16 %v921_v57, %v920_v56  ;;  %v6450_v63 = vld [vmem:[%s6844_s24 + $0x130] sm:$0xff]   ;;  %v925_v1 = vld [vmem:[%s6878_s14 + $0x78] sm:$0xff] }
  0x4b   : > { %6002 = vmatmul.mubr.msk.bf16.gmra.mxu0 %vm958_vm0, %v929_v20  ;;  %6086 = vmatmul.mubr.msk.bf16.gmra.mxu1 %vm958_vm0, %v6439_v21  ;;  %v6449_v61 = vld [vmem:[%s6844_s24 + $0x128] sm:$0xff]   ;;  %v940_v62 = vpack.c.bf16 %v923_v59, %v922_v58  ;;  %v924_v0 = vld [vmem:[%s6878_s14 + $0x70] sm:$0xff]  ;;  %v6451_v2 = vld [vmem:[%s6844_s24 + $0x138] sm:$0xff]   ;;  %s8930_s14 = scalar_lea.vmem %s9194_s7, %s6833_s27 }
  0x4c   : > { %6005 = vmatprep.mubr.msk.bf16.mxu0 %vm958_vm0, %v930_v22  ;;  %6089 = vmatprep.mubr.msk.bf16.mxu1 %vm958_vm0, %v6440_v23  ;;  %v941_v3 = vpack.c.bf16 %v925_v1, %v924_v0  ;;  %v6452_v4 = vld [vmem:[%s6844_s24] sm:$0xff]   ;;  %v6454_v6 = vld [vmem:[%s6844_s24 + $0x8] sm:$0xff]   ;;  %v6456_v8 = vld [vmem:[%s6844_s24 + $0x10] sm:$0xff]  }
  0x4d   : > { %v6453_v5 = vld [vmem:[%s6844_s24 + $0x140] sm:$0xff]   ;;  %v6455_v7 = vld [vmem:[%s6844_s24 + $0x148] sm:$0xff]   ;;  %v6457_v9 = vld [vmem:[%s6844_s24 + $0x150] sm:$0xff]  }
  0x4e   : > { %v6458_v10 = vld [vmem:[%s6844_s24 + $0x18] sm:$0xff]   ;;  %v6460_v12 = vld [vmem:[%s6844_s24 + $0x20] sm:$0xff]   ;;  %v6462_v14 = vld [vmem:[%s6844_s24 + $0x28] sm:$0xff]  }
  0x4f   : > { %v6459_v11 = vld [vmem:[%s6844_s24 + $0x158] sm:$0xff]   ;;  %v6461_v13 = vld [vmem:[%s6844_s24 + $0x160] sm:$0xff]   ;;  %v6463_v15 = vld [vmem:[%s6844_s24 + $0x168] sm:$0xff]  }
  0x50   : > { %v6464_v16 = vld [vmem:[%s6844_s24 + $0x30] sm:$0xff]   ;;  %v6466_v18 = vld [vmem:[%s6844_s24 + $0x38] sm:$0xff]   ;;  %v6468_v20 = vld [vmem:[%s6844_s24 + $0x40] sm:$0xff]  }
  0x51   : > { %v6465_v17 = vld [vmem:[%s6844_s24 + $0x170] sm:$0xff]   ;;  %v6467_v19 = vld [vmem:[%s6844_s24 + $0x178] sm:$0xff]   ;;  %v6469_v21 = vld [vmem:[%s6844_s24 + $0x180] sm:$0xff]  }
  0x52   : > { %v6470_v22 = vld [vmem:[%s6844_s24 + $0x48] sm:$0xff]   ;;  %v6472_v24 = vld [vmem:[%s6844_s24 + $0x50] sm:$0xff]   ;;  %v6474_v26 = vld [vmem:[%s6844_s24 + $0x58] sm:$0xff]  }
  0x53   : > { %6006 = vmatmul.mubr.msk.bf16.gmra.mxu0 %vm958_vm0, %v931_v28  ;;  %6090 = vmatmul.mubr.msk.bf16.gmra.mxu1 %vm958_vm0, %v6441_v29  ;;  %v6471_v23 = vld [vmem:[%s6844_s24 + $0x188] sm:$0xff]   ;;  %v6473_v25 = vld [vmem:[%s6844_s24 + $0x190] sm:$0xff]   ;;  %v6475_v27 = vld [vmem:[%s6844_s24 + $0x198] sm:$0xff]  }
  0x54   : > { %6009 = vmatprep.mubr.msk.bf16.mxu0 %vm958_vm0, %v932_v30  ;;  %6093 = vmatprep.mubr.msk.bf16.mxu1 %vm958_vm0, %v6442_v31  ;;  %v6476_v28 = vld [vmem:[%s6844_s24 + $0x60] sm:$0xff]   ;;  %v6478_v30 = vld [vmem:[%s6844_s24 + $0x68] sm:$0xff]   ;;  %v6480_v32 = vld [vmem:[%s6844_s24 + $0x70] sm:$0xff]  }
  0x55   : > { %v6477_v29 = vld [vmem:[%s6844_s24 + $0x1a0] sm:$0xff]   ;;  %v6479_v31 = vld [vmem:[%s6844_s24 + $0x1a8] sm:$0xff]   ;;  %v6481_v33 = vld [vmem:[%s6844_s24 + $0x1b0] sm:$0xff]  }
  0x56   : > { %v6482_v34 = vld [vmem:[%s6844_s24 + $0x78] sm:$0xff]   ;;  %v6488_v40 = vld [vmem:[%s6844_s24 + $0x90] sm:$0xff]  }
  0x57   : > { %v6483_v35 = vld [vmem:[%s6844_s24 + $0x1b8] sm:$0xff]   ;;  %v6489_v41 = vld [vmem:[%s6844_s24 + $0x1d0] sm:$0xff]  }
  0x58   : > { %v6490_v42 = vld [vmem:[%s6844_s24 + $0x98] sm:$0xff]   ;;  %v6496_v48 = vld [vmem:[%s6844_s24 + $0xb0] sm:$0xff]  }
  0x59   : > { %v6491_v43 = vld [vmem:[%s6844_s24 + $0x1d8] sm:$0xff]   ;;  %v6497_v49 = vld [vmem:[%s6844_s24 + $0x1f0] sm:$0xff]  }
  0x5a   : > { %v6498_v50 = vld [vmem:[%s6844_s24 + $0xb8] sm:$0xff]  }
  0x5b   : > { %6010 = vmatmul.mubr.msk.bf16.gmra.mxu0 %vm958_vm0, %v933_v36  ;;  %6094 = vmatmul.mubr.msk.bf16.gmra.mxu1 %vm958_vm0, %v6443_v37  ;;  %v6484_v36 = vld [vmem:[%s6844_s24 + $0x80] sm:$0xff]   ;;  %v6499_v51 = vld [vmem:[%s6844_s24 + $0x1f8] sm:$0xff]  }
  0x5c   : > { %6013 = vmatprep.mubr.msk.bf16.mxu0 %vm958_vm0, %v934_v38  ;;  %6097 = vmatprep.mubr.msk.bf16.mxu1 %vm958_vm0, %v6444_v39  ;;  %v6485_v37 = vld [vmem:[%s6844_s24 + $0x1c0] sm:$0xff]   ;;  %v6486_v38 = vld [vmem:[%s6844_s24 + $0x88] sm:$0xff]  }
  0x5d   : > { %v6487_v39 = vld [vmem:[%s6844_s24 + $0x1c8] sm:$0xff]  }
  0x63   : > { %6014 = vmatmul.mubr.msk.bf16.gmra.mxu0 %vm958_vm0, %v935_v44  ;;  %6098 = vmatmul.mubr.msk.bf16.gmra.mxu1 %vm958_vm0, %v6445_v45  ;;  %v6492_v44 = vld [vmem:[%s6844_s24 + $0xa0] sm:$0xff]  }
  0x64   : > { %6017 = vmatprep.mubr.msk.bf16.mxu0 %vm958_vm0, %v936_v46  ;;  %6101 = vmatprep.mubr.msk.bf16.mxu1 %vm958_vm0, %v6446_v47  ;;  %v6493_v45 = vld [vmem:[%s6844_s24 + $0x1e0] sm:$0xff]   ;;  %v6494_v46 = vld [vmem:[%s6844_s24 + $0xa8] sm:$0xff]  }
  0x65   : > { %v6495_v47 = vld [vmem:[%s6844_s24 + $0x1e8] sm:$0xff]  }
  0x6b   : > { %6018 = vmatmul.mubr.msk.bf16.gmra.mxu0 %vm958_vm0, %v937_v52  ;;  %6102 = vmatmul.mubr.msk.bf16.gmra.mxu1 %vm958_vm0, %v6447_v53 }
  0x6c   : > { %6021 = vmatprep.mubr.msk.bf16.mxu0 %vm958_vm0, %v938_v54  ;;  %6105 = vmatprep.mubr.msk.bf16.mxu1 %vm958_vm0, %v6448_v55 }
  0x73   : > { %6022 = vmatmul.mubr.msk.bf16.gmra.mxu0 %vm958_vm0, %v939_v60  ;;  %6106 = vmatmul.mubr.msk.bf16.gmra.mxu1 %vm958_vm0, %v6449_v61 }
  0x74   : > { %6025 = vmatprep.mubr.msk.bf16.mxu0 %vm958_vm0, %v940_v62  ;;  %6109 = vmatprep.mubr.msk.bf16.mxu1 %vm958_vm0, %v6450_v63 }
  0x7b   : > { %6026 = vmatmul.mubr.msk.bf16.gmra.mxu0 %vm958_vm0, %v941_v3  ;;  %6110 = vmatmul.mubr.msk.bf16.gmra.mxu1 %vm958_vm0, %v6451_v2 }
  0x7c   : > { %6033 = vmatprep.mubr.msk.bf16.mxu0 %vm958_vm0, %v6452_v4  ;;  %6113 = vmatprep.mubr.msk.bf16.mxu1 %vm958_vm0, %v6453_v5 }
  0x83   : > { %6034 = vmatmul.mubr.msk.bf16.vlgmr.msra.gmra.mxu0 %vm958_vm0, %v6454_v6  ;;  %6114 = vmatmul.mubr.msk.bf16.gmra.mxu1 %vm958_vm0, %v6455_v7 }
  0x84   : > { %6037 = vmatprep.mubr.msk.bf16.mxu0 %vm958_vm0, %v6456_v8  ;;  %6117 = vmatprep.mubr.msk.bf16.mxu1 %vm958_vm0, %v6457_v9 }
  0x8b   : > { %6038 = vmatmul.mubr.msk.bf16.gmra.mxu0 %vm958_vm0, %v6458_v10  ;;  %6118 = vmatmul.mubr.msk.bf16.gmra.mxu1 %vm958_vm0, %v6459_v11 }
  0x8c   : > { %6041 = vmatprep.mubr.msk.bf16.mxu0 %vm958_vm0, %v6460_v12  ;;  %6121 = vmatprep.mubr.msk.bf16.mxu1 %vm958_vm0, %v6461_v13 }
  0x93   : > { %6042 = vmatmul.mubr.msk.bf16.gmra.mxu0 %vm958_vm0, %v6462_v14  ;;  %6122 = vmatmul.mubr.msk.bf16.gmra.mxu1 %vm958_vm0, %v6463_v15 }
  0x94   : > { %6045 = vmatprep.mubr.msk.bf16.mxu0 %vm958_vm0, %v6464_v16  ;;  %6125 = vmatprep.mubr.msk.bf16.mxu1 %vm958_vm0, %v6465_v17 }
  0x9b   : > { %6046 = vmatmul.mubr.msk.bf16.gmra.mxu0 %vm958_vm0, %v6466_v18  ;;  %6126 = vmatmul.mubr.msk.bf16.gmra.mxu1 %vm958_vm0, %v6467_v19 }
  0x9c   : > { %6049 = vmatprep.mubr.msk.bf16.mxu0 %vm958_vm0, %v6468_v20  ;;  %6129 = vmatprep.mubr.msk.bf16.mxu1 %vm958_vm0, %v6469_v21 }
  0xa3   : > { %6050 = vmatmul.mubr.msk.bf16.gmra.mxu0 %vm958_vm0, %v6470_v22  ;;  %6130 = vmatmul.mubr.msk.bf16.gmra.mxu1 %vm958_vm0, %v6471_v23 }
  0xa4   : > { %6053 = vmatprep.mubr.msk.bf16.mxu0 %vm958_vm0, %v6472_v24  ;;  %6133 = vmatprep.mubr.msk.bf16.mxu1 %vm958_vm0, %v6473_v25 }
  0xab   : > { %6054 = vmatmul.mubr.msk.bf16.gmra.mxu0 %vm958_vm0, %v6474_v26  ;;  %6134 = vmatmul.mubr.msk.bf16.gmra.mxu1 %vm958_vm0, %v6475_v27 }
  0xac   : > { %6057 = vmatprep.mubr.msk.bf16.mxu0 %vm958_vm0, %v6476_v28  ;;  %6137 = vmatprep.mubr.msk.bf16.mxu1 %vm958_vm0, %v6477_v29 }
  0xb3   : > { %6058 = vmatmul.mubr.msk.bf16.gmra.mxu0 %vm958_vm0, %v6478_v30  ;;  %6138 = vmatmul.mubr.msk.bf16.gmra.mxu1 %vm958_vm0, %v6479_v31 }
  0xb4   : > { %6061 = vmatprep.mubr.msk.bf16.mxu0 %vm958_vm0, %v6480_v32  ;;  %6141 = vmatprep.mubr.msk.bf16.mxu1 %vm958_vm0, %v6481_v33 }
  0xbb   : > { %6062 = vmatmul.mubr.msk.bf16.gmra.mxu0 %vm958_vm0, %v6482_v34  ;;  %6142 = vmatmul.mubr.msk.bf16.gmra.mxu1 %vm958_vm0, %v6483_v35 }
  0xbc   : > { %6065 = vmatprep.mubr.msk.bf16.mxu0 %vm958_vm0, %v6484_v36  ;;  %6145 = vmatprep.mubr.msk.bf16.mxu1 %vm958_vm0, %v6485_v37 }
  0xc3   : > { %6066 = vmatmul.mubr.msk.bf16.gmra.mxu0 %vm958_vm0, %v6486_v38  ;;  %6146 = vmatmul.mubr.msk.bf16.gmra.mxu1 %vm958_vm0, %v6487_v39 }
  0xc4   : > { %6069 = vmatprep.mubr.msk.bf16.mxu0 %vm958_vm0, %v6488_v40  ;;  %6149 = vmatprep.mubr.msk.bf16.mxu1 %vm958_vm0, %v6489_v41 }
  0xcb   : > { %6070 = vmatmul.mubr.msk.bf16.gmra.mxu0 %vm958_vm0, %v6490_v42  ;;  %6150 = vmatmul.mubr.msk.bf16.gmra.mxu1 %vm958_vm0, %v6491_v43 }
  0xcc   : > { %6073 = vmatprep.mubr.msk.bf16.mxu0 %vm958_vm0, %v6492_v44  ;;  %6153 = vmatprep.mubr.msk.bf16.mxu1 %vm958_vm0, %v6493_v45 }
  0xd3   : > { %6074 = vmatmul.mubr.msk.bf16.gmra.mxu0 %vm958_vm0, %v6494_v46  ;;  %6154 = vmatmul.mubr.msk.bf16.gmra.mxu1 %vm958_vm0, %v6495_v47 }
  0xd4   : > { %6077 = vmatprep.mubr.msk.bf16.mxu0 %vm958_vm0, %v6496_v48  ;;  %6157 = vmatprep.mubr.msk.bf16.mxu1 %vm958_vm0, %v6497_v49 }
  0xdb   : > { %6078 = vmatmul.mubr.msk.bf16.gmra.mxu0 %vm958_vm0, %v6498_v50  ;;  %6158 = vmatmul.mubr.msk.bf16.gmra.mxu1 %vm958_vm0, %v6499_v51 }
 0x103   : > { %v7025_v52 = vpop.f32.mrf.mxu0  ;;  %v6083_v53 = vpop.f32.mrf.mxu1 }
 0x104   : > { %v3293_v54 = vadd.f32 %v6083_v53, %v7025_v52 }
 0x105   : > { %v7028_v55 = vpop.f32.mrf.mxu0  ;;  %v2210_v56 = vpop.f32.mrf.mxu1 }
 0x106   : > { %v3291_v57 = vadd.f32 %v2210_v56, %v7028_v55  ;;  %vm3309_vm1 = vcmp.gt.f32.partialorder %v3293_v54, 0.0  ;;  %v3325_v58 = vmul.f32 0.01, %v3293_v54 }
 0x107   : > { %v7031_v59 = vpop.f32.mrf.mxu0  ;;  %v6084_v60 = vpop.f32.mrf.mxu1 }
 0x108   : > { %v3323_v61 = vmul.f32 0.01, %v3291_v57  ;;  %v3294_v62 = vadd.f32 %v6084_v60, %v7031_v59  ;;  %v7034_v63 = vsel %vm3309_vm1, %v3293_v54, %v3325_v58  ;;  %vm3307_vm2 = vcmp.gt.f32.partialorder %v3291_v57, 0.0 }
 0x109   : > { %v7036_v0 = vpop.f32.mrf.mxu0  ;;  %3423 = vrot.lane.b32.xlu0 %v7034_v63, %s6607_s15  ;;  %v2213_v1 = vpop.f32.mrf.mxu1 }
 0x10a   : > { %v3292_v2 = vadd.f32 %v2213_v1, %v7036_v0  ;;  %vm3310_vm3 = vcmp.gt.f32.partialorder %v3294_v62, 0.0  ;;  %v3326_v3 = vmul.f32 0.01, %v3294_v62  ;;  %v7044_v8 = vsel %vm3307_vm2, %v3291_v57, %v3323_v61 }
 0x10b   : > { %v7041_v4 = vpop.f32.mrf.mxu0  ;;  %v6087_v5 = vpop.f32.mrf.mxu1 }
 0x10c   : > { %v3324_v6 = vmul.f32 0.01, %v3292_v2  ;;  %v3297_v7 = vadd.f32 %v6087_v5, %v7041_v4  ;;  %v7046_v9 = vsel %vm3310_vm3, %v3294_v62, %v3326_v3  ;;  %vm3308_vm4 = vcmp.gt.f32.partialorder %v3292_v2, 0.0 }
 0x10d   : > { %v7048_v10 = vpop.f32.mrf.mxu0  ;;  %3419 = vrot.lane.b32.xlu0 %v7044_v8, %s6607_s15  ;;  %3425 = vrot.lane.b32.xlu1 %v7046_v9, %s6607_s15  ;;  %v2226_v11 = vpop.f32.mrf.mxu1 }
 0x10e   : > { %v3329_v12 = vmul.f32 0.01, %v3297_v7  ;;  %v3295_v13 = vadd.f32 %v2226_v11, %v7048_v10  ;;  %vm3313_vm5 = vcmp.gt.f32.partialorder %v3297_v7, 0.0  ;;  %v7058_v18 = vsel %vm3308_vm4, %v3292_v2, %v3324_v6 }
 0x10f   : > { %v7055_v14 = vpop.f32.mrf.mxu0  ;;  %v6088_v15 = vpop.f32.mrf.mxu1 }
 0x110   : > { %v3327_v16 = vmul.f32 0.01, %v3295_v13  ;;  %v3298_v17 = vadd.f32 %v6088_v15, %v7055_v14  ;;  %v7060_v19 = vsel %vm3313_vm5, %v3297_v7, %v3329_v12  ;;  %vm3311_vm6 = vcmp.gt.f32.partialorder %v3295_v13, 0.0 }
 0x111   : > { %v7062_v20 = vpop.f32.mrf.mxu0  ;;  %3421 = vrot.lane.b32.xlu1 %v7058_v18, %s6607_s15  ;;  %3431 = vrot.lane.b32.xlu0 %v7060_v19, %s6607_s15  ;;  %v2229_v21 = vpop.f32.mrf.mxu1 }
 0x112   : > { %v3330_v22 = vmul.f32 0.01, %v3298_v17  ;;  %v3296_v23 = vadd.f32 %v2229_v21, %v7062_v20  ;;  %vm3314_vm7 = vcmp.gt.f32.partialorder %v3298_v17, 0.0  ;;  %v7072_v28 = vsel %vm3311_vm6, %v3295_v13, %v3327_v16 }
 0x113   : > { %v7069_v24 = vpop.f32.mrf.mxu0  ;;  %v6091_v25 = vpop.f32.mrf.mxu1 }
 0x114   : > { %v3328_v26 = vmul.f32 0.01, %v3296_v23  ;;  %v3301_v27 = vadd.f32 %v6091_v25, %v7069_v24  ;;  %v7074_v29 = vsel %vm3314_vm7, %v3298_v17, %v3330_v22  ;;  %vm3312_vm8 = vcmp.gt.f32.partialorder %v3296_v23, 0.0 }
 0x115   : > { %v7076_v30 = vpop.f32.mrf.mxu0  ;;  %3427 = vrot.lane.b32.xlu0 %v7072_v28, %s6607_s15  ;;  %3433 = vrot.lane.b32.xlu1 %v7074_v29, %s6607_s15  ;;  %v2242_v31 = vpop.f32.mrf.mxu1 }
 0x116   : > { %v3333_v32 = vmul.f32 0.01, %v3301_v27  ;;  %v3299_v33 = vadd.f32 %v2242_v31, %v7076_v30  ;;  %vm3317_vm9 = vcmp.gt.f32.partialorder %v3301_v27, 0.0  ;;  %v7086_v38 = vsel %vm3312_vm8, %v3296_v23, %v3328_v26 }
 0x117   : > { %v7083_v34 = vpop.f32.mrf.mxu0  ;;  %v6092_v35 = vpop.f32.mrf.mxu1 }
 0x118   : > { %v3331_v36 = vmul.f32 0.01, %v3299_v33  ;;  %v3302_v37 = vadd.f32 %v6092_v35, %v7083_v34  ;;  %v7088_v39 = vsel %vm3317_vm9, %v3301_v27, %v3333_v32  ;;  %vm3315_vm10 = vcmp.gt.f32.partialorder %v3299_v33, 0.0 }
 0x119   : > { %v7090_v40 = vpop.f32.mrf.mxu0  ;;  %3429 = vrot.lane.b32.xlu1 %v7086_v38, %s6607_s15  ;;  %3439 = vrot.lane.b32.xlu0 %v7088_v39, %s6607_s15  ;;  %v2245_v41 = vpop.f32.mrf.mxu1 }
 0x11a   : > { %v3334_v42 = vmul.f32 0.01, %v3302_v37  ;;  %v3300_v43 = vadd.f32 %v2245_v41, %v7090_v40  ;;  %vm3318_vm11 = vcmp.gt.f32.partialorder %v3302_v37, 0.0  ;;  %v7100_v48 = vsel %vm3315_vm10, %v3299_v33, %v3331_v36 }
 0x11b   : > { %v7097_v44 = vpop.f32.mrf.mxu0  ;;  %v6095_v45 = vpop.f32.mrf.mxu1 }
 0x11c   : > { %v3332_v46 = vmul.f32 0.01, %v3300_v43  ;;  %v3305_v47 = vadd.f32 %v6095_v45, %v7097_v44  ;;  %v7102_v49 = vsel %vm3318_vm11, %v3302_v37, %v3334_v42  ;;  %vm3316_vm12 = vcmp.gt.f32.partialorder %v3300_v43, 0.0 }
 0x11d   : > { %v7104_v50 = vpop.f32.mrf.mxu0  ;;  %3435 = vrot.lane.b32.xlu0 %v7100_v48, %s6607_s15  ;;  %3441 = vrot.lane.b32.xlu1 %v7102_v49, %s6607_s15  ;;  %v2258_v51 = vpop.f32.mrf.mxu1 }
 0x11e   : > { %v3337_v53 = vmul.f32 0.01, %v3305_v47  ;;  %v3303_v54 = vadd.f32 %v2258_v51, %v7104_v50  ;;  %vm3321_vm13 = vcmp.gt.f32.partialorder %v3305_v47, 0.0  ;;  %v7114_v61 = vsel %vm3316_vm12, %v3300_v43, %v3332_v46 }
 0x11f   : > { %v7111_v56 = vpop.f32.mrf.mxu0  ;;  %v6096_v57 = vpop.f32.mrf.mxu1 }
 0x120   : > { %v3335_v58 = vmul.f32 0.01, %v3303_v54  ;;  %v3306_v60 = vadd.f32 %v6096_v57, %v7111_v56  ;;  %v7116_v62 = vsel %vm3321_vm13, %v3305_v47, %v3337_v53  ;;  %vm3319_vm14 = vcmp.gt.f32.partialorder %v3303_v54, 0.0 }
 0x121   : > { %v7118_v1 = vpop.f32.mrf.mxu0  ;;  %3437 = vrot.lane.b32.xlu1 %v7114_v61, %s6607_s15  ;;  %3447 = vrot.lane.b32.xlu0 %v7116_v62, %s6607_s15  ;;  %v2261_v2 = vpop.f32.mrf.mxu1 }
 0x122   : > { %v3338_v3 = vmul.f32 0.01, %v3306_v60  ;;  %v3304_v5 = vadd.f32 %v2261_v2, %v7118_v1  ;;  %vm3322_vm15 = vcmp.gt.f32.partialorder %v3306_v60, 0.0  ;;  %v7128_v12 = vsel %vm3319_vm14, %v3303_v54, %v3335_v58 }
 0x123   : > { %v7125_v6 = vpop.f32.mrf.mxu0  ;;  %v6099_v7 = vpop.f32.mrf.mxu1 }
 0x124   : > { %v3856_v11 = vadd.f32 %v6099_v7, %v7025_v52  ;;  %v3336_v13 = vmul.f32 0.01, %v3304_v5  ;;  %v7134_v16 = vsel %vm3322_vm15, %v3306_v60, %v3338_v3  ;;  %vm3320_vm1 = vcmp.gt.f32.partialorder %v3304_v5, 0.0 }
 0x125   : > { %v7130_v15 = vpop.f32.mrf.mxu0  ;;  %3443 = vrot.lane.b32.xlu0 %v7128_v12, %s6607_s15  ;;  %v2274_v17 = vpop.f32.mrf.mxu1  ;;  %3449 = vrot.lane.b32.xlu1 %v7134_v16, %s6607_s15  ;;  %v1188_v27 = vmul.f32 1.442695, %v7125_v6  ;;  %vm1170_vm9 = vcmp.gt.f32.partialorder %v7125_v6, 0.0 }
 0x126   : > { %v3888_v21 = vmul.f32 0.01, %v3856_v11  ;;  %v1184_v22 = vmul.f32 1.442695, %v7130_v15  ;;  %v3854_v23 = vadd.f32 %v2274_v17, %v7028_v55  ;;  %vm3872_vm2 = vcmp.gt.f32.partialorder %v3856_v11, 0.0 }
 0x127   : > { %v7140_v25 = vpop.f32.mrf.mxu0  ;;  %v6100_v26 = vpop.f32.mrf.mxu1  ;;  %v7146_v35 = vsel %vm3320_vm1, %v3304_v5, %v3336_v13  ;;  %vm1168_vm10 = vcmp.gt.f32.partialorder %v7130_v15, 0.0 }
 0x128   : > { %v3857_v31 = vadd.f32 %v6100_v26, %v7031_v59  ;;  %v3886_v32 = vmul.f32 0.01, %v3854_v23  ;;  %v7148_v36 = vsel %vm3872_vm2, %v3856_v11, %v3888_v21  ;;  %6500 = vpow2.f32 %v1184_v22 }
 0x129   : > { %v7144_v33 = vpop.f32.mrf.mxu0  ;;  %9297 = vst [vmem:[#allocation3_spill] sm:$0xff] %v7148_v36  ;;  %v2277_v37 = vpop.f32.mrf.mxu1  ;;  %3445 = vrot.lane.b32.xlu1 %v7146_v35, %s6607_s15  ;;  %3986 = vrot.lane.b32.xlu0 %v7148_v36, %s6607_s15  ;;  %vm3870_vm3 = vcmp.gt.f32.partialorder %v3854_v23, 0.0  ;;  %6502 = vpow2.f32 %v1188_v27  ;;  %v1190_v54 = vmul.f32 1.442695, %v7140_v25  ;;  %vm1171_vm14 = vcmp.gt.f32.partialorder %v7140_v25, 0.0 }
 0x12a   : > { %v3889_v41 = vmul.f32 0.01, %v3857_v31  ;;  %v3855_v42 = vadd.f32 %v2277_v37, %v7036_v0  ;;  %v7160_v51 = vsel %vm3870_vm3, %v3854_v23, %v3886_v32  ;;  %vm3873_vm4 = vcmp.gt.f32.partialorder %v3857_v31, 0.0 }
 0x12b   : > { %v7155_v43 = vpop.f32.mrf.mxu0  ;;  %v6103_v45 = vpop.f32.mrf.mxu1  ;;  %9298 = vst [vmem:[#allocation4_spill] sm:$0xff] %v7160_v51  ;;  %v1186_v7 = vmul.f32 1.442695, %v7144_v33  ;;  %6504 = vpow2.f32 %v1190_v54  ;;  %vm1169_vm1 = vcmp.gt.f32.partialorder %v7144_v33, 0.0 }
 0x12c   : > { %v3860_v46 = vadd.f32 %v6103_v45, %v7041_v4  ;;  %v3887_v57 = vmul.f32 0.01, %v3855_v42  ;;  %v7165_v58 = vsel %vm3873_vm4, %v3857_v31, %v3889_v41  ;;  %vm3871_vm5 = vcmp.gt.f32.partialorder %v3855_v42, 0.0 }
 0x12d   : > { %v7158_v47 = vpop.f32.mrf.mxu0  ;;  %v2290_v53 = vpop.f32.mrf.mxu1  ;;  %3982 = vrot.lane.b32.xlu0 %v7160_v51, %s6607_s15  ;;  %9299 = vst [vmem:[#allocation5_spill] sm:$0xff] %v7165_v58  ;;  %3988 = vrot.lane.b32.xlu1 %v7165_v58, %s6607_s15  ;;  %6506 = vpow2.f32 %v1186_v7  ;;  %v1196_v27 = vmul.f32 1.442695, %v7155_v43  ;;  %vm1174_vm3 = vcmp.gt.f32.partialorder %v7155_v43, 0.0 }
 0x12e   : > { %v3892_v3 = vmul.f32 0.01, %v3860_v46  ;;  %v3858_v5 = vadd.f32 %v2290_v53, %v7048_v10  ;;  %v7176_v21 = vsel %vm3871_vm5, %v3855_v42, %v3887_v57  ;;  %vm3876_vm6 = vcmp.gt.f32.partialorder %v3860_v46, 0.0 }
 0x12f   : > { %v7167_v60 = vpop.f32.mrf.mxu0  ;;  %v6104_v2 = vpop.f32.mrf.mxu1  ;;  %9300 = vst [vmem:[#allocation6_spill] sm:$0xff] %v7176_v21  ;;  %6508 = vpow2.f32 %v1196_v27  ;;  %vm1172_vm4 = vcmp.gt.f32.partialorder %v7158_v47, 0.0 }
 0x130   : > { %v3861_v11 = vadd.f32 %v6104_v2, %v7055_v14  ;;  %v3890_v22 = vmul.f32 0.01, %v3858_v5  ;;  %v7180_v26 = vsel %vm3876_vm6, %v3860_v46, %v3892_v3  ;;  %vm3874_vm7 = vcmp.gt.f32.partialorder %v3858_v5, 0.0 }
 0x131   : > { %v2293_v13 = vpop.f32.mrf.mxu1  ;;  %v7174_v17 = vpop.f32.mrf.mxu0  ;;  %3984 = vrot.lane.b32.xlu1 %v7176_v21, %s6607_s15  ;;  %9301 = vst [vmem:[#allocation7_spill] sm:$0xff] %v7180_v26  ;;  %3994 = vrot.lane.b32.xlu0 %v7180_v26, %s6607_s15  ;;  %v1192_v46 = vmul.f32 1.442695, %v7158_v47  ;;  %v1198_v54 = vmul.f32 1.442695, %v7167_v60  ;;  %vm1175_vm5 = vcmp.gt.f32.partialorder %v7167_v60, 0.0 }
 0x132   : > { %v3893_v23 = vmul.f32 0.01, %v3861_v11  ;;  %vm3877_vm8 = vcmp.gt.f32.partialorder %v3861_v11, 0.0  ;;  %v7187_v41 = vsel %vm3874_vm7, %v3858_v5, %v3890_v22  ;;  %v3859_v57 = vadd.f32 %v2293_v13, %v7062_v20 }
 0x133   : > { %v6107_v31 = vpop.f32.mrf.mxu1  ;;  %v7185_v32 = vpop.f32.mrf.mxu0  ;;  %9302 = vst [vmem:[#allocation8_spill] sm:$0xff] %v7187_v41  ;;  %6510 = vpow2.f32 %v1192_v46  ;;  %v1194_v27 = vmul.f32 1.442695, %v7174_v17  ;;  %vm1173_vm7 = vcmp.gt.f32.partialorder %v7174_v17, 0.0 }
 0x134   : > { %v7189_v42 = vsel %vm3877_vm8, %v3861_v11, %v3893_v23  ;;  %v3864_v53 = vadd.f32 %v6107_v31, %v7069_v24  ;;  %6512 = vpow2.f32 %v1198_v54  ;;  %v3891_v31 = vmul.f32 0.01, %v3859_v57 }
 0x135   : > { %v6501_v37 = vpop.eup %6500  ;;  %9303 = vst [vmem:[#allocation9_spill] sm:$0xff] %v7189_v42  ;;  %3990 = vrot.lane.b32.xlu0 %v7187_v41, %s6607_s15  ;;  %3996 = vrot.lane.b32.xlu1 %v7189_v42, %s6607_s15  ;;  %v2306_v2 = vpop.f32.mrf.mxu1  ;;  %vm3875_vm11 = vcmp.gt.f32.partialorder %v3859_v57, 0.0  ;;  %6514 = vpow2.f32 %v1194_v27 }
 0x136   : > { %v6503_v45 = vpop.eup %6502  ;;  %v7199_v3 = vpop.f32.mrf.mxu0  ;;  %v5263_v5 = vadd.f32 -1.0, %v6501_v37  ;;  %v3896_v11 = vmul.f32 0.01, %v3864_v53  ;;  %v3862_v22 = vadd.f32 %v2306_v2, %v7076_v30  ;;  %vm3880_vm12 = vcmp.gt.f32.partialorder %v3864_v53, 0.0 }
 0x137   : > { %v5265_v7 = vadd.f32 -1.0, %v6503_v45  ;;  %v6108_v21 = vpop.f32.mrf.mxu1 }
 0x138   : > { %v1232_v23 = vsel %vm1168_vm10, %v7130_v15, %v5263_v5  ;;  %v7208_v37 = vpop.f32.mrf.mxu0  ;;  %v6505_v45 = vpop.eup %6504  ;;  %v3894_v46 = vmul.f32 0.01, %v3862_v22  ;;  %v7211_v2 = vsel %vm3880_vm12, %v3864_v53, %v3896_v11  ;;  %v3865_v54 = vadd.f32 %v6108_v21, %v7083_v34 }
 0x139   : > { %1264 = vrot.lane.b32.xlu0 %v1232_v23, %s6608_s16  ;;  %v1234_v13 = vsel %vm1170_vm9, %v7125_v6, %v5265_v7  ;;  %9304 = vst [vmem:[#allocation10_spill] sm:$0xff] %v7211_v2  ;;  %v7214_v5 = vsel %vm3875_vm11, %v3859_v57, %v3891_v31  ;;  %v2309_v7 = vpop.f32.mrf.mxu1  ;;  %v5266_v23 = vadd.f32 -1.0, %v6505_v45  ;;  %vm3878_vm13 = vcmp.gt.f32.partialorder %v3862_v22, 0.0 }
 0x13a   : > { %1268 = vrot.lane.b32.xlu1 %v1234_v13, %s6608_s16  ;;  %v6507_v15 = vpop.eup %6506  ;;  %9305 = vst [vmem:[#allocation11_spill] sm:$0xff] %v7214_v5  ;;  %v7218_v6 = vpop.f32.mrf.mxu0  ;;  %v1204_v53 = vmul.f32 1.442695, %v7185_v32  ;;  %v7224_v11 = vsel %vm3878_vm13, %v3862_v22, %v3894_v46  ;;  %v3897_v27 = vmul.f32 0.01, %v3865_v54  ;;  %v3863_v31 = vadd.f32 %v2309_v7, %v7090_v40 }
 0x13b   : > { %9306 = vst [vmem:[#allocation12_spill] sm:$0xff] %v7224_v11  ;;  %v5264_v21 = vadd.f32 -1.0, %v6507_v15  ;;  %v1235_v13 = vsel %vm1171_vm14, %v7140_v25, %v5266_v23  ;;  %v6111_v45 = vpop.f32.mrf.mxu1  ;;  %vm3881_vm15 = vcmp.gt.f32.partialorder %v3865_v54, 0.0  ;;  %v1200_v22 = vmul.f32 1.442695, %v7199_v3 }
 0x13c   : > { %v6509_v57 = vpop.eup %6508  ;;  %v7230_v58 = vpop.f32.mrf.mxu0  ;;  %6516 = vpow2.f32 %v1204_v53  ;;  %v1206_v25 = vmul.f32 1.442695, %v7208_v37  ;;  %v3895_v23 = vmul.f32 0.01, %v3863_v31  ;;  %v7238_v51 = vsel %vm3881_vm15, %v3865_v54, %v3897_v27 }
 0x13d   : > { %4002 = vrot.lane.b32.xlu0 %v7211_v2, %s6607_s15  ;;  %v1233_v46 = vsel %vm1169_vm1, %v7144_v33, %v5264_v21  ;;  %v5269_v15 = vadd.f32 -1.0, %v6509_v57  ;;  %9307 = vst [vmem:[#allocation13_spill] sm:$0xff] %v7238_v51  ;;  %vm3879_vm2 = vcmp.gt.f32.partialorder %v3863_v31, 0.0  ;;  %6518 = vpow2.f32 %v1200_v22 }
 0x13e   : > { %3992 = vrot.lane.b32.xlu1 %v7214_v5, %s6607_s15  ;;  %v1202_v33 = vmul.f32 1.442695, %v7218_v6  ;;  %v3868_v53 = vadd.f32 %v6111_v45, %v7097_v44  ;;  %6520 = vpow2.f32 %v1206_v25  ;;  %v7249_v54 = vsel %vm3879_vm2, %v3863_v31, %v3895_v23 }
 0x13f   : > { %v1238_v21 = vsel %vm1174_vm3, %v7155_v43, %v5269_v15  ;;  %9308 = vst [vmem:[#allocation14_spill] sm:$0xff] %v7249_v54  ;;  %vm1178_vm10 = vcmp.gt.f32.partialorder %v7185_v32, 0.0  ;;  %vm1176_vm12 = vcmp.gt.f32.partialorder %v7199_v3, 0.0  ;;  %vm1179_vm13 = vcmp.gt.f32.partialorder %v7208_v37, 0.0 }
 0x140   : > { %v6511_v7 = vpop.eup %6510  ;;  %6522 = vpow2.f32 %v1202_v33  ;;  %v3900_v43 = vmul.f32 0.01, %v3868_v53  ;;  %vm3884_vm6 = vcmp.gt.f32.partialorder %v3868_v53, 0.0  ;;  %vm1177_vm15 = vcmp.gt.f32.partialorder %v7218_v6, 0.0 }
 0x141   : > { %3998 = vrot.lane.b32.xlu0 %v7224_v11, %s6607_s15  ;;  %v6513_v36 = vpop.eup %6512  ;;  %v7240_v11 = vpop.f32.mrf.mxu0  ;;  %v5267_v57 = vadd.f32 -1.0, %v6511_v7 }
 0x142   : > { %1270 = vrot.lane.b32.xlu1 %v1235_v13, %s6608_s16  ;;  %v2322_v13 = vpop.f32.mrf.mxu1  ;;  %v5270_v27 = vadd.f32 -1.0, %v6513_v36  ;;  %v7266_v33 = vsel %vm3884_vm6, %v3868_v53, %v3900_v43 }
 0x143   : > { %v7251_v2 = vpop.f32.mrf.mxu0  ;;  %v3866_v45 = vadd.f32 %v2322_v13, %v7104_v50  ;;  %v1236_v22 = vsel %vm1172_vm4, %v7158_v47, %v5267_v57  ;;  %9309 = vst [vmem:[#allocation15_spill] sm:$0xff] %v7266_v33 }
 0x144   : > { %v1239_v36 = vsel %vm1175_vm5, %v7167_v60, %v5270_v27 }
 0x145   : > { %1266 = vrot.lane.b32.xlu0 %v1233_v46, %s6608_s16  ;;  %v6515_v46 = vpop.eup %6514  ;;  %v7262_v7 = vpop.f32.mrf.mxu0  ;;  %v3898_v23 = vmul.f32 0.01, %v3866_v45  ;;  %vm3882_vm8 = vcmp.gt.f32.partialorder %v3866_v45, 0.0 }
 0x146   : > { %4004 = vrot.lane.b32.xlu1 %v7238_v51, %s6607_s15  ;;  %v6112_v51 = vpop.f32.mrf.mxu1  ;;  %v5268_v15 = vadd.f32 -1.0, %v6515_v46 }
 0x147   : > { %v3869_v31 = vadd.f32 %v6112_v51, %v7111_v56  ;;  %v6035_v60 = vpop.f32.mrf.mxu0  ;;  %v7273_v27 = vsel %vm3882_vm8, %v3866_v45, %v3898_v23 }
 0x148   : > { %v2325_v25 = vpop.f32.mrf.mxu1  ;;  %9310 = vst [vmem:[#allocation16_spill] sm:$0xff] %v7273_v27  ;;  %v2570_v45 = vadd.f32 %v6035_v60, %v7025_v52  ;;  %v1208_v60 = vmul.f32 1.442695, %v7240_v11 }
 0x149   : > { %1276 = vrot.lane.b32.xlu0 %v1238_v21, %s6608_s16  ;;  %v6517_v13 = vpop.eup %6516  ;;  %v3901_v47 = vmul.f32 0.01, %v3869_v31  ;;  %v3867_v51 = vadd.f32 %v2325_v25, %v7118_v1  ;;  %v1237_v21 = vsel %vm1173_vm7, %v7174_v17, %v5268_v15  ;;  %vm3885_vm9 = vcmp.gt.f32.partialorder %v3869_v31, 0.0 }
 0x14a   : > { %4000 = vrot.lane.b32.xlu1 %v7249_v54, %s6607_s15  ;;  %v6519_v57 = vpop.eup %6518  ;;  %v5273_v46 = vadd.f32 -1.0, %v6517_v13  ;;  %v1212_v15 = vmul.f32 1.442695, %v7230_v58  ;;  %vm2586_vm14 = vcmp.gt.f32.partialorder %v2570_v45, 0.0  ;;  %vm1182_vm7 = vcmp.gt.f32.partialorder %v7230_v58, 0.0  ;;  %v7365_v54 = vld [vmem:[%s6844_s24 + $0xd8] sm:$0xff]  }
 0x14b   : > { %v3899_v53 = vmul.f32 0.01, %v3867_v51  ;;  %v7278_v43 = vsel %vm3885_vm9, %v3869_v31, %v3901_v47  ;;  %v6521_v17 = vpop.eup %6520  ;;  %vm3883_vm11 = vcmp.gt.f32.partialorder %v3867_v51, 0.0  ;;  %v5271_v23 = vadd.f32 -1.0, %v6519_v57 }
 0x14c   : > { %9311 = vst [vmem:[#allocation17_spill] sm:$0xff] %v7278_v43  ;;  %v1242_v25 = vsel %vm1178_vm10, %v7185_v32, %v5273_v46  ;;  %v5274_v47 = vadd.f32 -1.0, %v6521_v17  ;;  %6524 = vpow2.f32 %v1212_v15  ;;  %v1214_v32 = vmul.f32 1.442695, %v7251_v2 }
 0x14d   : > { %1272 = vrot.lane.b32.xlu0 %v1236_v22, %s6608_s16  ;;  %v6115_v22 = vpop.f32.mrf.mxu1  ;;  %v6523_v13 = vpop.eup %6522  ;;  %v7287_v31 = vsel %vm3883_vm11, %v3867_v51, %v3899_v53  ;;  %v2602_v57 = vmul.f32 0.01, %v2570_v45  ;;  %6526 = vpow2.f32 %v1208_v60  ;;  %v1210_v15 = vmul.f32 1.442695, %v7262_v7 }
 0x14e   : > { %1278 = vrot.lane.b32.xlu1 %v1239_v36, %s6608_s16  ;;  %v2018_v36 = vpop.f32.mrf.mxu0  ;;  %9312 = vst [vmem:[#allocation18_spill] sm:$0xff] %v7287_v31  ;;  %v4097_v46 = vadd.f32 %v6115_v22, %v7025_v52  ;;  %v1243_v53 = vsel %vm1179_vm13, %v7208_v37, %v5274_v47  ;;  %v5272_v17 = vadd.f32 -1.0, %v6523_v13  ;;  %6528 = vpow2.f32 %v1214_v32 }
 0x14f   : > { %6530 = vpow2.f32 %v1210_v15  ;;  %vm1180_vm9 = vcmp.gt.f32.partialorder %v7240_v11, 0.0  ;;  %vm1183_vm10 = vcmp.gt.f32.partialorder %v7251_v2, 0.0  ;;  %v5700_v41 = vunpack.c.l.bf16 %v7365_v54 }
 0x150   : > { %v4129_v22 = vmul.f32 0.01, %v4097_v46  ;;  %v1241_v37 = vsel %vm1177_vm15, %v7218_v6, %v5272_v17  ;;  %vm4113_vm1 = vcmp.gt.f32.partialorder %v4097_v46, 0.0 }
 0x151   : > { %4010 = vrot.lane.b32.xlu0 %v7266_v33, %s6607_s15 }
 0x152   : > { %1274 = vrot.lane.b32.xlu1 %v1237_v21, %s6608_s16  ;;  %v2338_v21 = vpop.f32.mrf.mxu1 }
 0x153   : > { %v4095_v60 = vadd.f32 %v2338_v21, %v7028_v55 }
 0x155   : > { %4006 = vrot.lane.b32.xlu0 %v7273_v27, %s6607_s15  ;;  %v6036_v27 = vpop.f32.mrf.mxu0  ;;  %vm4111_vm5 = vcmp.gt.f32.partialorder %v4095_v60, 0.0 }
 0x156   : > { %4012 = vrot.lane.b32.xlu1 %v7278_v43, %s6607_s15  ;;  %v2571_v51 = vadd.f32 %v6036_v27, %v7031_v59  ;;  %v3355_v43 = vadd.f32 1.0, %v7044_v8 }
 0x157   : > { %v2021_v13 = vpop.f32.mrf.mxu0 }
 0x158   : > { %v2603_v27 = vmul.f32 0.01, %v2571_v51  ;;  %vm2587_vm2 = vcmp.gt.f32.partialorder %v2571_v51, 0.0  ;;  %v2569_v32 = vadd.f32 %v2021_v13, %v7036_v0 }
 0x159   : > { %1284 = vrot.lane.b32.xlu0 %v1242_v25, %s6608_s16  ;;  %v1240_v25 = vsel %vm1176_vm12, %v7199_v3, %v5271_v23  ;;  %v2568_v3 = vadd.f32 %v2018_v36, %v7028_v55  ;;  %v7303_v23 = vsel %vm2586_vm14, %v2570_v45, %v2602_v57  ;;  %v7311_v36 = vsel %vm4113_vm1, %v4097_v46, %v4129_v22  ;;  %v6525_v57 = vpop.eup %6524 }
 0x15a   : > { %4008 = vrot.lane.b32.xlu1 %v7287_v31, %s6607_s15  ;;  %v6116_v31 = vpop.f32.mrf.mxu1  ;;  %9313 = vst [vmem:[#allocation19_spill] sm:$0xff] %v7303_v23  ;;  %v7316_v6 = vsel %vm2587_vm2, %v2571_v51, %v2603_v27  ;;  %v2601_v21 = vmul.f32 0.01, %v2569_v32  ;;  %v6039_v51 = vpop.f32.mrf.mxu0  ;;  %vm2585_vm6 = vcmp.gt.f32.partialorder %v2569_v32, 0.0  ;;  %vm1181_vm12 = vcmp.gt.f32.partialorder %v7262_v7, 0.0 }
 0x15b   : > { %v2600_v47 = vmul.f32 0.01, %v2568_v3  ;;  %9314 = vst [vmem:[#allocation20_spill] sm:$0xff] %v7316_v6  ;;  %vm2584_vm3 = vcmp.gt.f32.partialorder %v2568_v3, 0.0  ;;  %v6527_v22 = vpop.eup %6526 }
 0x15d   : > { %1280 = vrot.lane.b32.xlu0 %v1240_v25, %s6608_s16  ;;  %v4098_v25 = vadd.f32 %v6116_v31, %v7031_v59  ;;  %v2341_v31 = vpop.f32.mrf.mxu1  ;;  %v7320_v17 = vsel %vm2584_vm3, %v2568_v3, %v2600_v47  ;;  %v5277_v3 = vadd.f32 -1.0, %v6525_v57  ;;  %v5870_v57 = vld [vmem:[%s6844_s24 + $0xc8] sm:$0xff]  }
 0x15e   : > { %1286 = vrot.lane.b32.xlu1 %v1243_v53, %s6608_s16  ;;  %v4127_v53 = vmul.f32 0.01, %v4095_v60  ;;  %9315 = vst [vmem:[#allocation21_spill] sm:$0xff] %v7320_v17  ;;  %v4096_v46 = vadd.f32 %v2341_v31, %v7036_v0  ;;  %v3358_v31 = vadd.f32 1.0, %v7046_v9 }
 0x15f   : > { %v4130_v45 = vmul.f32 0.01, %v4098_v25  ;;  %vm4114_vm4 = vcmp.gt.f32.partialorder %v4098_v25, 0.0  ;;  %v6119_v47 = vpop.f32.mrf.mxu1 }
 0x160   : > { %v7329_v27 = vsel %vm4111_vm5, %v4095_v60, %v4127_v53  ;;  %v4128_v13 = vmul.f32 0.01, %v4096_v46  ;;  %vm4112_vm8 = vcmp.gt.f32.partialorder %v4096_v46, 0.0  ;;  %v3357_v60 = vadd.f32 1.0, %v7034_v63  ;;  %v7344_v53 = vld [vmem:[%s9192_s5] ss:$0 sm:$0xff] }
 0x161   : > { %2700 = vrot.lane.b32.xlu0 %v7303_v23, %s6607_s15  ;;  %v7325_v15 = vsel %vm4114_vm4, %v4098_v25, %v4130_v45  ;;  %v7334_v25 = vsel %vm2585_vm6, %v2569_v32, %v2601_v21  ;;  %v2034_v45 = vpop.f32.mrf.mxu0  ;;  %v1246_v32 = vsel %vm1182_vm7, %v7230_v58, %v5277_v3  ;;  %v5275_v21 = vadd.f32 -1.0, %v6527_v22  ;;  %v5869_v23 = vld [vmem:[%s6844_s24 + $0xc0] sm:$0xff]  }
 0x162   : > { %1282 = vrot.lane.b32.xlu1 %v1241_v37, %s6608_s16  ;;  %v6529_v37 = vpop.eup %6528  ;;  %9316 = vst [vmem:[#allocation22_spill] sm:$0xff] %v7334_v25  ;;  %v7350_v63 = vsel %vm4112_vm8, %v4096_v46, %v4128_v13  ;;  %v5692_v58 = vunpack.c.l.bf16 %v5870_v57  ;;  %v3374_v22 = vmul.f32 %v7344_v53, %v3358_v31  ;;  %v3356_v3 = vadd.f32 1.0, %v7058_v18 }
 0x163   : > { %v5278_v9 = vadd.f32 -1.0, %v6529_v37  ;;  %v6040_v33 = vpop.f32.mrf.mxu0  ;;  %v5693_v46 = vunpack.c.h.bf16 %v5870_v57  ;;  %v4101_v37 = vadd.f32 %v6119_v47, %v7041_v4  ;;  %v1244_v8 = vsel %vm1180_vm9, %v7240_v11, %v5275_v21 }
 0x164   : > { %v2575_v5 = vadd.f32 %v6040_v33, %v7055_v14  ;;  %v3371_v47 = vmul.f32 %v7344_v53, %v3355_v43  ;;  %v3361_v31 = vadd.f32 1.0, %v7060_v19  ;;  %v5689_v57 = vunpack.c.h.bf16 %v5869_v23 }
 0x165   : > { %4227 = vrot.lane.b32.xlu0 %v7311_v36, %s6607_s15  ;;  %v1247_v18 = vsel %vm1183_vm10, %v7251_v2, %v5278_v9  ;;  %v3372_v33 = vmul.f32 %v7344_v53, %v3356_v3  ;;  %v4133_v26 = vmul.f32 0.01, %v4101_v37  ;;  %v2572_v2 = vadd.f32 %v2034_v45, %v7048_v10  ;;  %v2037_v9 = vpop.f32.mrf.mxu0 }
 0x166   : > { %2702 = vrot.lane.b32.xlu1 %v7316_v6, %s6607_s15  ;;  %v6531_v6 = vpop.eup %6530  ;;  %v2607_v19 = vmul.f32 0.01, %v2575_v5  ;;  %vm4117_vm13 = vcmp.gt.f32.partialorder %v4101_v37, 0.0  ;;  %vm2591_vm14 = vcmp.gt.f32.partialorder %v2575_v5, 0.0 }
 0x167   : > { %vm2588_vm15 = vcmp.gt.f32.partialorder %v2572_v2, 0.0 }
 0x169   : > { %2696 = vrot.lane.b32.xlu0 %v7320_v17, %s6607_s15  ;;  %v2574_v17 = vadd.f32 %v6039_v51, %v7041_v4  ;;  %v3373_v51 = vmul.f32 %v7344_v53, %v3357_v60  ;;  %v5276_v60 = vadd.f32 -1.0, %v6531_v6 }
 0x16a   : > { %4229 = vrot.lane.b32.xlu1 %v7325_v15, %s6607_s15 }
 0x16b   : > { %v2606_v13 = vmul.f32 0.01, %v2574_v17  ;;  %vm2590_vm11 = vcmp.gt.f32.partialorder %v2574_v17, 0.0  ;;  %v3389_v21 = vadd.f32 %v5692_v58, %v3373_v51  ;;  %v3377_v58 = vmul.f32 %v7344_v53, %v3361_v31 }
 0x16c   : > { %v3359_v51 = vadd.f32 1.0, %v7072_v28  ;;  %v2573_v28 = vadd.f32 %v2037_v9, %v7062_v20  ;;  %v5701_v9 = vunpack.c.h.bf16 %v7365_v54 }
 0x16d   : > { %4223 = vrot.lane.b32.xlu0 %v7329_v27, %s6607_s15  ;;  %v7380_v43 = vsel %vm2590_vm11, %v2574_v17, %v2606_v13  ;;  %v7391_v13 = vld [vmem:[%s6844_s24 + $0xd0] sm:$0xff]  }
 0x16e   : > { %2698 = vrot.lane.b32.xlu1 %v7334_v25, %s6607_s15  ;;  %v2354_v25 = vpop.f32.mrf.mxu1  ;;  %9317 = vst [vmem:[#allocation23_spill] sm:$0xff] %v7380_v43  ;;  %vm2589_vm3 = vcmp.gt.f32.partialorder %v2573_v28, 0.0 }
 0x170   : > { %v6120_v42 = vpop.f32.mrf.mxu1 }
 0x171   : > { %1292 = vrot.lane.b32.xlu0 %v1246_v32, %s6608_s16  ;;  %v5688_v32 = vunpack.c.l.bf16 %v5869_v23  ;;  %v4102_v6 = vadd.f32 %v6120_v42, %v7055_v14 }
 0x172   : > { %4225 = vrot.lane.b32.xlu1 %v7350_v63, %s6607_s15 }
 0x173   : > { %v3387_v17 = vadd.f32 %v5688_v32, %v3371_v47  ;;  %v4134_v31 = vmul.f32 0.01, %v4102_v6  ;;  %v7398_v32 = vld [vmem:[%s6839_s11 + $0x10] sm:$0xff]  ;;  %vm4118_vm1 = vcmp.gt.f32.partialorder %v4102_v6, 0.0 }
 0x175   : > { %1288 = vrot.lane.b32.xlu0 %v1244_v8, %s6608_s16  ;;  %v3390_v8 = vadd.f32 %v5693_v46, %v3374_v22  ;;  %v3362_v22 = vadd.f32 1.0, %v7074_v29  ;;  %v3388_v46 = vadd.f32 %v5689_v57, %v3372_v33  ;;  %v7404_v29 = vsel %vm2591_vm14, %v2575_v5, %v2607_v19 }
 0x176   : > { %1294 = vrot.lane.b32.xlu1 %v1247_v18, %s6608_s16  ;;  %v1245_v18 = vsel %vm1181_vm12, %v7262_v7, %v5276_v60  ;;  %v4099_v7 = vadd.f32 %v2354_v25, %v7048_v10  ;;  %v2604_v60 = vmul.f32 0.01, %v2572_v2  ;;  %9319 = vst [vmem:[#allocation25_spill] sm:$0xff] %v7404_v29  ;;  %v7407_v25 = vld [vmem:[%s6839_s11 + $0x18] sm:$0xff]  ;;  %v3375_v5 = vmul.f32 %v7344_v53, %v3359_v51 }
 0x177   : > { %9320 = vst [vmem:[#allocation26_spill] sm:$0xff] %v7407_v25  ;;  %v3378_v19 = vmul.f32 %v7344_v53, %v3362_v22  ;;  %v7425_v54 = vsel %vm4118_vm1, %v4102_v6, %v4134_v31  ;;  %v7429_v22 = vld [vmem:[%s6839_s11] sm:$0xff]  ;;  %v3365_v6 = vadd.f32 1.0, %v7088_v39 }
 0x178   : > { %vm4115_vm2 = vcmp.gt.f32.partialorder %v4099_v7, 0.0 }
 0x179   : > { %2708 = vrot.lane.b32.xlu0 %v7380_v43, %s6607_s15  ;;  %v2605_v43 = vmul.f32 0.01, %v2573_v28  ;;  %v3394_v31 = vadd.f32 %v5701_v9, %v3378_v19 }
 0x17a   : > { %1290 = vrot.lane.b32.xlu1 %v1245_v18, %s6608_s16  ;;  %v6043_v18 = vpop.f32.mrf.mxu0 }
 0x17b   : > { %v3424_v11 = vpop.permute.xlu0 %3423  ;;  %v2578_v51 = vadd.f32 %v6043_v18, %v7069_v24  ;;  %v7449_v39 = vsel %vm2589_vm3, %v2573_v28, %v2605_v43 }
 0x17c   : > { %v3469_v23 = vadd.f32 %v3424_v11, %v3389_v21  ;;  %v7395_v11 = vsel %vm4117_vm13, %v4101_v37, %v4133_v26  ;;  %v2357_v21 = vpop.f32.mrf.mxu1  ;;  %9323 = vst [vmem:[#allocation29_spill] sm:$0xff] %v7449_v39 }
 0x17d   : > { %9318 = vst [vmem:[#allocation24_spill] sm:$0xff] %v7395_v11  ;;  %4235 = vrot.lane.b32.xlu0 %v7395_v11, %s6607_s15  ;;  %v4100_v11 = vadd.f32 %v2357_v21, %v7062_v20  ;;  %v5874_v21 = vld [vmem:[%s6844_s24 + $0xe8] sm:$0xff]   ;;  %v2610_v9 = vmul.f32 0.01, %v2578_v51  ;;  %vm2594_vm5 = vcmp.gt.f32.partialorder %v2578_v51, 0.0 }
 0x17e   : > { %v3485_v47 = vsub.f32 %v3469_v23, %v7398_v32  ;;  %2710 = vrot.lane.b32.xlu1 %v7404_v29, %s6607_s15  ;;  %v4131_v29 = vmul.f32 0.01, %v4099_v7 }
 0x17f   : > { %v3420_v42 = vpop.permute.xlu0 %3419  ;;  %v3426_v45 = vpop.permute.xlu1 %3425  ;;  %vm4116_vm4 = vcmp.gt.f32.partialorder %v4100_v11, 0.0 }
 0x180   : > { %v3470_v3 = vadd.f32 %v3426_v45, %v3390_v8  ;;  %v3467_v26 = vadd.f32 %v3420_v42, %v3387_v17  ;;  %v5696_v8 = vunpack.c.l.bf16 %v7391_v13  ;;  %v7419_v42 = vsel %vm2588_vm15, %v2572_v2, %v2604_v60 }
 0x181   : > { %9321 = vst [vmem:[#allocation27_spill] sm:$0xff] %v7419_v42  ;;  %v3393_v17 = vadd.f32 %v5700_v41, %v3377_v58  ;;  %2704 = vrot.lane.b32.xlu0 %v7419_v42, %s6607_s15  ;;  %v7435_v41 = vld [vmem:[%s6839_s11 + $0x8] sm:$0xff] }
 0x182   : > { %v3486_v57 = vsub.f32 %v3470_v3, %v7407_v25  ;;  %v3360_v3 = vadd.f32 1.0, %v7086_v38  ;;  %v2050_v25 = vpop.f32.mrf.mxu0  ;;  %v3483_v38 = vsub.f32 %v3467_v26, %v7429_v22  ;;  %4237 = vrot.lane.b32.xlu1 %v7425_v54, %s6607_s15  ;;  %v7444_v26 = vsel %vm4115_vm2, %v4099_v7, %v4131_v29 }
 0x183   : > { %v3422_v37 = vpop.permute.xlu1 %3421  ;;  %v3432_v33 = vpop.permute.xlu0 %3431  ;;  %v3391_v19 = vadd.f32 %v5696_v8, %v3375_v5  ;;  %v3381_v29 = vmul.f32 %v7344_v53, %v3365_v6 }
 0x184   : > { %v7416_v23 = vpack.i.bf16 %v3486_v57, %v3485_v47  ;;  %v3468_v45 = vadd.f32 %v3422_v37, %v3388_v46  ;;  %v3473_v60 = vadd.f32 %v3432_v33, %v3393_v17  ;;  %v3376_v18 = vmul.f32 %v7344_v53, %v3360_v3  ;;  %v6123_v47 = vpop.f32.mrf.mxu1  ;;  %v6044_v42 = vpop.f32.mrf.mxu0 }
 0x185   : > { %v5697_v37 = vunpack.c.h.bf16 %v7391_v13  ;;  %4231 = vrot.lane.b32.xlu0 %v7444_v26, %s6607_s15  ;;  %v5708_v17 = vunpack.c.l.bf16 %v5874_v21  ;;  %v3366_v13 = vadd.f32 1.0, %v7102_v49  ;;  %v4105_v28 = vadd.f32 %v6123_v47, %v7069_v24 }
 0x186   : > { %v3484_v2 = vsub.f32 %v3468_v45, %v7435_v41  ;;  %v4132_v45 = vmul.f32 0.01, %v4100_v11  ;;  %2706 = vrot.lane.b32.xlu1 %v7449_v39, %s6607_s15  ;;  %v2579_v5 = vadd.f32 %v6044_v42, %v7083_v34 }
 0x187   : > { %v3428_v58 = vpop.permute.xlu0 %3427  ;;  %v3434_v46 = vpop.permute.xlu1 %3433  ;;  %v3392_v8 = vadd.f32 %v5697_v37, %v3376_v18  ;;  %v3382_v39 = vmul.f32 %v7344_v53, %v3366_v13  ;;  %v3363_v18 = vadd.f32 1.0, %v7100_v48  ;;  %v2576_v37 = vadd.f32 %v2050_v25, %v7076_v30 }
 0x188   : > { %v7441_v57 = vpack.i.bf16 %v3484_v2, %v3483_v38  ;;  %v3474_v33 = vadd.f32 %v3434_v46, %v3394_v31  ;;  %v7456_v38 = vld [vmem:[%s6839_s11 + $0x30] sm:$0xff]  ;;  %v2370_v46 = vpop.f32.mrf.mxu1  ;;  %v3471_v31 = vadd.f32 %v3428_v58, %v3391_v19  ;;  %v7467_v49 = vsel %vm4116_vm4, %v4100_v11, %v4132_v45 }
 0x189   : > { %v3489_v2 = vsub.f32 %v3473_v60, %v7456_v38  ;;  %v7471_v60 = vsel %vm2594_vm5, %v2578_v51, %v2610_v9  ;;  %v5709_v58 = vunpack.c.h.bf16 %v5874_v21  ;;  %v4137_v11 = vmul.f32 0.01, %v4105_v28  ;;  %v7479_v51 = vld [vmem:[%s6839_s11 + $0x20] sm:$0xff] }
 0x18a   : > { %9322 = vst [vmem:[#allocation28_spill] sm:$0xff] %v7441_v57  ;;  %v7460_v57 = vld [vmem:[%s6839_s11 + $0x38] sm:$0xff]  ;;  %4233 = vrot.lane.b32.xlu1 %v7467_v49, %s6607_s15  ;;  %9325 = vst [vmem:[#allocation31_spill] sm:$0xff] %v7471_v60  ;;  %2716 = vrot.lane.b32.xlu0 %v7471_v60, %s6607_s15  ;;  %v6124_v45 = vpop.f32.mrf.mxu1  ;;  %v3397_v19 = vadd.f32 %v5708_v17, %v3381_v29  ;;  %v3487_v9 = vsub.f32 %v3471_v31, %v7479_v51  ;;  %vm4121_vm6 = vcmp.gt.f32.partialorder %v4105_v28, 0.0  ;;  %v5873_v60 = vld [vmem:[%s6844_s24 + $0xe0] sm:$0xff]  }
 0x18b   : > { %v3430_v3 = vpop.permute.xlu1 %3429  ;;  %v3440_v7 = vpop.permute.xlu0 %3439  ;;  %v3490_v43 = vsub.f32 %v3474_v33, %v7460_v57  ;;  %9326 = vst [vmem:[#allocation32_spill] sm:$0xff] %v7479_v51  ;;  %v3364_v21 = vadd.f32 1.0, %v7114_v61  ;;  %v4106_v25 = vadd.f32 %v6124_v45, %v7083_v34  ;;  %v3398_v29 = vadd.f32 %v5709_v58, %v3382_v39  ;;  %v7506_v58 = vld [vmem:[%s6839_s11 + $0x50] sm:$0xff] }
 0x18c   : > { %v3472_v42 = vadd.f32 %v3430_v3, %v3392_v8  ;;  %v3477_v17 = vadd.f32 %v3440_v7, %v3397_v19  ;;  %v3379_v31 = vmul.f32 %v7344_v53, %v3363_v18  ;;  %vm2595_vm7 = vcmp.gt.f32.partialorder %v2579_v5, 0.0  ;;  %9330 = vst [vmem:[#allocation36_spill] sm:$0xff] %v7506_v58 }
 0x18d   : > { %v7465_v6 = vpack.i.bf16 %v3490_v43, %v3489_v2  ;;  %v2611_v2 = vmul.f32 0.01, %v2579_v5  ;;  %v7483_v43 = vld [vmem:[%s6839_s11 + $0x28] sm:$0xff]  ;;  %v3380_v45 = vmul.f32 %v7344_v53, %v3364_v21  ;;  %v5705_v39 = vunpack.c.h.bf16 %v5873_v60 }
 0x18e   : > { %9327 = vst [vmem:[#allocation33_spill] sm:$0xff] %v7483_v43  ;;  %v3488_v13 = vsub.f32 %v3472_v42, %v7483_v43  ;;  %v5704_v42 = vunpack.c.l.bf16 %v5873_v60  ;;  %v2608_v43 = vmul.f32 0.01, %v2576_v37  ;;  %v3493_v18 = vsub.f32 %v3477_v17, %v7506_v58 }
 0x18f   : > { %9324 = vst [vmem:[#allocation30_spill] sm:$0xff] %v7465_v6  ;;  %v3436_v33 = vpop.permute.xlu0 %3435  ;;  %v3442_v47 = vpop.permute.xlu1 %3441  ;;  %v7494_v6 = vsel %vm4121_vm6, %v4105_v28, %v4137_v11  ;;  %v7498_v61 = vsel %vm2595_vm7, %v2579_v5, %v2611_v2  ;;  %v4138_v28 = vmul.f32 0.01, %v4106_v25  ;;  %v7510_v11 = vld [vmem:[%s6839_s11 + $0x58] sm:$0xff]  ;;  %v3369_v19 = vadd.f32 1.0, %v7116_v62 }
 0x190   : > { %v7491_v8 = vpack.i.bf16 %v3488_v13, %v3487_v9  ;;  %4243 = vrot.lane.b32.xlu0 %v7494_v6, %s6607_s15  ;;  %9329 = vst [vmem:[#allocation35_spill] sm:$0xff] %v7498_v61  ;;  %v3478_v51 = vadd.f32 %v3442_v47, %v3398_v29  ;;  %v2053_v9 = vpop.f32.mrf.mxu0  ;;  %2718 = vrot.lane.b32.xlu1 %v7498_v61, %s6607_s15  ;;  %9331 = vst [vmem:[#allocation37_spill] sm:$0xff] %v7510_v11  ;;  %vm2592_vm8 = vcmp.gt.f32.partialorder %v2576_v37, 0.0  ;;  %v5876_v61 = vld [vmem:[%s6844_s24 + $0xf8] sm:$0xff]  }
 0x191   : > { %v4103_v2 = vadd.f32 %v2370_v46, %v7076_v30  ;;  %v3395_v13 = vadd.f32 %v5704_v42, %v3379_v31  ;;  %v2577_v60 = vadd.f32 %v2053_v9, %v7090_v40  ;;  %v7518_v29 = vsel %vm2592_vm8, %v2576_v37, %v2608_v43  ;;  %v2373_v42 = vpop.f32.mrf.mxu1 }
 0x192   : > { %9328 = vst [vmem:[#allocation34_spill] sm:$0xff] %v7491_v8  ;;  %v3494_v5 = vsub.f32 %v3478_v51, %v7510_v11  ;;  %9333 = vst [vmem:[#allocation39_spill] sm:$0xff] %v7518_v29  ;;  %vm4122_vm9 = vcmp.gt.f32.partialorder %v4106_v25, 0.0  ;;  %v3370_v17 = vadd.f32 1.0, %v7134_v16  ;;  %v6047_v8 = vpop.f32.mrf.mxu0  ;;  %v3396_v62 = vadd.f32 %v5705_v39, %v3380_v45 }
 0x193   : > { %v3438_v3 = vpop.permute.xlu1 %3437  ;;  %v7488_v48 = vpop.permute.xlu0 %3447  ;;  %v3475_v58 = vadd.f32 %v3436_v33, %v3395_v13  ;;  %v7524_v46 = vsel %vm4122_vm9, %v4106_v25, %v4138_v28  ;;  %v3385_v37 = vmul.f32 %v7344_v53, %v3369_v19  ;;  %v4135_v43 = vmul.f32 0.01, %v4103_v2  ;;  %v6542_v25 = vld [vmem:[%s6839_s11 + $0x40] sm:$0xff] }
 0x194   : > { %v7516_v21 = vpack.i.bf16 %v3494_v5, %v3493_v18  ;;  %2712 = vrot.lane.b32.xlu0 %v7518_v29, %s6607_s15  ;;  %4245 = vrot.lane.b32.xlu1 %v7524_v46, %s6607_s15  ;;  %v3476_v16 = vadd.f32 %v3438_v3, %v3396_v62  ;;  %v5716_v33 = vunpack.c.l.bf16 %v5876_v61  ;;  %v2609_v9 = vmul.f32 0.01, %v2577_v60  ;;  %v2066_v39 = vpop.f32.mrf.mxu0  ;;  %v6543_v18 = vld [vmem:[%s6839_s11 + $0x48] sm:$0xff]  ;;  %v6127_v11 = vpop.f32.mrf.mxu1 }
 0x195   : > { %vm4119_vm10 = vcmp.gt.f32.partialorder %v4103_v2, 0.0  ;;  %v3386_v45 = vmul.f32 %v7344_v53, %v3370_v17  ;;  %v3491_v28 = vsub.f32 %v3475_v58, %v6542_v25  ;;  %v5717_v13 = vunpack.c.h.bf16 %v5876_v61 }
 0x196   : > { %9332 = vst [vmem:[#allocation38_spill] sm:$0xff] %v7516_v21  ;;  %v3492_v5 = vsub.f32 %v3476_v16, %v6543_v18  ;;  %v4104_v19 = vadd.f32 %v2373_v42, %v7090_v40  ;;  %v2582_v29 = vadd.f32 %v6047_v8, %v7097_v44  ;;  %v3401_v21 = vadd.f32 %v5716_v33, %v3385_v37  ;;  %v6048_v8 = vpop.f32.mrf.mxu0  ;;  %v2386_v25 = vpop.f32.mrf.mxu1 }
 0x197   : > { %v7503_v7 = vpop.permute.xlu0 %3443  ;;  %v3450_v47 = vpop.permute.xlu1 %3449  ;;  %v7540_v3 = vsel %vm4119_vm10, %v4103_v2, %v4135_v43  ;;  %vm2593_vm11 = vcmp.gt.f32.partialorder %v2577_v60, 0.0  ;;  %v3367_v17 = vadd.f32 1.0, %v7128_v12  ;;  %v5875_v2 = vld [vmem:[%s6844_s24 + $0xf0] sm:$0xff]   ;;  %v3402_v37 = vadd.f32 %v5717_v13, %v3386_v45 }
 0x198   : > { %4239 = vrot.lane.b32.xlu0 %v7540_v3, %s6607_s15  ;;  %v7547_v61 = vsel %vm2593_vm11, %v2577_v60, %v2609_v9  ;;  %v3481_v42 = vadd.f32 %v7488_v48, %v3401_v21  ;;  %v3368_v12 = vadd.f32 1.0, %v7146_v35  ;;  %v4136_v43 = vmul.f32 0.01, %v4104_v19  ;;  %v6544_v21 = vld [vmem:[%s6839_s11 + $0x70] sm:$0xff] }
 0x199   : > { %9336 = vst [vmem:[#allocation42_spill] sm:$0xff] %v7547_v61  ;;  %2714 = vrot.lane.b32.xlu1 %v7547_v61, %s6607_s15  ;;  %v2614_v16 = vmul.f32 0.01, %v2582_v29  ;;  %v3482_v33 = vadd.f32 %v3450_v47, %v3402_v37  ;;  %v3383_v60 = vmul.f32 %v7344_v53, %v3367_v17  ;;  %v4109_v9 = vadd.f32 %v6127_v11, %v7097_v44  ;;  %v6545_v61 = vld [vmem:[%s6839_s11 + $0x78] sm:$0xff]  ;;  %v6128_v17 = vpop.f32.mrf.mxu1 }
 0x19a   : > { %v5712_v18 = vunpack.c.l.bf16 %v5875_v2  ;;  %vm4120_vm12 = vcmp.gt.f32.partialorder %v4104_v19, 0.0  ;;  %vm2598_vm13 = vcmp.gt.f32.partialorder %v2582_v29, 0.0  ;;  %v3384_v47 = vmul.f32 %v7344_v53, %v3368_v12 }
 0x19b   : > { %v7526_v51 = vpop.permute.xlu1 %3445  ;;  %v7528_v31 = vpop.permute.xlu0 %3986  ;;  %v7566_v45 = vsel %vm4120_vm12, %v4104_v19, %v4136_v43  ;;  %v7568_v13 = vsel %vm2598_vm13, %v2582_v29, %v2614_v16  ;;  %v4141_v37 = vmul.f32 0.01, %v4109_v9  ;;  %v2580_v16 = vadd.f32 %v2066_v39, %v7104_v50  ;;  %v6546_v39 = vld [vmem:[%s6839_s11 + $0x60] sm:$0xff] }
 0x19c   : > { %9334 = vst [vmem:[#allocation40_spill] sm:$0xff] %v7528_v31  ;;  %v7538_v31 = vpack.i.bf16 %v3492_v5, %v3491_v28  ;;  %v2583_v28 = vadd.f32 %v6048_v8, %v7111_v56  ;;  %v3497_v5 = vsub.f32 %v3481_v42, %v6544_v21  ;;  %9340 = vst [vmem:[#allocation46_spill] sm:$0xff] %v7568_v13  ;;  %2724 = vrot.lane.b32.xlu0 %v7568_v13, %s6607_s15  ;;  %v2389_v21 = vpop.f32.mrf.mxu1 }
 0x19d   : > { %4241 = vrot.lane.b32.xlu1 %v7566_v45, %s6607_s15  ;;  %v3399_v8 = vadd.f32 %v5712_v18, %v3383_v60  ;;  %v5713_v42 = vunpack.c.h.bf16 %v5875_v2  ;;  %vm4125_vm14 = vcmp.gt.f32.partialorder %v4109_v9, 0.0  ;;  %vm2596_vm1 = vcmp.gt.f32.partialorder %v2580_v16, 0.0 }
 0x19e   : > { %v2615_v12 = vmul.f32 0.01, %v2583_v28  ;;  %vm2599_vm15 = vcmp.gt.f32.partialorder %v2583_v28, 0.0  ;;  %v7590_v60 = vsel %vm4125_vm14, %v4109_v9, %v4141_v37 }
 0x19f   : > { %v7542_v62 = vpop.permute.xlu0 %3982  ;;  %v7549_v58 = vpop.permute.xlu1 %3988  ;;  %v3400_v43 = vadd.f32 %v5713_v42, %v3384_v47  ;;  %v6547_v47 = vld [vmem:[%s6839_s11 + $0x68] sm:$0xff]  ;;  %v2612_v42 = vmul.f32 0.01, %v2580_v16 }
 0x1a0   : > { %9335 = vst [vmem:[#allocation41_spill] sm:$0xff] %v7542_v62  ;;  %9337 = vst [vmem:[#allocation43_spill] sm:$0xff] %v7549_v58  ;;  %v3498_v58 = vsub.f32 %v3482_v33, %v6545_v61  ;;  %v2069_v61 = vpop.f32.mrf.mxu0  ;;  %v4110_v33 = vadd.f32 %v6128_v17, %v7111_v56  ;;  %4251 = vrot.lane.b32.xlu0 %v7590_v60, %s6607_s15 }
 0x1a1   : > { %v2581_v37 = vadd.f32 %v2069_v61, %v7118_v1  ;;  %v7614_v61 = vsel %vm2596_vm1, %v2580_v16, %v2612_v42 }
 0x1a2   : > { %v7570_v11 = vpack.i.bf16 %v3498_v58, %v3497_v5  ;;  %v3479_v58 = vadd.f32 %v7503_v7, %v3399_v8  ;;  %v3480_v5 = vadd.f32 %v7526_v51, %v3400_v43  ;;  %v6051_v2 = vpop.f32.mrf.mxu0  ;;  %v7592_v7 = vsel %vm2599_vm15, %v2583_v28, %v2615_v12  ;;  %v6131_v12 = vpop.f32.mrf.mxu1  ;;  %9348 = vst [vmem:[#allocation54_spill] sm:$0xff] %v7614_v61 }
 0x1a3   : > { %v7559_v48 = vpop.permute.xlu1 %3984  ;;  %v7563_v35 = vpop.permute.xlu0 %3994  ;;  %9344 = vst [vmem:[#allocation50_spill] sm:$0xff] %v7592_v7  ;;  %2726 = vrot.lane.b32.xlu1 %v7592_v7, %s6607_s15  ;;  %v4107_v8 = vadd.f32 %v2386_v25, %v7104_v50  ;;  %v4142_v28 = vmul.f32 0.01, %v4110_v33  ;;  %vm4126_vm2 = vcmp.gt.f32.partialorder %v4110_v33, 0.0  ;;  %v4108_v25 = vadd.f32 %v2389_v21, %v7118_v1 }
 0x1a4   : > { %9338 = vst [vmem:[#allocation44_spill] sm:$0xff] %v7559_v48  ;;  %9339 = vst [vmem:[#allocation45_spill] sm:$0xff] %v7563_v35  ;;  %v3495_v18 = vsub.f32 %v3479_v58, %v6546_v39  ;;  %v3496_v17 = vsub.f32 %v3480_v5, %v6547_v47  ;;  %v2082_v43 = vpop.f32.mrf.mxu0  ;;  %v2811_v7 = vadd.f32 %v6051_v2, %v7025_v52  ;;  %v2402_v13 = vpop.f32.mrf.mxu1  ;;  %2720 = vrot.lane.b32.xlu0 %v7614_v61, %s6607_s15 }
 0x1a5   : > { %9341 = vst [vmem:[#allocation47_spill] sm:$0xff] %v7570_v11  ;;  %v4139_v39 = vmul.f32 0.01, %v4107_v8  ;;  %vm4123_vm3 = vcmp.gt.f32.partialorder %v4107_v8, 0.0  ;;  %vm2597_vm4 = vcmp.gt.f32.partialorder %v2581_v37, 0.0  ;;  %v4338_v2 = vadd.f32 %v6131_v12, %v7025_v52 }
 0x1a6   : > { %v7604_v58 = vpack.i.bf16 %v3496_v17, %v3495_v18  ;;  %v7616_v18 = vsel %vm4126_vm2, %v4110_v33, %v4142_v28  ;;  %v6052_v17 = vpop.f32.mrf.mxu0  ;;  %v2843_v42 = vmul.f32 0.01, %v2811_v7  ;;  %v6132_v28 = vpop.f32.mrf.mxu1  ;;  %vm4124_vm5 = vcmp.gt.f32.partialorder %v4108_v25, 0.0 }
 0x1a7   : > { %v7576_v19 = vpop.permute.xlu0 %3990  ;;  %v7578_v29 = vpop.permute.xlu1 %3996  ;;  %4253 = vrot.lane.b32.xlu1 %v7616_v18, %s6607_s15  ;;  %v2812_v33 = vadd.f32 %v6052_v17, %v7031_v59  ;;  %v7626_v48 = vsel %vm4123_vm3, %v4107_v8, %v4139_v39  ;;  %vm2827_vm6 = vcmp.gt.f32.partialorder %v2811_v7, 0.0  ;;  %v2809_v17 = vadd.f32 %v2082_v43, %v7028_v55 }
 0x1a8   : > { %9342 = vst [vmem:[#allocation48_spill] sm:$0xff] %v7576_v19  ;;  %9343 = vst [vmem:[#allocation49_spill] sm:$0xff] %v7578_v29  ;;  %v2085_v61 = vpop.f32.mrf.mxu0  ;;  %4247 = vrot.lane.b32.xlu0 %v7626_v48, %s6607_s15  ;;  %v4339_v39 = vadd.f32 %v6132_v28, %v7031_v59  ;;  %vm4354_vm7 = vcmp.gt.f32.partialorder %v4338_v2, 0.0 }
 0x1a9   : > { %9345 = vst [vmem:[#allocation51_spill] sm:$0xff] %v7604_v58  ;;  %vm2828_vm8 = vcmp.gt.f32.partialorder %v2812_v33, 0.0  ;;  %vm2825_vm9 = vcmp.gt.f32.partialorder %v2809_v17, 0.0 }
 0x1aa   : > { %vm4355_vm10 = vcmp.gt.f32.partialorder %v4339_v39, 0.0 }
 0x1ab   : > { %v1265_v51 = vpop.permute.xlu0 %1264 }
 0x1ac   : > { %1312 = vst.msk [vmem:[%s7588_s21] sm:$0xff] %vm958_vm0, %v1265_v51  ;;  %v1269_v9 = vpop.permute.xlu1 %1268  ;;  %v2613_v51 = vmul.f32 0.01, %v2581_v37 }
 0x1ad   : > { %1314 = vst.msk [vmem:[%s7588_s21 + $0x10] sm:$0xff] %vm958_vm0, %v1269_v9  ;;  %v4140_v9 = vmul.f32 0.01, %v4108_v25 }
 0x1ae   : > { %v7628_v62 = vsel %vm2597_vm4, %v2581_v37, %v2613_v51  ;;  %v2844_v37 = vmul.f32 0.01, %v2812_v33  ;;  %v2405_v51 = vpop.f32.mrf.mxu1 }
 0x1af   : > { %v7608_v5 = vpop.permute.xlu0 %4002  ;;  %9350 = vst [vmem:[#allocation56_spill] sm:$0xff] %v7628_v62  ;;  %2722 = vrot.lane.b32.xlu1 %v7628_v62, %s6607_s15  ;;  %v6055_v62 = vpop.f32.mrf.mxu0 }
 0x1b0   : > { %9346 = vst [vmem:[#allocation52_spill] sm:$0xff] %v7608_v5  ;;  %v7611_v47 = vpop.permute.xlu1 %3992  ;;  %v7644_v5 = vsel %vm2827_vm6, %v2811_v7, %v2843_v42  ;;  %v4371_v7 = vmul.f32 0.01, %v4339_v39  ;;  %v6135_v42 = vpop.f32.mrf.mxu1  ;;  %v7658_v29 = vsel %vm2828_vm8, %v2812_v33, %v2844_v37 }
 0x1b1   : > { %9347 = vst [vmem:[#allocation53_spill] sm:$0xff] %v7611_v47  ;;  %9353 = vst [vmem:[#allocation59_spill] sm:$0xff] %v7644_v5  ;;  %2941 = vrot.lane.b32.xlu0 %v7644_v5, %s6607_s15  ;;  %v2098_v47 = vpop.f32.mrf.mxu0 }
 0x1b2   : > { %9356 = vst [vmem:[#allocation62_spill] sm:$0xff] %v7658_v29  ;;  %v2418_v33 = vpop.f32.mrf.mxu1  ;;  %v7670_v35 = vsel %vm4355_vm10, %v4339_v39, %v4371_v7 }
 0x1b3   : > { %v7622_v21 = vpop.permute.xlu0 %3998  ;;  %9358 = vst [vmem:[#allocation64_spill] sm:$0xff] %v7670_v35  ;;  %v6056_v19 = vpop.f32.mrf.mxu0 }
 0x1b4   : > { %9349 = vst [vmem:[#allocation55_spill] sm:$0xff] %v7622_v21  ;;  %v1271_v16 = vpop.permute.xlu1 %1270  ;;  %v4370_v21 = vmul.f32 0.01, %v4338_v2  ;;  %v2816_v7 = vadd.f32 %v6056_v19, %v7055_v14  ;;  %v2813_v19 = vadd.f32 %v2098_v47, %v7048_v10 }
 0x1b5   : > { %1315 = vst.msk [vmem:[%s7588_s21 + $0x18] sm:$0xff] %vm958_vm0, %v1271_v16  ;;  %v7642_v16 = vsel %vm4124_vm5, %v4108_v25, %v4140_v9  ;;  %v2810_v9 = vadd.f32 %v2085_v61, %v7036_v0 }
 0x1b6   : > { %9352 = vst [vmem:[#allocation58_spill] sm:$0xff] %v7642_v16  ;;  %4249 = vrot.lane.b32.xlu1 %v7642_v16, %s6607_s15  ;;  %v7656_v28 = vsel %vm4354_vm7, %v4338_v2, %v4370_v21  ;;  %v2815_v2 = vadd.f32 %v6055_v62, %v7041_v4  ;;  %vm2832_vm1 = vcmp.gt.f32.partialorder %v2816_v7, 0.0  ;;  %vm2829_vm2 = vcmp.gt.f32.partialorder %v2813_v19, 0.0 }
 0x1b7   : > { %v1267_v12 = vpop.permute.xlu0 %1266  ;;  %9355 = vst [vmem:[#allocation61_spill] sm:$0xff] %v7656_v28  ;;  %4468 = vrot.lane.b32.xlu0 %v7656_v28, %s6607_s15  ;;  %v2842_v21 = vmul.f32 0.01, %v2810_v9  ;;  %vm2826_vm12 = vcmp.gt.f32.partialorder %v2810_v9, 0.0  ;;  %v4160_v28 = vadd.f32 1.0, %v7350_v63 }
 0x1b8   : > { %1313 = vst.msk [vmem:[%s7588_s21 + $0x8] sm:$0xff] %vm958_vm0, %v1267_v12  ;;  %v7639_v8 = vpop.permute.xlu1 %4004  ;;  %v4336_v12 = vadd.f32 %v2402_v13, %v7028_v55  ;;  %v2847_v39 = vmul.f32 0.01, %v2815_v2  ;;  %vm2831_vm14 = vcmp.gt.f32.partialorder %v2815_v2, 0.0 }
 0x1b9   : > { %9351 = vst [vmem:[#allocation57_spill] sm:$0xff] %v7639_v8  ;;  %v2841_v8 = vmul.f32 0.01, %v2809_v17  ;;  %v7684_v58 = vsel %vm2826_vm12, %v2810_v9, %v2842_v21  ;;  %v2848_v9 = vmul.f32 0.01, %v2816_v7 }
 0x1ba   : > { %2943 = vrot.lane.b32.xlu1 %v7658_v29, %s6607_s15  ;;  %vm4352_vm11 = vcmp.gt.f32.partialorder %v4336_v12, 0.0  ;;  %9361 = vst [vmem:[#allocation67_spill] sm:$0xff] %v7684_v58 }
 0x1bb   : > { %v1277_v43 = vpop.permute.xlu0 %1276  ;;  %v7668_v37 = vsel %vm2825_vm9, %v2809_v17, %v2841_v8  ;;  %v4342_v17 = vadd.f32 %v6135_v42, %v7041_v4 }
 0x1bc   : > { %1318 = vst.msk [vmem:[%s7588_s21 + $0x30] sm:$0xff] %vm958_vm0, %v1277_v43  ;;  %v7653_v25 = vpop.permute.xlu1 %4000  ;;  %v4368_v43 = vmul.f32 0.01, %v4336_v12  ;;  %9357 = vst [vmem:[#allocation63_spill] sm:$0xff] %v7668_v37  ;;  %2937 = vrot.lane.b32.xlu0 %v7668_v37, %s6607_s15  ;;  %v2101_v37 = vpop.f32.mrf.mxu0 }
 0x1bd   : > { %9354 = vst [vmem:[#allocation60_spill] sm:$0xff] %v7653_v25  ;;  %v4337_v25 = vadd.f32 %v2405_v51, %v7036_v0  ;;  %vm4358_vm15 = vcmp.gt.f32.partialorder %v4342_v17, 0.0 }
 0x1be   : > { %4470 = vrot.lane.b32.xlu1 %v7670_v35, %s6607_s15  ;;  %v6059_v11 = vpop.f32.mrf.mxu0 }
 0x1bf   : > { %v1273_v13 = vpop.permute.xlu0 %1272  ;;  %v4369_v62 = vmul.f32 0.01, %v4337_v25  ;;  %vm4353_vm13 = vcmp.gt.f32.partialorder %v4337_v25, 0.0 }
 0x1c0   : > { %1316 = vst.msk [vmem:[%s7588_s21 + $0x20] sm:$0xff] %vm958_vm0, %v1273_v13  ;;  %v1279_v61 = vpop.permute.xlu1 %1278  ;;  %v6136_v13 = vpop.f32.mrf.mxu1 }
 0x1c1   : > { %1319 = vst.msk [vmem:[%s7588_s21 + $0x38] sm:$0xff] %vm958_vm0, %v1279_v61  ;;  %v7682_v61 = vsel %vm4352_vm11, %v4336_v12, %v4368_v43  ;;  %v4343_v43 = vadd.f32 %v6136_v13, %v7055_v14 }
 0x1c2   : > { %9360 = vst [vmem:[#allocation66_spill] sm:$0xff] %v7682_v61  ;;  %4464 = vrot.lane.b32.xlu0 %v7682_v61, %s6607_s15  ;;  %2939 = vrot.lane.b32.xlu1 %v7684_v58, %s6607_s15  ;;  %v2421_v21 = vpop.f32.mrf.mxu1  ;;  %v7700_v61 = vsel %vm2831_vm14, %v2815_v2, %v2847_v39 }
 0x1c3   : > { %v7678_v51 = vpop.permute.xlu0 %4010  ;;  %9365 = vst [vmem:[#allocation71_spill] sm:$0xff] %v7700_v61  ;;  %v4375_v2 = vmul.f32 0.01, %v4343_v43  ;;  %vm4359_vm3 = vcmp.gt.f32.partialorder %v4343_v43, 0.0 }
 0x1c4   : > { %9359 = vst [vmem:[#allocation65_spill] sm:$0xff] %v7678_v51  ;;  %v1275_v8 = vpop.permute.xlu1 %1274  ;;  %v4374_v51 = vmul.f32 0.01, %v4342_v17  ;;  %v6139_v39 = vpop.f32.mrf.mxu1 }
 0x1c5   : > { %1317 = vst.msk [vmem:[%s7588_s21 + $0x28] sm:$0xff] %vm958_vm0, %v1275_v8  ;;  %v7698_v8 = vsel %vm4353_vm13, %v4337_v25, %v4369_v62  ;;  %v2814_v62 = vadd.f32 %v2101_v37, %v7062_v20 }
 0x1c6   : > { %9364 = vst [vmem:[#allocation70_spill] sm:$0xff] %v7698_v8  ;;  %4466 = vrot.lane.b32.xlu1 %v7698_v8, %s6607_s15  ;;  %2949 = vrot.lane.b32.xlu0 %v7700_v61, %s6607_s15  ;;  %v7712_v13 = vsel %vm4358_vm15, %v4342_v17, %v4374_v51  ;;  %v7714_v8 = vsel %vm2832_vm1, %v2816_v7, %v2848_v9  ;;  %v2114_v61 = vpop.f32.mrf.mxu0  ;;  %v2434_v7 = vpop.f32.mrf.mxu1 }
 0x1c7   : > { %v7692_v42 = vpop.permute.xlu0 %4006  ;;  %9367 = vst [vmem:[#allocation73_spill] sm:$0xff] %v7712_v13  ;;  %9368 = vst [vmem:[#allocation74_spill] sm:$0xff] %v7714_v8  ;;  %v2846_v51 = vmul.f32 0.01, %v2814_v62  ;;  %v2819_v17 = vadd.f32 %v6059_v11, %v7069_v24  ;;  %vm2830_vm5 = vcmp.gt.f32.partialorder %v2814_v62, 0.0 }
 0x1c8   : > { %9362 = vst [vmem:[#allocation68_spill] sm:$0xff] %v7692_v42  ;;  %v7695_v12 = vpop.permute.xlu1 %4012  ;;  %v2845_v42 = vmul.f32 0.01, %v2813_v19  ;;  %v6060_v58 = vpop.f32.mrf.mxu0 }
 0x1c9   : > { %9363 = vst [vmem:[#allocation69_spill] sm:$0xff] %v7695_v12  ;;  %v4340_v12 = vadd.f32 %v2418_v33, %v7048_v10  ;;  %vm2835_vm7 = vcmp.gt.f32.partialorder %v2819_v17, 0.0 }
 0x1ca   : > { %4476 = vrot.lane.b32.xlu0 %v7712_v13, %s6607_s15  ;;  %2951 = vrot.lane.b32.xlu1 %v7714_v8, %s6607_s15  ;;  %v7724_v9 = vsel %vm2829_vm2, %v2813_v19, %v2845_v42  ;;  %v7726_v13 = vsel %vm4359_vm3, %v4343_v43, %v4375_v2  ;;  %v4161_v8 = vadd.f32 1.0, %v7311_v36  ;;  %v4162_v42 = vadd.f32 1.0, %v7325_v15  ;;  %v5886_v2 = vld [vmem:[%s6844_s24 + $0x148] sm:$0xff]  }
 0x1cb   : > { %v1285_v47 = vpop.permute.xlu0 %1284  ;;  %9369 = vst [vmem:[#allocation75_spill] sm:$0xff] %v7724_v9  ;;  %9370 = vst [vmem:[#allocation76_spill] sm:$0xff] %v7726_v13  ;;  %vm4356_vm4 = vcmp.gt.f32.partialorder %v4340_v12, 0.0  ;;  %v4346_v43 = vadd.f32 %v6139_v39, %v7069_v24  ;;  %v2851_v36 = vmul.f32 0.01, %v2819_v17  ;;  %v4159_v15 = vadd.f32 1.0, %v7329_v27 }
 0x1cc   : > { %1322 = vst.msk [vmem:[%s7588_s21 + $0x50] sm:$0xff] %vm958_vm0, %v1285_v47  ;;  %v7709_v25 = vpop.permute.xlu1 %4008  ;;  %v4372_v47 = vmul.f32 0.01, %v4340_v12 }
 0x1cd   : > { %9366 = vst [vmem:[#allocation72_spill] sm:$0xff] %v7709_v25  ;;  %v4341_v25 = vadd.f32 %v2421_v21, %v7062_v20  ;;  %vm4362_vm8 = vcmp.gt.f32.partialorder %v4346_v43, 0.0 }
 0x1ce   : > { %2945 = vrot.lane.b32.xlu0 %v7724_v9, %s6607_s15  ;;  %4478 = vrot.lane.b32.xlu1 %v7726_v13, %s6607_s15  ;;  %v7741_v35 = vsel %vm4356_vm4, %v4340_v12, %v4372_v47  ;;  %v7743_v9 = vsel %vm2830_vm5, %v2814_v62, %v2846_v51  ;;  %v4177_v13 = vmul.f32 %v7344_v53, %v4161_v8  ;;  %v4378_v51 = vmul.f32 0.01, %v4346_v43 }
 0x1cf   : > { %v1281_v33 = vpop.permute.xlu0 %1280  ;;  %v4373_v19 = vmul.f32 0.01, %v4341_v25  ;;  %9372 = vst [vmem:[#allocation78_spill] sm:$0xff] %v7741_v35  ;;  %9373 = vst [vmem:[#allocation79_spill] sm:$0xff] %v7743_v9  ;;  %vm4357_vm6 = vcmp.gt.f32.partialorder %v4341_v25, 0.0  ;;  %v4178_v12 = vmul.f32 %v7344_v53, %v4162_v42  ;;  %v2817_v62 = vadd.f32 %v2114_v61, %v7076_v30 }
 0x1d0   : > { %1320 = vst.msk [vmem:[%s7588_s21 + $0x40] sm:$0xff] %vm958_vm0, %v1281_v33  ;;  %v1287_v37 = vpop.permute.xlu1 %1286  ;;  %v2820_v33 = vadd.f32 %v6060_v58, %v7083_v34  ;;  %v5756_v58 = vunpack.c.l.bf16 %v5886_v2  ;;  %v5757_v42 = vunpack.c.h.bf16 %v5886_v2 }
 0x1d1   : > { %1323 = vst.msk [vmem:[%s7588_s21 + $0x58] sm:$0xff] %vm958_vm0, %v1287_v37  ;;  %v6140_v37 = vpop.f32.mrf.mxu1  ;;  %vm2833_vm10 = vcmp.gt.f32.partialorder %v2817_v62, 0.0 }
 0x1d2   : > { %4472 = vrot.lane.b32.xlu0 %v7741_v35, %s6607_s15  ;;  %2947 = vrot.lane.b32.xlu1 %v7743_v9, %s6607_s15  ;;  %v4347_v47 = vadd.f32 %v6140_v37, %v7083_v34  ;;  %v7758_v35 = vsel %vm4357_vm6, %v4341_v25, %v4373_v19  ;;  %v7760_v9 = vsel %vm2835_vm7, %v2819_v17, %v2851_v36  ;;  %vm2836_vm9 = vcmp.gt.f32.partialorder %v2820_v33, 0.0  ;;  %v5885_v37 = vld [vmem:[%s6844_s24 + $0x140] sm:$0xff]  }
 0x1d3   : > { %v7735_v11 = vpop.permute.xlu0 %2700  ;;  %9375 = vst [vmem:[#allocation81_spill] sm:$0xff] %v7758_v35  ;;  %9376 = vst [vmem:[#allocation82_spill] sm:$0xff] %v7760_v9  ;;  %v2437_v27 = vpop.f32.mrf.mxu1  ;;  %v4193_v61 = vadd.f32 %v5756_v58, %v4177_v13  ;;  %v4344_v25 = vadd.f32 %v2434_v7, %v7076_v30  ;;  %v2849_v19 = vmul.f32 0.01, %v2817_v62  ;;  %v4194_v5 = vadd.f32 %v5757_v42, %v4178_v12 }
 0x1d4   : > { %9371 = vst [vmem:[#allocation77_spill] sm:$0xff] %v7735_v11  ;;  %v1283_v21 = vpop.permute.xlu1 %1282  ;;  %v2117_v11 = vpop.f32.mrf.mxu0  ;;  %v4379_v36 = vmul.f32 0.01, %v4347_v47  ;;  %v7774_v13 = vsel %vm4362_vm8, %v4346_v43, %v4378_v51  ;;  %vm4363_vm11 = vcmp.gt.f32.partialorder %v4347_v47, 0.0  ;;  %v5753_v43 = vunpack.c.h.bf16 %v5885_v37 }
 0x1d5   : > { %1321 = vst.msk [vmem:[%s7588_s21 + $0x48] sm:$0xff] %vm958_vm0, %v1283_v21  ;;  %v2852_v21 = vmul.f32 0.01, %v2820_v33  ;;  %v2818_v16 = vadd.f32 %v2117_v11, %v7090_v40  ;;  %9378 = vst [vmem:[#allocation84_spill] sm:$0xff] %v7774_v13  ;;  %v6143_v63 = vpop.f32.mrf.mxu1  ;;  %v4176_v11 = vmul.f32 %v7344_v53, %v4160_v28  ;;  %v4376_v58 = vmul.f32 0.01, %v4344_v25 }
 0x1d6   : > { %4474 = vrot.lane.b32.xlu1 %v7758_v35, %s6607_s15  ;;  %2957 = vrot.lane.b32.xlu0 %v7760_v9, %s6607_s15  ;;  %v6063_v9 = vpop.f32.mrf.mxu0  ;;  %v4345_v12 = vadd.f32 %v2437_v27, %v7090_v40  ;;  %vm4360_vm12 = vcmp.gt.f32.partialorder %v4344_v25, 0.0 }
 0x1d7   : > { %v4228_v39 = vpop.permute.xlu0 %4227  ;;  %v7777_v2 = vsel %vm2836_vm9, %v2820_v33, %v2852_v21  ;;  %v2823_v33 = vadd.f32 %v6063_v9, %v7097_v44  ;;  %v9379_v21 = vld [vmem:[#allocation26_spill] sm:$0xff]  ;;  %vm2834_vm13 = vcmp.gt.f32.partialorder %v2818_v16, 0.0 }
 0x1d8   : > { %v7756_v8 = vpop.permute.xlu1 %2702  ;;  %v4273_v29 = vadd.f32 %v4228_v39, %v4193_v61  ;;  %v2130_v28 = vpop.f32.mrf.mxu0  ;;  %v4377_v27 = vmul.f32 0.01, %v4345_v12  ;;  %vm4361_vm14 = vcmp.gt.f32.partialorder %v4345_v12, 0.0 }
 0x1d9   : > { %9374 = vst [vmem:[#allocation80_spill] sm:$0xff] %v7756_v8  ;;  %v4175_v8 = vmul.f32 %v7344_v53, %v4159_v15  ;;  %v5752_v15 = vunpack.c.l.bf16 %v5885_v37  ;;  %v7794_v53 = vsel %vm4363_vm11, %v4347_v47, %v4379_v36  ;;  %v4350_v47 = vadd.f32 %v6143_v63, %v7097_v44 }
 0x1da   : > { %4484 = vrot.lane.b32.xlu0 %v7774_v13, %s6607_s15  ;;  %2959 = vrot.lane.b32.xlu1 %v7777_v2, %s6607_s15  ;;  %v4289_v51 = vsub.f32 %v4273_v29, %v7398_v32  ;;  %v7791_v13 = vsel %vm2833_vm10, %v2817_v62, %v2849_v19  ;;  %v4192_v62 = vadd.f32 %v5753_v43, %v4176_v11  ;;  %v2855_v37 = vmul.f32 0.01, %v2823_v33 }
 0x1db   : > { %v7770_v17 = vpop.permute.xlu0 %2696  ;;  %v7805_v19 = vsel %vm4360_vm12, %v4344_v25, %v4376_v58  ;;  %vm2839_vm15 = vcmp.gt.f32.partialorder %v2823_v33, 0.0  ;;  %v2821_v43 = vadd.f32 %v2130_v28, %v7104_v50  ;;  %vm4366_vm1 = vcmp.gt.f32.partialorder %v4350_v47, 0.0 }
 0x1dc   : > { %9377 = vst [vmem:[#allocation83_spill] sm:$0xff] %v7770_v17  ;;  %v4230_v35 = vpop.permute.xlu1 %4229  ;;  %v2850_v17 = vmul.f32 0.01, %v2818_v16  ;;  %v4166_v28 = vadd.f32 1.0, %v7425_v54 }
 0x1dd   : > { %v4274_v7 = vadd.f32 %v4230_v35, %v4194_v5  ;;  %v4191_v35 = vadd.f32 %v5752_v15, %v4175_v8  ;;  %v2450_v5 = vpop.f32.mrf.mxu1  ;;  %vm2837_vm2 = vcmp.gt.f32.partialorder %v2821_v43, 0.0 }
 0x1de   : > { %2953 = vrot.lane.b32.xlu0 %v7791_v13, %s6607_s15  ;;  %4486 = vrot.lane.b32.xlu1 %v7794_v53, %s6607_s15  ;;  %v7807_v36 = vsel %vm2834_vm13, %v2818_v16, %v2850_v17  ;;  %v4382_v16 = vmul.f32 0.01, %v4350_v47  ;;  %v9381_v17 = vld [vmem:[#allocation24_spill] sm:$0xff] }
 0x1df   : > { %v4224_v39 = vpop.permute.xlu0 %4223  ;;  %v4290_v61 = vsub.f32 %v4274_v7, %v9379_v21  ;;  %v6064_v7 = vpop.f32.mrf.mxu0  ;;  %v4165_v58 = vadd.f32 1.0, %v9381_v17 }
 0x1e0   : > { %v7788_v42 = vpop.permute.xlu1 %2698  ;;  %v4271_v29 = vadd.f32 %v4224_v39, %v4191_v35  ;;  %v6144_v39 = vpop.f32.mrf.mxu1  ;;  %v2824_v21 = vadd.f32 %v6064_v7, %v7111_v56  ;;  %v7822_v35 = vsel %vm2839_vm15, %v2823_v33, %v2855_v37  ;;  %v4348_v33 = vadd.f32 %v2450_v5, %v7104_v50 }
 0x1e1   : > { %9380 = vst [vmem:[#allocation26_spill] sm:$0xff] %v7788_v42  ;;  %v7800_v32 = vpack.i.bf16 %v4290_v61, %v4289_v51  ;;  %v7820_v61 = vsel %vm4361_vm14, %v4345_v12, %v4377_v27  ;;  %9382 = vst [vmem:[#allocation24_spill] sm:$0xff] %v7822_v35  ;;  %v2133_v12 = vpop.f32.mrf.mxu0  ;;  %v4351_v7 = vadd.f32 %v6144_v39, %v7111_v56 }
 0x1e2   : > { %4480 = vrot.lane.b32.xlu0 %v7805_v19, %s6607_s15  ;;  %2955 = vrot.lane.b32.xlu1 %v7807_v36, %s6607_s15  ;;  %v4287_v63 = vsub.f32 %v4271_v29, %v7429_v22  ;;  %v2453_v22 = vpop.f32.mrf.mxu1  ;;  %vm2840_vm3 = vcmp.gt.f32.partialorder %v2824_v21, 0.0  ;;  %vm4364_vm4 = vcmp.gt.f32.partialorder %v4348_v33, 0.0 }
 0x1e3   : > { %v1293_v9 = vpop.permute.xlu0 %1292  ;;  %vm4367_vm5 = vcmp.gt.f32.partialorder %v4351_v7, 0.0 }
 0x1e4   : > { %1326 = vst.msk [vmem:[%s7588_s21 + $0x70] sm:$0xff] %vm958_vm0, %v1293_v9  ;;  %v4226_v8 = vpop.permute.xlu1 %4225  ;;  %v6147_v5 = vpop.f32.mrf.mxu1 }
 0x1e5   : > { %v4272_v15 = vadd.f32 %v4226_v8, %v4192_v62  ;;  %v7840_v62 = vld [vmem:[%s9192_s5] ss:$0 sm:$0xff]  ;;  %v2853_v8 = vmul.f32 0.01, %v2821_v43 }
 0x1e6   : > { %4482 = vrot.lane.b32.xlu1 %v7820_v61, %s6607_s15  ;;  %2965 = vrot.lane.b32.xlu0 %v7822_v35, %s6607_s15  ;;  %v4181_v27 = vmul.f32 %v7840_v62, %v4165_v58  ;;  %v4163_v58 = vadd.f32 1.0, %v7444_v26  ;;  %v4164_v26 = vadd.f32 1.0, %v7467_v49 }
 0x1e7   : > { %v4288_v11 = vsub.f32 %v4272_v15, %v7435_v41  ;;  %v1289_v25 = vpop.permute.xlu0 %1288  ;;  %v5888_v41 = vld [vmem:[%s6844_s24 + $0x158] sm:$0xff]   ;;  %v2856_v15 = vmul.f32 0.01, %v2824_v21 }
 0x1e8   : > { %1324 = vst.msk [vmem:[%s7588_s21 + $0x60] sm:$0xff] %vm958_vm0, %v1289_v25  ;;  %v1295_v51 = vpop.permute.xlu1 %1294  ;;  %v5764_v54 = vunpack.c.l.bf16 %v5888_v41  ;;  %v6067_v25 = vpop.f32.mrf.mxu0  ;;  %v5765_v39 = vunpack.c.h.bf16 %v5888_v41  ;;  %v5887_v41 = vld [vmem:[%s6844_s24 + $0x150] sm:$0xff]  }
 0x1e9   : > { %v7824_v9 = vpack.i.bf16 %v4288_v11, %v4287_v63  ;;  %1327 = vst.msk [vmem:[%s7588_s21 + $0x78] sm:$0xff] %vm958_vm0, %v1295_v51  ;;  %v7844_v63 = vsel %vm4366_vm1, %v4350_v47, %v4382_v16  ;;  %v4182_v11 = vmul.f32 %v7840_v62, %v4166_v28  ;;  %v4380_v47 = vmul.f32 0.01, %v4348_v33  ;;  %v2466_v28 = vpop.f32.mrf.mxu1 }
 0x1ea   : > { %9384 = vst [vmem:[#allocation86_spill] sm:$0xff] %v7844_v63  ;;  %6193 = vrot.lane.b32.xlu1 %v7416_v23, %s6607_s15  ;;  %4492 = vrot.lane.b32.xlu0 %v7844_v63, %s6607_s15  ;;  %v2822_v16 = vadd.f32 %v2133_v12, %v7118_v1  ;;  %v7859_v23 = vsel %vm2840_vm3, %v2824_v21, %v2856_v15  ;;  %v2146_v12 = vpop.f32.mrf.mxu0  ;;  %v5760_v49 = vunpack.c.l.bf16 %v5887_v41 }
 0x1eb   : > { %v7834_v29 = vpop.permute.xlu0 %2708  ;;  %9387 = vst [vmem:[#allocation89_spill] sm:$0xff] %v7859_v23  ;;  %v4197_v42 = vadd.f32 %v5764_v54, %v4181_v27  ;;  %v4349_v21 = vadd.f32 %v2453_v22, %v7118_v1  ;;  %v4179_v15 = vmul.f32 %v7840_v62, %v4163_v58  ;;  %v6148_v22 = vpop.f32.mrf.mxu1 }
 0x1ec   : > { %9383 = vst [vmem:[#allocation85_spill] sm:$0xff] %v7834_v29  ;;  %v1291_v37 = vpop.permute.xlu1 %1290  ;;  %v7857_v29 = vsel %vm2837_vm2, %v2821_v43, %v2853_v8  ;;  %v4198_v43 = vadd.f32 %v5765_v39, %v4182_v11  ;;  %v2854_v27 = vmul.f32 0.01, %v2822_v16  ;;  %v3052_v8 = vadd.f32 %v6067_v25, %v7025_v52 }
 0x1ed   : > { %1325 = vst.msk [vmem:[%s7588_s21 + $0x68] sm:$0xff] %vm958_vm0, %v1291_v37  ;;  %v4383_v37 = vmul.f32 0.01, %v4351_v7  ;;  %9386 = vst [vmem:[#allocation88_spill] sm:$0xff] %v7857_v29  ;;  %vm2838_vm6 = vcmp.gt.f32.partialorder %v2822_v16, 0.0  ;;  %v4180_v11 = vmul.f32 %v7840_v62, %v4164_v26  ;;  %v4579_v39 = vadd.f32 %v6147_v5, %v7025_v52  ;;  %v9391_v26 = vld [vmem:[#allocation28_spill] sm:$0xff] }
 0x1ee   : > { %2961 = vrot.lane.b32.xlu0 %v7857_v29, %s6607_s15  ;;  %2967 = vrot.lane.b32.xlu1 %v7859_v23, %s6607_s15  ;;  %v7873_v29 = vsel %vm4364_vm4, %v4348_v33, %v4380_v47  ;;  %vm4365_vm7 = vcmp.gt.f32.partialorder %v4349_v21, 0.0  ;;  %vm3068_vm8 = vcmp.gt.f32.partialorder %v3052_v8, 0.0 }
 0x1ef   : > { %v4236_v17 = vpop.permute.xlu0 %4235  ;;  %9389 = vst [vmem:[#allocation91_spill] sm:$0xff] %v7873_v29  ;;  %v7876_v23 = vsel %vm4367_vm5, %v4351_v7, %v4383_v37  ;;  %v4381_v7 = vmul.f32 0.01, %v4349_v21  ;;  %v3084_v37 = vmul.f32 0.01, %v3052_v8  ;;  %vm4595_vm9 = vcmp.gt.f32.partialorder %v4579_v39, 0.0 }
 0x1f0   : > { %v7855_v51 = vpop.permute.xlu1 %2710  ;;  %v4611_v5 = vmul.f32 0.01, %v4579_v39 }
 0x1f1   : > { %9385 = vst [vmem:[#allocation87_spill] sm:$0xff] %v7855_v51  ;;  %v4277_v51 = vadd.f32 %v4236_v17, %v4197_v42  ;;  %v6068_v42 = vpop.f32.mrf.mxu0  ;;  %v5761_v17 = vunpack.c.h.bf16 %v5887_v41 }
 0x1f2   : > { %4488 = vrot.lane.b32.xlu0 %v7873_v29, %s6607_s15  ;;  %4494 = vrot.lane.b32.xlu1 %v7876_v23, %s6607_s15  ;;  %v3053_v41 = vadd.f32 %v6068_v42, %v7031_v59  ;;  %v9395_v42 = vld [vmem:[#allocation33_spill] sm:$0xff] }
 0x1f3   : > { %v7867_v63 = vpop.permute.xlu0 %2704  ;;  %v4293_v25 = vsub.f32 %v4277_v51, %v7456_v38  ;;  %v2149_v38 = vpop.f32.mrf.mxu0  ;;  %v3050_v51 = vadd.f32 %v2146_v12, %v7028_v55  ;;  %v4169_v12 = vadd.f32 1.0, %v7494_v6  ;;  %v9398_v6 = vld [vmem:[#allocation30_spill] sm:$0xff] }
 0x1f4   : > { %9388 = vst [vmem:[#allocation90_spill] sm:$0xff] %v7867_v63  ;;  %v4238_v54 = vpop.permute.xlu1 %4237  ;;  %v4195_v63 = vadd.f32 %v5760_v49, %v4179_v15  ;;  %v7900_v15 = vsel %vm3068_vm8, %v3052_v8, %v3084_v37  ;;  %v5890_v37 = vld [vmem:[%s6844_s24 + $0x168] sm:$0xff]   ;;  %vm3069_vm11 = vcmp.gt.f32.partialorder %v3053_v41, 0.0 }
 0x1f5   : > { %v4278_v35 = vadd.f32 %v4238_v54, %v4198_v43  ;;  %v7888_v43 = vsel %vm2838_vm6, %v2822_v16, %v2854_v27  ;;  %v7898_v27 = vsel %vm4365_vm7, %v4349_v21, %v4381_v7  ;;  %9393 = vst [vmem:[#allocation93_spill] sm:$0xff] %v7900_v15  ;;  %v4577_v21 = vadd.f32 %v2466_v28, %v7028_v55 }
 0x1f6   : > { %6198 = vrot.lane.b32.xlu0 %v9391_v26, %s6607_s15  ;;  %2963 = vrot.lane.b32.xlu1 %v7888_v43, %s6607_s15  ;;  %9392 = vst [vmem:[#allocation28_spill] sm:$0xff] %v7898_v27  ;;  %v3082_v8 = vmul.f32 0.01, %v3050_v51  ;;  %v4580_v7 = vadd.f32 %v6148_v22, %v7031_v59  ;;  %v3085_v26 = vmul.f32 0.01, %v3053_v41  ;;  %vm3066_vm10 = vcmp.gt.f32.partialorder %v3050_v51, 0.0 }
 0x1f7   : > { %v4294_v33 = vsub.f32 %v4278_v35, %v7460_v57  ;;  %v4232_v47 = vpop.permute.xlu0 %4231  ;;  %v2469_v57 = vpop.f32.mrf.mxu1  ;;  %v4196_v35 = vadd.f32 %v5761_v17, %v4180_v11  ;;  %v4185_v59 = vmul.f32 %v7840_v62, %v4169_v12  ;;  %v5772_v22 = vunpack.c.l.bf16 %v5890_v37 }
 0x1f8   : > { %v7886_v58 = vpop.permute.xlu1 %2706  ;;  %v4275_v52 = vadd.f32 %v4232_v47, %v4195_v63  ;;  %v6071_v63 = vpop.f32.mrf.mxu0  ;;  %vm4593_vm12 = vcmp.gt.f32.partialorder %v4577_v21, 0.0  ;;  %vm4596_vm13 = vcmp.gt.f32.partialorder %v4580_v7, 0.0 }
 0x1f9   : > { %9390 = vst [vmem:[#allocation92_spill] sm:$0xff] %v7886_v58  ;;  %v7890_v54 = vpack.i.bf16 %v4294_v33, %v4293_v25  ;;  %v6151_v11 = vpop.f32.mrf.mxu1  ;;  %v9394_v25 = vld [vmem:[#allocation32_spill] sm:$0xff] }
 0x1fa   : > { %4490 = vrot.lane.b32.xlu1 %v7898_v27, %s6607_s15  ;;  %3182 = vrot.lane.b32.xlu0 %v7900_v15, %s6607_s15  ;;  %v4291_v33 = vsub.f32 %v4275_v52, %v9394_v25  ;;  %v2162_v28 = vpop.f32.mrf.mxu0  ;;  %v4609_v52 = vmul.f32 0.01, %v4577_v21  ;;  %v7930_v25 = vsel %vm3066_vm10, %v3050_v51, %v3082_v8  ;;  %v3056_v51 = vadd.f32 %v6071_v63, %v7041_v4 }
 0x1fb   : > { %v7923_v55 = vpop.f32.mrf.mxu1  ;;  %9400 = vst [vmem:[#allocation94_spill] sm:$0xff] %v7930_v25 }
 0x1fc   : > { %v4234_v16 = vpop.permute.xlu1 %4233  ;;  %v7911_v47 = vpop.permute.xlu0 %2716  ;;  %vm3072_vm1 = vcmp.gt.f32.partialorder %v3056_v51, 0.0 }
 0x1fd   : > { %v4276_v49 = vadd.f32 %v4234_v16, %v4196_v35  ;;  %9396 = vst [vmem:[#allocation32_spill] sm:$0xff] %v7911_v47  ;;  %v4170_v35 = vadd.f32 1.0, %v7524_v46  ;;  %v7915_v16 = vsel %vm4595_vm9, %v4579_v39, %v4611_v5  ;;  %v4612_v46 = vmul.f32 0.01, %v4580_v7 }
 0x1fe   : > { %9397 = vst [vmem:[#allocation33_spill] sm:$0xff] %v7915_v16  ;;  %6203 = vrot.lane.b32.xlu1 %v9398_v6, %s6607_s15  ;;  %4709 = vrot.lane.b32.xlu0 %v7915_v16, %s6607_s15  ;;  %v3051_v39 = vadd.f32 %v2149_v38, %v7036_v0  ;;  %v6152_v38 = vpop.f32.mrf.mxu1  ;;  %v4201_v6 = vadd.f32 %v5772_v22, %v4185_v59 }
 0x1ff   : > { %v4292_v17 = vsub.f32 %v4276_v49, %v9395_v42  ;;  %v4186_v49 = vmul.f32 %v7840_v62, %v4170_v35  ;;  %v5773_v42 = vunpack.c.h.bf16 %v5890_v37  ;;  %v7942_v8 = vsel %vm4596_vm13, %v4580_v7, %v4612_v46 }
 0x200   : > { %v3083_v35 = vmul.f32 0.01, %v3051_v39  ;;  %9403 = vst [vmem:[#allocation97_spill] sm:$0xff] %v7942_v8  ;;  %vm3067_vm14 = vcmp.gt.f32.partialorder %v3051_v39, 0.0  ;;  %v2485_v22 = vpop.f32.mrf.mxu1  ;;  %v4583_v7 = vadd.f32 %v6151_v11, %v7041_v4 }
 0x201   : > { %v7917_v58 = vpack.i.bf16 %v4292_v17, %v4291_v33  ;;  %v7932_v33 = vsel %vm3069_vm11, %v3053_v41, %v3085_v26  ;;  %v6072_v17 = vpop.f32.mrf.mxu0  ;;  %v7940_v41 = vsel %vm4593_vm12, %v4577_v21, %v4609_v52  ;;  %v4202_v26 = vadd.f32 %v5773_v42, %v4186_v49  ;;  %v5889_v49 = vld [vmem:[%s6844_s24 + $0x160] sm:$0xff]  }
 0x202   : > { %v7927_v5 = vpop.permute.xlu1 %2718  ;;  %9401 = vst [vmem:[#allocation95_spill] sm:$0xff] %v7932_v33  ;;  %3178 = vrot.lane.b32.xlu0 %v7930_v25, %s6607_s15  ;;  %3184 = vrot.lane.b32.xlu1 %v7932_v33, %s6607_s15  ;;  %v4244_v12 = vpop.permute.xlu0 %4243  ;;  %9402 = vst [vmem:[#allocation96_spill] sm:$0xff] %v7940_v41  ;;  %v3088_v52 = vmul.f32 0.01, %v3056_v51  ;;  %v4168_v42 = vadd.f32 1.0, %v7566_v45  ;;  %v5768_v45 = vunpack.c.l.bf16 %v5889_v49  ;;  %vm4599_vm2 = vcmp.gt.f32.partialorder %v4583_v7, 0.0 }
 0x203   : > { %9399 = vst [vmem:[#allocation30_spill] sm:$0xff] %v7927_v5  ;;  %v4578_v5 = vadd.f32 %v2469_v57, %v7036_v0  ;;  %v4281_v37 = vadd.f32 %v4244_v12, %v4201_v6  ;;  %v2165_v0 = vpop.f32.mrf.mxu0  ;;  %v4167_v57 = vadd.f32 1.0, %v7540_v3  ;;  %v7954_v12 = vsel %vm3067_vm14, %v3051_v39, %v3083_v35  ;;  %v9406_v6 = vld [vmem:[#allocation36_spill] sm:$0xff]  ;;  %v9408_v3 = vld [vmem:[#allocation34_spill] sm:$0xff]  ;;  %v6155_v11 = vpop.f32.mrf.mxu1 }
 0x204   : > { %9405 = vst [vmem:[#allocation99_spill] sm:$0xff] %v7954_v12  ;;  %v4615_v39 = vmul.f32 0.01, %v4583_v7  ;;  %v3054_v35 = vadd.f32 %v2162_v28, %v7048_v10 }
 0x205   : > { %v4610_v21 = vmul.f32 0.01, %v4578_v5  ;;  %v4297_v47 = vsub.f32 %v4281_v37, %v9406_v6  ;;  %vm4594_vm15 = vcmp.gt.f32.partialorder %v4578_v5, 0.0  ;;  %v6075_v4 = vpop.f32.mrf.mxu0  ;;  %v2498_v28 = vpop.f32.mrf.mxu1 }
 0x206   : > { %4705 = vrot.lane.b32.xlu0 %v7940_v41, %s6607_s15  ;;  %4711 = vrot.lane.b32.xlu1 %v7942_v8, %s6607_s15  ;;  %v4246_v59 = vpop.permute.xlu1 %4245  ;;  %v7950_v46 = vpop.permute.xlu0 %2712  ;;  %v9407_v41 = vld [vmem:[#allocation37_spill] sm:$0xff]  ;;  %vm3070_vm3 = vcmp.gt.f32.partialorder %v3054_v35, 0.0 }
 0x207   : > { %v4282_v63 = vadd.f32 %v4246_v59, %v4202_v26  ;;  %9404 = vst [vmem:[#allocation98_spill] sm:$0xff] %v7950_v46  ;;  %v4183_v26 = vmul.f32 %v7840_v62, %v4167_v57  ;;  %v7970_v6 = vsel %vm4594_vm15, %v4578_v5, %v4610_v21  ;;  %v5769_v46 = vunpack.c.h.bf16 %v5889_v49 }
 0x208   : > { %9410 = vst [vmem:[#allocation37_spill] sm:$0xff] %v7970_v6  ;;  %v4581_v57 = vadd.f32 %v7923_v55, %v7048_v10  ;;  %v4584_v5 = vadd.f32 %v6152_v38, %v7055_v14  ;;  %v7981_v21 = vsel %vm4599_vm2, %v4583_v7, %v4615_v39  ;;  %v7988_v10 = vadd.f32 %v2485_v22, %v7062_v20  ;;  %v6156_v55 = vpop.f32.mrf.mxu1 }
 0x209   : > { %v4298_v25 = vsub.f32 %v4282_v63, %v9407_v41  ;;  %v3057_v41 = vadd.f32 %v6072_v17, %v7055_v14  ;;  %v4184_v63 = vmul.f32 %v7840_v62, %v4168_v42  ;;  %v4199_v17 = vadd.f32 %v5768_v45, %v4183_v26  ;;  %9412 = vst [vmem:[#allocation100_spill] sm:$0xff] %v7981_v21 }
 0x20a   : > { %6208 = vrot.lane.b32.xlu0 %v9408_v3, %s6607_s15  ;;  %3180 = vrot.lane.b32.xlu1 %v7954_v12, %s6607_s15  ;;  %v7972_v3 = vsel %vm3072_vm1, %v3056_v51, %v3088_v52  ;;  %v3086_v42 = vmul.f32 0.01, %v3054_v35  ;;  %v4613_v7 = vmul.f32 0.01, %v4581_v57  ;;  %v4616_v45 = vmul.f32 0.01, %v4584_v5 }
 0x20b   : > { %v7963_v59 = vpack.i.bf16 %v4298_v25, %v4297_v47  ;;  %v7967_v37 = vpop.permute.xlu1 %2714  ;;  %9411 = vst [vmem:[#allocation34_spill] sm:$0xff] %v7972_v3  ;;  %v4240_v47 = vpop.permute.xlu0 %4239  ;;  %v3089_v51 = vmul.f32 0.01, %v3057_v41  ;;  %v4200_v49 = vadd.f32 %v5769_v46, %v4184_v63  ;;  %vm3073_vm4 = vcmp.gt.f32.partialorder %v3057_v41, 0.0 }
 0x20c   : > { %9409 = vst [vmem:[#allocation36_spill] sm:$0xff] %v7967_v37  ;;  %v2178_v25 = vpop.f32.mrf.mxu0  ;;  %v4279_v52 = vadd.f32 %v4240_v47, %v4199_v17  ;;  %v9413_v37 = vld [vmem:[#allocation38_spill] sm:$0xff]  ;;  %v3055_v46 = vadd.f32 %v2165_v0, %v7062_v20  ;;  %v4173_v39 = vadd.f32 1.0, %v7590_v60  ;;  %v7999_v17 = vsel %vm3070_vm3, %v3054_v35, %v3086_v42  ;;  %v2501_v35 = vpop.f32.mrf.mxu1 }
 0x20d   : > { %9415 = vst [vmem:[#allocation101_spill] sm:$0xff] %v7999_v17  ;;  %v8002_v22 = vsel %vm3073_vm4, %v3057_v41, %v3089_v51  ;;  %vm4597_vm5 = vcmp.gt.f32.partialorder %v4581_v57, 0.0  ;;  %vm4600_vm6 = vcmp.gt.f32.partialorder %v4584_v5, 0.0  ;;  %v8009_v20 = vadd.f32 %v6075_v4, %v7069_v24  ;;  %v5892_v60 = vld [vmem:[%s6844_s24 + $0x178] sm:$0xff]  }
 0x20e   : > { %4707 = vrot.lane.b32.xlu1 %v7970_v6, %s6607_s15  ;;  %3190 = vrot.lane.b32.xlu0 %v7972_v3, %s6607_s15  ;;  %v6076_v14 = vpop.f32.mrf.mxu0  ;;  %9416 = vst [vmem:[#allocation102_spill] sm:$0xff] %v8002_v22  ;;  %vm4598_vm7 = vcmp.gt.f32.partialorder %v7988_v10, 0.0  ;;  %v4614_v0 = vmul.f32 0.01, %v7988_v10  ;;  %v4174_v42 = vadd.f32 1.0, %v7616_v18  ;;  %v8022_v4 = vadd.f32 %v6155_v11, %v7069_v24 }
 0x20f   : > { %v4242_v26 = vpop.permute.xlu1 %4241  ;;  %v7992_v63 = vpop.permute.xlu0 %2724  ;;  %v5780_v18 = vunpack.c.l.bf16 %v5892_v60  ;;  %vm3071_vm8 = vcmp.gt.f32.partialorder %v3055_v46, 0.0  ;;  %vm3076_vm9 = vcmp.gt.f32.partialorder %v8009_v20, 0.0  ;;  %v8039_v24 = vadd.f32 %v6076_v14, %v7083_v34 }
 0x210   : > { %v4280_v38 = vadd.f32 %v4242_v26, %v4200_v49  ;;  %9414 = vst [vmem:[#allocation38_spill] sm:$0xff] %v7992_v63  ;;  %v8005_v49 = vld [vmem:[%s6839_s11 + $0x48] sm:$0xff]  ;;  %v2181_v41 = vpop.f32.mrf.mxu0  ;;  %v8028_v63 = vadd.f32 %v2178_v25, %v7076_v30  ;;  %v8042_v11 = vadd.f32 %v6156_v55, %v7083_v34  ;;  %v3092_v25 = vmul.f32 0.01, %v8009_v20  ;;  %v6159_v14 = vpop.f32.mrf.mxu1 }
 0x211   : > { %v5781_v34 = vunpack.c.h.bf16 %v5892_v60  ;;  %vm4603_vm10 = vcmp.gt.f32.partialorder %v8022_v4, 0.0  ;;  %v4619_v55 = vmul.f32 0.01, %v8022_v4  ;;  %vm3077_vm12 = vcmp.gt.f32.partialorder %v8039_v24, 0.0 }
 0x212   : > { %6213 = vrot.lane.b32.xlu1 %v9413_v37, %s6607_s15  ;;  %4717 = vrot.lane.b32.xlu0 %v7981_v21, %s6607_s15  ;;  %v7995_v37 = vld [vmem:[%s6839_s11 + $0x40] sm:$0xff]  ;;  %v4296_v26 = vsub.f32 %v4280_v38, %v8005_v49  ;;  %v8025_v38 = vadd.f32 %v2498_v28, %v7076_v30  ;;  %v8032_v21 = vsel %vm4597_vm5, %v4581_v57, %v4613_v7  ;;  %vm3074_vm11 = vcmp.gt.f32.partialorder %v8028_v63, 0.0 }
 0x213   : > { %v4295_v47 = vsub.f32 %v4279_v52, %v7995_v37  ;;  %v3087_v52 = vmul.f32 0.01, %v3055_v46  ;;  %9417 = vst [vmem:[#allocation103_spill] sm:$0xff] %v8032_v21  ;;  %v4252_v30 = vpop.permute.xlu0 %4251  ;;  %v8052_v57 = vadd.f32 %v2501_v35, %v7090_v40  ;;  %v4190_v7 = vmul.f32 %v7840_v62, %v4174_v42 }
 0x214   : > { %v8070_v60 = vmul.f32 0.01, %v8039_v24  ;;  %v8073_v42 = vmul.f32 0.01, %v8042_v11  ;;  %vm4601_vm13 = vcmp.gt.f32.partialorder %v8025_v38, 0.0  ;;  %vm4604_vm14 = vcmp.gt.f32.partialorder %v8042_v11, 0.0 }
 0x215   : > { %v8019_v51 = vpack.i.bf16 %v4296_v26, %v4295_v47  ;;  %v8048_v28 = vpop.permute.xlu1 %2726  ;;  %v8063_v47 = vmul.f32 0.01, %v8028_v63  ;;  %v8066_v35 = vsel %vm3071_vm8, %v3055_v46, %v3087_v52  ;;  %v8084_v46 = vmul.f32 0.01, %v8052_v57 }
 0x216   : > { %3186 = vrot.lane.b32.xlu0 %v7999_v17, %s6607_s15  ;;  %3192 = vrot.lane.b32.xlu1 %v8002_v22, %s6607_s15  ;;  %v4189_v17 = vmul.f32 %v7840_v62, %v4173_v39  ;;  %v8035_v22 = vsel %vm4600_vm6, %v4584_v5, %v4616_v45  ;;  %9419 = vst [vmem:[#allocation105_spill] sm:$0xff] %v8048_v28  ;;  %v6079_v5 = vpop.f32.mrf.mxu0  ;;  %v8058_v45 = vmul.f32 0.01, %v8025_v38  ;;  %v4171_v39 = vadd.f32 1.0, %v7626_v48  ;;  %v5891_v48 = vld [vmem:[%s6844_s24 + $0x170] sm:$0xff]  }
 0x217   : > { %9418 = vst [vmem:[#allocation104_spill] sm:$0xff] %v8035_v22  ;;  %9420 = vst [vmem:[#allocation106_spill] sm:$0xff] %v8066_v35  ;;  %v8076_v28 = vadd.f32 %v2181_v41, %v7090_v40  ;;  %v4206_v3 = vadd.f32 %v5781_v34, %v4190_v7  ;;  %v8088_v6 = vadd.f32 %v6079_v5, %v7097_v44  ;;  %v9422_v41 = vld [vmem:[#allocation59_spill] sm:$0xff]  ;;  %v8095_v12 = vpop.permute.xlu0 %2720  ;;  %v5776_v5 = vunpack.c.l.bf16 %v5891_v48 }
 0x218   : > { %v4205_v26 = vadd.f32 %v5780_v18, %v4189_v17  ;;  %v2514_v17 = vpop.f32.mrf.mxu1  ;;  %v2194_v52 = vpop.f32.mrf.mxu0  ;;  %v9421_v18 = vld [vmem:[#allocation58_spill] sm:$0xff]  ;;  %v8091_v40 = vadd.f32 %v6159_v14, %v7097_v44  ;;  %v8106_v44 = vsel %vm3076_vm9, %v8009_v20, %v3092_v25  ;;  %v5854_v20 = vld [vmem:[%s6844_s24 + $0x48] sm:$0xff]   ;;  %vm4602_vm1 = vcmp.gt.f32.partialorder %v8052_v57, 0.0 }
 0x219   : > { %9423 = vst [vmem:[#allocation58_spill] sm:$0xff] %v8095_v12  ;;  %v4254_v8 = vpop.permute.xlu1 %4253  ;;  %9425 = vst [vmem:[#allocation107_spill] sm:$0xff] %v8106_v44  ;;  %v8110_v14 = vmul.f32 0.01, %v8076_v28  ;;  %v8113_v7 = vadd.f32 %v2514_v17, %v7104_v50  ;;  %v8130_v17 = vld [vmem:[%s6839_s11 + $0x78] sm:$0xff]  ;;  %vm3075_vm15 = vcmp.gt.f32.partialorder %v8076_v28, 0.0 }
 0x21a   : > { %4713 = vrot.lane.b32.xlu0 %v8032_v21, %s6607_s15  ;;  %4719 = vrot.lane.b32.xlu1 %v8035_v22, %s6607_s15  ;;  %v4172_v21 = vadd.f32 1.0, %v9421_v18  ;;  %v4285_v22 = vadd.f32 %v4252_v30, %v4205_v26  ;;  %v4286_v18 = vadd.f32 %v4254_v8, %v4206_v3  ;;  %v8101_v30 = vsel %vm4598_vm7, %v7988_v10, %v4614_v0  ;;  %v9426_v3 = vld [vmem:[#allocation62_spill] sm:$0xff]  ;;  %v6080_v0 = vpop.f32.mrf.mxu0  ;;  %v6160_v25 = vpop.f32.mrf.mxu1 }
 0x21b   : > { %9424 = vst [vmem:[#allocation59_spill] sm:$0xff] %v8101_v30  ;;  %v8116_v8 = vadd.f32 %v2194_v52, %v7104_v50  ;;  %v2876_v10 = vadd.f32 1.0, %v9426_v3  ;;  %9428 = vst [vmem:[#allocation108_spill] sm:$0xff] %v8130_v17  ;;  %v5777_v52 = vunpack.c.h.bf16 %v5891_v48  ;;  %v8137_v3 = vmul.f32 0.01, %v8091_v40 }
 0x21c   : > { %v4188_v34 = vmul.f32 %v7840_v62, %v4172_v21  ;;  %v4302_v50 = vsub.f32 %v4286_v18, %v8130_v17  ;;  %v8148_v48 = vsel %vm4603_vm10, %v8022_v4, %v4619_v55  ;;  %v5628_v18 = vunpack.c.l.bf16 %v5854_v20 }
 0x21d   : > { %9431 = vst [vmem:[#allocation109_spill] sm:$0xff] %v8148_v48  ;;  %v8152_v15 = vmul.f32 0.01, %v8113_v7  ;;  %v8162_v4 = vmul.f32 0.01, %v8116_v8  ;;  %v8165_v55 = vadd.f32 %v6080_v0, %v7111_v56  ;;  %v8176_v0 = vsel %vm3074_vm11, %v8028_v63, %v8063_v47  ;;  %v9437_v47 = vld [vmem:[#allocation67_spill] sm:$0xff] }
 0x21e   : > { %6218 = vrot.lane.b32.xlu0 %v7538_v31, %s6607_s15  ;;  %3188 = vrot.lane.b32.xlu1 %v8066_v35, %s6607_s15  ;;  %v4187_v31 = vmul.f32 %v7840_v62, %v4171_v39  ;;  %v2875_v35 = vadd.f32 1.0, %v9422_v41  ;;  %v8126_v39 = vld [vmem:[%s6839_s11 + $0x70] sm:$0xff]  ;;  %v8134_v41 = vmul.f32 0.01, %v8088_v6  ;;  %vm3080_vm2 = vcmp.gt.f32.partialorder %v8088_v6, 0.0 }
 0x21f   : > { %9427 = vst [vmem:[#allocation62_spill] sm:$0xff] %v8126_v39  ;;  %v4301_v26 = vsub.f32 %v4285_v22, %v8126_v39  ;;  %v9434_v39 = vld [vmem:[#allocation63_spill] sm:$0xff]  ;;  %vm4607_vm3 = vcmp.gt.f32.partialorder %v8091_v40, 0.0  ;;  %vm3081_vm4 = vcmp.gt.f32.partialorder %v8165_v55, 0.0  ;;  %vm3078_vm5 = vcmp.gt.f32.partialorder %v8116_v8, 0.0 }
 0x220   : > { %v2891_v12 = vmul.f32 %v7840_v62, %v2875_v35  ;;  %v4203_v33 = vadd.f32 %v5776_v5, %v4187_v31  ;;  %v2892_v35 = vmul.f32 %v7840_v62, %v2876_v10  ;;  %v5894_v31 = vld [vmem:[%s6844_s24 + $0x188] sm:$0xff]   ;;  %v5629_v5 = vunpack.c.h.bf16 %v5854_v20 }
 0x221   : > { %v8141_v16 = vpop.permute.xlu1 %2722  ;;  %v8143_v22 = vpack.i.bf16 %v4302_v50, %v4301_v26  ;;  %v2517_v26 = vpop.f32.mrf.mxu1  ;;  %v4204_v10 = vadd.f32 %v5777_v52, %v4188_v34  ;;  %v2873_v27 = vadd.f32 1.0, %v9434_v39  ;;  %v5853_v34 = vld [vmem:[%s6844_s24 + $0x40] sm:$0xff]   ;;  %v2874_v52 = vadd.f32 1.0, %v9437_v47 }
 0x222   : > { %4715 = vrot.lane.b32.xlu1 %v8101_v30, %s6607_s15  ;;  %3198 = vrot.lane.b32.xlu0 %v8106_v44, %s6607_s15  ;;  %v9429_v44 = vld [vmem:[#allocation61_spill] sm:$0xff]  ;;  %v4248_v30 = vpop.permute.xlu0 %4247  ;;  %v8188_v39 = vadd.f32 %v2517_v26, %v7118_v1  ;;  %v5789_v26 = vunpack.c.h.bf16 %v5894_v31  ;;  %vm4605_vm7 = vcmp.gt.f32.partialorder %v8113_v7, 0.0  ;;  %vm3707_vm10 = vcmask 523264  }
 0x223   : > { %v4402_v21 = vadd.f32 1.0, %v9429_v44  ;;  %9430 = vst [vmem:[#allocation61_spill] sm:$0xff] %v8141_v16  ;;  %v9432_v44 = vld [vmem:[#allocation64_spill] sm:$0xff]  ;;  %v9433_v16 = vld [vmem:[#allocation47_spill] sm:$0xff]  ;;  %v4283_v50 = vadd.f32 %v4248_v30, %v4203_v33  ;;  %v2907_v33 = vadd.f32 %v5628_v18, %v2891_v12  ;;  %v8184_v30 = vsel %vm3077_vm12, %v8039_v24, %v8070_v60 }
 0x224   : > { %v4403_v17 = vadd.f32 1.0, %v9432_v44  ;;  %v8168_v44 = vadd.f32 %v6160_v25, %v7111_v56  ;;  %9435 = vst [vmem:[#allocation64_spill] sm:$0xff] %v8176_v0  ;;  %9436 = vst [vmem:[#allocation47_spill] sm:$0xff] %v8184_v30  ;;  %v5788_v25 = vunpack.c.l.bf16 %v5894_v31  ;;  %v2908_v12 = vadd.f32 %v5629_v5, %v2892_v35  ;;  %v8201_v60 = vld [vmem:[%s6839_s11 + $0x68] sm:$0xff] }
 0x225   : > { %9439 = vst [vmem:[#allocation67_spill] sm:$0xff] %v8201_v60  ;;  %v8210_v35 = vsel %vm4601_vm13, %v8025_v38, %v8058_v45  ;;  %v5624_v5 = vunpack.c.l.bf16 %v5853_v34  ;;  %v2890_v38 = vmul.f32 %v7840_v62, %v2874_v52  ;;  %v9443_v45 = vld [vmem:[#allocation70_spill] sm:$0xff]  ;;  %vm4606_vm8 = vcmp.gt.f32.partialorder %v8188_v39, 0.0 }
 0x226   : > { %6223 = vrot.lane.b32.xlu1 %v9433_v16, %s6607_s15  ;;  %4725 = vrot.lane.b32.xlu0 %v8148_v48, %s6607_s15  ;;  %v4418_v16 = vmul.f32 %v7840_v62, %v4402_v21  ;;  %v2942_v20 = vpop.permute.xlu0 %2941  ;;  %v4419_v63 = vmul.f32 %v7840_v62, %v4403_v17  ;;  %v8197_v21 = vld [vmem:[%s6839_s11 + $0x60] sm:$0xff]  ;;  %v2889_v17 = vmul.f32 %v7840_v62, %v2873_v27  ;;  %vm4608_vm6 = vcmp.gt.f32.partialorder %v8168_v44, 0.0 }
 0x227   : > { %9438 = vst [vmem:[#allocation63_spill] sm:$0xff] %v8197_v21  ;;  %v4299_v24 = vsub.f32 %v4283_v50, %v8197_v21  ;;  %v2987_v18 = vadd.f32 %v2942_v20, %v2907_v33  ;;  %v8219_v20 = vsel %vm4604_vm14, %v8042_v11, %v8073_v42  ;;  %v4401_v33 = vadd.f32 1.0, %v9443_v45  ;;  %v9444_v45 = vld [vmem:[#allocation71_spill] sm:$0xff] }
 0x228   : > { %v4250_v48 = vpop.permute.xlu1 %4249  ;;  %v4434_v31 = vadd.f32 %v5788_v25, %v4418_v16  ;;  %9442 = vst [vmem:[#allocation110_spill] sm:$0xff] %v8219_v20  ;;  %v5625_v16 = vunpack.c.h.bf16 %v5853_v34  ;;  %v8233_v25 = vld [vmem:[%s6839_s11 + $0x10] sm:$0xff]  ;;  %v4435_v52 = vadd.f32 %v5789_v26, %v4419_v63  ;;  %v2905_v34 = vadd.f32 %v5624_v5, %v2889_v17  ;;  %v9445_v5 = vld [vmem:[#allocation74_spill] sm:$0xff] }
 0x229   : > { %v4284_v56 = vadd.f32 %v4250_v48, %v4204_v10  ;;  %v9440_v10 = vld [vmem:[#allocation66_spill] sm:$0xff]  ;;  %v3003_v11 = vsub.f32 %v2987_v18, %v8233_v25  ;;  %v8252_v63 = vsel %vm3075_vm15, %v8076_v28, %v8110_v14  ;;  %v4417_v17 = vmul.f32 %v7840_v62, %v4401_v33  ;;  %v2197_v28 = vpop.f32.mrf.mxu0 }
 0x22a   : > { %3194 = vrot.lane.b32.xlu0 %v8176_v0, %s6607_s15  ;;  %3200 = vrot.lane.b32.xlu1 %v8184_v30, %s6607_s15  ;;  %v4400_v47 = vadd.f32 1.0, %v9440_v10  ;;  %v4469_v0 = vpop.permute.xlu0 %4468  ;;  %9441 = vst [vmem:[#allocation66_spill] sm:$0xff] %v8210_v35  ;;  %vm3724_vm11 = vcmask 785408  }
 0x22b   : > { %v4300_v48 = vsub.f32 %v4284_v56, %v8201_v60  ;;  %v8223_v56 = vmul.f32 0.01, %v8165_v55  ;;  %v4514_v42 = vadd.f32 %v4469_v0, %v4434_v31  ;;  %v2880_v31 = vadd.f32 1.0, %v9445_v5  ;;  %v9447_v60 = vld [vmem:[#allocation73_spill] sm:$0xff] }
 0x22c   : > { %v2944_v29 = vpop.permute.xlu1 %2943  ;;  %v4416_v10 = vmul.f32 %v7840_v62, %v4400_v47  ;;  %v8256_v47 = vmul.f32 0.01, %v8188_v39  ;;  %v4406_v5 = vadd.f32 1.0, %v9447_v60 }
 0x22d   : > { %v8213_v50 = vpack.i.bf16 %v4300_v48, %v4299_v24  ;;  %v2988_v27 = vadd.f32 %v2944_v29, %v2908_v12  ;;  %v5893_v29 = vld [vmem:[%s6844_s24 + $0x180] sm:$0xff]   ;;  %v8237_v12 = vld [vmem:[%s6839_s11 + $0x18] sm:$0xff]  ;;  %v8241_v48 = vmul.f32 0.01, %v8168_v44  ;;  %v4530_v14 = vsub.f32 %v4514_v42, %v8233_v25 }
 0x22e   : > { %4721 = vrot.lane.b32.xlu0 %v8210_v35, %s6607_s15  ;;  %4727 = vrot.lane.b32.xlu1 %v8219_v20, %s6607_s15  ;;  %v2879_v35 = vadd.f32 1.0, %v9444_v45  ;;  %v2938_v20 = vpop.permute.xlu0 %2937  ;;  %v5784_v26 = vunpack.c.l.bf16 %v5893_v29  ;;  %v2906_v45 = vadd.f32 %v5625_v16, %v2890_v38  ;;  %v5896_v42 = vld [vmem:[%s6844_s24 + $0x198] sm:$0xff]  }
 0x22f   : > { %v3004_v24 = vsub.f32 %v2988_v27, %v8237_v12  ;;  %v9446_v27 = vld [vmem:[#allocation51_spill] sm:$0xff] }
 0x230   : > { %v4471_v30 = vpop.permute.xlu1 %4470  ;;  %v2895_v33 = vmul.f32 %v7840_v62, %v2879_v35  ;;  %v4432_v60 = vadd.f32 %v5784_v26, %v4416_v10 }
 0x231   : > { %v8246_v18 = vpack.i.bf16 %v3004_v24, %v3003_v11  ;;  %v4515_v0 = vadd.f32 %v4471_v30, %v4435_v52  ;;  %v5785_v30 = vunpack.c.h.bf16 %v5893_v29  ;;  %v5856_v11 = vld [vmem:[%s6844_s24 + $0x58] sm:$0xff]   ;;  %v2985_v24 = vadd.f32 %v2938_v20, %v2905_v34 }
 0x232   : > { %6228 = vrot.lane.b32.xlu0 %v9446_v27, %s6607_s15  ;;  %3196 = vrot.lane.b32.xlu1 %v8252_v63, %s6607_s15  ;;  %v8273_v29 = vsel %vm4602_vm1, %v8052_v57, %v8084_v46  ;;  %v8279_v20 = vsel %vm3080_vm2, %v8088_v6, %v8134_v41  ;;  %v5636_v16 = vunpack.c.l.bf16 %v5856_v11  ;;  %v8286_v34 = vadd.f32 %v2197_v28, %v7118_v1  ;;  %v9448_v46 = vld [vmem:[#allocation76_spill] sm:$0xff]  ;;  %v8295_v41 = vld [vmem:[%s6839_s11] sm:$0xff] }
 0x233   : > { %v4531_v52 = vsub.f32 %v4515_v0, %v8237_v12  ;;  %v2896_v57 = vmul.f32 %v7840_v62, %v2880_v31  ;;  %v4407_v0 = vadd.f32 1.0, %v9448_v46  ;;  %v4433_v6 = vadd.f32 %v5785_v30, %v4417_v17 }
 0x234   : > { %v4465_v21 = vpop.permute.xlu0 %4464  ;;  %v2940_v27 = vpop.permute.xlu1 %2939  ;;  %v3001_v10 = vsub.f32 %v2985_v24, %v8295_v41  ;;  %v5637_v28 = vunpack.c.h.bf16 %v5856_v11  ;;  %v4422_v31 = vmul.f32 %v7840_v62, %v4406_v5  ;;  %v8308_v17 = vsel %vm4607_vm3, %v8091_v40, %v8137_v3  ;;  %v5855_v3 = vld [vmem:[%s6844_s24 + $0x50] sm:$0xff]  }
 0x235   : > { %v8282_v35 = vpack.i.bf16 %v4531_v52, %v4530_v14  ;;  %v2986_v38 = vadd.f32 %v2940_v27, %v2906_v45  ;;  %v4512_v26 = vadd.f32 %v4465_v21, %v4432_v60  ;;  %v8299_v14 = vld [vmem:[%s6839_s11 + $0x8] sm:$0xff]  ;;  %v9449_v52 = vld [vmem:[#allocation75_spill] sm:$0xff]  ;;  %9450 = vst [vmem:[#allocation70_spill] sm:$0xff] %v8308_v17  ;;  %v5796_v30 = vunpack.c.l.bf16 %v5896_v42 }
 0x236   : > { %4723 = vrot.lane.b32.xlu1 %v8273_v29, %s6607_s15  ;;  %3206 = vrot.lane.b32.xlu0 %v8279_v20, %s6607_s15  ;;  %v2877_v45 = vadd.f32 1.0, %v9449_v52  ;;  %v2911_v11 = vadd.f32 %v5636_v16, %v2895_v33  ;;  %v8317_v5 = vsel %vm3081_vm4, %v8165_v55, %v8223_v56  ;;  %v3095_v60 = vmul.f32 0.01, %v8286_v34  ;;  %v9451_v52 = vld [vmem:[#allocation79_spill] sm:$0xff] }
 0x237   : > { %v3002_v1 = vsub.f32 %v2986_v38, %v8299_v14  ;;  %v4423_v38 = vmul.f32 %v7840_v62, %v4407_v0  ;;  %v2878_v40 = vadd.f32 1.0, %v9451_v52  ;;  %v5797_v33 = vunpack.c.h.bf16 %v5896_v42  ;;  %v9452_v0 = vld [vmem:[#allocation78_spill] sm:$0xff] }
 0x238   : > { %v4467_v27 = vpop.permute.xlu1 %4466  ;;  %v2950_v46 = vpop.permute.xlu0 %2949  ;;  %v4528_v16 = vsub.f32 %v4512_v26, %v8295_v41  ;;  %v8335_v42 = vsel %vm3078_vm5, %v8116_v8, %v8162_v4  ;;  %vm3079_vm9 = vcmp.gt.f32.partialorder %v8286_v34, 0.0  ;;  %v8354_v4 = vld [vmem:[%s6839_s11 + $0x30] sm:$0xff] }
 0x239   : > { %v8311_v21 = vpack.i.bf16 %v3002_v1, %v3001_v10  ;;  %v4513_v24 = vadd.f32 %v4467_v27, %v4433_v6  ;;  %v2991_v56 = vadd.f32 %v2950_v46, %v2911_v11  ;;  %v2912_v6 = vadd.f32 %v5637_v28, %v2896_v57  ;;  %v9453_v46 = vld [vmem:[#allocation81_spill] sm:$0xff] }
 0x23a   : > { %4733 = vrot.lane.b32.xlu0 %v8308_v17, %s6607_s15  ;;  %3208 = vrot.lane.b32.xlu1 %v8317_v5, %s6607_s15  ;;  %v2893_v10 = vmul.f32 %v7840_v62, %v2877_v45  ;;  %v4404_v1 = vadd.f32 1.0, %v9452_v0  ;;  %v4438_v27 = vadd.f32 %v5796_v30, %v4422_v31  ;;  %v8343_v57 = vsel %vm4608_vm6, %v8168_v44, %v8241_v48  ;;  %v5895_v31 = vld [vmem:[%s6844_s24 + $0x190] sm:$0xff]  }
 0x23b   : > { %v4529_v55 = vsub.f32 %v4513_v24, %v8299_v14  ;;  %v5632_v28 = vunpack.c.l.bf16 %v5855_v3  ;;  %v2894_v45 = vmul.f32 %v7840_v62, %v2878_v40  ;;  %v4405_v30 = vadd.f32 1.0, %v9453_v46  ;;  %v9454_v40 = vld [vmem:[#allocation82_spill] sm:$0xff] }
 0x23c   : > { %v4477_v52 = vpop.permute.xlu0 %4476  ;;  %v2952_v17 = vpop.permute.xlu1 %2951  ;;  %v4439_v8 = vadd.f32 %v5797_v33, %v4423_v38  ;;  %v3007_v44 = vsub.f32 %v2991_v56, %v8354_v4  ;;  %v8366_v38 = vsel %vm4605_vm7, %v8113_v7, %v8152_v15  ;;  %v5792_v33 = vunpack.c.l.bf16 %v5895_v31 }
 0x23d   : > { %v8337_v26 = vpack.i.bf16 %v4529_v55, %v4528_v16  ;;  %v2992_v24 = vadd.f32 %v2952_v17, %v2912_v6  ;;  %v4518_v48 = vadd.f32 %v4477_v52, %v4438_v27  ;;  %v8358_v17 = vld [vmem:[%s6839_s11 + $0x38] sm:$0xff]  ;;  %v5633_v16 = vunpack.c.h.bf16 %v5855_v3 }
 0x23e   : > { %3202 = vrot.lane.b32.xlu0 %v8335_v42, %s6607_s15  ;;  %4735 = vrot.lane.b32.xlu1 %v8343_v57, %s6607_s15  ;;  %v2883_v55 = vadd.f32 1.0, %v9454_v40  ;;  %v4420_v56 = vmul.f32 %v7840_v62, %v4404_v1  ;;  %v2909_v52 = vadd.f32 %v5632_v28, %v2893_v10  ;;  %v8374_v3 = vsel %vm3079_vm9, %v8286_v34, %v3095_v60  ;;  %v5858_v1 = vld [vmem:[%s6844_s24 + $0x68] sm:$0xff]  }
 0x23f   : > { %v3008_v11 = vsub.f32 %v2992_v24, %v8358_v17  ;;  %v2884_v24 = vadd.f32 1.0, %v7777_v2  ;;  %v5793_v15 = vunpack.c.h.bf16 %v5895_v31  ;;  %v4421_v7 = vmul.f32 %v7840_v62, %v4405_v30  ;;  %v9455_v60 = vld [vmem:[#allocation84_spill] sm:$0xff] }
 0x240   : > { %v2946_v6 = vpop.permute.xlu0 %2945  ;;  %v4479_v0 = vpop.permute.xlu1 %4478  ;;  %v4534_v10 = vsub.f32 %v4518_v48, %v8354_v4  ;;  %v2910_v34 = vadd.f32 %v5633_v16, %v2894_v45  ;;  %v4436_v2 = vadd.f32 %v5792_v33, %v4420_v56  ;;  %v8390_v31 = vsel %vm4606_vm8, %v8188_v39, %v8256_v47  ;;  %v5898_v45 = vld [vmem:[%s6844_s24 + $0x1a8] sm:$0xff]   ;;  %v8403_v47 = vld [vmem:[%s6839_s11 + $0x20] sm:$0xff] }
 0x241   : > { %v8369_v27 = vpack.i.bf16 %v3008_v11, %v3007_v44  ;;  %v4519_v46 = vadd.f32 %v4479_v0, %v4439_v8  ;;  %v2989_v28 = vadd.f32 %v2946_v6, %v2909_v52  ;;  %v4410_v44 = vadd.f32 1.0, %v9455_v60  ;;  %9456 = vst [vmem:[#allocation71_spill] sm:$0xff] %v8390_v31 }
 0x242   : > { %4729 = vrot.lane.b32.xlu0 %v8366_v38, %s6607_s15  ;;  %3204 = vrot.lane.b32.xlu1 %v8374_v3, %s6607_s15  ;;  %v5644_v6 = vunpack.c.l.bf16 %v5858_v1  ;;  %v2899_v0 = vmul.f32 %v7840_v62, %v2883_v55  ;;  %v4411_v16 = vadd.f32 1.0, %v7794_v53  ;;  %v5645_v33 = vunpack.c.h.bf16 %v5858_v1  ;;  %v8407_v55 = vld [vmem:[%s6839_s11 + $0x28] sm:$0xff] }
 0x243   : > { %v4535_v8 = vsub.f32 %v4519_v46, %v8358_v17  ;;  %v2900_v39 = vmul.f32 %v7840_v62, %v2884_v24  ;;  %v3005_v56 = vsub.f32 %v2989_v28, %v8403_v47  ;;  %v4437_v46 = vadd.f32 %v5793_v15, %v4421_v7 }
 0x244   : > { %v4473_v11 = vpop.permute.xlu0 %4472  ;;  %v2948_v40 = vpop.permute.xlu1 %2947  ;;  %v4426_v24 = vmul.f32 %v7840_v62, %v4410_v44  ;;  %v2882_v28 = vadd.f32 1.0, %v7807_v36  ;;  %v5805_v15 = vunpack.c.h.bf16 %v5898_v45  ;;  %v4427_v44 = vmul.f32 %v7840_v62, %v4411_v16 }
 0x245   : > { %v8392_v30 = vpack.i.bf16 %v4535_v8, %v4534_v10  ;;  %v2990_v48 = vadd.f32 %v2948_v40, %v2910_v34  ;;  %v4516_v52 = vadd.f32 %v4473_v11, %v4436_v2  ;;  %v2881_v10 = vadd.f32 1.0, %v7791_v13 }
 0x246   : > { %6238 = vrot.lane.b32.xlu0 %v7824_v9, %s6609_s29  ;;  %4731 = vrot.lane.b32.xlu1 %v8390_v31, %s6607_s15  ;;  %v5804_v34 = vunpack.c.l.bf16 %v5898_v45  ;;  %v2915_v40 = vadd.f32 %v5644_v6, %v2899_v0  ;;  %v5857_v31 = vld [vmem:[%s6844_s24 + $0x60] sm:$0xff]   ;;  %v2916_v13 = vadd.f32 %v5645_v33, %v2900_v39  ;;  %v4409_v39 = vadd.f32 1.0, %v7820_v61 }
 0x247   : > { %v3006_v53 = vsub.f32 %v2990_v48, %v8407_v55  ;;  %v4532_v7 = vsub.f32 %v4516_v52, %v8403_v47  ;;  %v4408_v48 = vadd.f32 1.0, %v7805_v19  ;;  %v2897_v45 = vmul.f32 %v7840_v62, %v2881_v10  ;;  %v5897_v33 = vld [vmem:[%s6844_s24 + $0x1a0] sm:$0xff]   ;;  %v8435_v52 = vld [vmem:[%s6839_s11 + $0x50] sm:$0xff] }
 0x248   : > { %v4475_v9 = vpop.permute.xlu1 %4474  ;;  %v2958_v8 = vpop.permute.xlu0 %2957  ;;  %v5641_v19 = vunpack.c.h.bf16 %v5857_v31  ;;  %v2898_v16 = vmul.f32 %v7840_v62, %v2882_v28  ;;  %v8452_v28 = vld [vmem:[%s9192_s5] ss:$0 sm:$0xff] }
 0x249   : > { %v8411_v60 = vpack.i.bf16 %v3006_v53, %v3005_v56  ;;  %v4517_v1 = vadd.f32 %v4475_v9, %v4437_v46  ;;  %v2995_v11 = vadd.f32 %v2958_v8, %v2915_v40  ;;  %v4442_v56 = vadd.f32 %v5804_v34, %v4426_v24  ;;  %v8439_v9 = vld [vmem:[%s6839_s11 + $0x58] sm:$0xff] }
 0x24a   : > { %6248 = vrot.lane.b32.xlu0 %v7917_v58, %s6609_s29  ;;  %6233 = vrot.lane.b32.xlu1 %v7800_v32, %s6609_s29  ;;  %v5640_v58 = vunpack.c.l.bf16 %v5857_v31  ;;  %v4443_v8 = vadd.f32 %v5805_v15, %v4427_v44  ;;  %v4424_v31 = vmul.f32 %v7840_v62, %v4408_v48  ;;  %v5801_v24 = vunpack.c.h.bf16 %v5897_v33  ;;  %v9457_v44 = vld [vmem:[#allocation24_spill] sm:$0xff] }
 0x24b   : > { %v4533_v2 = vsub.f32 %v4517_v1, %v8407_v55  ;;  %v3011_v53 = vsub.f32 %v2995_v11, %v8435_v52  ;;  %v5800_v1 = vunpack.c.l.bf16 %v5897_v33  ;;  %v2887_v48 = vadd.f32 1.0, %v9457_v44 }
 0x24c   : > { %v4485_v36 = vpop.permute.xlu0 %4484  ;;  %v2960_v6 = vpop.permute.xlu1 %2959  ;;  %v2913_v40 = vadd.f32 %v5640_v58, %v2897_v45  ;;  %v9458_v58 = vld [vmem:[#allocation89_spill] sm:$0xff] }
 0x24d   : > { %v8424_v0 = vpack.i.bf16 %v4533_v2, %v4532_v7  ;;  %v2996_v32 = vadd.f32 %v2960_v6, %v2916_v13  ;;  %v4522_v46 = vadd.f32 %v4485_v36, %v4442_v56  ;;  %v4425_v13 = vmul.f32 %v8452_v28, %v4409_v39 }
 0x24e   : > { %6258 = vrot.lane.b32.xlu0 %v8019_v51, %s6609_s29  ;;  %6243 = vrot.lane.b32.xlu1 %v7890_v54, %s6609_s29  ;;  %v2914_v2 = vadd.f32 %v5641_v19, %v2898_v16  ;;  %v4440_v36 = vadd.f32 %v5800_v1, %v4424_v31  ;;  %v2888_v56 = vadd.f32 1.0, %v9458_v58  ;;  %v9459_v16 = vld [vmem:[#allocation86_spill] sm:$0xff]  ;;  %v4415_v1 = vadd.f32 1.0, %v7876_v23 }
 0x24f   : > { %v3012_v10 = vsub.f32 %v2996_v32, %v8439_v9  ;;  %v4538_v15 = vsub.f32 %v4522_v46, %v8435_v52  ;;  %v5860_v32 = vld [vmem:[%s6844_s24 + $0x78] sm:$0xff]   ;;  %v4441_v19 = vadd.f32 %v5801_v24, %v4425_v13  ;;  %v9460_v13 = vld [vmem:[#allocation88_spill] sm:$0xff] }
 0x250   : > { %v2954_v61 = vpop.permute.xlu0 %2953  ;;  %v4487_v34 = vpop.permute.xlu1 %4486  ;;  %v5653_v31 = vunpack.c.h.bf16 %v5860_v32  ;;  %v2904_v24 = vmul.f32 %v8452_v28, %v2888_v56 }
 0x251   : > { %v8442_v51 = vpack.i.bf16 %v3012_v10, %v3011_v53  ;;  %v4523_v54 = vadd.f32 %v4487_v34, %v4443_v8  ;;  %v2993_v7 = vadd.f32 %v2954_v61, %v2913_v40  ;;  %v4414_v53 = vadd.f32 1.0, %v9459_v16 }
 0x252   : > { %6268 = vrot.lane.b32.xlu0 %v8213_v50, %s6609_s29  ;;  %6253 = vrot.lane.b32.xlu1 %v7963_v59, %s6609_s29  ;;  %v5652_v34 = vunpack.c.l.bf16 %v5860_v32 }
 0x253   : > { %v4539_v62 = vsub.f32 %v4523_v54, %v8439_v9  ;;  %v3009_v45 = vsub.f32 %v2993_v7, %v7995_v37 }
 0x254   : > { %v4481_v11 = vpop.permute.xlu0 %4480  ;;  %v2956_v50 = vpop.permute.xlu1 %2955 }
 0x255   : > { %v8458_v59 = vpack.i.bf16 %v4539_v62, %v4538_v15  ;;  %v2994_v6 = vadd.f32 %v2956_v50, %v2914_v2  ;;  %v4520_v33 = vadd.f32 %v4481_v11, %v4440_v36  ;;  %v2885_v15 = vadd.f32 1.0, %v9460_v13  ;;  %v9461_v36 = vld [vmem:[#allocation91_spill] sm:$0xff] }
 0x256   : > { %6283 = vrot.lane.b32.xlu0 %v8311_v21, %s6609_s29  ;;  %6263 = vrot.lane.b32.xlu1 %v8143_v22, %s6609_s29  ;;  %v2903_v21 = vmul.f32 %v8452_v28, %v2887_v48  ;;  %v5900_v22 = vld [vmem:[%s6844_s24 + $0x1b8] sm:$0xff]   ;;  %v4430_v11 = vmul.f32 %v8452_v28, %v4414_v53  ;;  %v2920_v50 = vadd.f32 %v5653_v31, %v2904_v24 }
 0x257   : > { %v3010_v39 = vsub.f32 %v2994_v6, %v8005_v49  ;;  %v4536_v40 = vsub.f32 %v4520_v33, %v7995_v37  ;;  %v5859_v37 = vld [vmem:[%s6844_s24 + $0x70] sm:$0xff]   ;;  %v5813_v44 = vunpack.c.h.bf16 %v5900_v22  ;;  %v4431_v48 = vmul.f32 %v8452_v28, %v4415_v1  ;;  %v9463_v53 = vld [vmem:[#allocation62_spill] sm:$0xff] }
 0x258   : > { %v4483_v46 = vpop.permute.xlu1 %4482  ;;  %v2966_v10 = vpop.permute.xlu0 %2965  ;;  %v2919_v2 = vadd.f32 %v5652_v34, %v2903_v21  ;;  %v4412_v6 = vadd.f32 1.0, %v9461_v36  ;;  %v5862_v36 = vld [vmem:[%s6844_s24 + $0x88] sm:$0xff]  }
 0x259   : > { %v6322_v8 = vpack.i.bf16 %v3010_v39, %v3009_v45  ;;  %v4521_v61 = vadd.f32 %v4483_v46, %v4441_v19  ;;  %v5648_v45 = vunpack.c.l.bf16 %v5859_v37  ;;  %v5899_v39 = vld [vmem:[%s6844_s24 + $0x1b0] sm:$0xff]   ;;  %v4447_v21 = vadd.f32 %v5813_v44, %v4431_v48  ;;  %v9466_v48 = vld [vmem:[#allocation95_spill] sm:$0xff] }
 0x25a   : > { %6288 = vrot.lane.b32.xlu0 %v8337_v26, %s6608_s16  ;;  %6273 = vrot.lane.b32.xlu1 %v8246_v18, %s6609_s29  ;;  %v5812_v26 = vunpack.c.l.bf16 %v5900_v22  ;;  %v2886_v18 = vadd.f32 1.0, %v7888_v43  ;;  %v2901_v43 = vmul.f32 %v8452_v28, %v2885_v15  ;;  %v5808_v1 = vunpack.c.l.bf16 %v5899_v39 }
 0x25b   : > { %v4537_v54 = vsub.f32 %v4521_v61, %v8005_v49  ;;  %v2999_v49 = vadd.f32 %v2966_v10, %v2919_v2  ;;  %v9464_v61 = vld [vmem:[#allocation108_spill] sm:$0xff]  ;;  %v4428_v24 = vmul.f32 %v8452_v28, %v4412_v6  ;;  %v9467_v6 = vld [vmem:[#allocation63_spill] sm:$0xff] }
 0x25c   : > { %v8480_v7 = vpop.permute.xlu1 %6193  ;;  %v4493_v23 = vpop.permute.xlu0 %4492  ;;  %v4446_v32 = vadd.f32 %v5812_v26, %v4430_v11  ;;  %v2902_v16 = vmul.f32 %v8452_v28, %v2886_v18 }
 0x25d   : > { %v6327_v62 = vpack.i.bf16 %v4537_v54, %v4536_v40  ;;  %v3015_v46 = vsub.f32 %v2999_v49, %v9463_v53  ;;  %v2917_v54 = vadd.f32 %v5648_v45, %v2901_v43 }
 0x25e   : > { %6303 = vrot.lane.b32.xlu0 %v8411_v60, %s6609_s29  ;;  %6278 = vrot.lane.b32.xlu1 %v8282_v35, %s6608_s16  ;;  %v9462_v60 = vld [vmem:[#allocation28_spill] sm:$0xff]  ;;  %v5649_v35 = vunpack.c.h.bf16 %v5859_v37  ;;  %v4526_v10 = vadd.f32 %v4493_v23, %v4446_v32  ;;  %v9465_v37 = vld [vmem:[#allocation93_spill] sm:$0xff]  ;;  %v9468_v32 = vld [vmem:[#allocation67_spill] sm:$0xff] }
 0x25f   : > { %v4413_v19 = vadd.f32 1.0, %v9462_v60  ;;  %v3116_v49 = vadd.f32 1.0, %v9465_v37 }
 0x260   : > { %v2962_v58 = vpop.permute.xlu0 %2961  ;;  %v2968_v56 = vpop.permute.xlu1 %2967  ;;  %v4542_v15 = vsub.f32 %v4526_v10, %v9463_v53  ;;  %v2918_v26 = vadd.f32 %v5649_v35, %v2902_v16  ;;  %v5660_v53 = vunpack.c.l.bf16 %v5862_v36 }
 0x261   : > { %v3000_v33 = vadd.f32 %v2968_v56, %v2920_v50  ;;  %v4429_v13 = vmul.f32 %v8452_v28, %v4413_v19  ;;  %v2997_v23 = vadd.f32 %v2962_v58, %v2917_v54  ;;  %v4444_v50 = vadd.f32 %v5808_v1, %v4428_v24 }
 0x262   : > { %6308 = vrot.lane.b32.xlu0 %v8424_v0, %s6608_s16  ;;  %6293 = vrot.lane.b32.xlu1 %v8369_v27, %s6609_s29  ;;  %v5809_v27 = vunpack.c.h.bf16 %v5899_v39 }
 0x263   : > { %v3016_v34 = vsub.f32 %v3000_v33, %v9464_v61  ;;  %v3013_v58 = vsub.f32 %v2997_v23, %v9467_v6  ;;  %v9469_v33 = vld [vmem:[#allocation33_spill] sm:$0xff]  ;;  %v9472_v23 = vld [vmem:[#allocation99_spill] sm:$0xff] }
 0x264   : > { %v4489_v22 = vpop.permute.xlu0 %4488  ;;  %v4495_v40 = vpop.permute.xlu1 %4494  ;;  %v4445_v43 = vadd.f32 %v5809_v27, %v4429_v13  ;;  %v4643_v39 = vadd.f32 1.0, %v9469_v33 }
 0x265   : > { %v6332_v31 = vpack.i.bf16 %v3016_v34, %v3015_v46  ;;  %v4527_v0 = vadd.f32 %v4495_v40, %v4447_v21  ;;  %v4524_v56 = vadd.f32 %v4489_v22, %v4444_v50  ;;  %v9470_v46 = vld [vmem:[#allocation97_spill] sm:$0xff]  ;;  %v5661_v21 = vunpack.c.h.bf16 %v5862_v36  ;;  %v9471_v22 = vld [vmem:[#allocation94_spill] sm:$0xff]  ;;  %v9473_v36 = vld [vmem:[#allocation96_spill] sm:$0xff] }
 0x266   : > { %6323 = vrot.lane.b32.xlu0 %v6322_v8, %s6609_s29  ;;  %6298 = vrot.lane.b32.xlu1 %v8392_v30, %s6608_s16  ;;  %v3117_v30 = vadd.f32 1.0, %v9466_v48  ;;  %v4644_v10 = vadd.f32 1.0, %v9470_v46  ;;  %v3114_v40 = vadd.f32 1.0, %v9471_v22 }
 0x267   : > { %v4543_v2 = vsub.f32 %v4527_v0, %v9464_v61  ;;  %v4540_v61 = vsub.f32 %v4524_v56, %v9467_v6  ;;  %v4641_v6 = vadd.f32 1.0, %v9473_v36 }
 0x268   : > { %v8508_v11 = vpop.permute.xlu0 %6198  ;;  %v2964_v18 = vpop.permute.xlu1 %2963  ;;  %v3133_v1 = vmul.f32 %v8452_v28, %v3117_v30  ;;  %v3130_v48 = vmul.f32 %v8452_v28, %v3114_v40 }
 0x269   : > { %v6337_v8 = vpack.i.bf16 %v4543_v2, %v4542_v15  ;;  %v2998_v44 = vadd.f32 %v2964_v18, %v2918_v26  ;;  %v5861_v15 = vld [vmem:[%s6844_s24 + $0x80] sm:$0xff]   ;;  %v3115_v2 = vadd.f32 1.0, %v9472_v23 }
 0x26a   : > { %6328 = vrot.lane.b32.xlu0 %v6327_v62, %s6608_s16  ;;  %6313 = vrot.lane.b32.xlu1 %v8442_v51, %s6609_s29  ;;  %v3132_v62 = vmul.f32 %v8452_v28, %v3116_v49  ;;  %v5902_v51 = vld [vmem:[%s6844_s24 + $0x1c8] sm:$0xff]   ;;  %v3149_v18 = vadd.f32 %v5661_v21, %v3133_v1  ;;  %v4660_v49 = vmul.f32 %v8452_v28, %v4644_v10  ;;  %v5656_v50 = vunpack.c.l.bf16 %v5861_v15 }
 0x26b   : > { %v3014_v45 = vsub.f32 %v2998_v44, %v9468_v32  ;;  %v5820_v13 = vunpack.c.l.bf16 %v5902_v51  ;;  %v5821_v37 = vunpack.c.h.bf16 %v5902_v51  ;;  %v3131_v33 = vmul.f32 %v8452_v28, %v3115_v2  ;;  %v9476_v2 = vld [vmem:[#allocation102_spill] sm:$0xff] }
 0x26c   : > { %v4491_v60 = vpop.permute.xlu1 %4490  ;;  %v3183_v19 = vpop.permute.xlu0 %3182  ;;  %v3148_v27 = vadd.f32 %v5660_v53, %v3132_v62  ;;  %v4657_v51 = vmul.f32 %v8452_v28, %v4641_v6 }
 0x26d   : > { %v6342_v35 = vpack.i.bf16 %v3014_v45, %v3013_v58  ;;  %v4525_v16 = vadd.f32 %v4491_v60, %v4445_v43  ;;  %v5657_v43 = vunpack.c.h.bf16 %v5861_v15 }
 0x26e   : > { %6318 = vrot.lane.b32.xlu1 %v8458_v59, %s6608_s16  ;;  %v4659_v59 = vmul.f32 %v8452_v28, %v4643_v39  ;;  %v3228_v26 = vadd.f32 %v3183_v19, %v3148_v27  ;;  %v9475_v27 = vld [vmem:[#allocation34_spill] sm:$0xff] }
 0x26f   : > { %v4541_v34 = vsub.f32 %v4525_v16, %v9468_v32  ;;  %6343 = vrot.lane.b32.xlu0 %v6342_v35, %s6609_s29  ;;  %v9474_v32 = vld [vmem:[#allocation37_spill] sm:$0xff]  ;;  %v4676_v35 = vadd.f32 %v5821_v37, %v4660_v49  ;;  %v3146_v16 = vadd.f32 %v5656_v50, %v3130_v48  ;;  %v3147_v40 = vadd.f32 %v5657_v43, %v3131_v33  ;;  %v9477_v50 = vld [vmem:[#allocation100_spill] sm:$0xff] }
 0x270   : > { %v8529_v54 = vpop.permute.xlu1 %6203  ;;  %v4710_v24 = vpop.permute.xlu0 %4709  ;;  %v4675_v58 = vadd.f32 %v5820_v13, %v4659_v59  ;;  %v4642_v45 = vadd.f32 1.0, %v9474_v32  ;;  %v3244_v39 = vsub.f32 %v3228_v26, %v8233_v25  ;;  %v3120_v13 = vadd.f32 1.0, %v9475_v27  ;;  %v9478_v32 = vld [vmem:[#allocation104_spill] sm:$0xff] }
 0x271   : > { %v6347_v0 = vpack.i.bf16 %v4541_v34, %v4540_v61  ;;  %v3121_v26 = vadd.f32 1.0, %v9476_v2  ;;  %v9482_v2 = vld [vmem:[#allocation59_spill] sm:$0xff] }
 0x272   : > { %6333 = vrot.lane.b32.xlu1 %v6332_v31, %s6609_s29  ;;  %v5901_v31 = vld [vmem:[%s6844_s24 + $0x1c0] sm:$0xff]   ;;  %v4755_v60 = vadd.f32 %v4710_v24, %v4675_v58  ;;  %v4658_v34 = vmul.f32 %v8452_v28, %v4642_v45  ;;  %v4648_v45 = vadd.f32 1.0, %v9478_v32 }
 0x273   : > { %6348 = vrot.lane.b32.xlu0 %v6347_v0, %s6608_s16  ;;  %v5816_v10 = vunpack.c.l.bf16 %v5901_v31 }
 0x274   : > { %v3179_v44 = vpop.permute.xlu0 %3178  ;;  %v3185_v30 = vpop.permute.xlu1 %3184  ;;  %v4771_v21 = vsub.f32 %v4755_v60, %v8233_v25  ;;  %v3137_v60 = vmul.f32 %v8452_v28, %v3121_v26  ;;  %v4646_v26 = vadd.f32 1.0, %v9482_v2  ;;  %v9487_v2 = vld [vmem:[#allocation110_spill] sm:$0xff] }
 0x275   : > { %v3229_v56 = vadd.f32 %v3185_v30, %v3149_v18  ;;  %v3226_v1 = vadd.f32 %v3179_v44, %v3146_v16  ;;  %v4673_v59 = vadd.f32 %v5816_v10, %v4657_v51  ;;  %v5864_v18 = vld [vmem:[%s6844_s24 + $0x98] sm:$0xff]   ;;  %v4647_v44 = vadd.f32 1.0, %v9477_v50 }
 0x276   : > { %6338 = vrot.lane.b32.xlu1 %v6337_v8, %s6608_s16  ;;  %v5817_v8 = vunpack.c.h.bf16 %v5901_v31  ;;  %v5668_v58 = vunpack.c.l.bf16 %v5864_v18  ;;  %v5904_v31 = vld [vmem:[%s6844_s24 + $0x1d8] sm:$0xff]  }
 0x277   : > { %v3245_v19 = vsub.f32 %v3229_v56, %v8237_v12  ;;  %v3242_v25 = vsub.f32 %v3226_v1, %v8295_v41  ;;  %v3136_v56 = vmul.f32 %v8452_v28, %v3120_v13  ;;  %v5828_v10 = vunpack.c.l.bf16 %v5904_v31  ;;  %v9481_v13 = vld [vmem:[#allocation103_spill] sm:$0xff] }
 0x278   : > { %v4706_v53 = vpop.permute.xlu0 %4705  ;;  %v4712_v62 = vpop.permute.xlu1 %4711  ;;  %v4674_v49 = vadd.f32 %v5817_v8, %v4658_v34  ;;  %v4663_v51 = vmul.f32 %v8452_v28, %v4647_v44  ;;  %v4664_v1 = vmul.f32 %v8452_v28, %v4648_v45 }
 0x279   : > { %v6352_v46 = vpack.i.bf16 %v3245_v19, %v3244_v39  ;;  %v4756_v61 = vadd.f32 %v4712_v62, %v4676_v35  ;;  %v4753_v37 = vadd.f32 %v4706_v53, %v4673_v59  ;;  %v5669_v39 = vunpack.c.h.bf16 %v5864_v18  ;;  %v9479_v19 = vld [vmem:[#allocation101_spill] sm:$0xff] }
 0x27a   : > { %v3118_v35 = vadd.f32 1.0, %v9479_v19  ;;  %v4645_v59 = vadd.f32 1.0, %v9481_v13  ;;  %v5903_v18 = vld [vmem:[%s6844_s24 + $0x1d0] sm:$0xff]  }
 0x27b   : > { %v4772_v22 = vsub.f32 %v4756_v61, %v8237_v12  ;;  %6353 = vrot.lane.b32.xlu1 %v6352_v46, %s6608_s16  ;;  %v4769_v43 = vsub.f32 %v4753_v37, %v8295_v41  ;;  %v3152_v46 = vadd.f32 %v5668_v58, %v3136_v56  ;;  %v5863_v61 = vld [vmem:[%s6844_s24 + $0x90] sm:$0xff]   ;;  %v9480_v41 = vld [vmem:[#allocation106_spill] sm:$0xff]  ;;  %v3153_v34 = vadd.f32 %v5669_v39, %v3137_v60 }
 0x27c   : > { %v8550_v24 = vpop.permute.xlu0 %6208  ;;  %v3181_v0 = vpop.permute.xlu1 %3180  ;;  %v3119_v8 = vadd.f32 1.0, %v9480_v41  ;;  %v5824_v58 = vunpack.c.l.bf16 %v5903_v18  ;;  %v4661_v56 = vmul.f32 %v8452_v28, %v4645_v59  ;;  %v5825_v45 = vunpack.c.h.bf16 %v5903_v18  ;;  %v5906_v18 = vld [vmem:[%s6844_s24 + $0x1e8] sm:$0xff]  }
 0x27d   : > { %v6357_v15 = vpack.i.bf16 %v4772_v22, %v4771_v21  ;;  %v3227_v23 = vadd.f32 %v3181_v0, %v3147_v40  ;;  %v5829_v21 = vunpack.c.h.bf16 %v5904_v31  ;;  %v5664_v22 = vunpack.c.l.bf16 %v5863_v61 }
 0x27e   : > { %v3134_v0 = vmul.f32 %v8452_v28, %v3118_v35  ;;  %v3135_v37 = vmul.f32 %v8452_v28, %v3119_v8  ;;  %v4662_v31 = vmul.f32 %v8452_v28, %v4646_v26  ;;  %v5866_v8 = vld [vmem:[%s6844_s24 + $0xa8] sm:$0xff]   ;;  %v4652_v26 = vadd.f32 1.0, %v9487_v2 }
 0x27f   : > { %v3243_v12 = vsub.f32 %v3227_v23, %v8299_v14  ;;  %6358 = vrot.lane.b32.xlu1 %v6357_v15, %s6607_s15  ;;  %v4679_v15 = vadd.f32 %v5828_v10, %v4663_v51  ;;  %v4680_v44 = vadd.f32 %v5829_v21, %v4664_v1  ;;  %v9485_v21 = vld [vmem:[#allocation109_spill] sm:$0xff]  ;;  %v5676_v13 = vunpack.c.l.bf16 %v5866_v8 }
 0x280   : > { %v4708_v48 = vpop.permute.xlu1 %4707  ;;  %v3191_v30 = vpop.permute.xlu0 %3190  ;;  %v4651_v1 = vadd.f32 1.0, %v9485_v21 }
 0x281   : > { %v6362_v36 = vpack.i.bf16 %v3243_v12, %v3242_v25  ;;  %v4754_v6 = vadd.f32 %v4708_v48, %v4674_v49  ;;  %v5665_v25 = vunpack.c.h.bf16 %v5863_v61  ;;  %v3150_v48 = vadd.f32 %v5664_v22, %v3134_v0  ;;  %v9484_v61 = vld [vmem:[#allocation47_spill] sm:$0xff] }
 0x282   : > { %v3125_v41 = vadd.f32 1.0, %v9484_v61 }
 0x283   : > { %v4770_v33 = vsub.f32 %v4754_v6, %v8299_v14  ;;  %6363 = vrot.lane.b32.xlu0 %v6362_v36, %s6608_s16  ;;  %v3232_v14 = vadd.f32 %v3191_v30, %v3152_v46  ;;  %v3151_v60 = vadd.f32 %v5665_v25, %v3135_v37  ;;  %v4677_v46 = vadd.f32 %v5824_v58, %v4661_v56 }
 0x284   : > { %v8567_v16 = vpop.permute.xlu1 %6213  ;;  %v4718_v53 = vpop.permute.xlu0 %4717 }
 0x285   : > { %v6367_v62 = vpack.i.bf16 %v4770_v33, %v4769_v43  ;;  %v3248_v12 = vsub.f32 %v3232_v14, %v8354_v4  ;;  %v4759_v49 = vadd.f32 %v4718_v53, %v4679_v15  ;;  %v9483_v53 = vld [vmem:[#allocation107_spill] sm:$0xff] }
 0x286   : > { %v9486_v15 = vld [vmem:[#allocation7_spill] sm:$0xff] }
 0x287   : > { %6368 = vrot.lane.b32.xlu0 %v6367_v62, %s6607_s15  ;;  %v4775_v43 = vsub.f32 %v4759_v49, %v8354_v4  ;;  %v3124_v62 = vadd.f32 1.0, %v9483_v53  ;;  %v3141_v49 = vmul.f32 %v8452_v28, %v3125_v41  ;;  %v5865_v53 = vld [vmem:[%s6844_s24 + $0xa0] sm:$0xff]  }
 0x288   : > { %v3187_v40 = vpop.permute.xlu0 %3186  ;;  %v3193_v27 = vpop.permute.xlu1 %3192 }
 0x289   : > { %v3233_v23 = vadd.f32 %v3193_v27, %v3153_v34  ;;  %v3230_v33 = vadd.f32 %v3187_v40, %v3150_v48  ;;  %v4678_v34 = vadd.f32 %v5825_v45, %v4662_v31  ;;  %v3140_v59 = vmul.f32 %v8452_v28, %v3124_v62  ;;  %v9489_v48 = vld [vmem:[#allocation9_spill] sm:$0xff] }
 0x28a   : > { %v5836_v31 = vunpack.c.l.bf16 %v5906_v18 }
 0x28b   : > { %v3249_v50 = vsub.f32 %v3233_v23, %v8358_v17  ;;  %v3246_v4 = vsub.f32 %v3230_v33, %v8403_v47  ;;  %v3924_v23 = vadd.f32 1.0, %v9486_v15  ;;  %v3156_v45 = vadd.f32 %v5676_v13, %v3140_v59 }
 0x28c   : > { %v4714_v30 = vpop.permute.xlu0 %4713  ;;  %v4720_v36 = vpop.permute.xlu1 %4719  ;;  %v4650_v13 = vadd.f32 1.0, %v8273_v29  ;;  %v5673_v59 = vunpack.c.h.bf16 %v5865_v53  ;;  %v3128_v29 = vadd.f32 1.0, %v8279_v20 }
 0x28d   : > { %v6372_v6 = vpack.i.bf16 %v3249_v50, %v3248_v12  ;;  %v4760_v32 = vadd.f32 %v4720_v36, %v4680_v44  ;;  %v4757_v14 = vadd.f32 %v4714_v30, %v4677_v46  ;;  %v5677_v12 = vunpack.c.h.bf16 %v5866_v8  ;;  %v9488_v50 = vld [vmem:[#allocation8_spill] sm:$0xff]  ;;  %v9493_v8 = vld [vmem:[#allocation10_spill] sm:$0xff] }
 0x28e   : > { %v3922_v44 = vadd.f32 1.0, %v9488_v50  ;;  %v3925_v30 = vadd.f32 1.0, %v9489_v48  ;;  %v9490_v36 = vld [vmem:[#allocation64_spill] sm:$0xff]  ;;  %v8610_v33 = vmul.f32 %v8452_v28, %v3924_v23  ;;  %v4666_v20 = vmul.f32 %v8452_v28, %v4650_v13 }
 0x28f   : > { %v4776_v39 = vsub.f32 %v4760_v32, %v8358_v17  ;;  %6373 = vrot.lane.b32.xlu1 %v6372_v6, %s6608_s16  ;;  %v4773_v25 = vsub.f32 %v4757_v14, %v8403_v47  ;;  %v3122_v6 = vadd.f32 1.0, %v9490_v36  ;;  %v3157_v46 = vadd.f32 %v5677_v12, %v3141_v49  ;;  %v9494_v14 = vld [vmem:[#allocation66_spill] sm:$0xff]  ;;  %v9496_v12 = vld [vmem:[#allocation13_spill] sm:$0xff] }
 0x290   : > { %v8586_v19 = vpop.permute.xlu0 %6218  ;;  %v3189_v35 = vpop.permute.xlu1 %3188  ;;  %v8618_v61 = vmul.f32 %v8452_v28, %v3922_v44  ;;  %v8621_v41 = vmul.f32 %v8452_v28, %v3925_v30  ;;  %v3929_v49 = vadd.f32 1.0, %v9496_v12 }
 0x291   : > { %v6377_v10 = vpack.i.bf16 %v4776_v39, %v4775_v43  ;;  %v3231_v51 = vadd.f32 %v3189_v35, %v3151_v60  ;;  %v4667_v43 = vmul.f32 %v8452_v28, %v4651_v1  ;;  %v9492_v39 = vld [vmem:[#allocation11_spill] sm:$0xff]  ;;  %v3123_v35 = vadd.f32 1.0, %v8252_v63 }
 0x292   : > { %v3923_v60 = vadd.f32 1.0, %v9492_v39  ;;  %v5672_v1 = vunpack.c.l.bf16 %v5865_v53  ;;  %v5868_v39 = vld [vmem:[%s6844_s24 + $0xb8] sm:$0xff]  }
 0x293   : > { %v3247_v17 = vsub.f32 %v3231_v51, %v8407_v55  ;;  %6378 = vrot.lane.b32.xlu1 %v6377_v10, %s6607_s15  ;;  %v5837_v10 = vunpack.c.h.bf16 %v5906_v18  ;;  %v4668_v51 = vmul.f32 %v8452_v28, %v4652_v26  ;;  %v4683_v21 = vadd.f32 %v5836_v31, %v4667_v43 }
 0x294   : > { %v4716_v22 = vpop.permute.xlu1 %4715  ;;  %v3199_v40 = vpop.permute.xlu0 %3198  ;;  %v3139_v15 = vmul.f32 %v8452_v28, %v3123_v35 }
 0x295   : > { %v6382_v0 = vpack.i.bf16 %v3247_v17, %v3246_v4  ;;  %v4758_v27 = vadd.f32 %v4716_v22, %v4678_v34  ;;  %v3236_v62 = vadd.f32 %v3199_v40, %v3156_v45  ;;  %v3928_v4 = vadd.f32 1.0, %v9493_v8 }
 0x296   : > { %v4649_v17 = vadd.f32 1.0, %v9494_v14  ;;  %v3138_v22 = vmul.f32 %v8452_v28, %v3122_v6  ;;  %v4684_v18 = vadd.f32 %v5837_v10, %v4668_v51  ;;  %v3129_v45 = vadd.f32 1.0, %v8317_v5  ;;  %v9497_v5 = vld [vmem:[#allocation70_spill] sm:$0xff] }
 0x297   : > { %v4774_v37 = vsub.f32 %v4758_v27, %v8407_v55  ;;  %6383 = vrot.lane.b32.xlu0 %v6382_v0, %s6608_s16  ;;  %v5905_v0 = vld [vmem:[%s6844_s24 + $0x1e0] sm:$0xff]   ;;  %v8628_v27 = vmul.f32 %v8452_v28, %v3923_v60  ;;  %v3252_v23 = vsub.f32 %v3236_v62, %v8435_v52  ;;  %v3155_v31 = vadd.f32 %v5673_v59, %v3139_v15 }
 0x298   : > { %v8606_v58 = vpop.permute.xlu1 %6223  ;;  %v4726_v56 = vpop.permute.xlu0 %4725  ;;  %v5832_v50 = vunpack.c.l.bf16 %v5905_v0  ;;  %v4665_v44 = vmul.f32 %v8452_v28, %v4649_v17  ;;  %v3154_v36 = vadd.f32 %v5672_v1, %v3138_v22  ;;  %v5833_v43 = vunpack.c.h.bf16 %v5905_v0  ;;  %v9499_v1 = vld [vmem:[#allocation14_spill] sm:$0xff]  ;;  %v8662_v59 = vld [vmem:[%s6839_s11 + $0x40] sm:$0xff] }
 0x299   : > { %9491 = vst [vmem:[#allocation74_spill] sm:$0xff] %v8606_v58  ;;  %v6387_v32 = vpack.i.bf16 %v4774_v37, %v4773_v25  ;;  %v4763_v2 = vadd.f32 %v4726_v56, %v4683_v21  ;;  %v9495_v25 = vld [vmem:[#allocation12_spill] sm:$0xff]  ;;  %v8639_v56 = vmul.f32 %v8452_v28, %v3928_v4  ;;  %v4655_v10 = vadd.f32 1.0, %v9497_v5  ;;  %v5908_v21 = vld [vmem:[%s6844_s24 + $0x1f8] sm:$0xff]  }
 0x29a   : > { %v3926_v37 = vadd.f32 1.0, %v9495_v25  ;;  %v4681_v51 = vadd.f32 %v5832_v50, %v4665_v44  ;;  %v3927_v22 = vadd.f32 1.0, %v9499_v1  ;;  %v5685_v0 = vunpack.c.h.bf16 %v5868_v39  ;;  %v9500_v25 = vld [vmem:[#allocation15_spill] sm:$0xff] }
 0x29b   : > { %6388 = vrot.lane.b32.xlu0 %v6387_v32, %s6607_s15  ;;  %v4779_v60 = vsub.f32 %v4763_v2, %v8435_v52  ;;  %v3145_v13 = vmul.f32 %v8452_v28, %v3129_v45  ;;  %v8666_v2 = vld [vmem:[%s6839_s11 + $0x48] sm:$0xff]  ;;  %v5844_v44 = vunpack.c.l.bf16 %v5908_v21  ;;  %v3127_v45 = vadd.f32 1.0, %v8374_v3 }
 0x29c   : > { %v3195_v63 = vpop.permute.xlu0 %3194  ;;  %v3201_v34 = vpop.permute.xlu1 %3200  ;;  %v8648_v62 = vmul.f32 %v8452_v28, %v3926_v37  ;;  %v3932_v37 = vadd.f32 1.0, %v9500_v25  ;;  %v8701_v25 = vld [vmem:[%s6839_s11 + $0x78] sm:$0xff] }
 0x29d   : > { %v3237_v40 = vadd.f32 %v3201_v34, %v3157_v46  ;;  %v3234_v35 = vadd.f32 %v3195_v63, %v3154_v36  ;;  %v8651_v46 = vmul.f32 %v8452_v28, %v3929_v49  ;;  %v5684_v63 = vunpack.c.l.bf16 %v5868_v39  ;;  %9504 = vst [vmem:[#allocation76_spill] sm:$0xff] %v8701_v25 }
 0x29e   : > { %v3144_v34 = vmul.f32 %v8452_v28, %v3128_v29  ;;  %v5845_v39 = vunpack.c.h.bf16 %v5908_v21  ;;  %v8685_v5 = vmul.f32 %v8452_v28, %v3932_v37 }
 0x29f   : > { %v3253_v26 = vsub.f32 %v3237_v40, %v8439_v9  ;;  %v4656_v40 = vadd.f32 1.0, %v8343_v57  ;;  %v3250_v15 = vsub.f32 %v3234_v35, %v8662_v59  ;;  %v9501_v57 = vld [vmem:[#allocation16_spill] sm:$0xff] }
 0x2a0   : > { %v4722_v48 = vpop.permute.xlu0 %4721  ;;  %v4728_v30 = vpop.permute.xlu1 %4727  ;;  %v3930_v12 = vadd.f32 1.0, %v9501_v57 }
 0x2a1   : > { %v6392_v6 = vpack.i.bf16 %v3253_v26, %v3252_v23  ;;  %v4764_v32 = vadd.f32 %v4728_v30, %v4684_v18  ;;  %v4761_v23 = vadd.f32 %v4722_v48, %v4681_v51  ;;  %v4682_v18 = vadd.f32 %v5833_v43, %v4666_v20  ;;  %v5867_v43 = vld [vmem:[%s6844_s24 + $0xb0] sm:$0xff]  }
 0x2a2   : > { %v4671_v30 = vmul.f32 %v8452_v28, %v4655_v10  ;;  %v3126_v48 = vadd.f32 1.0, %v8335_v42  ;;  %v4672_v42 = vmul.f32 %v8452_v28, %v4656_v40  ;;  %v8688_v3 = vmul.f32 %v8452_v28, %v3930_v12  ;;  %v9505_v12 = vld [vmem:[#allocation17_spill] sm:$0xff] }
 0x2a3   : > { %v4780_v53 = vsub.f32 %v4764_v32, %v8439_v9  ;;  %6393 = vrot.lane.b32.xlu1 %v6392_v6, %s6608_s16  ;;  %v3160_v6 = vadd.f32 %v5684_v63, %v3144_v34  ;;  %v8675_v32 = vmul.f32 %v8452_v28, %v3927_v22  ;;  %v4777_v35 = vsub.f32 %v4761_v23, %v8662_v59  ;;  %v5907_v22 = vld [vmem:[%s6844_s24 + $0x1f0] sm:$0xff]  }
 0x2a4   : > { %v8654_v8 = vpop.permute.xlu0 %6228  ;;  %v3197_v4 = vpop.permute.xlu1 %3196  ;;  %v4653_v10 = vadd.f32 1.0, %v8366_v38  ;;  %v4687_v51 = vadd.f32 %v5844_v44, %v4671_v30  ;;  %v5680_v21 = vunpack.c.l.bf16 %v5867_v43  ;;  %v3142_v1 = vmul.f32 %v8452_v28, %v3126_v48 }
 0x2a5   : > { %9498 = vst [vmem:[#allocation51_spill] sm:$0xff] %v8654_v8  ;;  %v6397_v14 = vpack.i.bf16 %v4780_v53, %v4779_v60  ;;  %v3235_v17 = vadd.f32 %v3197_v4, %v3155_v31  ;;  %v3161_v31 = vadd.f32 %v5685_v0, %v3145_v13  ;;  %v5879_v60 = vld [vmem:[%s6844_s24 + $0x110] sm:$0xff]   ;;  %v9502_v0 = vld [vmem:[#allocation71_spill] sm:$0xff]  ;;  %v3143_v23 = vmul.f32 %v8452_v28, %v3127_v45  ;;  %v9534_v8 = vld [vmem:[#allocation22_spill] sm:$0xff] }
 0x2a6   : > { %v5728_v40 = vunpack.c.l.bf16 %v5879_v60  ;;  %v4654_v13 = vadd.f32 1.0, %v9502_v0  ;;  %v4688_v57 = vadd.f32 %v5845_v39, %v4672_v42  ;;  %v5881_v39 = vld [vmem:[%s6844_s24 + $0x120] sm:$0xff]  }
 0x2a7   : > { %v3251_v26 = vsub.f32 %v3235_v17, %v8666_v2  ;;  %6398 = vrot.lane.b32.xlu1 %v6397_v14, %s6607_s15  ;;  %v5880_v17 = vld [vmem:[%s6844_s24 + $0x118] sm:$0xff]  }
 0x2a8   : > { %v4724_v49 = vpop.permute.xlu1 %4723  ;;  %v3207_v50 = vpop.permute.xlu0 %3206  ;;  %v5733_v44 = vunpack.c.h.bf16 %v5880_v17 }
 0x2a9   : > { %v6402_v29 = vpack.i.bf16 %v3251_v26, %v3250_v15  ;;  %v4762_v36 = vadd.f32 %v4724_v49, %v4682_v18  ;;  %v3240_v20 = vadd.f32 %v3207_v50, %v3160_v6  ;;  %v5681_v15 = vunpack.c.h.bf16 %v5867_v43  ;;  %v8697_v26 = vld [vmem:[%s6839_s11 + $0x70] sm:$0xff] }
 0x2aa   : > { %9503 = vst [vmem:[#allocation73_spill] sm:$0xff] %v8697_v26  ;;  %v3933_v49 = vadd.f32 1.0, %v9505_v12  ;;  %v5732_v50 = vunpack.c.l.bf16 %v5880_v17  ;;  %v3158_v6 = vadd.f32 %v5680_v21, %v3142_v1  ;;  %v3954_v43 = vadd.f32 %v5728_v40, %v8618_v61  ;;  %v8721_v12 = vld [vmem:[%s6839_s11 + $0x60] sm:$0xff] }
 0x2ab   : > { %v4778_v53 = vsub.f32 %v4762_v36, %v8666_v2  ;;  %6403 = vrot.lane.b32.xlu0 %v6402_v29, %s6608_s16  ;;  %v3256_v38 = vsub.f32 %v3240_v20, %v8697_v26  ;;  %v5840_v29 = vunpack.c.l.bf16 %v5907_v22  ;;  %v3159_v20 = vadd.f32 %v5681_v15, %v3143_v23  ;;  %9508 = vst [vmem:[#allocation75_spill] sm:$0xff] %v8721_v12 }
 0x2ac   : > { %v4734_v4 = vpop.permute.xlu0 %4733  ;;  %v3209_v14 = vpop.permute.xlu1 %3208  ;;  %v4670_v17 = vmul.f32 %v8452_v28, %v4654_v13  ;;  %v3956_v61 = vadd.f32 %v5732_v50, %v8610_v33  ;;  %v3957_v21 = vadd.f32 %v5733_v44, %v8621_v41 }
 0x2ad   : > { %v6407_v63 = vpack.i.bf16 %v4778_v53, %v4777_v35  ;;  %v3241_v34 = vadd.f32 %v3209_v14, %v3161_v31  ;;  %v4767_v18 = vadd.f32 %v4734_v4, %v4687_v51  ;;  %v4669_v31 = vmul.f32 %v8452_v28, %v4653_v10  ;;  %v5882_v53 = vld [vmem:[%s6844_s24 + $0x128] sm:$0xff]  }
 0x2ae   : > { %v5729_v35 = vunpack.c.h.bf16 %v5879_v60  ;;  %v5841_v51 = vunpack.c.h.bf16 %v5907_v22  ;;  %v9507_v60 = vld [vmem:[#allocation48_spill] sm:$0xff]  ;;  %v5740_v40 = vunpack.c.l.bf16 %v5882_v53  ;;  %v5741_v13 = vunpack.c.h.bf16 %v5882_v53 }
 0x2af   : > { %v3257_v37 = vsub.f32 %v3241_v34, %v8701_v25  ;;  %6408 = vrot.lane.b32.xlu0 %v6407_v63, %s6607_s15  ;;  %v4783_v42 = vsub.f32 %v4767_v18, %v8697_v26  ;;  %v9506_v63 = vld [vmem:[#allocation18_spill] sm:$0xff]  ;;  %v4034_v34 = vadd.f32 %v9507_v60, %v3954_v43  ;;  %v4685_v15 = vadd.f32 %v5840_v29, %v4669_v31  ;;  %v9510_v29 = vld [vmem:[#allocation45_spill] sm:$0xff] }
 0x2b0   : > { %v3203_v30 = vpop.permute.xlu0 %3202  ;;  %v4736_v48 = vpop.permute.xlu1 %4735  ;;  %v3931_v10 = vadd.f32 1.0, %v9506_v63  ;;  %v5736_v18 = vunpack.c.l.bf16 %v5881_v39  ;;  %v4686_v44 = vadd.f32 %v5841_v51, %v4670_v17  ;;  %v3961_v63 = vadd.f32 %v5741_v13, %v8651_v46  ;;  %v9516_v46 = vld [vmem:[#allocation57_spill] sm:$0xff] }
 0x2b1   : > { %v6412_v36 = vpack.i.bf16 %v3257_v37, %v3256_v38  ;;  %v4768_v45 = vadd.f32 %v4736_v48, %v4688_v57  ;;  %v3238_v4 = vadd.f32 %v3203_v30, %v3158_v6  ;;  %v3955_v38 = vadd.f32 %v5729_v35, %v8628_v27  ;;  %v5883_v57 = vld [vmem:[%s6844_s24 + $0x130] sm:$0xff]   ;;  %v8725_v30 = vld [vmem:[%s6839_s11 + $0x68] sm:$0xff] }
 0x2b2   : > { %v5737_v37 = vunpack.c.h.bf16 %v5881_v39  ;;  %9509 = vst [vmem:[#allocation79_spill] sm:$0xff] %v8725_v30  ;;  %v3949_v48 = vmul.f32 %v8452_v28, %v3933_v49  ;;  %v3947_v27 = vmul.f32 %v8452_v28, %v3931_v10  ;;  %v9511_v6 = vld [vmem:[#allocation53_spill] sm:$0xff]  ;;  %v3958_v51 = vadd.f32 %v5736_v18, %v8648_v62  ;;  %v5884_v10 = vld [vmem:[%s6844_s24 + $0x138] sm:$0xff]  }
 0x2b3   : > { %v4784_v14 = vsub.f32 %v4768_v45, %v8701_v25  ;;  %6413 = vrot.lane.b32.xlu1 %v6412_v36, %s6608_s16  ;;  %v3254_v33 = vsub.f32 %v3238_v4, %v8721_v12  ;;  %v4036_v36 = vadd.f32 %v9510_v29, %v3956_v61  ;;  %v4035_v45 = vadd.f32 %v9511_v6, %v3955_v38  ;;  %v9512_v35 = vld [vmem:[#allocation49_spill] sm:$0xff]  ;;  %v9517_v6 = vld [vmem:[#allocation68_spill] sm:$0xff] }
 0x2b4   : > { %v4730_v1 = vpop.permute.xlu0 %4729  ;;  %v3205_v22 = vpop.permute.xlu1 %3204  ;;  %v4037_v53 = vadd.f32 %v9512_v35, %v3957_v21  ;;  %v3959_v49 = vadd.f32 %v5737_v37, %v8675_v32  ;;  %v5744_v4 = vunpack.c.l.bf16 %v5883_v57  ;;  %v4050_v17 = vsub.f32 %v4034_v34, %v8403_v47  ;;  %v9513_v21 = vld [vmem:[#allocation52_spill] sm:$0xff]  ;;  %v9514_v32 = vld [vmem:[#allocation55_spill] sm:$0xff] }
 0x2b5   : > { %v6427_v0 = vpack.i.bf16 %v4784_v14, %v4783_v42  ;;  %v3239_v23 = vadd.f32 %v3205_v22, %v3159_v20  ;;  %v4765_v50 = vadd.f32 %v4730_v1, %v4685_v15  ;;  %v3960_v20 = vadd.f32 %v5740_v40, %v8639_v56  ;;  %v9515_v22 = vld [vmem:[#allocation60_spill] sm:$0xff] }
 0x2b6   : > { %v5745_v14 = vunpack.c.h.bf16 %v5883_v57  ;;  %v4051_v56 = vsub.f32 %v4035_v45, %v8407_v55  ;;  %v4038_v1 = vadd.f32 %v9514_v32, %v3958_v51  ;;  %v4039_v40 = vadd.f32 %v9515_v22, %v3959_v49  ;;  %v8754_v57 = vld [vmem:[%s6839_s11 + $0x30] sm:$0xff] }
 0x2b7   : > { %v3255_v41 = vsub.f32 %v3239_v23, %v8725_v30  ;;  %6428 = vrot.lane.b32.xlu1 %v6427_v0, %s6607_s15  ;;  %v4781_v61 = vsub.f32 %v4765_v50, %v8721_v12  ;;  %v4040_v62 = vadd.f32 %v9513_v21, %v3960_v20  ;;  %v4041_v0 = vadd.f32 %v9516_v46, %v3961_v63  ;;  %v8758_v50 = vld [vmem:[%s6839_s11 + $0x38] sm:$0xff] }
 0x2b8   : > { %v8733_v31 = vpop.permute.xlu0 %6238  ;;  %v4732_v43 = vpop.permute.xlu1 %4731  ;;  %v5748_v18 = vunpack.c.l.bf16 %v5884_v10  ;;  %v3962_v13 = vadd.f32 %v5744_v4, %v8688_v3  ;;  %v5749_v37 = vunpack.c.h.bf16 %v5884_v10  ;;  %v3963_v55 = vadd.f32 %v5745_v14, %v3947_v27 }
 0x2b9   : > { %v6417_v39 = vpack.i.bf16 %v3255_v41, %v3254_v33  ;;  %v4766_v42 = vadd.f32 %v4732_v43, %v4686_v44  ;;  %v4052_v33 = vsub.f32 %v4036_v36, %v8754_v57  ;;  %v4053_v41 = vsub.f32 %v4037_v53, %v8758_v50  ;;  %v9518_v43 = vld [vmem:[#allocation72_spill] sm:$0xff] }
 0x2ba   : > { %v4054_v3 = vsub.f32 %v4038_v1, %v8662_v59  ;;  %v4055_v27 = vsub.f32 %v4039_v40, %v8666_v2  ;;  %v4042_v45 = vadd.f32 %v9517_v6, %v3962_v13  ;;  %v4043_v36 = vadd.f32 %v9518_v43, %v3963_v55 }
 0x2bb   : > { %v4782_v60 = vsub.f32 %v4766_v42, %v8725_v30  ;;  %6418 = vrot.lane.b32.xlu0 %v6417_v39, %s6608_s16  ;;  %v4056_v49 = vsub.f32 %v4040_v62, %v8435_v52  ;;  %v4057_v4 = vsub.f32 %v4041_v0, %v8439_v9  ;;  %v3964_v14 = vadd.f32 %v5748_v18, %v8685_v5  ;;  %v9522_v9 = vld [vmem:[#allocation69_spill] sm:$0xff] }
 0x2bc   : > { %v6249_v47 = vpop.permute.xlu0 %6248  ;;  %v8749_v34 = vpop.permute.xlu1 %6233  ;;  %v4058_v52 = vsub.f32 %v4042_v45, %v8721_v12  ;;  %v4059_v5 = vsub.f32 %v4043_v36, %v8725_v30 }
 0x2bd   : > { %v6422_v15 = vpack.i.bf16 %v4782_v60, %v4781_v61  ;;  %v6251_v23 = vunpack.i.h.bf16 %v6249_v47  ;;  %v6250_v38 = vunpack.i.l.bf16 %v6249_v47 }
 0x2bf   : > { %v8762_v44 = vsel %vm958_vm0, %v4051_v56, %v6251_v23  ;;  %v8765_v29 = vsel %vm958_vm0, %v4050_v17, %v6250_v38  ;;  %6423 = vrot.lane.b32.xlu0 %v6422_v15, %s6607_s15  ;;  %v3965_v17 = vadd.f32 %v5749_v37, %v3949_v48  ;;  %v9521_v56 = vld [vmem:[#allocation65_spill] sm:$0xff] }
 0x2c0   : > { %v6259_v35 = vpop.permute.xlu0 %6258  ;;  %v6244_v20 = vpop.permute.xlu1 %6243  ;;  %v4044_v21 = vadd.f32 %v9521_v56, %v3964_v14  ;;  %v9530_v14 = vld [vmem:[#allocation6_spill] sm:$0xff]  ;;  %v5878_v56 = vld [vmem:[%s6844_s24 + $0x108] sm:$0xff]  }
 0x2c1   : > { %v6261_v39 = vunpack.i.h.bf16 %v6259_v35  ;;  %v6260_v53 = vunpack.i.l.bf16 %v6259_v35  ;;  %v6246_v42 = vunpack.i.h.bf16 %v6244_v20  ;;  %v6245_v51 = vunpack.i.l.bf16 %v6244_v20 }
 0x2c2   : > { %v4045_v62 = vadd.f32 %v9522_v9, %v3965_v17  ;;  %v4060_v13 = vsub.f32 %v4044_v21, %v8697_v26  ;;  %v3919_v17 = vadd.f32 1.0, %v9530_v14  ;;  %v5725_v14 = vunpack.c.h.bf16 %v5878_v56 }
 0x2c3   : > { %v8776_v63 = vsel %vm958_vm0, %v4055_v27, %v6261_v39  ;;  %v8779_v10 = vsel %vm958_vm0, %v4054_v3, %v6260_v53  ;;  %v8782_v61 = vsel %vm958_vm0, %v4053_v41, %v6246_v42  ;;  %v8785_v60 = vsel %vm958_vm0, %v4052_v33, %v6245_v51  ;;  %v9527_v39 = vld [vmem:[#allocation3_spill] sm:$0xff]  ;;  %v9528_v42 = vld [vmem:[#allocation4_spill] sm:$0xff] }
 0x2c4   : > { %9519 = vst [vmem:[#allocation78_spill] sm:$0xff] %v8776_v63  ;;  %9520 = vst [vmem:[#allocation81_spill] sm:$0xff] %v8779_v10  ;;  %v6269_v48 = vpop.permute.xlu0 %6268  ;;  %v6254_v32 = vpop.permute.xlu1 %6253  ;;  %v4061_v37 = vsub.f32 %v4045_v62, %v8701_v25  ;;  %v3920_v53 = vadd.f32 1.0, %v9527_v39  ;;  %v3918_v51 = vadd.f32 1.0, %v9528_v42  ;;  %v9532_v62 = vld [vmem:[#allocation20_spill] sm:$0xff]  ;;  %v9540_v10 = vld [vmem:[#allocation41_spill] sm:$0xff] }
 0x2c5   : > { %v6271_v1 = vunpack.i.h.bf16 %v6269_v48  ;;  %v6270_v22 = vunpack.i.l.bf16 %v6269_v48  ;;  %v6256_v40 = vunpack.i.h.bf16 %v6254_v32  ;;  %v6255_v47 = vunpack.i.l.bf16 %v6254_v32  ;;  %v5877_v48 = vld [vmem:[%s6844_s24 + $0x100] sm:$0xff]   ;;  %v9533_v32 = vld [vmem:[#allocation21_spill] sm:$0xff] }
 0x2c6   : > { %v5720_v42 = vunpack.c.l.bf16 %v5877_v48 }
 0x2c7   : > { %v8792_v46 = vsel %vm958_vm0, %v4059_v5, %v6271_v1  ;;  %v8795_v0 = vsel %vm958_vm0, %v4058_v52, %v6270_v22  ;;  %v8798_v15 = vsel %vm958_vm0, %v4057_v4, %v6256_v40  ;;  %v8801_v23 = vsel %vm958_vm0, %v4056_v49, %v6255_v47  ;;  %v9529_v49 = vld [vmem:[#allocation5_spill] sm:$0xff]  ;;  %v9531_v52 = vld [vmem:[#allocation19_spill] sm:$0xff]  ;;  %v5846_v47 = vld [vmem:[%s6844_s24 + $0x8] sm:$0xff]  }
 0x2c8   : > { %9523 = vst [vmem:[#allocation82_spill] sm:$0xff] %v8792_v46  ;;  %9524 = vst [vmem:[#allocation84_spill] sm:$0xff] %v8795_v0  ;;  %v8803_v38 = vpop.permute.xlu0 %6283  ;;  %v6264_v18 = vpop.permute.xlu1 %6263  ;;  %v3921_v4 = vadd.f32 1.0, %v9529_v49  ;;  %v2634_v9 = vadd.f32 1.0, %v9531_v52  ;;  %v2635_v5 = vadd.f32 1.0, %v9532_v62  ;;  %v2632_v1 = vadd.f32 1.0, %v9533_v32 }
 0x2c9   : > { %v6266_v55 = vunpack.i.h.bf16 %v6264_v18  ;;  %v6265_v33 = vunpack.i.l.bf16 %v6264_v18  ;;  %v3936_v22 = vmul.f32 %v8452_v28, %v3920_v53  ;;  %v5724_v40 = vunpack.c.l.bf16 %v5878_v56  ;;  %v5591_v18 = vld [vmem:[%s6844_s24] sm:$0xff]  }
 0x2ca   : > { %v5721_v52 = vunpack.c.h.bf16 %v5877_v48  ;;  %v5596_v32 = vunpack.c.l.bf16 %v5846_v47  ;;  %v5597_v46 = vunpack.c.h.bf16 %v5846_v47  ;;  %v5592_v0 = vunpack.c.l.bf16 %v5591_v18  ;;  %v9539_v48 = vld [vmem:[#allocation40_spill] sm:$0xff] }
 0x2cb   : > { %v8808_v41 = vsel %vm958_vm0, %v4061_v37, %v6266_v55  ;;  %v8811_v3 = vsel %vm958_vm0, %v4060_v13, %v6265_v33  ;;  %v8846_v37 = vld [vmem:[%s9192_s5] ss:$0 sm:$0xff]  ;;  %v3952_v30 = vadd.f32 %v5724_v40, %v3936_v22 }
 0x2cc   : > { %9525 = vst [vmem:[#allocation24_spill] sm:$0xff] %v8808_v41  ;;  %9526 = vst [vmem:[#allocation89_spill] sm:$0xff] %v8811_v3  ;;  %v8813_v27 = vpop.permute.xlu1 %6273  ;;  %v8815_v6 = vpop.permute.xlu0 %6288  ;;  %v3934_v55 = vmul.f32 %v8846_v37, %v3918_v51  ;;  %v3937_v33 = vmul.f32 %v8846_v37, %v3921_v4  ;;  %v3935_v39 = vmul.f32 %v8846_v37, %v3919_v17  ;;  %v2633_v51 = vadd.f32 1.0, %v9534_v8  ;;  %v9535_v4 = vld [vmem:[#allocation23_spill] sm:$0xff]  ;;  %v9536_v17 = vld [vmem:[#allocation25_spill] sm:$0xff] }
 0x2cd   : > { %v2650_v28 = vmul.f32 %v8846_v37, %v2634_v9  ;;  %v2651_v53 = vmul.f32 %v8846_v37, %v2635_v5  ;;  %v2648_v62 = vmul.f32 %v8846_v37, %v2632_v1  ;;  %v2638_v12 = vadd.f32 1.0, %v9535_v4  ;;  %v9537_v3 = vld [vmem:[#allocation27_spill] sm:$0xff]  ;;  %v9538_v5 = vld [vmem:[#allocation29_spill] sm:$0xff] }
 0x2ce   : > { %v2639_v41 = vadd.f32 1.0, %v9536_v17  ;;  %v2636_v58 = vadd.f32 1.0, %v9537_v3  ;;  %v3950_v25 = vadd.f32 %v5720_v42, %v3934_v55  ;;  %v2637_v56 = vadd.f32 1.0, %v9538_v5  ;;  %v9541_v55 = vld [vmem:[#allocation43_spill] sm:$0xff]  ;;  %v9542_v17 = vld [vmem:[#allocation44_spill] sm:$0xff] }
 0x2cf   : > { %v4032_v26 = vadd.f32 %v9539_v48, %v3952_v30  ;;  %v3953_v1 = vadd.f32 %v5725_v14, %v3937_v33  ;;  %v3951_v63 = vadd.f32 %v5721_v52, %v3935_v39  ;;  %v2666_v22 = vadd.f32 %v5596_v32, %v2650_v28  ;;  %v9543_v30 = vld [vmem:[#allocation77_spill] sm:$0xff]  ;;  %v9544_v39 = vld [vmem:[#allocation80_spill] sm:$0xff]  ;;  %v6577_v48 = vld [vmem:[%s6839_s11 + $0x18] sm:$0xff] }
 0x2d0   : > { %v8817_v45 = vpop.permute.xlu1 %6278  ;;  %v8819_v43 = vpop.permute.xlu0 %6303  ;;  %v8867_v8 = vadd.f32 %v9540_v10, %v3950_v25  ;;  %v2667_v40 = vadd.f32 %v5597_v46, %v2651_v53  ;;  %v2664_v4 = vadd.f32 %v5592_v0, %v2648_v62  ;;  %v2649_v3 = vmul.f32 %v8846_v37, %v2633_v51  ;;  %v9545_v25 = vld [vmem:[#allocation83_spill] sm:$0xff]  ;;  %v6575_v62 = vld [vmem:[%s6839_s11 + $0x10] sm:$0xff] }
 0x2d1   : > { %v4033_v42 = vadd.f32 %v9541_v55, %v3953_v1  ;;  %v8872_v5 = vadd.f32 %v9542_v17, %v3951_v63  ;;  %v2746_v33 = vadd.f32 %v9543_v30, %v2666_v22  ;;  %v5593_v28 = vunpack.c.h.bf16 %v5591_v18  ;;  %v8895_v51 = vld [vmem:[%s6839_s11] sm:$0xff]  ;;  %v8901_v1 = vld [vmem:[%s6839_s11 + $0x8] sm:$0xff]  ;;  %v8912_v17 = vld [vmem:[%s6844_s24 + $0x18] sm:$0xff]  }
 0x2d2   : > { %v2747_v14 = vadd.f32 %v9544_v39, %v2667_v40  ;;  %v8877_v10 = vadd.f32 %v9545_v25, %v2664_v4  ;;  %v8882_v0 = vmul.f32 %v8846_v37, %v2638_v12  ;;  %v8885_v53 = vmul.f32 %v8846_v37, %v2639_v41 }
 0x2d3   : > { %v8888_v63 = vmul.f32 %v8846_v37, %v2636_v58  ;;  %v8891_v52 = vmul.f32 %v8846_v37, %v2637_v56  ;;  %v4048_v32 = vsub.f32 %v4032_v26, %v6575_v62  ;;  %v4049_v12 = vsub.f32 %v4033_v42, %v6577_v48 }
 0x2d4   : > { %v8821_v36 = vpop.permute.xlu1 %6293  ;;  %v8825_v20 = vpop.permute.xlu0 %6308  ;;  %v6276_v58 = vunpack.i.h.bf16 %v8813_v27  ;;  %v6275_v56 = vunpack.i.l.bf16 %v8813_v27  ;;  %v2762_v40 = vsub.f32 %v2746_v33, %v6575_v62  ;;  %v2763_v26 = vsub.f32 %v2747_v14, %v6577_v48  ;;  %v9547_v48 = vld [vmem:[#allocation26_spill] sm:$0xff] }
 0x2d5   : > { %v2760_v4 = vsub.f32 %v8877_v10, %v8895_v51  ;;  %v2665_v55 = vadd.f32 %v5593_v28, %v2649_v3  ;;  %v6196_v42 = vunpack.i.h.bf16 %v8480_v7  ;;  %v6236_v30 = vunpack.i.h.bf16 %v8749_v34 }
 0x2d6   : > { %v6235_v39 = vunpack.i.l.bf16 %v8749_v34  ;;  %v6195_v27 = vunpack.i.l.bf16 %v8480_v7  ;;  %v3694_v62 = vsel %vm958_vm0, %v2763_v26, %v6276_v58  ;;  %v3693_v3 = vsel %vm958_vm0, %v2762_v40, %v6275_v56 }
 0x2d7   : > { %v6281_v10 = vunpack.i.h.bf16 %v8817_v45  ;;  %v6280_v28 = vunpack.i.l.bf16 %v8817_v45  ;;  %v2745_v18 = vadd.f32 %v9547_v48, %v2665_v55  ;;  %v5604_v41 = vunpack.c.l.bf16 %v8912_v17 }
 0x2d8   : > { %v8823_v35 = vpop.permute.xlu1 %6298  ;;  %v8841_v13 = vpop.permute.xlu0 %6323  ;;  %v4980_v7 = vsel %vm958_vm0, %v4049_v12, %v6236_v30  ;;  %v4979_v58 = vsel %vm958_vm0, %v4048_v32, %v6235_v39  ;;  %v5605_v39 = vunpack.c.h.bf16 %v8912_v17  ;;  %v6200_v17 = vunpack.i.l.bf16 %v8508_v11 }
 0x2d9   : > { %v4995_v12 = vsel %vm3707_vm10, %v4979_v58, %v6280_v28  ;;  %v4996_v32 = vsel %vm3707_vm10, %v4980_v7, %v6281_v10  ;;  %v2761_v30 = vsub.f32 %v2745_v18, %v8901_v1  ;;  %v6201_v18 = vunpack.i.h.bf16 %v8508_v11 }
 0x2dc   : > { %v8832_v21 = vpop.permute.xlu1 %6313  ;;  %v8864_v47 = vpop.permute.xlu0 %6328 }
 0x2e0   : > { %v8851_v49 = vpop.permute.xlu1 %6318 }
 0x2e1   : > { %v8907_v22 = vpop.permute.xlu0 %6343 }
 0x2e2   : > { %9546 = vst [vmem:[#allocation86_spill] sm:$0xff] %v8907_v22 }
 0x2e4   : > { %v8860_v9 = vpop.permute.xlu1 %6333 }
 0x2e5   : > { %v8934_v45 = vpop.permute.xlu0 %6348 }
 0x2e8   : > { %v8879_v46 = vpop.permute.xlu1 %6338 }
 0x2ed   : > { %v6354_v25 = vpop.permute.xlu1 %6353 }
 0x2ee   : > { %v6356_v33 = vunpack.i.h.bf16 %v6354_v25  ;;  %v6355_v14 = vunpack.i.l.bf16 %v6354_v25 }
 0x2f0   : > { %v3710_v34 = vsel %vm3707_vm10, %v3693_v3, %v6355_v14  ;;  %v3711_v22 = vsel %vm3707_vm10, %v3694_v62, %v6356_v33  ;;  %v6286_v62 = vunpack.i.h.bf16 %v8803_v38  ;;  %v6285_v3 = vunpack.i.l.bf16 %v8803_v38 }
 0x2f1   : > { %v3727_v56 = vsel %vm3724_vm11, %v3710_v34, %v6195_v27  ;;  %v3728_v40 = vsel %vm3724_vm11, %v3711_v22, %v6196_v42  ;;  %v6359_v26 = vpop.permute.xlu1 %6358  ;;  %v6241_v27 = vunpack.i.h.bf16 %v8733_v31  ;;  %v6240_v38 = vunpack.i.l.bf16 %v8733_v31  ;;  %v9548_v31 = vld [vmem:[#allocation31_spill] sm:$0xff] }
 0x2f2   : > { %v5560_v55 = vpack.c.bf16 %v3727_v56, %v3727_v56  ;;  %v5561_v25 = vpack.c.bf16 %v3728_v40, %v3728_v40  ;;  %v6361_v33 = vunpack.i.h.bf16 %v6359_v26  ;;  %v6360_v14 = vunpack.i.l.bf16 %v6359_v26 }
 0x2f3   : > { %v3692_v58 = vsel %vm958_vm0, %v2761_v30, %v6286_v62  ;;  %v3691_v56 = vsel %vm958_vm0, %v2760_v4, %v6285_v3  ;;  %v6291_v40 = vunpack.i.h.bf16 %v8815_v6  ;;  %v6290_v26 = vunpack.i.l.bf16 %v8815_v6 }
 0x2f4   : > { %3807 = vst [vmem:[%s8930_s14 + $0x10] sm:$0xf] %v5560_v55  ;;  %3808 = vst [vmem:[%s8930_s14 + $0x18] sm:$0xf] %v5561_v25  ;;  %v5011_v22 = vsel %vm3724_vm11, %v4995_v12, %v6360_v14  ;;  %v5012_v42 = vsel %vm3724_vm11, %v4996_v32, %v6361_v33  ;;  %v2642_v55 = vadd.f32 1.0, %v9548_v31  ;;  %v9549_v25 = vld [vmem:[#allocation35_spill] sm:$0xff]  ;;  %v9550_v62 = vsub.f32 %v8872_v5, %v8901_v1 }
 0x2f5   : > { %v5576_v48 = vpack.c.bf16 %v5011_v22, %v5011_v22  ;;  %v5577_v28 = vpack.c.bf16 %v5012_v42, %v5012_v42  ;;  %v6364_v10 = vpop.permute.xlu0 %6363  ;;  %v2643_v33 = vadd.f32 1.0, %v9549_v25  ;;  %v5847_v12 = vld [vmem:[%s6844_s24 + $0x10] sm:$0xff]   ;;  %v9551_v6 = vsub.f32 %v8867_v8, %v8895_v51  ;;  %v9554_v31 = vld [vmem:[#allocation39_spill] sm:$0xff] }
 0x2f6   : > { %v6366_v34 = vunpack.i.h.bf16 %v6364_v10  ;;  %v6365_v7 = vunpack.i.l.bf16 %v6364_v10  ;;  %v4978_v4 = vsel %vm958_vm0, %v9550_v62, %v6241_v27  ;;  %v2670_v5 = vadd.f32 %v5604_v41, %v8882_v0 }
 0x2f7   : > { %5091 = vst [vmem:[%s8930_s14 + $0x14] sm:$0xf] %v5576_v48  ;;  %5092 = vst [vmem:[%s8930_s14 + $0x1c] sm:$0xf] %v5577_v28  ;;  %v4977_v3 = vsel %vm958_vm0, %v9551_v6, %v6240_v38  ;;  %v2671_v1 = vadd.f32 %v5605_v39, %v8885_v53  ;;  %v4994_v51 = vsel %vm3707_vm10, %v4978_v4, %v6291_v40  ;;  %v5600_v27 = vunpack.c.l.bf16 %v5847_v12 }
 0x2f8   : > { %v3708_v14 = vsel %vm3707_vm10, %v3691_v56, %v6365_v7  ;;  %v3709_v11 = vsel %vm3707_vm10, %v3692_v58, %v6366_v34  ;;  %v4993_v8 = vsel %vm3707_vm10, %v4977_v3, %v6290_v26  ;;  %v5601_v38 = vunpack.c.h.bf16 %v5847_v12  ;;  %v9552_v34 = vld [vmem:[#allocation85_spill] sm:$0xff]  ;;  %v9553_v58 = vld [vmem:[#allocation87_spill] sm:$0xff] }
 0x2f9   : > { %v3725_v32 = vsel %vm3724_vm11, %v3708_v14, %v6200_v17  ;;  %v3726_v30 = vsel %vm3724_vm11, %v3709_v11, %v6201_v18  ;;  %v6369_v22 = vpop.permute.xlu0 %6368  ;;  %v2750_v7 = vadd.f32 %v9552_v34, %v2670_v5  ;;  %v2751_v0 = vadd.f32 %v9553_v58, %v2671_v1  ;;  %v9555_v14 = vld [vmem:[#allocation42_spill] sm:$0xff]  ;;  %v5850_v1 = vld [vmem:[%s6844_s24 + $0x28] sm:$0xff]  }
 0x2fa   : > { %v5558_v42 = vpack.c.bf16 %v3725_v32, %v3725_v32  ;;  %v5559_v48 = vpack.c.bf16 %v3726_v30, %v3726_v30  ;;  %v6371_v28 = vunpack.i.h.bf16 %v6369_v22  ;;  %v6370_v10 = vunpack.i.l.bf16 %v6369_v22 }
 0x2fb   : > { %v6296_v53 = vunpack.i.h.bf16 %v8821_v36  ;;  %v6295_v39 = vunpack.i.l.bf16 %v8821_v36  ;;  %v8988_v40 = vmul.f32 %v8846_v37, %v2642_v55  ;;  %v8991_v26 = vmul.f32 %v8846_v37, %v2643_v33 }
 0x2fc   : > { %3805 = vst [vmem:[%s8930_s14] sm:$0xf] %v5558_v42  ;;  %3806 = vst [vmem:[%s8930_s14 + $0x8] sm:$0xf] %v5559_v48  ;;  %v5009_v18 = vsel %vm3724_vm11, %v4993_v8, %v6370_v10  ;;  %v5010_v17 = vsel %vm3724_vm11, %v4994_v51, %v6371_v28  ;;  %v2640_v25 = vadd.f32 1.0, %v9554_v31  ;;  %v2641_v11 = vadd.f32 1.0, %v9555_v14  ;;  %v9556_v48 = vld [vmem:[#allocation90_spill] sm:$0xff] }
 0x2fd   : > { %v5574_v41 = vpack.c.bf16 %v5009_v18, %v5009_v18  ;;  %v5575_v56 = vpack.c.bf16 %v5010_v17, %v5010_v17  ;;  %v2766_v12 = vsub.f32 %v2750_v7, %v8754_v57  ;;  %v2767_v62 = vsub.f32 %v2751_v0, %v8758_v50  ;;  %v9557_v10 = vld [vmem:[#allocation92_spill] sm:$0xff]  ;;  %v6579_v31 = vld [vmem:[%s6839_s11 + $0x20] sm:$0xff] }
 0x2fe   : > { %v2668_v4 = vadd.f32 %v5600_v27, %v8888_v63  ;;  %v2669_v36 = vadd.f32 %v5601_v38, %v8891_v52  ;;  %v6206_v55 = vunpack.i.h.bf16 %v8529_v54  ;;  %v6205_v3 = vunpack.i.l.bf16 %v8529_v54  ;;  %v6580_v14 = vld [vmem:[%s6839_s11 + $0x28] sm:$0xff] }
 0x2ff   : > { %5089 = vst [vmem:[%s8930_s14 + $0x4] sm:$0xf] %v5574_v41  ;;  %5090 = vst [vmem:[%s8930_s14 + $0xc] sm:$0xf] %v5575_v56  ;;  %v3698_v30 = vsel %vm958_vm0, %v2767_v62, %v6296_v53  ;;  %v3697_v22 = vsel %vm958_vm0, %v2766_v12, %v6295_v39  ;;  %v6301_v57 = vunpack.i.h.bf16 %v8823_v35  ;;  %v6300_v50 = vunpack.i.l.bf16 %v8823_v35 }
 0x300   : > { %v9006_v63 = vmul.f32 %v8846_v37, %v2640_v25  ;;  %v9009_v52 = vmul.f32 %v8846_v37, %v2641_v11  ;;  %v2748_v28 = vadd.f32 %v9556_v48, %v2668_v4  ;;  %v2749_v5 = vadd.f32 %v9557_v10, %v2669_v36  ;;  %v9561_v48 = vld [vmem:[#allocation56_spill] sm:$0xff]  ;;  %v5849_v10 = vld [vmem:[%s6844_s24 + $0x20] sm:$0xff]  }
 0x301   : > { %v6374_v6 = vpop.permute.xlu1 %6373  ;;  %v6306_v34 = vunpack.i.h.bf16 %v8819_v43  ;;  %v6305_v7 = vunpack.i.l.bf16 %v8819_v43  ;;  %v4999_v58 = vsel %vm3707_vm10, %v8785_v60, %v6300_v50  ;;  %v5000_v0 = vsel %vm3707_vm10, %v8782_v61, %v6301_v57 }
 0x302   : > { %v6376_v33 = vunpack.i.h.bf16 %v6374_v6  ;;  %v6375_v32 = vunpack.i.l.bf16 %v6374_v6  ;;  %v5612_v41 = vunpack.c.l.bf16 %v5850_v1  ;;  %v5613_v56 = vunpack.c.h.bf16 %v5850_v1 }
 0x303   : > { %v2764_v25 = vsub.f32 %v2748_v28, %v6579_v31  ;;  %v2765_v43 = vsub.f32 %v2749_v5, %v6580_v14  ;;  %v6211_v62 = vunpack.i.h.bf16 %v8550_v24  ;;  %v6210_v61 = vunpack.i.l.bf16 %v8550_v24 }
 0x304   : > { %v3714_v42 = vsel %vm3707_vm10, %v3697_v22, %v6375_v32  ;;  %v3715_v54 = vsel %vm3707_vm10, %v3698_v30, %v6376_v33  ;;  %v6310_v33 = vunpack.i.l.bf16 %v8825_v20  ;;  %v9558_v32 = vld [vmem:[#allocation46_spill] sm:$0xff]  ;;  %v2645_v28 = vadd.f32 1.0, %v9561_v48 }
 0x305   : > { %v3731_v8 = vsel %vm3724_vm11, %v3714_v42, %v6205_v3  ;;  %v3732_v35 = vsel %vm3724_vm11, %v3715_v54, %v6206_v55  ;;  %v6379_v51 = vpop.permute.xlu1 %6378  ;;  %v3696_v6 = vsel %vm958_vm0, %v2765_v43, %v6306_v34  ;;  %v3695_v55 = vsel %vm958_vm0, %v2764_v25, %v6305_v7  ;;  %v9559_v22 = vld [vmem:[#allocation50_spill] sm:$0xff] }
 0x306   : > { %v5564_v27 = vpack.c.bf16 %v3731_v8, %v3731_v8  ;;  %v5565_v38 = vpack.c.bf16 %v3732_v35, %v3732_v35  ;;  %v6381_v18 = vunpack.i.h.bf16 %v6379_v51  ;;  %v6380_v17 = vunpack.i.l.bf16 %v6379_v51  ;;  %v9560_v42 = vld [vmem:[#allocation54_spill] sm:$0xff] }
 0x307   : > { %v6311_v3 = vunpack.i.h.bf16 %v8825_v20  ;;  %v2646_v30 = vadd.f32 1.0, %v9558_v32  ;;  %v2647_v57 = vadd.f32 1.0, %v9559_v22  ;;  %v2644_v54 = vadd.f32 1.0, %v9560_v42  ;;  %v9564_v42 = vld [vmem:[#allocation98_spill] sm:$0xff] }
 0x308   : > { %3811 = vst [vmem:[%s8930_s14 + $0x30] sm:$0xf] %v5564_v27  ;;  %3812 = vst [vmem:[%s8930_s14 + $0x38] sm:$0xf] %v5565_v38  ;;  %v5015_v53 = vsel %vm3724_vm11, %v4999_v58, %v6380_v17  ;;  %v5016_v39 = vsel %vm3724_vm11, %v5000_v0, %v6381_v18  ;;  %v2674_v38 = vadd.f32 %v5612_v41, %v8988_v40  ;;  %v5608_v7 = vunpack.c.l.bf16 %v5849_v10  ;;  %v9562_v41 = vld [vmem:[#allocation32_spill] sm:$0xff] }
 0x309   : > { %v5580_v11 = vpack.c.bf16 %v5015_v53, %v5015_v53  ;;  %v5581_v12 = vpack.c.bf16 %v5016_v39, %v5016_v39  ;;  %v6384_v60 = vpop.permute.xlu0 %6383  ;;  %v2675_v18 = vadd.f32 %v5613_v56, %v8991_v26  ;;  %v4997_v17 = vsel %vm3707_vm10, %v8765_v29, %v6310_v33  ;;  %v9563_v26 = vld [vmem:[#allocation30_spill] sm:$0xff] }
 0x30a   : > { %v6386_v4 = vunpack.i.h.bf16 %v6384_v60  ;;  %v6385_v36 = vunpack.i.l.bf16 %v6384_v60  ;;  %v4998_v34 = vsel %vm3707_vm10, %v8762_v44, %v6311_v3  ;;  %v5609_v58 = vunpack.c.h.bf16 %v5849_v10 }
 0x30b   : > { %5095 = vst [vmem:[%s8930_s14 + $0x34] sm:$0xf] %v5580_v11  ;;  %5096 = vst [vmem:[%s8930_s14 + $0x3c] sm:$0xf] %v5581_v12  ;;  %v2754_v53 = vadd.f32 %v9562_v41, %v2674_v38  ;;  %v2755_v56 = vadd.f32 %v9563_v26, %v2675_v18  ;;  %v6316_v31 = vunpack.i.h.bf16 %v8832_v21  ;;  %v6315_v44 = vunpack.i.l.bf16 %v8832_v21  ;;  %v6581_v12 = vld [vmem:[%s6839_s11 + $0x50] sm:$0xff] }
 0x30c   : > { %v3712_v50 = vsel %vm3707_vm10, %v3695_v55, %v6385_v36  ;;  %v3713_v24 = vsel %vm3707_vm10, %v3696_v6, %v6386_v4  ;;  %v2662_v25 = vmul.f32 %v8846_v37, %v2646_v30  ;;  %v2663_v14 = vmul.f32 %v8846_v37, %v2647_v57  ;;  %v5852_v36 = vld [vmem:[%s6844_s24 + $0x38] sm:$0xff]  }
 0x30d   : > { %v3729_v5 = vsel %vm3724_vm11, %v3712_v50, %v6210_v61  ;;  %v3730_v20 = vsel %vm3724_vm11, %v3713_v24, %v6211_v62  ;;  %v6389_v1 = vpop.permute.xlu0 %6388  ;;  %v9066_v43 = vmul.f32 %v8846_v37, %v2644_v54  ;;  %v9069_v11 = vmul.f32 %v8846_v37, %v2645_v28  ;;  %v6582_v62 = vld [vmem:[%s6839_s11 + $0x58] sm:$0xff] }
 0x30e   : > { %v5562_v8 = vpack.c.bf16 %v3729_v5, %v3729_v5  ;;  %v5563_v35 = vpack.c.bf16 %v3730_v20, %v3730_v20  ;;  %v6391_v51 = vunpack.i.h.bf16 %v6389_v1  ;;  %v6390_v27 = vunpack.i.l.bf16 %v6389_v1 }
 0x30f   : > { %v2770_v60 = vsub.f32 %v2754_v53, %v6581_v12  ;;  %v2771_v61 = vsub.f32 %v2755_v56, %v6582_v62  ;;  %v2672_v4 = vadd.f32 %v5608_v7, %v9006_v63  ;;  %v2673_v21 = vadd.f32 %v5609_v58, %v9009_v52  ;;  %v9566_v12 = vld [vmem:[#allocation38_spill] sm:$0xff] }
 0x310   : > { %3809 = vst [vmem:[%s8930_s14 + $0x20] sm:$0xf] %v5562_v8  ;;  %3810 = vst [vmem:[%s8930_s14 + $0x28] sm:$0xf] %v5563_v35  ;;  %v5013_v0 = vsel %vm3724_vm11, %v4997_v17, %v6390_v27  ;;  %v5014_v40 = vsel %vm3724_vm11, %v4998_v34, %v6391_v51  ;;  %v6216_v55 = vunpack.i.h.bf16 %v8567_v16  ;;  %v6215_v3 = vunpack.i.l.bf16 %v8567_v16  ;;  %v9565_v16 = vld [vmem:[#allocation36_spill] sm:$0xff] }
 0x311   : > { %v5578_v39 = vpack.c.bf16 %v5013_v0, %v5013_v0  ;;  %v5579_v29 = vpack.c.bf16 %v5014_v40, %v5014_v40  ;;  %v3702_v30 = vsel %vm958_vm0, %v2771_v61, %v6316_v31  ;;  %v3701_v37 = vsel %vm958_vm0, %v2770_v60, %v6315_v44  ;;  %v5851_v0 = vld [vmem:[%s6844_s24 + $0x30] sm:$0xff]  }
 0x312   : > { %v6321_v22 = vunpack.i.h.bf16 %v8851_v49  ;;  %v6320_v57 = vunpack.i.l.bf16 %v8851_v49  ;;  %v5620_v50 = vunpack.c.l.bf16 %v5852_v36  ;;  %v5621_v63 = vunpack.c.h.bf16 %v5852_v36  ;;  %v9567_v60 = vld [vmem:[#allocation105_spill] sm:$0xff] }
 0x313   : > { %5093 = vst [vmem:[%s8930_s14 + $0x24] sm:$0xf] %v5578_v39  ;;  %5094 = vst [vmem:[%s8930_s14 + $0x2c] sm:$0xf] %v5579_v29  ;;  %v2752_v54 = vadd.f32 %v9564_v42, %v2672_v4  ;;  %v2753_v48 = vadd.f32 %v9565_v16, %v2673_v21  ;;  %v6326_v35 = vunpack.i.h.bf16 %v8841_v13  ;;  %v6325_v51 = vunpack.i.l.bf16 %v8841_v13 }
 0x314   : > { %v5003_v27 = vsel %vm3707_vm10, %v8801_v23, %v6320_v57  ;;  %v5004_v38 = vsel %vm3707_vm10, %v8798_v15, %v6321_v22  ;;  %v2678_v18 = vadd.f32 %v5620_v50, %v2662_v25  ;;  %v2679_v17 = vadd.f32 %v5621_v63, %v2663_v14 }
 0x315   : > { %v6394_v6 = vpop.permute.xlu1 %6393  ;;  %v2768_v58 = vsub.f32 %v2752_v54, %v8662_v59  ;;  %v2769_v13 = vsub.f32 %v2753_v48, %v8666_v2  ;;  %v6221_v15 = vunpack.i.h.bf16 %v8586_v19  ;;  %v6220_v53 = vunpack.i.l.bf16 %v8586_v19  ;;  %v9571_v54 = vld [vmem:[#allocation76_spill] sm:$0xff] }
 0x316   : > { %v6396_v33 = vunpack.i.h.bf16 %v6394_v6  ;;  %v6395_v32 = vunpack.i.l.bf16 %v6394_v6  ;;  %v6331_v31 = vunpack.i.h.bf16 %v8864_v47  ;;  %v6330_v59 = vunpack.i.l.bf16 %v8864_v47 }
 0x317   : > { %v3700_v39 = vsel %vm958_vm0, %v2769_v13, %v6326_v35  ;;  %v3699_v29 = vsel %vm958_vm0, %v2768_v58, %v6325_v51  ;;  %v5616_v2 = vunpack.c.l.bf16 %v5851_v0  ;;  %v5617_v44 = vunpack.c.h.bf16 %v5851_v0 }
 0x318   : > { %v3718_v52 = vsel %vm3707_vm10, %v3701_v37, %v6395_v32  ;;  %v3719_v24 = vsel %vm3707_vm10, %v3702_v30, %v6396_v33  ;;  %v2758_v19 = vadd.f32 %v9566_v12, %v2678_v18  ;;  %v2759_v62 = vadd.f32 %v9567_v60, %v2679_v17  ;;  %v9569_v32 = vld [vmem:[#allocation78_spill] sm:$0xff]  ;;  %v9574_v17 = vld [vmem:[#allocation61_spill] sm:$0xff] }
 0x319   : > { %v3735_v28 = vsel %vm3724_vm11, %v3718_v52, %v6215_v3  ;;  %v3736_v10 = vsel %vm3724_vm11, %v3719_v24, %v6216_v55  ;;  %v6399_v5 = vpop.permute.xlu1 %6398  ;;  %v9568_v3 = vld [vmem:[#allocation81_spill] sm:$0xff]  ;;  %v5002_v30 = vsel %vm3707_vm10, %v9569_v32, %v6331_v31  ;;  %v6336_v37 = vunpack.i.h.bf16 %v8860_v9 }
 0x31a   : > { %v5568_v20 = vpack.c.bf16 %v3735_v28, %v3735_v28  ;;  %v5569_v49 = vpack.c.bf16 %v3736_v10, %v3736_v10  ;;  %v6401_v1 = vunpack.i.h.bf16 %v6399_v5  ;;  %v6400_v8 = vunpack.i.l.bf16 %v6399_v5  ;;  %v9570_v24 = vld [vmem:[#allocation73_spill] sm:$0xff] }
 0x31b   : > { %v5001_v33 = vsel %vm3707_vm10, %v9568_v3, %v6330_v59  ;;  %v6335_v22 = vunpack.i.l.bf16 %v8860_v9  ;;  %v2676_v57 = vadd.f32 %v5616_v2, %v9066_v43  ;;  %v2677_v50 = vadd.f32 %v5617_v44, %v9069_v11  ;;  %v9572_v9 = vld [vmem:[#allocation74_spill] sm:$0xff]  ;;  %v9578_v2 = vld [vmem:[#allocation75_spill] sm:$0xff] }
 0x31c   : > { %3815 = vst [vmem:[%s8930_s14 + $0x50] sm:$0xf] %v5568_v20  ;;  %3816 = vst [vmem:[%s8930_s14 + $0x58] sm:$0xf] %v5569_v49  ;;  %v5019_v34 = vsel %vm3724_vm11, %v5003_v27, %v6400_v8  ;;  %v5020_v7 = vsel %vm3724_vm11, %v5004_v38, %v6401_v1  ;;  %v2774_v42 = vsub.f32 %v2758_v19, %v9570_v24  ;;  %v6226_v5 = vunpack.i.h.bf16 %v9572_v9  ;;  %v9573_v38 = vld [vmem:[#allocation58_spill] sm:$0xff]  ;;  %v9581_v24 = vld [vmem:[#allocation84_spill] sm:$0xff] }
 0x31d   : > { %v5584_v40 = vpack.c.bf16 %v5019_v34, %v5019_v34  ;;  %v5585_v23 = vpack.c.bf16 %v5020_v7, %v5020_v7  ;;  %v6404_v41 = vpop.permute.xlu0 %6403  ;;  %v2775_v16 = vsub.f32 %v2759_v62, %v9571_v54  ;;  %v6225_v43 = vunpack.i.l.bf16 %v9572_v9  ;;  %v9580_v62 = vld [vmem:[#allocation51_spill] sm:$0xff] }
 0x31e   : > { %v6406_v26 = vunpack.i.h.bf16 %v6404_v41  ;;  %v6405_v56 = vunpack.i.l.bf16 %v6404_v41  ;;  %v3705_v1 = vsel %vm958_vm0, %v2774_v42, %v6335_v22  ;;  %v6341_v8 = vunpack.i.h.bf16 %v8879_v46  ;;  %v9575_v41 = vld [vmem:[#allocation86_spill] sm:$0xff] }
 0x31f   : > { %5099 = vst [vmem:[%s8930_s14 + $0x54] sm:$0xf] %v5584_v40  ;;  %5100 = vst [vmem:[%s8930_s14 + $0x5c] sm:$0xf] %v5585_v23  ;;  %v3706_v49 = vsel %vm958_vm0, %v2775_v16, %v6336_v37  ;;  %v6340_v35 = vunpack.i.l.bf16 %v8879_v46  ;;  %v2756_v18 = vadd.f32 %v9573_v38, %v2676_v57  ;;  %v2757_v34 = vadd.f32 %v9574_v17, %v2677_v50  ;;  %v9582_v42 = vld [vmem:[#allocation82_spill] sm:$0xff] }
 0x320   : > { %v3716_v25 = vsel %vm3707_vm10, %v3699_v29, %v6405_v56  ;;  %v3717_v14 = vsel %vm3707_vm10, %v3700_v39, %v6406_v26  ;;  %v9576_v26 = vld [vmem:[#allocation89_spill] sm:$0xff]  ;;  %v9577_v39 = vld [vmem:[#allocation24_spill] sm:$0xff]  ;;  %v6350_v3 = vunpack.i.l.bf16 %v8934_v45 }
 0x321   : > { %v3733_v61 = vsel %vm3724_vm11, %v3716_v25, %v6220_v53  ;;  %v3734_v4 = vsel %vm3724_vm11, %v3717_v14, %v6221_v15  ;;  %v6409_v21 = vpop.permute.xlu0 %6408  ;;  %v6346_v15 = vunpack.i.h.bf16 %v9575_v41  ;;  %v6345_v53 = vunpack.i.l.bf16 %v9575_v41  ;;  %v9579_v25 = vld [vmem:[#allocation79_spill] sm:$0xff] }
 0x322   : > { %v5566_v47 = vpack.c.bf16 %v3733_v61, %v3733_v61  ;;  %v5567_v36 = vpack.c.bf16 %v3734_v4, %v3734_v4  ;;  %v6411_v6 = vunpack.i.h.bf16 %v6409_v21  ;;  %v6410_v55 = vunpack.i.l.bf16 %v6409_v21 }
 0x323   : > { %v5007_v56 = vsel %vm3707_vm10, %v9576_v26, %v6340_v35  ;;  %v5008_v29 = vsel %vm3707_vm10, %v9577_v39, %v6341_v8  ;;  %v2772_v44 = vsub.f32 %v2756_v18, %v9578_v2  ;;  %v2773_v14 = vsub.f32 %v2757_v34, %v9579_v25 }
 0x324   : > { %3813 = vst [vmem:[%s8930_s14 + $0x40] sm:$0xf] %v5566_v47  ;;  %3814 = vst [vmem:[%s8930_s14 + $0x48] sm:$0xf] %v5567_v36  ;;  %v5017_v63 = vsel %vm3724_vm11, %v5001_v33, %v6410_v55  ;;  %v5018_v52 = vsel %vm3724_vm11, %v5002_v30, %v6411_v6  ;;  %v6231_v61 = vunpack.i.h.bf16 %v9580_v62  ;;  %v6230_v4 = vunpack.i.l.bf16 %v9580_v62 }
 0x325   : > { %v5582_v48 = vpack.c.bf16 %v5017_v63, %v5017_v63  ;;  %v5583_v28 = vpack.c.bf16 %v5018_v52, %v5018_v52  ;;  %v6414_v10 = vpop.permute.xlu1 %6413  ;;  %v3704_v36 = vsel %vm958_vm0, %v2773_v14, %v6346_v15  ;;  %v3703_v6 = vsel %vm958_vm0, %v2772_v44, %v6345_v53 }
 0x326   : > { %v6416_v11 = vunpack.i.h.bf16 %v6414_v10  ;;  %v6415_v20 = vunpack.i.l.bf16 %v6414_v10  ;;  %v6351_v55 = vunpack.i.h.bf16 %v8934_v45  ;;  %v5005_v45 = vsel %vm3707_vm10, %v9581_v24, %v6350_v3 }
 0x327   : > { %5097 = vst [vmem:[%s8930_s14 + $0x44] sm:$0xf] %v5582_v48  ;;  %5098 = vst [vmem:[%s8930_s14 + $0x4c] sm:$0xf] %v5583_v28 }
 0x328   : > { %v3722_v51 = vsel %vm3707_vm10, %v3705_v1, %v6415_v20  ;;  %v3723_v27 = vsel %vm3707_vm10, %v3706_v49, %v6416_v11  ;;  %v5006_v54 = vsel %vm3707_vm10, %v9582_v42, %v6351_v55 }
 0x329   : > { %v3739_v7 = vsel %vm3724_vm11, %v3722_v51, %v6225_v43  ;;  %v3740_v58 = vsel %vm3724_vm11, %v3723_v27, %v6226_v5  ;;  %v6429_v13 = vpop.permute.xlu1 %6428 }
 0x32a   : > { %v5572_v0 = vpack.c.bf16 %v3739_v7, %v3739_v7  ;;  %v5573_v40 = vpack.c.bf16 %v3740_v58, %v3740_v58  ;;  %v6431_v46 = vunpack.i.h.bf16 %v6429_v13  ;;  %v6430_v23 = vunpack.i.l.bf16 %v6429_v13 }
 0x32c   : > { %3819 = vst [vmem:[%s8930_s14 + $0x70] sm:$0xf] %v5572_v0  ;;  %3820 = vst [vmem:[%s8930_s14 + $0x78] sm:$0xf] %v5573_v40  ;;  %v5023_v31 = vsel %vm3724_vm11, %v5007_v56, %v6430_v23  ;;  %v5024_v59 = vsel %vm3724_vm11, %v5008_v29, %v6431_v46 }
 0x32d   : > { %v5588_v12 = vpack.c.bf16 %v5023_v31, %v5023_v31  ;;  %v5589_v19 = vpack.c.bf16 %v5024_v59, %v5024_v59  ;;  %v6419_v60 = vpop.permute.xlu0 %6418 }
 0x32e   : > { %v6421_v21 = vunpack.i.h.bf16 %v6419_v60  ;;  %v6420_v47 = vunpack.i.l.bf16 %v6419_v60 }
 0x32f   : > { %5103 = vst [vmem:[%s8930_s14 + $0x74] sm:$0xf] %v5588_v12  ;;  %5104 = vst [vmem:[%s8930_s14 + $0x7c] sm:$0xf] %v5589_v19 }
 0x330   : > { %v3721_v33 = vsel %vm3707_vm10, %v3704_v36, %v6421_v21  ;;  %v3720_v32 = vsel %vm3707_vm10, %v3703_v6, %v6420_v47 }
 0x331   : > { %v3738_v30 = vsel %vm3724_vm11, %v3721_v33, %v6231_v61  ;;  %v3737_v37 = vsel %vm3724_vm11, %v3720_v32, %v6230_v4  ;;  %v6424_v22 = vpop.permute.xlu0 %6423 }
 0x332   : > { %v5571_v57 = vpack.c.bf16 %v3738_v30, %v3738_v30  ;;  %v5570_v50 = vpack.c.bf16 %v3737_v37, %v3737_v37  ;;  %v6426_v63 = vunpack.i.h.bf16 %v6424_v22  ;;  %v6425_v52 = vunpack.i.l.bf16 %v6424_v22 }
 0x334   : > { %3818 = vst [vmem:[%s8930_s14 + $0x68] sm:$0xf] %v5571_v57  ;;  %3817 = vst [vmem:[%s8930_s14 + $0x60] sm:$0xf] %v5570_v50  ;;  %v5022_v16 = vsel %vm3724_vm11, %v5006_v54, %v6426_v63  ;;  %v5021_v48 = vsel %vm3724_vm11, %v5005_v45, %v6425_v52 }
 0x335   : > { %v5587_v28 = vpack.c.bf16 %v5022_v16, %v5022_v16  ;;  %v5586_v10 = vpack.c.bf16 %v5021_v48, %v5021_v48 }
 0x337   : > { %5102 = vst [vmem:[%s8930_s14 + $0x6c] sm:$0xf] %v5587_v28  ;;  %5101 = vst [vmem:[%s8930_s14 + $0x64] sm:$0xf] %v5586_v10 }
 0x338 PF: > { %p15_p9 = scmp.ge.s32.totalorder %s6667_s28, 4   ;;  %s9583_s24 = smov %s6601_s25 }
 0x339   : > { %s9584_s25 = smov %s6676_s8  ;;  %s9585_s26 = smov %s6667_s28 }
 0x33a   :  { %17 = sbr.rel (!%p15_p9) target bundleno = 2 (0x2), region = 145 }

</bundles_post_ra>
